<compile_context>
chip_gen: v7x
topology: tpu7x:2x2x1
jax: 0.10.0
libtpu: 0.0.40
codegen_flags: <defaults>
</compile_context>

<pallas_src>
import functools

import jax
import jax.numpy as jnp
from jax import lax
from jax.experimental import pallas as pl
from jax.experimental.pallas import tpu as pltpu

NEG_PAD = float(-(2 ** 32) + 1)   # padding value used by the reference impl
LN_EPS = 1e-8                     # layer_normalization epsilon (added to std)
_PER_LAYER_REFS = 16              # weight/bias/LN arrays per decoder layer


def _layer_norm(x, gamma, beta):
    """torch-style LN: mean over last dim, *unbiased* std, eps added to std."""
    c = x.shape[-1]
    mean = jnp.mean(x, axis=-1, keepdims=True)
    var = jnp.sum((x - mean) ** 2, axis=-1, keepdims=True) / (c - 1)
    std = jnp.sqrt(var)
    return gamma * (x - mean) / (std + LN_EPS) + beta


# --------------------------------------------------------------------------
# Fused decoder-stack kernel: one invocation, everything resident in VMEM.
# --------------------------------------------------------------------------
def _decoder_kernel(dec_ref, enc_ref, *refs, num_heads, num_layers,
                    batch, tq, tk):
    out_ref = refs[-1]
    wrefs = refs[:-1]
    assert len(wrefs) == _PER_LAYER_REFS * num_layers

    c = dec_ref.shape[-1]
    dh = c // num_heads
    scale = 1.0 / (float(dh) ** 0.5)

    dec = dec_ref[...]              # (B*Tq, C) current decoder activations
    enc = enc_ref[...]              # (B*Tk, C) encoder memory (constant)

    # ---- hoisted, layer-independent quantities ----------------------------
    # ones @ kv^T broadcasts the per-key row-sum along the query axis without
    # any transpose / 1-D relayout: result[q, k] = sum_c kv[k, c].
    ones_qc = jnp.ones((tq, c), jnp.float32)

    row = lax.broadcasted_iota(jnp.int32, (tq, tq), 0)
    col = lax.broadcasted_iota(jnp.int32, (tq, tq), 1)
    causal_bool = col > row                                    # (Tq, Tq)

    def key_pad_bool(kv_2d, n_kv):
        """Per-batch list of (Tq, n_kv) bools, True where key k is padding."""
        pads = []
        for bi in range(batch):
            kv_b = kv_2d[bi * n_kv:(bi + 1) * n_kv, :]         # (n_kv, C)
            rowsum = lax.dot_general(
                ones_qc, kv_b, (((1,), (1,)), ((), ())),
                preferred_element_type=jnp.float32)            # (Tq, n_kv)
            pads.append(rowsum == 0.0)
        return pads

    enc_kpad = key_pad_bool(enc, tk)   # cross-attn key mask, reused per layer

    def mha_core(q_act, q_p, k_p, v_p, kpad, gamma_ref, beta_ref, *,
                 causal, n_kv):
        # query padding mask (0/1) from the raw (pre-projection) queries
        qmask = (jnp.sum(q_act, axis=-1, keepdims=True) != 0.0
                 ).astype(jnp.float32)                         # (B*Tq, 1)
        outs = []
        for bi in range(batch):
            qs = slice(bi * tq, (bi + 1) * tq)
            ks = slice(bi * n_kv, (bi + 1) * n_kv)
            masked = kpad[bi]
            if causal:
                masked = jnp.logical_or(masked, causal_bool)
            qm_b = qmask[qs, :]                                # (Tq, 1)
            head_outs = []
            for h in range(num_heads):
                hs = slice(h * dh, (h + 1) * dh)
                qh = q_p[qs, hs]                               # (Tq, dh)
                kh = k_p[ks, hs]                               # (n_kv, dh)
                vh = v_p[ks, hs]                               # (n_kv, dh)
                s = lax.dot_general(qh, kh, (((1,), (1,)), ((), ())),
                                    preferred_element_type=jnp.float32)
                s = jnp.where(masked, NEG_PAD, s)              # one select
                s = s - jnp.max(s, axis=-1, keepdims=True)
                e = jnp.exp(s)
                inv = pl.reciprocal(jnp.sum(e, axis=-1, keepdims=True),
                                    approx=True)
                # fold the query mask into the (Tq,1) reciprocal column so we
                # only broadcast-multiply the (Tq,n_kv) tile once per head
                p = e * (inv * qm_b)
                head_outs.append(
                    jnp.dot(p, vh, preferred_element_type=jnp.float32))
            outs.append(jnp.concatenate(head_outs, axis=-1))   # (Tq, C)
        attn = jnp.concatenate(outs, axis=0)                   # (B*Tq, C)
        return _layer_norm(attn + q_act, gamma_ref[...], beta_ref[...])

    def lin(x, w_ref, b_ref):
        return jnp.dot(x, w_ref[...],
                       preferred_element_type=jnp.float32) + b_ref[...]

    for layer in range(num_layers):
        (w_qkv, b_qkv, sa_g, sa_b,
         w_q, b_q, w_kv, b_kv, ca_g, ca_b,
         w1, b1, w2, b2, ff_g, ff_b) = wrefs[
            layer * _PER_LAYER_REFS:(layer + 1) * _PER_LAYER_REFS]

        # ---- self attention (causal) --------------------------------------
        dec_kpad = key_pad_bool(dec, tq)
        qkv = jnp.maximum(lin(dec, w_qkv, b_qkv), 0.0)         # (B*Tq, 3C)
        q_p = qkv[:, :c] * scale        # fold 1/sqrt(dh) into Q once
        k_p = qkv[:, c:2 * c]
        v_p = qkv[:, 2 * c:]
        dec = mha_core(dec, q_p, k_p, v_p, dec_kpad, sa_g, sa_b,
                       causal=True, n_kv=tq)

        # ---- vanilla (cross) attention -------------------------------------
        q_p = jnp.maximum(lin(dec, w_q, b_q), 0.0) * scale     # (B*Tq, C)
        kv_p = jnp.maximum(lin(enc, w_kv, b_kv), 0.0)          # (B*Tk, 2C)
        k_p = kv_p[:, :c]
        v_p = kv_p[:, c:]
        dec = mha_core(dec, q_p, k_p, v_p, enc_kpad, ca_g, ca_b,
                       causal=False, n_kv=tk)

        # ---- position-wise feed forward -------------------------------------
        h_ff = jnp.maximum(lin(dec, w1, b1), 0.0)              # (B*Tq, 4C)
        o = lin(h_ff, w2, b2) + dec
        dec = _layer_norm(o, ff_g[...], ff_b[...])

    out_ref[...] = dec.astype(out_ref.dtype)   # single contiguous slab write


# --------------------------------------------------------------------------
# Python wrapper
# --------------------------------------------------------------------------
def _flatten_params(params):
    flat = []
    for layer in params:
        sa, ca, ff = layer["self_attn"], layer["cross_attn"], layer["ff"]
        flat += [sa["w_qkv"], sa["b_qkv"], sa["gamma"], sa["beta"],
                 ca["w_q"], ca["b_q"], ca["w_kv"], ca["b_kv"],
                 ca["gamma"], ca["beta"],
                 ff["w1"], ff["b1"], ff["w2"], ff["b2"],
                 ff["gamma"], ff["beta"]]
    return flat


def transformer_decoder(y, enc, params, *, num_heads):
    # dec_dropout has p=0.0 -> identity (omitted)
    b, ty, c = y.shape
    tq = ty - 1                      # decoder_inputs = y[:, :-1, :]
    tk = enc.shape[1]
    num_layers = len(params)

    dec0 = y[:, :-1, :].reshape(b * tq, c)    # contiguous (B*Tq, C) slab
    enc2d = enc.reshape(b * tk, c)
    flat_w = _flatten_params(params)

    kernel = functools.partial(_decoder_kernel, num_heads=num_heads,
                               num_layers=num_layers, batch=b, tq=tq, tk=tk)
    vmem = pl.BlockSpec(memory_space=pltpu.MemorySpace.VMEM)
    dec_out = pl.pallas_call(
        kernel,
        out_shape=jax.ShapeDtypeStruct((b * tq, c), y.dtype),
        in_specs=[vmem] * (2 + len(flat_w)),
        out_specs=vmem,
    )(dec0, enc2d, *flat_w)

    dec3d = dec_out.reshape(b, tq, c)
    return jnp.concatenate([y[:, :1, :], dec3d[:, :21, :]], axis=1)


# --------------------------------------------------------------------------
# Deterministic parameter init (nn.Linear-style uniform bounds)
# --------------------------------------------------------------------------
def init_params(key, emb_dim, layers):
    hidden = 4 * emb_dim

    def linear(k, fan_in, fan_out):
        k1, k2 = jax.random.split(k)
        bound = 1.0 / (fan_in ** 0.5)
        w = jax.random.uniform(k1, (fan_in, fan_out), jnp.float32, -bound, bound)
        bb = jax.random.uniform(k2, (1, fan_out), jnp.float32, -bound, bound)
        return w, bb

    def ln_params():
        return (jnp.ones((1, emb_dim), jnp.float32),
                jnp.zeros((1, emb_dim), jnp.float32))

    params = []
    for _ in range(layers):
        layer = {}

        # self attention: fused (C, 3C) Q/K/V projection
        key, kq, kk, kv = jax.random.split(key, 4)
        wq, bq = linear(kq, emb_dim, emb_dim)
        wk, bk = linear(kk, emb_dim, emb_dim)
        wv, bv = linear(kv, emb_dim, emb_dim)
        g, be = ln_params()
        layer["self_attn"] = dict(
            w_qkv=jnp.concatenate([wq, wk, wv], axis=1),
            b_qkv=jnp.concatenate([bq, bk, bv], axis=1),
            gamma=g, beta=be)

        # cross attention: separate Q, fused (C, 2C) K/V projection
        key, kq, kk, kv = jax.random.split(key, 4)
        wq, bq = linear(kq, emb_dim, emb_dim)
        wk, bk = linear(kk, emb_dim, emb_dim)
        wv, bv = linear(kv, emb_dim, emb_dim)
        g, be = ln_params()
        layer["cross_attn"] = dict(
            w_q=wq, b_q=bq,
            w_kv=jnp.concatenate([wk, wv], axis=1),
            b_kv=jnp.concatenate([bk, bv], axis=1),
            gamma=g, beta=be)

        # position-wise FFN
        key, k1, k2 = jax.random.split(key, 3)
        w1, b1 = linear(k1, emb_dim, hidden)
        w2, b2 = linear(k2, hidden, emb_dim)
        g, be = ln_params()
        layer["ff"] = dict(w1=w1, b1=b1, w2=w2, b2=b2, gamma=g, beta=be)

        params.append(layer)
    return params


if __name__ == "__main__":
    B, T_Y, T_ENC = 2, 24, 16          # y seq 24 -> 23 decoder steps (>= 21)
    EMB_DIM, NUM_HEADS, LAYERS = 32, 4, 2

    root = jax.random.PRNGKey(0)
    ky, kenc, kp = jax.random.split(root, 3)
    y = jax.random.normal(ky, (B, T_Y, EMB_DIM), jnp.float32)
    enc = jax.random.normal(kenc, (B, T_ENC, EMB_DIM), jnp.float32)
    params = init_params(kp, EMB_DIM, LAYERS)

    fwd = jax.jit(functools.partial(transformer_decoder, num_heads=NUM_HEADS))
    out = jax.block_until_ready(fwd(y, enc, params))

    assert out.shape == (B, 1 + 21, EMB_DIM), out.shape
    assert bool(jnp.all(jnp.isfinite(out)))
    print("KERNEL_OK")
</pallas_src>

<mosaic_0001>
module attributes {stable_mosaic.version = 11 : i64} {
  func.func @_decoder_kernel(%arg0: memref<46x32xf32, #tpu.memory_space<vmem>>, %arg1: memref<32x32xf32, #tpu.memory_space<vmem>>, %arg2: memref<32x96xf32, #tpu.memory_space<vmem>>, %arg3: memref<1x96xf32, #tpu.memory_space<vmem>>, %arg4: memref<1x32xf32, #tpu.memory_space<vmem>>, %arg5: memref<1x32xf32, #tpu.memory_space<vmem>>, %arg6: memref<32x32xf32, #tpu.memory_space<vmem>>, %arg7: memref<1x32xf32, #tpu.memory_space<vmem>>, %arg8: memref<32x64xf32, #tpu.memory_space<vmem>>, %arg9: memref<1x64xf32, #tpu.memory_space<vmem>>, %arg10: memref<1x32xf32, #tpu.memory_space<vmem>>, %arg11: memref<1x32xf32, #tpu.memory_space<vmem>>, %arg12: memref<32x128xf32, #tpu.memory_space<vmem>>, %arg13: memref<1x128xf32, #tpu.memory_space<vmem>>, %arg14: memref<128x32xf32, #tpu.memory_space<vmem>>, %arg15: memref<1x32xf32, #tpu.memory_space<vmem>>, %arg16: memref<1x32xf32, #tpu.memory_space<vmem>>, %arg17: memref<1x32xf32, #tpu.memory_space<vmem>>, %arg18: memref<32x96xf32, #tpu.memory_space<vmem>>, %arg19: memref<1x96xf32, #tpu.memory_space<vmem>>, %arg20: memref<1x32xf32, #tpu.memory_space<vmem>>, %arg21: memref<1x32xf32, #tpu.memory_space<vmem>>, %arg22: memref<32x32xf32, #tpu.memory_space<vmem>>, %arg23: memref<1x32xf32, #tpu.memory_space<vmem>>, %arg24: memref<32x64xf32, #tpu.memory_space<vmem>>, %arg25: memref<1x64xf32, #tpu.memory_space<vmem>>, %arg26: memref<1x32xf32, #tpu.memory_space<vmem>>, %arg27: memref<1x32xf32, #tpu.memory_space<vmem>>, %arg28: memref<32x128xf32, #tpu.memory_space<vmem>>, %arg29: memref<1x128xf32, #tpu.memory_space<vmem>>, %arg30: memref<128x32xf32, #tpu.memory_space<vmem>>, %arg31: memref<1x32xf32, #tpu.memory_space<vmem>>, %arg32: memref<1x32xf32, #tpu.memory_space<vmem>>, %arg33: memref<1x32xf32, #tpu.memory_space<vmem>>, %arg34: memref<46x32xf32, #tpu.memory_space<vmem>>) attributes {dimension_semantics = [], scalar_prefetch = 0 : i64, scratch_operands = 0 : i64, tpu.core_type = #tpu.core_type<tc>} {
    %c0 = arith.constant 0 : index
    %c0_0 = arith.constant 0 : index
    %0 = vector.load %arg0[%c0, %c0_0] : memref<46x32xf32, #tpu.memory_space<vmem>>, vector<46x32xf32>
    %c0_1 = arith.constant 0 : index
    %c0_2 = arith.constant 0 : index
    %1 = vector.load %arg1[%c0_1, %c0_2] : memref<32x32xf32, #tpu.memory_space<vmem>>, vector<32x32xf32>
    %cst = arith.constant 1.000000e+00 : f32
    %2 = vector.broadcast %cst : f32 to vector<23x32xf32>
    %3 = tpu.iota {dimensions = array<i32: 0>} : vector<23x23xi32>
    %4 = tpu.iota {dimensions = array<i32: 1>} : vector<23x23xi32>
    %5 = arith.cmpi sgt, %4, %3 : vector<23x23xi32>
    %6 = vector.extract_strided_slice %1 {offsets = [0, 0], sizes = [16, 32], strides = [1, 1]} : vector<32x32xf32> to vector<16x32xf32>
    %cst_3 = arith.constant dense<0.000000e+00> : vector<23x16xf32>
    %7 = tpu.matmul %2, %6, %cst_3 {dimension_numbers = #tpu.dot_dimension_numbers<[1], [1], [0], [0], [0, 0, 1, 0], [], []>} : vector<23x32xf32>, vector<16x32xf32>, vector<23x16xf32> -> vector<23x16xf32>
    %cst_4 = arith.constant 0.000000e+00 : f32
    %8 = vector.broadcast %cst_4 : f32 to vector<23x16xf32>
    %9 = arith.cmpf oeq, %7, %8 : vector<23x16xf32>
    %10 = vector.extract_strided_slice %1 {offsets = [16, 0], sizes = [16, 32], strides = [1, 1]} : vector<32x32xf32> to vector<16x32xf32>
    %cst_5 = arith.constant dense<0.000000e+00> : vector<23x16xf32>
    %11 = tpu.matmul %2, %10, %cst_5 {dimension_numbers = #tpu.dot_dimension_numbers<[1], [1], [0], [0], [0, 0, 1, 0], [], []>} : vector<23x32xf32>, vector<16x32xf32>, vector<23x16xf32> -> vector<23x16xf32>
    %cst_6 = arith.constant 0.000000e+00 : f32
    %12 = vector.broadcast %cst_6 : f32 to vector<23x16xf32>
    %13 = arith.cmpf oeq, %11, %12 : vector<23x16xf32>
    %14 = vector.extract_strided_slice %0 {offsets = [0, 0], sizes = [23, 32], strides = [1, 1]} : vector<46x32xf32> to vector<23x32xf32>
    %cst_7 = arith.constant dense<0.000000e+00> : vector<23x23xf32>
    %15 = tpu.matmul %2, %14, %cst_7 {dimension_numbers = #tpu.dot_dimension_numbers<[1], [1], [0], [0], [0, 0, 1, 0], [], []>} : vector<23x32xf32>, vector<23x32xf32>, vector<23x23xf32> -> vector<23x23xf32>
    %cst_8 = arith.constant 0.000000e+00 : f32
    %16 = vector.broadcast %cst_8 : f32 to vector<23x23xf32>
    %17 = arith.cmpf oeq, %15, %16 : vector<23x23xf32>
    %18 = vector.extract_strided_slice %0 {offsets = [23, 0], sizes = [23, 32], strides = [1, 1]} : vector<46x32xf32> to vector<23x32xf32>
    %cst_9 = arith.constant dense<0.000000e+00> : vector<23x23xf32>
    %19 = tpu.matmul %2, %18, %cst_9 {dimension_numbers = #tpu.dot_dimension_numbers<[1], [1], [0], [0], [0, 0, 1, 0], [], []>} : vector<23x32xf32>, vector<23x32xf32>, vector<23x23xf32> -> vector<23x23xf32>
    %cst_10 = arith.constant 0.000000e+00 : f32
    %20 = vector.broadcast %cst_10 : f32 to vector<23x23xf32>
    %21 = arith.cmpf oeq, %19, %20 : vector<23x23xf32>
    %c0_11 = arith.constant 0 : index
    %c0_12 = arith.constant 0 : index
    %22 = vector.load %arg2[%c0_11, %c0_12] : memref<32x96xf32, #tpu.memory_space<vmem>>, vector<32x96xf32>
    %cst_13 = arith.constant dense<0.000000e+00> : vector<46x96xf32>
    %23 = tpu.matmul %0, %22, %cst_13 {dimension_numbers = #tpu.dot_dimension_numbers<[1], [0], [0], [1], [0, 0, 1, 1], [], []>} : vector<46x32xf32>, vector<32x96xf32>, vector<46x96xf32> -> vector<46x96xf32>
    %c0_14 = arith.constant 0 : index
    %c0_15 = arith.constant 0 : index
    %24 = vector.load %arg3[%c0_14, %c0_15] : memref<1x96xf32, #tpu.memory_space<vmem>>, vector<1x96xf32>
    %25 = vector.broadcast %24 : vector<1x96xf32> to vector<46x96xf32>
    %26 = arith.addf %23, %25 : vector<46x96xf32>
    %cst_16 = arith.constant 0.000000e+00 : f32
    %27 = vector.broadcast %cst_16 : f32 to vector<46x96xf32>
    %28 = arith.maximumf %26, %27 : vector<46x96xf32>
    %29 = vector.extract_strided_slice %28 {offsets = [0, 0], sizes = [46, 32], strides = [1, 1]} : vector<46x96xf32> to vector<46x32xf32>
    %cst_17 = arith.constant 0.353553385 : f32
    %30 = vector.broadcast %cst_17 : f32 to vector<46x32xf32>
    %31 = arith.mulf %29, %30 : vector<46x32xf32>
    %32 = vector.extract_strided_slice %28 {offsets = [0, 32], sizes = [46, 32], strides = [1, 1]} : vector<46x96xf32> to vector<46x32xf32>
    %33 = vector.extract_strided_slice %28 {offsets = [0, 64], sizes = [46, 32], strides = [1, 1]} : vector<46x96xf32> to vector<46x32xf32>
    %cst_18 = arith.constant dense<0.000000e+00> : vector<46xf32>
    %34 = vector.multi_reduction <add>, %0, %cst_18 [1] : vector<46x32xf32> to vector<46xf32>
    %35 = vector.shape_cast %34 : vector<46xf32> to vector<46x1xf32>
    %cst_19 = arith.constant 0.000000e+00 : f32
    %36 = vector.broadcast %cst_19 : f32 to vector<46x1xf32>
    %37 = arith.cmpf one, %35, %36 : vector<46x1xf32>
    %38 = arith.extui %37 : vector<46x1xi1> to vector<46x1xi32>
    %39 = arith.sitofp %38 : vector<46x1xi32> to vector<46x1xf32>
    %40 = arith.ori %17, %5 : vector<23x23xi1>
    %41 = vector.extract_strided_slice %39 {offsets = [0, 0], sizes = [23, 1], strides = [1, 1]} : vector<46x1xf32> to vector<23x1xf32>
    %42 = vector.extract_strided_slice %31 {offsets = [0, 0], sizes = [23, 8], strides = [1, 1]} : vector<46x32xf32> to vector<23x8xf32>
    %43 = vector.extract_strided_slice %32 {offsets = [0, 0], sizes = [23, 8], strides = [1, 1]} : vector<46x32xf32> to vector<23x8xf32>
    %44 = vector.extract_strided_slice %33 {offsets = [0, 0], sizes = [23, 8], strides = [1, 1]} : vector<46x32xf32> to vector<23x8xf32>
    %cst_20 = arith.constant dense<0.000000e+00> : vector<23x23xf32>
    %45 = tpu.matmul %42, %43, %cst_20 {dimension_numbers = #tpu.dot_dimension_numbers<[1], [1], [0], [0], [0, 0, 1, 0], [], []>} : vector<23x8xf32>, vector<23x8xf32>, vector<23x23xf32> -> vector<23x23xf32>
    %cst_21 = arith.constant -4.2949673E+9 : f32
    %46 = vector.broadcast %cst_21 : f32 to vector<23x23xf32>
    %47 = arith.select %40, %46, %45 : vector<23x23xi1>, vector<23x23xf32>
    %cst_22 = arith.constant dense<0xFF800000> : vector<23xf32>
    %48 = vector.multi_reduction <maximumf>, %47, %cst_22 [1] : vector<23x23xf32> to vector<23xf32>
    %49 = vector.shape_cast %48 : vector<23xf32> to vector<23x1xf32>
    %50 = vector.broadcast %49 : vector<23x1xf32> to vector<23x23xf32>
    %51 = arith.subf %47, %50 : vector<23x23xf32>
    %52 = math.exp %51 : vector<23x23xf32>
    %cst_23 = arith.constant dense<0.000000e+00> : vector<23xf32>
    %53 = vector.multi_reduction <add>, %52, %cst_23 [1] : vector<23x23xf32> to vector<23xf32>
    %54 = vector.shape_cast %53 : vector<23xf32> to vector<23x1xf32>
    %55 = tpu.reciprocal %54 {approx = true} : vector<23x1xf32> -> vector<23x1xf32>
    %56 = arith.mulf %55, %41 : vector<23x1xf32>
    %57 = vector.broadcast %56 : vector<23x1xf32> to vector<23x23xf32>
    %58 = arith.mulf %52, %57 : vector<23x23xf32>
    %cst_24 = arith.constant dense<0.000000e+00> : vector<23x8xf32>
    %59 = tpu.matmul %58, %44, %cst_24 {dimension_numbers = #tpu.dot_dimension_numbers<[1], [0], [0], [1], [0, 0, 1, 1], [], []>} : vector<23x23xf32>, vector<23x8xf32>, vector<23x8xf32> -> vector<23x8xf32>
    %60 = vector.extract_strided_slice %31 {offsets = [0, 8], sizes = [23, 8], strides = [1, 1]} : vector<46x32xf32> to vector<23x8xf32>
    %61 = vector.extract_strided_slice %32 {offsets = [0, 8], sizes = [23, 8], strides = [1, 1]} : vector<46x32xf32> to vector<23x8xf32>
    %62 = vector.extract_strided_slice %33 {offsets = [0, 8], sizes = [23, 8], strides = [1, 1]} : vector<46x32xf32> to vector<23x8xf32>
    %cst_25 = arith.constant dense<0.000000e+00> : vector<23x23xf32>
    %63 = tpu.matmul %60, %61, %cst_25 {dimension_numbers = #tpu.dot_dimension_numbers<[1], [1], [0], [0], [0, 0, 1, 0], [], []>} : vector<23x8xf32>, vector<23x8xf32>, vector<23x23xf32> -> vector<23x23xf32>
    %cst_26 = arith.constant -4.2949673E+9 : f32
    %64 = vector.broadcast %cst_26 : f32 to vector<23x23xf32>
    %65 = arith.select %40, %64, %63 : vector<23x23xi1>, vector<23x23xf32>
    %cst_27 = arith.constant dense<0xFF800000> : vector<23xf32>
    %66 = vector.multi_reduction <maximumf>, %65, %cst_27 [1] : vector<23x23xf32> to vector<23xf32>
    %67 = vector.shape_cast %66 : vector<23xf32> to vector<23x1xf32>
    %68 = vector.broadcast %67 : vector<23x1xf32> to vector<23x23xf32>
    %69 = arith.subf %65, %68 : vector<23x23xf32>
    %70 = math.exp %69 : vector<23x23xf32>
    %cst_28 = arith.constant dense<0.000000e+00> : vector<23xf32>
    %71 = vector.multi_reduction <add>, %70, %cst_28 [1] : vector<23x23xf32> to vector<23xf32>
    %72 = vector.shape_cast %71 : vector<23xf32> to vector<23x1xf32>
    %73 = tpu.reciprocal %72 {approx = true} : vector<23x1xf32> -> vector<23x1xf32>
    %74 = arith.mulf %73, %41 : vector<23x1xf32>
    %75 = vector.broadcast %74 : vector<23x1xf32> to vector<23x23xf32>
    %76 = arith.mulf %70, %75 : vector<23x23xf32>
    %cst_29 = arith.constant dense<0.000000e+00> : vector<23x8xf32>
    %77 = tpu.matmul %76, %62, %cst_29 {dimension_numbers = #tpu.dot_dimension_numbers<[1], [0], [0], [1], [0, 0, 1, 1], [], []>} : vector<23x23xf32>, vector<23x8xf32>, vector<23x8xf32> -> vector<23x8xf32>
    %78 = vector.extract_strided_slice %31 {offsets = [0, 16], sizes = [23, 8], strides = [1, 1]} : vector<46x32xf32> to vector<23x8xf32>
    %79 = vector.extract_strided_slice %32 {offsets = [0, 16], sizes = [23, 8], strides = [1, 1]} : vector<46x32xf32> to vector<23x8xf32>
    %80 = vector.extract_strided_slice %33 {offsets = [0, 16], sizes = [23, 8], strides = [1, 1]} : vector<46x32xf32> to vector<23x8xf32>
    %cst_30 = arith.constant dense<0.000000e+00> : vector<23x23xf32>
    %81 = tpu.matmul %78, %79, %cst_30 {dimension_numbers = #tpu.dot_dimension_numbers<[1], [1], [0], [0], [0, 0, 1, 0], [], []>} : vector<23x8xf32>, vector<23x8xf32>, vector<23x23xf32> -> vector<23x23xf32>
    %cst_31 = arith.constant -4.2949673E+9 : f32
    %82 = vector.broadcast %cst_31 : f32 to vector<23x23xf32>
    %83 = arith.select %40, %82, %81 : vector<23x23xi1>, vector<23x23xf32>
    %cst_32 = arith.constant dense<0xFF800000> : vector<23xf32>
    %84 = vector.multi_reduction <maximumf>, %83, %cst_32 [1] : vector<23x23xf32> to vector<23xf32>
    %85 = vector.shape_cast %84 : vector<23xf32> to vector<23x1xf32>
    %86 = vector.broadcast %85 : vector<23x1xf32> to vector<23x23xf32>
    %87 = arith.subf %83, %86 : vector<23x23xf32>
    %88 = math.exp %87 : vector<23x23xf32>
    %cst_33 = arith.constant dense<0.000000e+00> : vector<23xf32>
    %89 = vector.multi_reduction <add>, %88, %cst_33 [1] : vector<23x23xf32> to vector<23xf32>
    %90 = vector.shape_cast %89 : vector<23xf32> to vector<23x1xf32>
    %91 = tpu.reciprocal %90 {approx = true} : vector<23x1xf32> -> vector<23x1xf32>
    %92 = arith.mulf %91, %41 : vector<23x1xf32>
    %93 = vector.broadcast %92 : vector<23x1xf32> to vector<23x23xf32>
    %94 = arith.mulf %88, %93 : vector<23x23xf32>
    %cst_34 = arith.constant dense<0.000000e+00> : vector<23x8xf32>
    %95 = tpu.matmul %94, %80, %cst_34 {dimension_numbers = #tpu.dot_dimension_numbers<[1], [0], [0], [1], [0, 0, 1, 1], [], []>} : vector<23x23xf32>, vector<23x8xf32>, vector<23x8xf32> -> vector<23x8xf32>
    %96 = vector.extract_strided_slice %31 {offsets = [0, 24], sizes = [23, 8], strides = [1, 1]} : vector<46x32xf32> to vector<23x8xf32>
    %97 = vector.extract_strided_slice %32 {offsets = [0, 24], sizes = [23, 8], strides = [1, 1]} : vector<46x32xf32> to vector<23x8xf32>
    %98 = vector.extract_strided_slice %33 {offsets = [0, 24], sizes = [23, 8], strides = [1, 1]} : vector<46x32xf32> to vector<23x8xf32>
    %cst_35 = arith.constant dense<0.000000e+00> : vector<23x23xf32>
    %99 = tpu.matmul %96, %97, %cst_35 {dimension_numbers = #tpu.dot_dimension_numbers<[1], [1], [0], [0], [0, 0, 1, 0], [], []>} : vector<23x8xf32>, vector<23x8xf32>, vector<23x23xf32> -> vector<23x23xf32>
    %cst_36 = arith.constant -4.2949673E+9 : f32
    %100 = vector.broadcast %cst_36 : f32 to vector<23x23xf32>
    %101 = arith.select %40, %100, %99 : vector<23x23xi1>, vector<23x23xf32>
    %cst_37 = arith.constant dense<0xFF800000> : vector<23xf32>
    %102 = vector.multi_reduction <maximumf>, %101, %cst_37 [1] : vector<23x23xf32> to vector<23xf32>
    %103 = vector.shape_cast %102 : vector<23xf32> to vector<23x1xf32>
    %104 = vector.broadcast %103 : vector<23x1xf32> to vector<23x23xf32>
    %105 = arith.subf %101, %104 : vector<23x23xf32>
    %106 = math.exp %105 : vector<23x23xf32>
    %cst_38 = arith.constant dense<0.000000e+00> : vector<23xf32>
    %107 = vector.multi_reduction <add>, %106, %cst_38 [1] : vector<23x23xf32> to vector<23xf32>
    %108 = vector.shape_cast %107 : vector<23xf32> to vector<23x1xf32>
    %109 = tpu.reciprocal %108 {approx = true} : vector<23x1xf32> -> vector<23x1xf32>
    %110 = arith.mulf %109, %41 : vector<23x1xf32>
    %111 = vector.broadcast %110 : vector<23x1xf32> to vector<23x23xf32>
    %112 = arith.mulf %106, %111 : vector<23x23xf32>
    %cst_39 = arith.constant dense<0.000000e+00> : vector<23x8xf32>
    %113 = tpu.matmul %112, %98, %cst_39 {dimension_numbers = #tpu.dot_dimension_numbers<[1], [0], [0], [1], [0, 0, 1, 1], [], []>} : vector<23x23xf32>, vector<23x8xf32>, vector<23x8xf32> -> vector<23x8xf32>
    %114 = tpu.concatenate %59, %77, %95, %113 in 1 : vector<23x8xf32>, vector<23x8xf32>, vector<23x8xf32>, vector<23x8xf32> -> vector<23x32xf32>
    %115 = arith.ori %21, %5 : vector<23x23xi1>
    %116 = vector.extract_strided_slice %39 {offsets = [23, 0], sizes = [23, 1], strides = [1, 1]} : vector<46x1xf32> to vector<23x1xf32>
    %117 = vector.extract_strided_slice %31 {offsets = [23, 0], sizes = [23, 8], strides = [1, 1]} : vector<46x32xf32> to vector<23x8xf32>
    %118 = vector.extract_strided_slice %32 {offsets = [23, 0], sizes = [23, 8], strides = [1, 1]} : vector<46x32xf32> to vector<23x8xf32>
    %119 = vector.extract_strided_slice %33 {offsets = [23, 0], sizes = [23, 8], strides = [1, 1]} : vector<46x32xf32> to vector<23x8xf32>
    %cst_40 = arith.constant dense<0.000000e+00> : vector<23x23xf32>
    %120 = tpu.matmul %117, %118, %cst_40 {dimension_numbers = #tpu.dot_dimension_numbers<[1], [1], [0], [0], [0, 0, 1, 0], [], []>} : vector<23x8xf32>, vector<23x8xf32>, vector<23x23xf32> -> vector<23x23xf32>
    %cst_41 = arith.constant -4.2949673E+9 : f32
    %121 = vector.broadcast %cst_41 : f32 to vector<23x23xf32>
    %122 = arith.select %115, %121, %120 : vector<23x23xi1>, vector<23x23xf32>
    %cst_42 = arith.constant dense<0xFF800000> : vector<23xf32>
    %123 = vector.multi_reduction <maximumf>, %122, %cst_42 [1] : vector<23x23xf32> to vector<23xf32>
    %124 = vector.shape_cast %123 : vector<23xf32> to vector<23x1xf32>
    %125 = vector.broadcast %124 : vector<23x1xf32> to vector<23x23xf32>
    %126 = arith.subf %122, %125 : vector<23x23xf32>
    %127 = math.exp %126 : vector<23x23xf32>
    %cst_43 = arith.constant dense<0.000000e+00> : vector<23xf32>
    %128 = vector.multi_reduction <add>, %127, %cst_43 [1] : vector<23x23xf32> to vector<23xf32>
    %129 = vector.shape_cast %128 : vector<23xf32> to vector<23x1xf32>
    %130 = tpu.reciprocal %129 {approx = true} : vector<23x1xf32> -> vector<23x1xf32>
    %131 = arith.mulf %130, %116 : vector<23x1xf32>
    %132 = vector.broadcast %131 : vector<23x1xf32> to vector<23x23xf32>
    %133 = arith.mulf %127, %132 : vector<23x23xf32>
    %cst_44 = arith.constant dense<0.000000e+00> : vector<23x8xf32>
    %134 = tpu.matmul %133, %119, %cst_44 {dimension_numbers = #tpu.dot_dimension_numbers<[1], [0], [0], [1], [0, 0, 1, 1], [], []>} : vector<23x23xf32>, vector<23x8xf32>, vector<23x8xf32> -> vector<23x8xf32>
    %135 = vector.extract_strided_slice %31 {offsets = [23, 8], sizes = [23, 8], strides = [1, 1]} : vector<46x32xf32> to vector<23x8xf32>
    %136 = vector.extract_strided_slice %32 {offsets = [23, 8], sizes = [23, 8], strides = [1, 1]} : vector<46x32xf32> to vector<23x8xf32>
    %137 = vector.extract_strided_slice %33 {offsets = [23, 8], sizes = [23, 8], strides = [1, 1]} : vector<46x32xf32> to vector<23x8xf32>
    %cst_45 = arith.constant dense<0.000000e+00> : vector<23x23xf32>
    %138 = tpu.matmul %135, %136, %cst_45 {dimension_numbers = #tpu.dot_dimension_numbers<[1], [1], [0], [0], [0, 0, 1, 0], [], []>} : vector<23x8xf32>, vector<23x8xf32>, vector<23x23xf32> -> vector<23x23xf32>
    %cst_46 = arith.constant -4.2949673E+9 : f32
    %139 = vector.broadcast %cst_46 : f32 to vector<23x23xf32>
    %140 = arith.select %115, %139, %138 : vector<23x23xi1>, vector<23x23xf32>
    %cst_47 = arith.constant dense<0xFF800000> : vector<23xf32>
    %141 = vector.multi_reduction <maximumf>, %140, %cst_47 [1] : vector<23x23xf32> to vector<23xf32>
    %142 = vector.shape_cast %141 : vector<23xf32> to vector<23x1xf32>
    %143 = vector.broadcast %142 : vector<23x1xf32> to vector<23x23xf32>
    %144 = arith.subf %140, %143 : vector<23x23xf32>
    %145 = math.exp %144 : vector<23x23xf32>
    %cst_48 = arith.constant dense<0.000000e+00> : vector<23xf32>
    %146 = vector.multi_reduction <add>, %145, %cst_48 [1] : vector<23x23xf32> to vector<23xf32>
    %147 = vector.shape_cast %146 : vector<23xf32> to vector<23x1xf32>
    %148 = tpu.reciprocal %147 {approx = true} : vector<23x1xf32> -> vector<23x1xf32>
    %149 = arith.mulf %148, %116 : vector<23x1xf32>
    %150 = vector.broadcast %149 : vector<23x1xf32> to vector<23x23xf32>
    %151 = arith.mulf %145, %150 : vector<23x23xf32>
    %cst_49 = arith.constant dense<0.000000e+00> : vector<23x8xf32>
    %152 = tpu.matmul %151, %137, %cst_49 {dimension_numbers = #tpu.dot_dimension_numbers<[1], [0], [0], [1], [0, 0, 1, 1], [], []>} : vector<23x23xf32>, vector<23x8xf32>, vector<23x8xf32> -> vector<23x8xf32>
    %153 = vector.extract_strided_slice %31 {offsets = [23, 16], sizes = [23, 8], strides = [1, 1]} : vector<46x32xf32> to vector<23x8xf32>
    %154 = vector.extract_strided_slice %32 {offsets = [23, 16], sizes = [23, 8], strides = [1, 1]} : vector<46x32xf32> to vector<23x8xf32>
    %155 = vector.extract_strided_slice %33 {offsets = [23, 16], sizes = [23, 8], strides = [1, 1]} : vector<46x32xf32> to vector<23x8xf32>
    %cst_50 = arith.constant dense<0.000000e+00> : vector<23x23xf32>
    %156 = tpu.matmul %153, %154, %cst_50 {dimension_numbers = #tpu.dot_dimension_numbers<[1], [1], [0], [0], [0, 0, 1, 0], [], []>} : vector<23x8xf32>, vector<23x8xf32>, vector<23x23xf32> -> vector<23x23xf32>
    %cst_51 = arith.constant -4.2949673E+9 : f32
    %157 = vector.broadcast %cst_51 : f32 to vector<23x23xf32>
    %158 = arith.select %115, %157, %156 : vector<23x23xi1>, vector<23x23xf32>
    %cst_52 = arith.constant dense<0xFF800000> : vector<23xf32>
    %159 = vector.multi_reduction <maximumf>, %158, %cst_52 [1] : vector<23x23xf32> to vector<23xf32>
    %160 = vector.shape_cast %159 : vector<23xf32> to vector<23x1xf32>
    %161 = vector.broadcast %160 : vector<23x1xf32> to vector<23x23xf32>
    %162 = arith.subf %158, %161 : vector<23x23xf32>
    %163 = math.exp %162 : vector<23x23xf32>
    %cst_53 = arith.constant dense<0.000000e+00> : vector<23xf32>
    %164 = vector.multi_reduction <add>, %163, %cst_53 [1] : vector<23x23xf32> to vector<23xf32>
    %165 = vector.shape_cast %164 : vector<23xf32> to vector<23x1xf32>
    %166 = tpu.reciprocal %165 {approx = true} : vector<23x1xf32> -> vector<23x1xf32>
    %167 = arith.mulf %166, %116 : vector<23x1xf32>
    %168 = vector.broadcast %167 : vector<23x1xf32> to vector<23x23xf32>
    %169 = arith.mulf %163, %168 : vector<23x23xf32>
    %cst_54 = arith.constant dense<0.000000e+00> : vector<23x8xf32>
    %170 = tpu.matmul %169, %155, %cst_54 {dimension_numbers = #tpu.dot_dimension_numbers<[1], [0], [0], [1], [0, 0, 1, 1], [], []>} : vector<23x23xf32>, vector<23x8xf32>, vector<23x8xf32> -> vector<23x8xf32>
    %171 = vector.extract_strided_slice %31 {offsets = [23, 24], sizes = [23, 8], strides = [1, 1]} : vector<46x32xf32> to vector<23x8xf32>
    %172 = vector.extract_strided_slice %32 {offsets = [23, 24], sizes = [23, 8], strides = [1, 1]} : vector<46x32xf32> to vector<23x8xf32>
    %173 = vector.extract_strided_slice %33 {offsets = [23, 24], sizes = [23, 8], strides = [1, 1]} : vector<46x32xf32> to vector<23x8xf32>
    %cst_55 = arith.constant dense<0.000000e+00> : vector<23x23xf32>
    %174 = tpu.matmul %171, %172, %cst_55 {dimension_numbers = #tpu.dot_dimension_numbers<[1], [1], [0], [0], [0, 0, 1, 0], [], []>} : vector<23x8xf32>, vector<23x8xf32>, vector<23x23xf32> -> vector<23x23xf32>
    %cst_56 = arith.constant -4.2949673E+9 : f32
    %175 = vector.broadcast %cst_56 : f32 to vector<23x23xf32>
    %176 = arith.select %115, %175, %174 : vector<23x23xi1>, vector<23x23xf32>
    %cst_57 = arith.constant dense<0xFF800000> : vector<23xf32>
    %177 = vector.multi_reduction <maximumf>, %176, %cst_57 [1] : vector<23x23xf32> to vector<23xf32>
    %178 = vector.shape_cast %177 : vector<23xf32> to vector<23x1xf32>
    %179 = vector.broadcast %178 : vector<23x1xf32> to vector<23x23xf32>
    %180 = arith.subf %176, %179 : vector<23x23xf32>
    %181 = math.exp %180 : vector<23x23xf32>
    %cst_58 = arith.constant dense<0.000000e+00> : vector<23xf32>
    %182 = vector.multi_reduction <add>, %181, %cst_58 [1] : vector<23x23xf32> to vector<23xf32>
    %183 = vector.shape_cast %182 : vector<23xf32> to vector<23x1xf32>
    %184 = tpu.reciprocal %183 {approx = true} : vector<23x1xf32> -> vector<23x1xf32>
    %185 = arith.mulf %184, %116 : vector<23x1xf32>
    %186 = vector.broadcast %185 : vector<23x1xf32> to vector<23x23xf32>
    %187 = arith.mulf %181, %186 : vector<23x23xf32>
    %cst_59 = arith.constant dense<0.000000e+00> : vector<23x8xf32>
    %188 = tpu.matmul %187, %173, %cst_59 {dimension_numbers = #tpu.dot_dimension_numbers<[1], [0], [0], [1], [0, 0, 1, 1], [], []>} : vector<23x23xf32>, vector<23x8xf32>, vector<23x8xf32> -> vector<23x8xf32>
    %189 = tpu.concatenate %134, %152, %170, %188 in 1 : vector<23x8xf32>, vector<23x8xf32>, vector<23x8xf32>, vector<23x8xf32> -> vector<23x32xf32>
    %190 = tpu.concatenate %114, %189 in 0 : vector<23x32xf32>, vector<23x32xf32> -> vector<46x32xf32>
    %191 = arith.addf %190, %0 : vector<46x32xf32>
    %c0_60 = arith.constant 0 : index
    %c0_61 = arith.constant 0 : index
    %192 = vector.load %arg4[%c0_60, %c0_61] : memref<1x32xf32, #tpu.memory_space<vmem>>, vector<1x32xf32>
    %c0_62 = arith.constant 0 : index
    %c0_63 = arith.constant 0 : index
    %193 = vector.load %arg5[%c0_62, %c0_63] : memref<1x32xf32, #tpu.memory_space<vmem>>, vector<1x32xf32>
    %cst_64 = arith.constant dense<0.000000e+00> : vector<46xf32>
    %194 = vector.multi_reduction <add>, %191, %cst_64 [1] : vector<46x32xf32> to vector<46xf32>
    %195 = vector.shape_cast %194 : vector<46xf32> to vector<46x1xf32>
    %cst_65 = arith.constant 3.200000e+01 : f32
    %196 = vector.broadcast %cst_65 : f32 to vector<46x1xf32>
    %197 = arith.divf %195, %196 : vector<46x1xf32>
    %198 = vector.broadcast %197 : vector<46x1xf32> to vector<46x32xf32>
    %199 = arith.subf %191, %198 : vector<46x32xf32>
    %200 = arith.mulf %199, %199 : vector<46x32xf32>
    %cst_66 = arith.constant dense<0.000000e+00> : vector<46xf32>
    %201 = vector.multi_reduction <add>, %200, %cst_66 [1] : vector<46x32xf32> to vector<46xf32>
    %202 = vector.shape_cast %201 : vector<46xf32> to vector<46x1xf32>
    %cst_67 = arith.constant 3.100000e+01 : f32
    %203 = vector.broadcast %cst_67 : f32 to vector<46x1xf32>
    %204 = arith.divf %202, %203 : vector<46x1xf32>
    %205 = math.sqrt %204 : vector<46x1xf32>
    %206 = vector.broadcast %197 : vector<46x1xf32> to vector<46x32xf32>
    %207 = arith.subf %191, %206 : vector<46x32xf32>
    %208 = vector.broadcast %192 : vector<1x32xf32> to vector<46x32xf32>
    %209 = arith.mulf %208, %207 : vector<46x32xf32>
    %cst_68 = arith.constant 9.99999993E-9 : f32
    %210 = vector.broadcast %cst_68 : f32 to vector<46x1xf32>
    %211 = arith.addf %205, %210 : vector<46x1xf32>
    %212 = vector.broadcast %211 : vector<46x1xf32> to vector<46x32xf32>
    %213 = arith.divf %209, %212 : vector<46x32xf32>
    %214 = vector.broadcast %193 : vector<1x32xf32> to vector<46x32xf32>
    %215 = arith.addf %213, %214 : vector<46x32xf32>
    %c0_69 = arith.constant 0 : index
    %c0_70 = arith.constant 0 : index
    %216 = vector.load %arg6[%c0_69, %c0_70] : memref<32x32xf32, #tpu.memory_space<vmem>>, vector<32x32xf32>
    %cst_71 = arith.constant dense<0.000000e+00> : vector<46x32xf32>
    %217 = tpu.matmul %215, %216, %cst_71 {dimension_numbers = #tpu.dot_dimension_numbers<[1], [0], [0], [1], [0, 0, 1, 1], [], []>} : vector<46x32xf32>, vector<32x32xf32>, vector<46x32xf32> -> vector<46x32xf32>
    %c0_72 = arith.constant 0 : index
    %c0_73 = arith.constant 0 : index
    %218 = vector.load %arg7[%c0_72, %c0_73] : memref<1x32xf32, #tpu.memory_space<vmem>>, vector<1x32xf32>
    %219 = vector.broadcast %218 : vector<1x32xf32> to vector<46x32xf32>
    %220 = arith.addf %217, %219 : vector<46x32xf32>
    %cst_74 = arith.constant 0.000000e+00 : f32
    %221 = vector.broadcast %cst_74 : f32 to vector<46x32xf32>
    %222 = arith.maximumf %220, %221 : vector<46x32xf32>
    %cst_75 = arith.constant 0.353553385 : f32
    %223 = vector.broadcast %cst_75 : f32 to vector<46x32xf32>
    %224 = arith.mulf %222, %223 : vector<46x32xf32>
    %c0_76 = arith.constant 0 : index
    %c0_77 = arith.constant 0 : index
    %225 = vector.load %arg8[%c0_76, %c0_77] : memref<32x64xf32, #tpu.memory_space<vmem>>, vector<32x64xf32>
    %cst_78 = arith.constant dense<0.000000e+00> : vector<32x64xf32>
    %226 = tpu.matmul %1, %225, %cst_78 {dimension_numbers = #tpu.dot_dimension_numbers<[1], [0], [0], [1], [0, 0, 1, 1], [], []>} : vector<32x32xf32>, vector<32x64xf32>, vector<32x64xf32> -> vector<32x64xf32>
    %c0_79 = arith.constant 0 : index
    %c0_80 = arith.constant 0 : index
    %227 = vector.load %arg9[%c0_79, %c0_80] : memref<1x64xf32, #tpu.memory_space<vmem>>, vector<1x64xf32>
    %228 = vector.broadcast %227 : vector<1x64xf32> to vector<32x64xf32>
    %229 = arith.addf %226, %228 : vector<32x64xf32>
    %cst_81 = arith.constant 0.000000e+00 : f32
    %230 = vector.broadcast %cst_81 : f32 to vector<32x64xf32>
    %231 = arith.maximumf %229, %230 : vector<32x64xf32>
    %232 = vector.extract_strided_slice %231 {offsets = [0, 0], sizes = [32, 32], strides = [1, 1]} : vector<32x64xf32> to vector<32x32xf32>
    %233 = vector.extract_strided_slice %231 {offsets = [0, 32], sizes = [32, 32], strides = [1, 1]} : vector<32x64xf32> to vector<32x32xf32>
    %cst_82 = arith.constant dense<0.000000e+00> : vector<46xf32>
    %234 = vector.multi_reduction <add>, %215, %cst_82 [1] : vector<46x32xf32> to vector<46xf32>
    %235 = vector.shape_cast %234 : vector<46xf32> to vector<46x1xf32>
    %cst_83 = arith.constant 0.000000e+00 : f32
    %236 = vector.broadcast %cst_83 : f32 to vector<46x1xf32>
    %237 = arith.cmpf one, %235, %236 : vector<46x1xf32>
    %238 = arith.extui %237 : vector<46x1xi1> to vector<46x1xi32>
    %239 = arith.sitofp %238 : vector<46x1xi32> to vector<46x1xf32>
    %240 = vector.extract_strided_slice %239 {offsets = [0, 0], sizes = [23, 1], strides = [1, 1]} : vector<46x1xf32> to vector<23x1xf32>
    %241 = vector.extract_strided_slice %224 {offsets = [0, 0], sizes = [23, 8], strides = [1, 1]} : vector<46x32xf32> to vector<23x8xf32>
    %242 = vector.extract_strided_slice %232 {offsets = [0, 0], sizes = [16, 8], strides = [1, 1]} : vector<32x32xf32> to vector<16x8xf32>
    %243 = vector.extract_strided_slice %233 {offsets = [0, 0], sizes = [16, 8], strides = [1, 1]} : vector<32x32xf32> to vector<16x8xf32>
    %cst_84 = arith.constant dense<0.000000e+00> : vector<23x16xf32>
    %244 = tpu.matmul %241, %242, %cst_84 {dimension_numbers = #tpu.dot_dimension_numbers<[1], [1], [0], [0], [0, 0, 1, 0], [], []>} : vector<23x8xf32>, vector<16x8xf32>, vector<23x16xf32> -> vector<23x16xf32>
    %cst_85 = arith.constant -4.2949673E+9 : f32
    %245 = vector.broadcast %cst_85 : f32 to vector<23x16xf32>
    %246 = arith.select %9, %245, %244 : vector<23x16xi1>, vector<23x16xf32>
    %cst_86 = arith.constant dense<0xFF800000> : vector<23xf32>
    %247 = vector.multi_reduction <maximumf>, %246, %cst_86 [1] : vector<23x16xf32> to vector<23xf32>
    %248 = vector.shape_cast %247 : vector<23xf32> to vector<23x1xf32>
    %249 = vector.broadcast %248 : vector<23x1xf32> to vector<23x16xf32>
    %250 = arith.subf %246, %249 : vector<23x16xf32>
    %251 = math.exp %250 : vector<23x16xf32>
    %cst_87 = arith.constant dense<0.000000e+00> : vector<23xf32>
    %252 = vector.multi_reduction <add>, %251, %cst_87 [1] : vector<23x16xf32> to vector<23xf32>
    %253 = vector.shape_cast %252 : vector<23xf32> to vector<23x1xf32>
    %254 = tpu.reciprocal %253 {approx = true} : vector<23x1xf32> -> vector<23x1xf32>
    %255 = arith.mulf %254, %240 : vector<23x1xf32>
    %256 = vector.broadcast %255 : vector<23x1xf32> to vector<23x16xf32>
    %257 = arith.mulf %251, %256 : vector<23x16xf32>
    %cst_88 = arith.constant dense<0.000000e+00> : vector<23x8xf32>
    %258 = tpu.matmul %257, %243, %cst_88 {dimension_numbers = #tpu.dot_dimension_numbers<[1], [0], [0], [1], [0, 0, 1, 1], [], []>} : vector<23x16xf32>, vector<16x8xf32>, vector<23x8xf32> -> vector<23x8xf32>
    %259 = vector.extract_strided_slice %224 {offsets = [0, 8], sizes = [23, 8], strides = [1, 1]} : vector<46x32xf32> to vector<23x8xf32>
    %260 = vector.extract_strided_slice %232 {offsets = [0, 8], sizes = [16, 8], strides = [1, 1]} : vector<32x32xf32> to vector<16x8xf32>
    %261 = vector.extract_strided_slice %233 {offsets = [0, 8], sizes = [16, 8], strides = [1, 1]} : vector<32x32xf32> to vector<16x8xf32>
    %cst_89 = arith.constant dense<0.000000e+00> : vector<23x16xf32>
    %262 = tpu.matmul %259, %260, %cst_89 {dimension_numbers = #tpu.dot_dimension_numbers<[1], [1], [0], [0], [0, 0, 1, 0], [], []>} : vector<23x8xf32>, vector<16x8xf32>, vector<23x16xf32> -> vector<23x16xf32>
    %cst_90 = arith.constant -4.2949673E+9 : f32
    %263 = vector.broadcast %cst_90 : f32 to vector<23x16xf32>
    %264 = arith.select %9, %263, %262 : vector<23x16xi1>, vector<23x16xf32>
    %cst_91 = arith.constant dense<0xFF800000> : vector<23xf32>
    %265 = vector.multi_reduction <maximumf>, %264, %cst_91 [1] : vector<23x16xf32> to vector<23xf32>
    %266 = vector.shape_cast %265 : vector<23xf32> to vector<23x1xf32>
    %267 = vector.broadcast %266 : vector<23x1xf32> to vector<23x16xf32>
    %268 = arith.subf %264, %267 : vector<23x16xf32>
    %269 = math.exp %268 : vector<23x16xf32>
    %cst_92 = arith.constant dense<0.000000e+00> : vector<23xf32>
    %270 = vector.multi_reduction <add>, %269, %cst_92 [1] : vector<23x16xf32> to vector<23xf32>
    %271 = vector.shape_cast %270 : vector<23xf32> to vector<23x1xf32>
    %272 = tpu.reciprocal %271 {approx = true} : vector<23x1xf32> -> vector<23x1xf32>
    %273 = arith.mulf %272, %240 : vector<23x1xf32>
    %274 = vector.broadcast %273 : vector<23x1xf32> to vector<23x16xf32>
    %275 = arith.mulf %269, %274 : vector<23x16xf32>
    %cst_93 = arith.constant dense<0.000000e+00> : vector<23x8xf32>
    %276 = tpu.matmul %275, %261, %cst_93 {dimension_numbers = #tpu.dot_dimension_numbers<[1], [0], [0], [1], [0, 0, 1, 1], [], []>} : vector<23x16xf32>, vector<16x8xf32>, vector<23x8xf32> -> vector<23x8xf32>
    %277 = vector.extract_strided_slice %224 {offsets = [0, 16], sizes = [23, 8], strides = [1, 1]} : vector<46x32xf32> to vector<23x8xf32>
    %278 = vector.extract_strided_slice %232 {offsets = [0, 16], sizes = [16, 8], strides = [1, 1]} : vector<32x32xf32> to vector<16x8xf32>
    %279 = vector.extract_strided_slice %233 {offsets = [0, 16], sizes = [16, 8], strides = [1, 1]} : vector<32x32xf32> to vector<16x8xf32>
    %cst_94 = arith.constant dense<0.000000e+00> : vector<23x16xf32>
    %280 = tpu.matmul %277, %278, %cst_94 {dimension_numbers = #tpu.dot_dimension_numbers<[1], [1], [0], [0], [0, 0, 1, 0], [], []>} : vector<23x8xf32>, vector<16x8xf32>, vector<23x16xf32> -> vector<23x16xf32>
    %cst_95 = arith.constant -4.2949673E+9 : f32
    %281 = vector.broadcast %cst_95 : f32 to vector<23x16xf32>
    %282 = arith.select %9, %281, %280 : vector<23x16xi1>, vector<23x16xf32>
    %cst_96 = arith.constant dense<0xFF800000> : vector<23xf32>
    %283 = vector.multi_reduction <maximumf>, %282, %cst_96 [1] : vector<23x16xf32> to vector<23xf32>
    %284 = vector.shape_cast %283 : vector<23xf32> to vector<23x1xf32>
    %285 = vector.broadcast %284 : vector<23x1xf32> to vector<23x16xf32>
    %286 = arith.subf %282, %285 : vector<23x16xf32>
    %287 = math.exp %286 : vector<23x16xf32>
    %cst_97 = arith.constant dense<0.000000e+00> : vector<23xf32>
    %288 = vector.multi_reduction <add>, %287, %cst_97 [1] : vector<23x16xf32> to vector<23xf32>
    %289 = vector.shape_cast %288 : vector<23xf32> to vector<23x1xf32>
    %290 = tpu.reciprocal %289 {approx = true} : vector<23x1xf32> -> vector<23x1xf32>
    %291 = arith.mulf %290, %240 : vector<23x1xf32>
    %292 = vector.broadcast %291 : vector<23x1xf32> to vector<23x16xf32>
    %293 = arith.mulf %287, %292 : vector<23x16xf32>
    %cst_98 = arith.constant dense<0.000000e+00> : vector<23x8xf32>
    %294 = tpu.matmul %293, %279, %cst_98 {dimension_numbers = #tpu.dot_dimension_numbers<[1], [0], [0], [1], [0, 0, 1, 1], [], []>} : vector<23x16xf32>, vector<16x8xf32>, vector<23x8xf32> -> vector<23x8xf32>
    %295 = vector.extract_strided_slice %224 {offsets = [0, 24], sizes = [23, 8], strides = [1, 1]} : vector<46x32xf32> to vector<23x8xf32>
    %296 = vector.extract_strided_slice %232 {offsets = [0, 24], sizes = [16, 8], strides = [1, 1]} : vector<32x32xf32> to vector<16x8xf32>
    %297 = vector.extract_strided_slice %233 {offsets = [0, 24], sizes = [16, 8], strides = [1, 1]} : vector<32x32xf32> to vector<16x8xf32>
    %cst_99 = arith.constant dense<0.000000e+00> : vector<23x16xf32>
    %298 = tpu.matmul %295, %296, %cst_99 {dimension_numbers = #tpu.dot_dimension_numbers<[1], [1], [0], [0], [0, 0, 1, 0], [], []>} : vector<23x8xf32>, vector<16x8xf32>, vector<23x16xf32> -> vector<23x16xf32>
    %cst_100 = arith.constant -4.2949673E+9 : f32
    %299 = vector.broadcast %cst_100 : f32 to vector<23x16xf32>
    %300 = arith.select %9, %299, %298 : vector<23x16xi1>, vector<23x16xf32>
    %cst_101 = arith.constant dense<0xFF800000> : vector<23xf32>
    %301 = vector.multi_reduction <maximumf>, %300, %cst_101 [1] : vector<23x16xf32> to vector<23xf32>
    %302 = vector.shape_cast %301 : vector<23xf32> to vector<23x1xf32>
    %303 = vector.broadcast %302 : vector<23x1xf32> to vector<23x16xf32>
    %304 = arith.subf %300, %303 : vector<23x16xf32>
    %305 = math.exp %304 : vector<23x16xf32>
    %cst_102 = arith.constant dense<0.000000e+00> : vector<23xf32>
    %306 = vector.multi_reduction <add>, %305, %cst_102 [1] : vector<23x16xf32> to vector<23xf32>
    %307 = vector.shape_cast %306 : vector<23xf32> to vector<23x1xf32>
    %308 = tpu.reciprocal %307 {approx = true} : vector<23x1xf32> -> vector<23x1xf32>
    %309 = arith.mulf %308, %240 : vector<23x1xf32>
    %310 = vector.broadcast %309 : vector<23x1xf32> to vector<23x16xf32>
    %311 = arith.mulf %305, %310 : vector<23x16xf32>
    %cst_103 = arith.constant dense<0.000000e+00> : vector<23x8xf32>
    %312 = tpu.matmul %311, %297, %cst_103 {dimension_numbers = #tpu.dot_dimension_numbers<[1], [0], [0], [1], [0, 0, 1, 1], [], []>} : vector<23x16xf32>, vector<16x8xf32>, vector<23x8xf32> -> vector<23x8xf32>
    %313 = tpu.concatenate %258, %276, %294, %312 in 1 : vector<23x8xf32>, vector<23x8xf32>, vector<23x8xf32>, vector<23x8xf32> -> vector<23x32xf32>
    %314 = vector.extract_strided_slice %239 {offsets = [23, 0], sizes = [23, 1], strides = [1, 1]} : vector<46x1xf32> to vector<23x1xf32>
    %315 = vector.extract_strided_slice %224 {offsets = [23, 0], sizes = [23, 8], strides = [1, 1]} : vector<46x32xf32> to vector<23x8xf32>
    %316 = vector.extract_strided_slice %232 {offsets = [16, 0], sizes = [16, 8], strides = [1, 1]} : vector<32x32xf32> to vector<16x8xf32>
    %317 = vector.extract_strided_slice %233 {offsets = [16, 0], sizes = [16, 8], strides = [1, 1]} : vector<32x32xf32> to vector<16x8xf32>
    %cst_104 = arith.constant dense<0.000000e+00> : vector<23x16xf32>
    %318 = tpu.matmul %315, %316, %cst_104 {dimension_numbers = #tpu.dot_dimension_numbers<[1], [1], [0], [0], [0, 0, 1, 0], [], []>} : vector<23x8xf32>, vector<16x8xf32>, vector<23x16xf32> -> vector<23x16xf32>
    %cst_105 = arith.constant -4.2949673E+9 : f32
    %319 = vector.broadcast %cst_105 : f32 to vector<23x16xf32>
    %320 = arith.select %13, %319, %318 : vector<23x16xi1>, vector<23x16xf32>
    %cst_106 = arith.constant dense<0xFF800000> : vector<23xf32>
    %321 = vector.multi_reduction <maximumf>, %320, %cst_106 [1] : vector<23x16xf32> to vector<23xf32>
    %322 = vector.shape_cast %321 : vector<23xf32> to vector<23x1xf32>
    %323 = vector.broadcast %322 : vector<23x1xf32> to vector<23x16xf32>
    %324 = arith.subf %320, %323 : vector<23x16xf32>
    %325 = math.exp %324 : vector<23x16xf32>
    %cst_107 = arith.constant dense<0.000000e+00> : vector<23xf32>
    %326 = vector.multi_reduction <add>, %325, %cst_107 [1] : vector<23x16xf32> to vector<23xf32>
    %327 = vector.shape_cast %326 : vector<23xf32> to vector<23x1xf32>
    %328 = tpu.reciprocal %327 {approx = true} : vector<23x1xf32> -> vector<23x1xf32>
    %329 = arith.mulf %328, %314 : vector<23x1xf32>
    %330 = vector.broadcast %329 : vector<23x1xf32> to vector<23x16xf32>
    %331 = arith.mulf %325, %330 : vector<23x16xf32>
    %cst_108 = arith.constant dense<0.000000e+00> : vector<23x8xf32>
    %332 = tpu.matmul %331, %317, %cst_108 {dimension_numbers = #tpu.dot_dimension_numbers<[1], [0], [0], [1], [0, 0, 1, 1], [], []>} : vector<23x16xf32>, vector<16x8xf32>, vector<23x8xf32> -> vector<23x8xf32>
    %333 = vector.extract_strided_slice %224 {offsets = [23, 8], sizes = [23, 8], strides = [1, 1]} : vector<46x32xf32> to vector<23x8xf32>
    %334 = vector.extract_strided_slice %232 {offsets = [16, 8], sizes = [16, 8], strides = [1, 1]} : vector<32x32xf32> to vector<16x8xf32>
    %335 = vector.extract_strided_slice %233 {offsets = [16, 8], sizes = [16, 8], strides = [1, 1]} : vector<32x32xf32> to vector<16x8xf32>
    %cst_109 = arith.constant dense<0.000000e+00> : vector<23x16xf32>
    %336 = tpu.matmul %333, %334, %cst_109 {dimension_numbers = #tpu.dot_dimension_numbers<[1], [1], [0], [0], [0, 0, 1, 0], [], []>} : vector<23x8xf32>, vector<16x8xf32>, vector<23x16xf32> -> vector<23x16xf32>
    %cst_110 = arith.constant -4.2949673E+9 : f32
    %337 = vector.broadcast %cst_110 : f32 to vector<23x16xf32>
    %338 = arith.select %13, %337, %336 : vector<23x16xi1>, vector<23x16xf32>
    %cst_111 = arith.constant dense<0xFF800000> : vector<23xf32>
    %339 = vector.multi_reduction <maximumf>, %338, %cst_111 [1] : vector<23x16xf32> to vector<23xf32>
    %340 = vector.shape_cast %339 : vector<23xf32> to vector<23x1xf32>
    %341 = vector.broadcast %340 : vector<23x1xf32> to vector<23x16xf32>
    %342 = arith.subf %338, %341 : vector<23x16xf32>
    %343 = math.exp %342 : vector<23x16xf32>
    %cst_112 = arith.constant dense<0.000000e+00> : vector<23xf32>
    %344 = vector.multi_reduction <add>, %343, %cst_112 [1] : vector<23x16xf32> to vector<23xf32>
    %345 = vector.shape_cast %344 : vector<23xf32> to vector<23x1xf32>
    %346 = tpu.reciprocal %345 {approx = true} : vector<23x1xf32> -> vector<23x1xf32>
    %347 = arith.mulf %346, %314 : vector<23x1xf32>
    %348 = vector.broadcast %347 : vector<23x1xf32> to vector<23x16xf32>
    %349 = arith.mulf %343, %348 : vector<23x16xf32>
    %cst_113 = arith.constant dense<0.000000e+00> : vector<23x8xf32>
    %350 = tpu.matmul %349, %335, %cst_113 {dimension_numbers = #tpu.dot_dimension_numbers<[1], [0], [0], [1], [0, 0, 1, 1], [], []>} : vector<23x16xf32>, vector<16x8xf32>, vector<23x8xf32> -> vector<23x8xf32>
    %351 = vector.extract_strided_slice %224 {offsets = [23, 16], sizes = [23, 8], strides = [1, 1]} : vector<46x32xf32> to vector<23x8xf32>
    %352 = vector.extract_strided_slice %232 {offsets = [16, 16], sizes = [16, 8], strides = [1, 1]} : vector<32x32xf32> to vector<16x8xf32>
    %353 = vector.extract_strided_slice %233 {offsets = [16, 16], sizes = [16, 8], strides = [1, 1]} : vector<32x32xf32> to vector<16x8xf32>
    %cst_114 = arith.constant dense<0.000000e+00> : vector<23x16xf32>
    %354 = tpu.matmul %351, %352, %cst_114 {dimension_numbers = #tpu.dot_dimension_numbers<[1], [1], [0], [0], [0, 0, 1, 0], [], []>} : vector<23x8xf32>, vector<16x8xf32>, vector<23x16xf32> -> vector<23x16xf32>
    %cst_115 = arith.constant -4.2949673E+9 : f32
    %355 = vector.broadcast %cst_115 : f32 to vector<23x16xf32>
    %356 = arith.select %13, %355, %354 : vector<23x16xi1>, vector<23x16xf32>
    %cst_116 = arith.constant dense<0xFF800000> : vector<23xf32>
    %357 = vector.multi_reduction <maximumf>, %356, %cst_116 [1] : vector<23x16xf32> to vector<23xf32>
    %358 = vector.shape_cast %357 : vector<23xf32> to vector<23x1xf32>
    %359 = vector.broadcast %358 : vector<23x1xf32> to vector<23x16xf32>
    %360 = arith.subf %356, %359 : vector<23x16xf32>
    %361 = math.exp %360 : vector<23x16xf32>
    %cst_117 = arith.constant dense<0.000000e+00> : vector<23xf32>
    %362 = vector.multi_reduction <add>, %361, %cst_117 [1] : vector<23x16xf32> to vector<23xf32>
    %363 = vector.shape_cast %362 : vector<23xf32> to vector<23x1xf32>
    %364 = tpu.reciprocal %363 {approx = true} : vector<23x1xf32> -> vector<23x1xf32>
    %365 = arith.mulf %364, %314 : vector<23x1xf32>
    %366 = vector.broadcast %365 : vector<23x1xf32> to vector<23x16xf32>
    %367 = arith.mulf %361, %366 : vector<23x16xf32>
    %cst_118 = arith.constant dense<0.000000e+00> : vector<23x8xf32>
    %368 = tpu.matmul %367, %353, %cst_118 {dimension_numbers = #tpu.dot_dimension_numbers<[1], [0], [0], [1], [0, 0, 1, 1], [], []>} : vector<23x16xf32>, vector<16x8xf32>, vector<23x8xf32> -> vector<23x8xf32>
    %369 = vector.extract_strided_slice %224 {offsets = [23, 24], sizes = [23, 8], strides = [1, 1]} : vector<46x32xf32> to vector<23x8xf32>
    %370 = vector.extract_strided_slice %232 {offsets = [16, 24], sizes = [16, 8], strides = [1, 1]} : vector<32x32xf32> to vector<16x8xf32>
    %371 = vector.extract_strided_slice %233 {offsets = [16, 24], sizes = [16, 8], strides = [1, 1]} : vector<32x32xf32> to vector<16x8xf32>
    %cst_119 = arith.constant dense<0.000000e+00> : vector<23x16xf32>
    %372 = tpu.matmul %369, %370, %cst_119 {dimension_numbers = #tpu.dot_dimension_numbers<[1], [1], [0], [0], [0, 0, 1, 0], [], []>} : vector<23x8xf32>, vector<16x8xf32>, vector<23x16xf32> -> vector<23x16xf32>
    %cst_120 = arith.constant -4.2949673E+9 : f32
    %373 = vector.broadcast %cst_120 : f32 to vector<23x16xf32>
    %374 = arith.select %13, %373, %372 : vector<23x16xi1>, vector<23x16xf32>
    %cst_121 = arith.constant dense<0xFF800000> : vector<23xf32>
    %375 = vector.multi_reduction <maximumf>, %374, %cst_121 [1] : vector<23x16xf32> to vector<23xf32>
    %376 = vector.shape_cast %375 : vector<23xf32> to vector<23x1xf32>
    %377 = vector.broadcast %376 : vector<23x1xf32> to vector<23x16xf32>
    %378 = arith.subf %374, %377 : vector<23x16xf32>
    %379 = math.exp %378 : vector<23x16xf32>
    %cst_122 = arith.constant dense<0.000000e+00> : vector<23xf32>
    %380 = vector.multi_reduction <add>, %379, %cst_122 [1] : vector<23x16xf32> to vector<23xf32>
    %381 = vector.shape_cast %380 : vector<23xf32> to vector<23x1xf32>
    %382 = tpu.reciprocal %381 {approx = true} : vector<23x1xf32> -> vector<23x1xf32>
    %383 = arith.mulf %382, %314 : vector<23x1xf32>
    %384 = vector.broadcast %383 : vector<23x1xf32> to vector<23x16xf32>
    %385 = arith.mulf %379, %384 : vector<23x16xf32>
    %cst_123 = arith.constant dense<0.000000e+00> : vector<23x8xf32>
    %386 = tpu.matmul %385, %371, %cst_123 {dimension_numbers = #tpu.dot_dimension_numbers<[1], [0], [0], [1], [0, 0, 1, 1], [], []>} : vector<23x16xf32>, vector<16x8xf32>, vector<23x8xf32> -> vector<23x8xf32>
    %387 = tpu.concatenate %332, %350, %368, %386 in 1 : vector<23x8xf32>, vector<23x8xf32>, vector<23x8xf32>, vector<23x8xf32> -> vector<23x32xf32>
    %388 = tpu.concatenate %313, %387 in 0 : vector<23x32xf32>, vector<23x32xf32> -> vector<46x32xf32>
    %389 = arith.addf %388, %215 : vector<46x32xf32>
    %c0_124 = arith.constant 0 : index
    %c0_125 = arith.constant 0 : index
    %390 = vector.load %arg10[%c0_124, %c0_125] : memref<1x32xf32, #tpu.memory_space<vmem>>, vector<1x32xf32>
    %c0_126 = arith.constant 0 : index
    %c0_127 = arith.constant 0 : index
    %391 = vector.load %arg11[%c0_126, %c0_127] : memref<1x32xf32, #tpu.memory_space<vmem>>, vector<1x32xf32>
    %cst_128 = arith.constant dense<0.000000e+00> : vector<46xf32>
    %392 = vector.multi_reduction <add>, %389, %cst_128 [1] : vector<46x32xf32> to vector<46xf32>
    %393 = vector.shape_cast %392 : vector<46xf32> to vector<46x1xf32>
    %cst_129 = arith.constant 3.200000e+01 : f32
    %394 = vector.broadcast %cst_129 : f32 to vector<46x1xf32>
    %395 = arith.divf %393, %394 : vector<46x1xf32>
    %396 = vector.broadcast %395 : vector<46x1xf32> to vector<46x32xf32>
    %397 = arith.subf %389, %396 : vector<46x32xf32>
    %398 = arith.mulf %397, %397 : vector<46x32xf32>
    %cst_130 = arith.constant dense<0.000000e+00> : vector<46xf32>
    %399 = vector.multi_reduction <add>, %398, %cst_130 [1] : vector<46x32xf32> to vector<46xf32>
    %400 = vector.shape_cast %399 : vector<46xf32> to vector<46x1xf32>
    %cst_131 = arith.constant 3.100000e+01 : f32
    %401 = vector.broadcast %cst_131 : f32 to vector<46x1xf32>
    %402 = arith.divf %400, %401 : vector<46x1xf32>
    %403 = math.sqrt %402 : vector<46x1xf32>
    %404 = vector.broadcast %395 : vector<46x1xf32> to vector<46x32xf32>
    %405 = arith.subf %389, %404 : vector<46x32xf32>
    %406 = vector.broadcast %390 : vector<1x32xf32> to vector<46x32xf32>
    %407 = arith.mulf %406, %405 : vector<46x32xf32>
    %cst_132 = arith.constant 9.99999993E-9 : f32
    %408 = vector.broadcast %cst_132 : f32 to vector<46x1xf32>
    %409 = arith.addf %403, %408 : vector<46x1xf32>
    %410 = vector.broadcast %409 : vector<46x1xf32> to vector<46x32xf32>
    %411 = arith.divf %407, %410 : vector<46x32xf32>
    %412 = vector.broadcast %391 : vector<1x32xf32> to vector<46x32xf32>
    %413 = arith.addf %411, %412 : vector<46x32xf32>
    %c0_133 = arith.constant 0 : index
    %c0_134 = arith.constant 0 : index
    %414 = vector.load %arg12[%c0_133, %c0_134] : memref<32x128xf32, #tpu.memory_space<vmem>>, vector<32x128xf32>
    %cst_135 = arith.constant dense<0.000000e+00> : vector<46x128xf32>
    %415 = tpu.matmul %413, %414, %cst_135 {dimension_numbers = #tpu.dot_dimension_numbers<[1], [0], [0], [1], [0, 0, 1, 1], [], []>} : vector<46x32xf32>, vector<32x128xf32>, vector<46x128xf32> -> vector<46x128xf32>
    %c0_136 = arith.constant 0 : index
    %c0_137 = arith.constant 0 : index
    %416 = vector.load %arg13[%c0_136, %c0_137] : memref<1x128xf32, #tpu.memory_space<vmem>>, vector<1x128xf32>
    %417 = vector.broadcast %416 : vector<1x128xf32> to vector<46x128xf32>
    %418 = arith.addf %415, %417 : vector<46x128xf32>
    %cst_138 = arith.constant 0.000000e+00 : f32
    %419 = vector.broadcast %cst_138 : f32 to vector<46x128xf32>
    %420 = arith.maximumf %418, %419 : vector<46x128xf32>
    %c0_139 = arith.constant 0 : index
    %c0_140 = arith.constant 0 : index
    %421 = vector.load %arg14[%c0_139, %c0_140] : memref<128x32xf32, #tpu.memory_space<vmem>>, vector<128x32xf32>
    %cst_141 = arith.constant dense<0.000000e+00> : vector<46x32xf32>
    %422 = tpu.matmul %420, %421, %cst_141 {dimension_numbers = #tpu.dot_dimension_numbers<[1], [0], [0], [1], [0, 0, 1, 1], [], []>} : vector<46x128xf32>, vector<128x32xf32>, vector<46x32xf32> -> vector<46x32xf32>
    %c0_142 = arith.constant 0 : index
    %c0_143 = arith.constant 0 : index
    %423 = vector.load %arg15[%c0_142, %c0_143] : memref<1x32xf32, #tpu.memory_space<vmem>>, vector<1x32xf32>
    %424 = vector.broadcast %423 : vector<1x32xf32> to vector<46x32xf32>
    %425 = arith.addf %422, %424 : vector<46x32xf32>
    %426 = arith.addf %425, %413 : vector<46x32xf32>
    %c0_144 = arith.constant 0 : index
    %c0_145 = arith.constant 0 : index
    %427 = vector.load %arg16[%c0_144, %c0_145] : memref<1x32xf32, #tpu.memory_space<vmem>>, vector<1x32xf32>
    %c0_146 = arith.constant 0 : index
    %c0_147 = arith.constant 0 : index
    %428 = vector.load %arg17[%c0_146, %c0_147] : memref<1x32xf32, #tpu.memory_space<vmem>>, vector<1x32xf32>
    %cst_148 = arith.constant dense<0.000000e+00> : vector<46xf32>
    %429 = vector.multi_reduction <add>, %426, %cst_148 [1] : vector<46x32xf32> to vector<46xf32>
    %430 = vector.shape_cast %429 : vector<46xf32> to vector<46x1xf32>
    %cst_149 = arith.constant 3.200000e+01 : f32
    %431 = vector.broadcast %cst_149 : f32 to vector<46x1xf32>
    %432 = arith.divf %430, %431 : vector<46x1xf32>
    %433 = vector.broadcast %432 : vector<46x1xf32> to vector<46x32xf32>
    %434 = arith.subf %426, %433 : vector<46x32xf32>
    %435 = arith.mulf %434, %434 : vector<46x32xf32>
    %cst_150 = arith.constant dense<0.000000e+00> : vector<46xf32>
    %436 = vector.multi_reduction <add>, %435, %cst_150 [1] : vector<46x32xf32> to vector<46xf32>
    %437 = vector.shape_cast %436 : vector<46xf32> to vector<46x1xf32>
    %cst_151 = arith.constant 3.100000e+01 : f32
    %438 = vector.broadcast %cst_151 : f32 to vector<46x1xf32>
    %439 = arith.divf %437, %438 : vector<46x1xf32>
    %440 = math.sqrt %439 : vector<46x1xf32>
    %441 = vector.broadcast %432 : vector<46x1xf32> to vector<46x32xf32>
    %442 = arith.subf %426, %441 : vector<46x32xf32>
    %443 = vector.broadcast %427 : vector<1x32xf32> to vector<46x32xf32>
    %444 = arith.mulf %443, %442 : vector<46x32xf32>
    %cst_152 = arith.constant 9.99999993E-9 : f32
    %445 = vector.broadcast %cst_152 : f32 to vector<46x1xf32>
    %446 = arith.addf %440, %445 : vector<46x1xf32>
    %447 = vector.broadcast %446 : vector<46x1xf32> to vector<46x32xf32>
    %448 = arith.divf %444, %447 : vector<46x32xf32>
    %449 = vector.broadcast %428 : vector<1x32xf32> to vector<46x32xf32>
    %450 = arith.addf %448, %449 : vector<46x32xf32>
    %451 = vector.extract_strided_slice %450 {offsets = [0, 0], sizes = [23, 32], strides = [1, 1]} : vector<46x32xf32> to vector<23x32xf32>
    %cst_153 = arith.constant dense<0.000000e+00> : vector<23x23xf32>
    %452 = tpu.matmul %2, %451, %cst_153 {dimension_numbers = #tpu.dot_dimension_numbers<[1], [1], [0], [0], [0, 0, 1, 0], [], []>} : vector<23x32xf32>, vector<23x32xf32>, vector<23x23xf32> -> vector<23x23xf32>
    %cst_154 = arith.constant 0.000000e+00 : f32
    %453 = vector.broadcast %cst_154 : f32 to vector<23x23xf32>
    %454 = arith.cmpf oeq, %452, %453 : vector<23x23xf32>
    %455 = vector.extract_strided_slice %450 {offsets = [23, 0], sizes = [23, 32], strides = [1, 1]} : vector<46x32xf32> to vector<23x32xf32>
    %cst_155 = arith.constant dense<0.000000e+00> : vector<23x23xf32>
    %456 = tpu.matmul %2, %455, %cst_155 {dimension_numbers = #tpu.dot_dimension_numbers<[1], [1], [0], [0], [0, 0, 1, 0], [], []>} : vector<23x32xf32>, vector<23x32xf32>, vector<23x23xf32> -> vector<23x23xf32>
    %cst_156 = arith.constant 0.000000e+00 : f32
    %457 = vector.broadcast %cst_156 : f32 to vector<23x23xf32>
    %458 = arith.cmpf oeq, %456, %457 : vector<23x23xf32>
    %c0_157 = arith.constant 0 : index
    %c0_158 = arith.constant 0 : index
    %459 = vector.load %arg18[%c0_157, %c0_158] : memref<32x96xf32, #tpu.memory_space<vmem>>, vector<32x96xf32>
    %cst_159 = arith.constant dense<0.000000e+00> : vector<46x96xf32>
    %460 = tpu.matmul %450, %459, %cst_159 {dimension_numbers = #tpu.dot_dimension_numbers<[1], [0], [0], [1], [0, 0, 1, 1], [], []>} : vector<46x32xf32>, vector<32x96xf32>, vector<46x96xf32> -> vector<46x96xf32>
    %c0_160 = arith.constant 0 : index
    %c0_161 = arith.constant 0 : index
    %461 = vector.load %arg19[%c0_160, %c0_161] : memref<1x96xf32, #tpu.memory_space<vmem>>, vector<1x96xf32>
    %462 = vector.broadcast %461 : vector<1x96xf32> to vector<46x96xf32>
    %463 = arith.addf %460, %462 : vector<46x96xf32>
    %cst_162 = arith.constant 0.000000e+00 : f32
    %464 = vector.broadcast %cst_162 : f32 to vector<46x96xf32>
    %465 = arith.maximumf %463, %464 : vector<46x96xf32>
    %466 = vector.extract_strided_slice %465 {offsets = [0, 0], sizes = [46, 32], strides = [1, 1]} : vector<46x96xf32> to vector<46x32xf32>
    %cst_163 = arith.constant 0.353553385 : f32
    %467 = vector.broadcast %cst_163 : f32 to vector<46x32xf32>
    %468 = arith.mulf %466, %467 : vector<46x32xf32>
    %469 = vector.extract_strided_slice %465 {offsets = [0, 32], sizes = [46, 32], strides = [1, 1]} : vector<46x96xf32> to vector<46x32xf32>
    %470 = vector.extract_strided_slice %465 {offsets = [0, 64], sizes = [46, 32], strides = [1, 1]} : vector<46x96xf32> to vector<46x32xf32>
    %cst_164 = arith.constant dense<0.000000e+00> : vector<46xf32>
    %471 = vector.multi_reduction <add>, %450, %cst_164 [1] : vector<46x32xf32> to vector<46xf32>
    %472 = vector.shape_cast %471 : vector<46xf32> to vector<46x1xf32>
    %cst_165 = arith.constant 0.000000e+00 : f32
    %473 = vector.broadcast %cst_165 : f32 to vector<46x1xf32>
    %474 = arith.cmpf one, %472, %473 : vector<46x1xf32>
    %475 = arith.extui %474 : vector<46x1xi1> to vector<46x1xi32>
    %476 = arith.sitofp %475 : vector<46x1xi32> to vector<46x1xf32>
    %477 = arith.ori %454, %5 : vector<23x23xi1>
    %478 = vector.extract_strided_slice %476 {offsets = [0, 0], sizes = [23, 1], strides = [1, 1]} : vector<46x1xf32> to vector<23x1xf32>
    %479 = vector.extract_strided_slice %468 {offsets = [0, 0], sizes = [23, 8], strides = [1, 1]} : vector<46x32xf32> to vector<23x8xf32>
    %480 = vector.extract_strided_slice %469 {offsets = [0, 0], sizes = [23, 8], strides = [1, 1]} : vector<46x32xf32> to vector<23x8xf32>
    %481 = vector.extract_strided_slice %470 {offsets = [0, 0], sizes = [23, 8], strides = [1, 1]} : vector<46x32xf32> to vector<23x8xf32>
    %cst_166 = arith.constant dense<0.000000e+00> : vector<23x23xf32>
    %482 = tpu.matmul %479, %480, %cst_166 {dimension_numbers = #tpu.dot_dimension_numbers<[1], [1], [0], [0], [0, 0, 1, 0], [], []>} : vector<23x8xf32>, vector<23x8xf32>, vector<23x23xf32> -> vector<23x23xf32>
    %cst_167 = arith.constant -4.2949673E+9 : f32
    %483 = vector.broadcast %cst_167 : f32 to vector<23x23xf32>
    %484 = arith.select %477, %483, %482 : vector<23x23xi1>, vector<23x23xf32>
    %cst_168 = arith.constant dense<0xFF800000> : vector<23xf32>
    %485 = vector.multi_reduction <maximumf>, %484, %cst_168 [1] : vector<23x23xf32> to vector<23xf32>
    %486 = vector.shape_cast %485 : vector<23xf32> to vector<23x1xf32>
    %487 = vector.broadcast %486 : vector<23x1xf32> to vector<23x23xf32>
    %488 = arith.subf %484, %487 : vector<23x23xf32>
    %489 = math.exp %488 : vector<23x23xf32>
    %cst_169 = arith.constant dense<0.000000e+00> : vector<23xf32>
    %490 = vector.multi_reduction <add>, %489, %cst_169 [1] : vector<23x23xf32> to vector<23xf32>
    %491 = vector.shape_cast %490 : vector<23xf32> to vector<23x1xf32>
    %492 = tpu.reciprocal %491 {approx = true} : vector<23x1xf32> -> vector<23x1xf32>
    %493 = arith.mulf %492, %478 : vector<23x1xf32>
    %494 = vector.broadcast %493 : vector<23x1xf32> to vector<23x23xf32>
    %495 = arith.mulf %489, %494 : vector<23x23xf32>
    %cst_170 = arith.constant dense<0.000000e+00> : vector<23x8xf32>
    %496 = tpu.matmul %495, %481, %cst_170 {dimension_numbers = #tpu.dot_dimension_numbers<[1], [0], [0], [1], [0, 0, 1, 1], [], []>} : vector<23x23xf32>, vector<23x8xf32>, vector<23x8xf32> -> vector<23x8xf32>
    %497 = vector.extract_strided_slice %468 {offsets = [0, 8], sizes = [23, 8], strides = [1, 1]} : vector<46x32xf32> to vector<23x8xf32>
    %498 = vector.extract_strided_slice %469 {offsets = [0, 8], sizes = [23, 8], strides = [1, 1]} : vector<46x32xf32> to vector<23x8xf32>
    %499 = vector.extract_strided_slice %470 {offsets = [0, 8], sizes = [23, 8], strides = [1, 1]} : vector<46x32xf32> to vector<23x8xf32>
    %cst_171 = arith.constant dense<0.000000e+00> : vector<23x23xf32>
    %500 = tpu.matmul %497, %498, %cst_171 {dimension_numbers = #tpu.dot_dimension_numbers<[1], [1], [0], [0], [0, 0, 1, 0], [], []>} : vector<23x8xf32>, vector<23x8xf32>, vector<23x23xf32> -> vector<23x23xf32>
    %cst_172 = arith.constant -4.2949673E+9 : f32
    %501 = vector.broadcast %cst_172 : f32 to vector<23x23xf32>
    %502 = arith.select %477, %501, %500 : vector<23x23xi1>, vector<23x23xf32>
    %cst_173 = arith.constant dense<0xFF800000> : vector<23xf32>
    %503 = vector.multi_reduction <maximumf>, %502, %cst_173 [1] : vector<23x23xf32> to vector<23xf32>
    %504 = vector.shape_cast %503 : vector<23xf32> to vector<23x1xf32>
    %505 = vector.broadcast %504 : vector<23x1xf32> to vector<23x23xf32>
    %506 = arith.subf %502, %505 : vector<23x23xf32>
    %507 = math.exp %506 : vector<23x23xf32>
    %cst_174 = arith.constant dense<0.000000e+00> : vector<23xf32>
    %508 = vector.multi_reduction <add>, %507, %cst_174 [1] : vector<23x23xf32> to vector<23xf32>
    %509 = vector.shape_cast %508 : vector<23xf32> to vector<23x1xf32>
    %510 = tpu.reciprocal %509 {approx = true} : vector<23x1xf32> -> vector<23x1xf32>
    %511 = arith.mulf %510, %478 : vector<23x1xf32>
    %512 = vector.broadcast %511 : vector<23x1xf32> to vector<23x23xf32>
    %513 = arith.mulf %507, %512 : vector<23x23xf32>
    %cst_175 = arith.constant dense<0.000000e+00> : vector<23x8xf32>
    %514 = tpu.matmul %513, %499, %cst_175 {dimension_numbers = #tpu.dot_dimension_numbers<[1], [0], [0], [1], [0, 0, 1, 1], [], []>} : vector<23x23xf32>, vector<23x8xf32>, vector<23x8xf32> -> vector<23x8xf32>
    %515 = vector.extract_strided_slice %468 {offsets = [0, 16], sizes = [23, 8], strides = [1, 1]} : vector<46x32xf32> to vector<23x8xf32>
    %516 = vector.extract_strided_slice %469 {offsets = [0, 16], sizes = [23, 8], strides = [1, 1]} : vector<46x32xf32> to vector<23x8xf32>
    %517 = vector.extract_strided_slice %470 {offsets = [0, 16], sizes = [23, 8], strides = [1, 1]} : vector<46x32xf32> to vector<23x8xf32>
    %cst_176 = arith.constant dense<0.000000e+00> : vector<23x23xf32>
    %518 = tpu.matmul %515, %516, %cst_176 {dimension_numbers = #tpu.dot_dimension_numbers<[1], [1], [0], [0], [0, 0, 1, 0], [], []>} : vector<23x8xf32>, vector<23x8xf32>, vector<23x23xf32> -> vector<23x23xf32>
    %cst_177 = arith.constant -4.2949673E+9 : f32
    %519 = vector.broadcast %cst_177 : f32 to vector<23x23xf32>
    %520 = arith.select %477, %519, %518 : vector<23x23xi1>, vector<23x23xf32>
    %cst_178 = arith.constant dense<0xFF800000> : vector<23xf32>
    %521 = vector.multi_reduction <maximumf>, %520, %cst_178 [1] : vector<23x23xf32> to vector<23xf32>
    %522 = vector.shape_cast %521 : vector<23xf32> to vector<23x1xf32>
    %523 = vector.broadcast %522 : vector<23x1xf32> to vector<23x23xf32>
    %524 = arith.subf %520, %523 : vector<23x23xf32>
    %525 = math.exp %524 : vector<23x23xf32>
    %cst_179 = arith.constant dense<0.000000e+00> : vector<23xf32>
    %526 = vector.multi_reduction <add>, %525, %cst_179 [1] : vector<23x23xf32> to vector<23xf32>
    %527 = vector.shape_cast %526 : vector<23xf32> to vector<23x1xf32>
    %528 = tpu.reciprocal %527 {approx = true} : vector<23x1xf32> -> vector<23x1xf32>
    %529 = arith.mulf %528, %478 : vector<23x1xf32>
    %530 = vector.broadcast %529 : vector<23x1xf32> to vector<23x23xf32>
    %531 = arith.mulf %525, %530 : vector<23x23xf32>
    %cst_180 = arith.constant dense<0.000000e+00> : vector<23x8xf32>
    %532 = tpu.matmul %531, %517, %cst_180 {dimension_numbers = #tpu.dot_dimension_numbers<[1], [0], [0], [1], [0, 0, 1, 1], [], []>} : vector<23x23xf32>, vector<23x8xf32>, vector<23x8xf32> -> vector<23x8xf32>
    %533 = vector.extract_strided_slice %468 {offsets = [0, 24], sizes = [23, 8], strides = [1, 1]} : vector<46x32xf32> to vector<23x8xf32>
    %534 = vector.extract_strided_slice %469 {offsets = [0, 24], sizes = [23, 8], strides = [1, 1]} : vector<46x32xf32> to vector<23x8xf32>
    %535 = vector.extract_strided_slice %470 {offsets = [0, 24], sizes = [23, 8], strides = [1, 1]} : vector<46x32xf32> to vector<23x8xf32>
    %cst_181 = arith.constant dense<0.000000e+00> : vector<23x23xf32>
    %536 = tpu.matmul %533, %534, %cst_181 {dimension_numbers = #tpu.dot_dimension_numbers<[1], [1], [0], [0], [0, 0, 1, 0], [], []>} : vector<23x8xf32>, vector<23x8xf32>, vector<23x23xf32> -> vector<23x23xf32>
    %cst_182 = arith.constant -4.2949673E+9 : f32
    %537 = vector.broadcast %cst_182 : f32 to vector<23x23xf32>
    %538 = arith.select %477, %537, %536 : vector<23x23xi1>, vector<23x23xf32>
    %cst_183 = arith.constant dense<0xFF800000> : vector<23xf32>
    %539 = vector.multi_reduction <maximumf>, %538, %cst_183 [1] : vector<23x23xf32> to vector<23xf32>
    %540 = vector.shape_cast %539 : vector<23xf32> to vector<23x1xf32>
    %541 = vector.broadcast %540 : vector<23x1xf32> to vector<23x23xf32>
    %542 = arith.subf %538, %541 : vector<23x23xf32>
    %543 = math.exp %542 : vector<23x23xf32>
    %cst_184 = arith.constant dense<0.000000e+00> : vector<23xf32>
    %544 = vector.multi_reduction <add>, %543, %cst_184 [1] : vector<23x23xf32> to vector<23xf32>
    %545 = vector.shape_cast %544 : vector<23xf32> to vector<23x1xf32>
    %546 = tpu.reciprocal %545 {approx = true} : vector<23x1xf32> -> vector<23x1xf32>
    %547 = arith.mulf %546, %478 : vector<23x1xf32>
    %548 = vector.broadcast %547 : vector<23x1xf32> to vector<23x23xf32>
    %549 = arith.mulf %543, %548 : vector<23x23xf32>
    %cst_185 = arith.constant dense<0.000000e+00> : vector<23x8xf32>
    %550 = tpu.matmul %549, %535, %cst_185 {dimension_numbers = #tpu.dot_dimension_numbers<[1], [0], [0], [1], [0, 0, 1, 1], [], []>} : vector<23x23xf32>, vector<23x8xf32>, vector<23x8xf32> -> vector<23x8xf32>
    %551 = tpu.concatenate %496, %514, %532, %550 in 1 : vector<23x8xf32>, vector<23x8xf32>, vector<23x8xf32>, vector<23x8xf32> -> vector<23x32xf32>
    %552 = arith.ori %458, %5 : vector<23x23xi1>
    %553 = vector.extract_strided_slice %476 {offsets = [23, 0], sizes = [23, 1], strides = [1, 1]} : vector<46x1xf32> to vector<23x1xf32>
    %554 = vector.extract_strided_slice %468 {offsets = [23, 0], sizes = [23, 8], strides = [1, 1]} : vector<46x32xf32> to vector<23x8xf32>
    %555 = vector.extract_strided_slice %469 {offsets = [23, 0], sizes = [23, 8], strides = [1, 1]} : vector<46x32xf32> to vector<23x8xf32>
    %556 = vector.extract_strided_slice %470 {offsets = [23, 0], sizes = [23, 8], strides = [1, 1]} : vector<46x32xf32> to vector<23x8xf32>
    %cst_186 = arith.constant dense<0.000000e+00> : vector<23x23xf32>
    %557 = tpu.matmul %554, %555, %cst_186 {dimension_numbers = #tpu.dot_dimension_numbers<[1], [1], [0], [0], [0, 0, 1, 0], [], []>} : vector<23x8xf32>, vector<23x8xf32>, vector<23x23xf32> -> vector<23x23xf32>
    %cst_187 = arith.constant -4.2949673E+9 : f32
    %558 = vector.broadcast %cst_187 : f32 to vector<23x23xf32>
    %559 = arith.select %552, %558, %557 : vector<23x23xi1>, vector<23x23xf32>
    %cst_188 = arith.constant dense<0xFF800000> : vector<23xf32>
    %560 = vector.multi_reduction <maximumf>, %559, %cst_188 [1] : vector<23x23xf32> to vector<23xf32>
    %561 = vector.shape_cast %560 : vector<23xf32> to vector<23x1xf32>
    %562 = vector.broadcast %561 : vector<23x1xf32> to vector<23x23xf32>
    %563 = arith.subf %559, %562 : vector<23x23xf32>
    %564 = math.exp %563 : vector<23x23xf32>
    %cst_189 = arith.constant dense<0.000000e+00> : vector<23xf32>
    %565 = vector.multi_reduction <add>, %564, %cst_189 [1] : vector<23x23xf32> to vector<23xf32>
    %566 = vector.shape_cast %565 : vector<23xf32> to vector<23x1xf32>
    %567 = tpu.reciprocal %566 {approx = true} : vector<23x1xf32> -> vector<23x1xf32>
    %568 = arith.mulf %567, %553 : vector<23x1xf32>
    %569 = vector.broadcast %568 : vector<23x1xf32> to vector<23x23xf32>
    %570 = arith.mulf %564, %569 : vector<23x23xf32>
    %cst_190 = arith.constant dense<0.000000e+00> : vector<23x8xf32>
    %571 = tpu.matmul %570, %556, %cst_190 {dimension_numbers = #tpu.dot_dimension_numbers<[1], [0], [0], [1], [0, 0, 1, 1], [], []>} : vector<23x23xf32>, vector<23x8xf32>, vector<23x8xf32> -> vector<23x8xf32>
    %572 = vector.extract_strided_slice %468 {offsets = [23, 8], sizes = [23, 8], strides = [1, 1]} : vector<46x32xf32> to vector<23x8xf32>
    %573 = vector.extract_strided_slice %469 {offsets = [23, 8], sizes = [23, 8], strides = [1, 1]} : vector<46x32xf32> to vector<23x8xf32>
    %574 = vector.extract_strided_slice %470 {offsets = [23, 8], sizes = [23, 8], strides = [1, 1]} : vector<46x32xf32> to vector<23x8xf32>
    %cst_191 = arith.constant dense<0.000000e+00> : vector<23x23xf32>
    %575 = tpu.matmul %572, %573, %cst_191 {dimension_numbers = #tpu.dot_dimension_numbers<[1], [1], [0], [0], [0, 0, 1, 0], [], []>} : vector<23x8xf32>, vector<23x8xf32>, vector<23x23xf32> -> vector<23x23xf32>
    %cst_192 = arith.constant -4.2949673E+9 : f32
    %576 = vector.broadcast %cst_192 : f32 to vector<23x23xf32>
    %577 = arith.select %552, %576, %575 : vector<23x23xi1>, vector<23x23xf32>
    %cst_193 = arith.constant dense<0xFF800000> : vector<23xf32>
    %578 = vector.multi_reduction <maximumf>, %577, %cst_193 [1] : vector<23x23xf32> to vector<23xf32>
    %579 = vector.shape_cast %578 : vector<23xf32> to vector<23x1xf32>
    %580 = vector.broadcast %579 : vector<23x1xf32> to vector<23x23xf32>
    %581 = arith.subf %577, %580 : vector<23x23xf32>
    %582 = math.exp %581 : vector<23x23xf32>
    %cst_194 = arith.constant dense<0.000000e+00> : vector<23xf32>
    %583 = vector.multi_reduction <add>, %582, %cst_194 [1] : vector<23x23xf32> to vector<23xf32>
    %584 = vector.shape_cast %583 : vector<23xf32> to vector<23x1xf32>
    %585 = tpu.reciprocal %584 {approx = true} : vector<23x1xf32> -> vector<23x1xf32>
    %586 = arith.mulf %585, %553 : vector<23x1xf32>
    %587 = vector.broadcast %586 : vector<23x1xf32> to vector<23x23xf32>
    %588 = arith.mulf %582, %587 : vector<23x23xf32>
    %cst_195 = arith.constant dense<0.000000e+00> : vector<23x8xf32>
    %589 = tpu.matmul %588, %574, %cst_195 {dimension_numbers = #tpu.dot_dimension_numbers<[1], [0], [0], [1], [0, 0, 1, 1], [], []>} : vector<23x23xf32>, vector<23x8xf32>, vector<23x8xf32> -> vector<23x8xf32>
    %590 = vector.extract_strided_slice %468 {offsets = [23, 16], sizes = [23, 8], strides = [1, 1]} : vector<46x32xf32> to vector<23x8xf32>
    %591 = vector.extract_strided_slice %469 {offsets = [23, 16], sizes = [23, 8], strides = [1, 1]} : vector<46x32xf32> to vector<23x8xf32>
    %592 = vector.extract_strided_slice %470 {offsets = [23, 16], sizes = [23, 8], strides = [1, 1]} : vector<46x32xf32> to vector<23x8xf32>
    %cst_196 = arith.constant dense<0.000000e+00> : vector<23x23xf32>
    %593 = tpu.matmul %590, %591, %cst_196 {dimension_numbers = #tpu.dot_dimension_numbers<[1], [1], [0], [0], [0, 0, 1, 0], [], []>} : vector<23x8xf32>, vector<23x8xf32>, vector<23x23xf32> -> vector<23x23xf32>
    %cst_197 = arith.constant -4.2949673E+9 : f32
    %594 = vector.broadcast %cst_197 : f32 to vector<23x23xf32>
    %595 = arith.select %552, %594, %593 : vector<23x23xi1>, vector<23x23xf32>
    %cst_198 = arith.constant dense<0xFF800000> : vector<23xf32>
    %596 = vector.multi_reduction <maximumf>, %595, %cst_198 [1] : vector<23x23xf32> to vector<23xf32>
    %597 = vector.shape_cast %596 : vector<23xf32> to vector<23x1xf32>
    %598 = vector.broadcast %597 : vector<23x1xf32> to vector<23x23xf32>
    %599 = arith.subf %595, %598 : vector<23x23xf32>
    %600 = math.exp %599 : vector<23x23xf32>
    %cst_199 = arith.constant dense<0.000000e+00> : vector<23xf32>
    %601 = vector.multi_reduction <add>, %600, %cst_199 [1] : vector<23x23xf32> to vector<23xf32>
    %602 = vector.shape_cast %601 : vector<23xf32> to vector<23x1xf32>
    %603 = tpu.reciprocal %602 {approx = true} : vector<23x1xf32> -> vector<23x1xf32>
    %604 = arith.mulf %603, %553 : vector<23x1xf32>
    %605 = vector.broadcast %604 : vector<23x1xf32> to vector<23x23xf32>
    %606 = arith.mulf %600, %605 : vector<23x23xf32>
    %cst_200 = arith.constant dense<0.000000e+00> : vector<23x8xf32>
    %607 = tpu.matmul %606, %592, %cst_200 {dimension_numbers = #tpu.dot_dimension_numbers<[1], [0], [0], [1], [0, 0, 1, 1], [], []>} : vector<23x23xf32>, vector<23x8xf32>, vector<23x8xf32> -> vector<23x8xf32>
    %608 = vector.extract_strided_slice %468 {offsets = [23, 24], sizes = [23, 8], strides = [1, 1]} : vector<46x32xf32> to vector<23x8xf32>
    %609 = vector.extract_strided_slice %469 {offsets = [23, 24], sizes = [23, 8], strides = [1, 1]} : vector<46x32xf32> to vector<23x8xf32>
    %610 = vector.extract_strided_slice %470 {offsets = [23, 24], sizes = [23, 8], strides = [1, 1]} : vector<46x32xf32> to vector<23x8xf32>
    %cst_201 = arith.constant dense<0.000000e+00> : vector<23x23xf32>
    %611 = tpu.matmul %608, %609, %cst_201 {dimension_numbers = #tpu.dot_dimension_numbers<[1], [1], [0], [0], [0, 0, 1, 0], [], []>} : vector<23x8xf32>, vector<23x8xf32>, vector<23x23xf32> -> vector<23x23xf32>
    %cst_202 = arith.constant -4.2949673E+9 : f32
    %612 = vector.broadcast %cst_202 : f32 to vector<23x23xf32>
    %613 = arith.select %552, %612, %611 : vector<23x23xi1>, vector<23x23xf32>
    %cst_203 = arith.constant dense<0xFF800000> : vector<23xf32>
    %614 = vector.multi_reduction <maximumf>, %613, %cst_203 [1] : vector<23x23xf32> to vector<23xf32>
    %615 = vector.shape_cast %614 : vector<23xf32> to vector<23x1xf32>
    %616 = vector.broadcast %615 : vector<23x1xf32> to vector<23x23xf32>
    %617 = arith.subf %613, %616 : vector<23x23xf32>
    %618 = math.exp %617 : vector<23x23xf32>
    %cst_204 = arith.constant dense<0.000000e+00> : vector<23xf32>
    %619 = vector.multi_reduction <add>, %618, %cst_204 [1] : vector<23x23xf32> to vector<23xf32>
    %620 = vector.shape_cast %619 : vector<23xf32> to vector<23x1xf32>
    %621 = tpu.reciprocal %620 {approx = true} : vector<23x1xf32> -> vector<23x1xf32>
    %622 = arith.mulf %621, %553 : vector<23x1xf32>
    %623 = vector.broadcast %622 : vector<23x1xf32> to vector<23x23xf32>
    %624 = arith.mulf %618, %623 : vector<23x23xf32>
    %cst_205 = arith.constant dense<0.000000e+00> : vector<23x8xf32>
    %625 = tpu.matmul %624, %610, %cst_205 {dimension_numbers = #tpu.dot_dimension_numbers<[1], [0], [0], [1], [0, 0, 1, 1], [], []>} : vector<23x23xf32>, vector<23x8xf32>, vector<23x8xf32> -> vector<23x8xf32>
    %626 = tpu.concatenate %571, %589, %607, %625 in 1 : vector<23x8xf32>, vector<23x8xf32>, vector<23x8xf32>, vector<23x8xf32> -> vector<23x32xf32>
    %627 = tpu.concatenate %551, %626 in 0 : vector<23x32xf32>, vector<23x32xf32> -> vector<46x32xf32>
    %628 = arith.addf %627, %450 : vector<46x32xf32>
    %c0_206 = arith.constant 0 : index
    %c0_207 = arith.constant 0 : index
    %629 = vector.load %arg20[%c0_206, %c0_207] : memref<1x32xf32, #tpu.memory_space<vmem>>, vector<1x32xf32>
    %c0_208 = arith.constant 0 : index
    %c0_209 = arith.constant 0 : index
    %630 = vector.load %arg21[%c0_208, %c0_209] : memref<1x32xf32, #tpu.memory_space<vmem>>, vector<1x32xf32>
    %cst_210 = arith.constant dense<0.000000e+00> : vector<46xf32>
    %631 = vector.multi_reduction <add>, %628, %cst_210 [1] : vector<46x32xf32> to vector<46xf32>
    %632 = vector.shape_cast %631 : vector<46xf32> to vector<46x1xf32>
    %cst_211 = arith.constant 3.200000e+01 : f32
    %633 = vector.broadcast %cst_211 : f32 to vector<46x1xf32>
    %634 = arith.divf %632, %633 : vector<46x1xf32>
    %635 = vector.broadcast %634 : vector<46x1xf32> to vector<46x32xf32>
    %636 = arith.subf %628, %635 : vector<46x32xf32>
    %637 = arith.mulf %636, %636 : vector<46x32xf32>
    %cst_212 = arith.constant dense<0.000000e+00> : vector<46xf32>
    %638 = vector.multi_reduction <add>, %637, %cst_212 [1] : vector<46x32xf32> to vector<46xf32>
    %639 = vector.shape_cast %638 : vector<46xf32> to vector<46x1xf32>
    %cst_213 = arith.constant 3.100000e+01 : f32
    %640 = vector.broadcast %cst_213 : f32 to vector<46x1xf32>
    %641 = arith.divf %639, %640 : vector<46x1xf32>
    %642 = math.sqrt %641 : vector<46x1xf32>
    %643 = vector.broadcast %634 : vector<46x1xf32> to vector<46x32xf32>
    %644 = arith.subf %628, %643 : vector<46x32xf32>
    %645 = vector.broadcast %629 : vector<1x32xf32> to vector<46x32xf32>
    %646 = arith.mulf %645, %644 : vector<46x32xf32>
    %cst_214 = arith.constant 9.99999993E-9 : f32
    %647 = vector.broadcast %cst_214 : f32 to vector<46x1xf32>
    %648 = arith.addf %642, %647 : vector<46x1xf32>
    %649 = vector.broadcast %648 : vector<46x1xf32> to vector<46x32xf32>
    %650 = arith.divf %646, %649 : vector<46x32xf32>
    %651 = vector.broadcast %630 : vector<1x32xf32> to vector<46x32xf32>
    %652 = arith.addf %650, %651 : vector<46x32xf32>
    %c0_215 = arith.constant 0 : index
    %c0_216 = arith.constant 0 : index
    %653 = vector.load %arg22[%c0_215, %c0_216] : memref<32x32xf32, #tpu.memory_space<vmem>>, vector<32x32xf32>
    %cst_217 = arith.constant dense<0.000000e+00> : vector<46x32xf32>
    %654 = tpu.matmul %652, %653, %cst_217 {dimension_numbers = #tpu.dot_dimension_numbers<[1], [0], [0], [1], [0, 0, 1, 1], [], []>} : vector<46x32xf32>, vector<32x32xf32>, vector<46x32xf32> -> vector<46x32xf32>
    %c0_218 = arith.constant 0 : index
    %c0_219 = arith.constant 0 : index
    %655 = vector.load %arg23[%c0_218, %c0_219] : memref<1x32xf32, #tpu.memory_space<vmem>>, vector<1x32xf32>
    %656 = vector.broadcast %655 : vector<1x32xf32> to vector<46x32xf32>
    %657 = arith.addf %654, %656 : vector<46x32xf32>
    %cst_220 = arith.constant 0.000000e+00 : f32
    %658 = vector.broadcast %cst_220 : f32 to vector<46x32xf32>
    %659 = arith.maximumf %657, %658 : vector<46x32xf32>
    %cst_221 = arith.constant 0.353553385 : f32
    %660 = vector.broadcast %cst_221 : f32 to vector<46x32xf32>
    %661 = arith.mulf %659, %660 : vector<46x32xf32>
    %c0_222 = arith.constant 0 : index
    %c0_223 = arith.constant 0 : index
    %662 = vector.load %arg24[%c0_222, %c0_223] : memref<32x64xf32, #tpu.memory_space<vmem>>, vector<32x64xf32>
    %cst_224 = arith.constant dense<0.000000e+00> : vector<32x64xf32>
    %663 = tpu.matmul %1, %662, %cst_224 {dimension_numbers = #tpu.dot_dimension_numbers<[1], [0], [0], [1], [0, 0, 1, 1], [], []>} : vector<32x32xf32>, vector<32x64xf32>, vector<32x64xf32> -> vector<32x64xf32>
    %c0_225 = arith.constant 0 : index
    %c0_226 = arith.constant 0 : index
    %664 = vector.load %arg25[%c0_225, %c0_226] : memref<1x64xf32, #tpu.memory_space<vmem>>, vector<1x64xf32>
    %665 = vector.broadcast %664 : vector<1x64xf32> to vector<32x64xf32>
    %666 = arith.addf %663, %665 : vector<32x64xf32>
    %cst_227 = arith.constant 0.000000e+00 : f32
    %667 = vector.broadcast %cst_227 : f32 to vector<32x64xf32>
    %668 = arith.maximumf %666, %667 : vector<32x64xf32>
    %669 = vector.extract_strided_slice %668 {offsets = [0, 0], sizes = [32, 32], strides = [1, 1]} : vector<32x64xf32> to vector<32x32xf32>
    %670 = vector.extract_strided_slice %668 {offsets = [0, 32], sizes = [32, 32], strides = [1, 1]} : vector<32x64xf32> to vector<32x32xf32>
    %cst_228 = arith.constant dense<0.000000e+00> : vector<46xf32>
    %671 = vector.multi_reduction <add>, %652, %cst_228 [1] : vector<46x32xf32> to vector<46xf32>
    %672 = vector.shape_cast %671 : vector<46xf32> to vector<46x1xf32>
    %cst_229 = arith.constant 0.000000e+00 : f32
    %673 = vector.broadcast %cst_229 : f32 to vector<46x1xf32>
    %674 = arith.cmpf one, %672, %673 : vector<46x1xf32>
    %675 = arith.extui %674 : vector<46x1xi1> to vector<46x1xi32>
    %676 = arith.sitofp %675 : vector<46x1xi32> to vector<46x1xf32>
    %677 = vector.extract_strided_slice %676 {offsets = [0, 0], sizes = [23, 1], strides = [1, 1]} : vector<46x1xf32> to vector<23x1xf32>
    %678 = vector.extract_strided_slice %661 {offsets = [0, 0], sizes = [23, 8], strides = [1, 1]} : vector<46x32xf32> to vector<23x8xf32>
    %679 = vector.extract_strided_slice %669 {offsets = [0, 0], sizes = [16, 8], strides = [1, 1]} : vector<32x32xf32> to vector<16x8xf32>
    %680 = vector.extract_strided_slice %670 {offsets = [0, 0], sizes = [16, 8], strides = [1, 1]} : vector<32x32xf32> to vector<16x8xf32>
    %cst_230 = arith.constant dense<0.000000e+00> : vector<23x16xf32>
    %681 = tpu.matmul %678, %679, %cst_230 {dimension_numbers = #tpu.dot_dimension_numbers<[1], [1], [0], [0], [0, 0, 1, 0], [], []>} : vector<23x8xf32>, vector<16x8xf32>, vector<23x16xf32> -> vector<23x16xf32>
    %cst_231 = arith.constant -4.2949673E+9 : f32
    %682 = vector.broadcast %cst_231 : f32 to vector<23x16xf32>
    %683 = arith.select %9, %682, %681 : vector<23x16xi1>, vector<23x16xf32>
    %cst_232 = arith.constant dense<0xFF800000> : vector<23xf32>
    %684 = vector.multi_reduction <maximumf>, %683, %cst_232 [1] : vector<23x16xf32> to vector<23xf32>
    %685 = vector.shape_cast %684 : vector<23xf32> to vector<23x1xf32>
    %686 = vector.broadcast %685 : vector<23x1xf32> to vector<23x16xf32>
    %687 = arith.subf %683, %686 : vector<23x16xf32>
    %688 = math.exp %687 : vector<23x16xf32>
    %cst_233 = arith.constant dense<0.000000e+00> : vector<23xf32>
    %689 = vector.multi_reduction <add>, %688, %cst_233 [1] : vector<23x16xf32> to vector<23xf32>
    %690 = vector.shape_cast %689 : vector<23xf32> to vector<23x1xf32>
    %691 = tpu.reciprocal %690 {approx = true} : vector<23x1xf32> -> vector<23x1xf32>
    %692 = arith.mulf %691, %677 : vector<23x1xf32>
    %693 = vector.broadcast %692 : vector<23x1xf32> to vector<23x16xf32>
    %694 = arith.mulf %688, %693 : vector<23x16xf32>
    %cst_234 = arith.constant dense<0.000000e+00> : vector<23x8xf32>
    %695 = tpu.matmul %694, %680, %cst_234 {dimension_numbers = #tpu.dot_dimension_numbers<[1], [0], [0], [1], [0, 0, 1, 1], [], []>} : vector<23x16xf32>, vector<16x8xf32>, vector<23x8xf32> -> vector<23x8xf32>
    %696 = vector.extract_strided_slice %661 {offsets = [0, 8], sizes = [23, 8], strides = [1, 1]} : vector<46x32xf32> to vector<23x8xf32>
    %697 = vector.extract_strided_slice %669 {offsets = [0, 8], sizes = [16, 8], strides = [1, 1]} : vector<32x32xf32> to vector<16x8xf32>
    %698 = vector.extract_strided_slice %670 {offsets = [0, 8], sizes = [16, 8], strides = [1, 1]} : vector<32x32xf32> to vector<16x8xf32>
    %cst_235 = arith.constant dense<0.000000e+00> : vector<23x16xf32>
    %699 = tpu.matmul %696, %697, %cst_235 {dimension_numbers = #tpu.dot_dimension_numbers<[1], [1], [0], [0], [0, 0, 1, 0], [], []>} : vector<23x8xf32>, vector<16x8xf32>, vector<23x16xf32> -> vector<23x16xf32>
    %cst_236 = arith.constant -4.2949673E+9 : f32
    %700 = vector.broadcast %cst_236 : f32 to vector<23x16xf32>
    %701 = arith.select %9, %700, %699 : vector<23x16xi1>, vector<23x16xf32>
    %cst_237 = arith.constant dense<0xFF800000> : vector<23xf32>
    %702 = vector.multi_reduction <maximumf>, %701, %cst_237 [1] : vector<23x16xf32> to vector<23xf32>
    %703 = vector.shape_cast %702 : vector<23xf32> to vector<23x1xf32>
    %704 = vector.broadcast %703 : vector<23x1xf32> to vector<23x16xf32>
    %705 = arith.subf %701, %704 : vector<23x16xf32>
    %706 = math.exp %705 : vector<23x16xf32>
    %cst_238 = arith.constant dense<0.000000e+00> : vector<23xf32>
    %707 = vector.multi_reduction <add>, %706, %cst_238 [1] : vector<23x16xf32> to vector<23xf32>
    %708 = vector.shape_cast %707 : vector<23xf32> to vector<23x1xf32>
    %709 = tpu.reciprocal %708 {approx = true} : vector<23x1xf32> -> vector<23x1xf32>
    %710 = arith.mulf %709, %677 : vector<23x1xf32>
    %711 = vector.broadcast %710 : vector<23x1xf32> to vector<23x16xf32>
    %712 = arith.mulf %706, %711 : vector<23x16xf32>
    %cst_239 = arith.constant dense<0.000000e+00> : vector<23x8xf32>
    %713 = tpu.matmul %712, %698, %cst_239 {dimension_numbers = #tpu.dot_dimension_numbers<[1], [0], [0], [1], [0, 0, 1, 1], [], []>} : vector<23x16xf32>, vector<16x8xf32>, vector<23x8xf32> -> vector<23x8xf32>
    %714 = vector.extract_strided_slice %661 {offsets = [0, 16], sizes = [23, 8], strides = [1, 1]} : vector<46x32xf32> to vector<23x8xf32>
    %715 = vector.extract_strided_slice %669 {offsets = [0, 16], sizes = [16, 8], strides = [1, 1]} : vector<32x32xf32> to vector<16x8xf32>
    %716 = vector.extract_strided_slice %670 {offsets = [0, 16], sizes = [16, 8], strides = [1, 1]} : vector<32x32xf32> to vector<16x8xf32>
    %cst_240 = arith.constant dense<0.000000e+00> : vector<23x16xf32>
    %717 = tpu.matmul %714, %715, %cst_240 {dimension_numbers = #tpu.dot_dimension_numbers<[1], [1], [0], [0], [0, 0, 1, 0], [], []>} : vector<23x8xf32>, vector<16x8xf32>, vector<23x16xf32> -> vector<23x16xf32>
    %cst_241 = arith.constant -4.2949673E+9 : f32
    %718 = vector.broadcast %cst_241 : f32 to vector<23x16xf32>
    %719 = arith.select %9, %718, %717 : vector<23x16xi1>, vector<23x16xf32>
    %cst_242 = arith.constant dense<0xFF800000> : vector<23xf32>
    %720 = vector.multi_reduction <maximumf>, %719, %cst_242 [1] : vector<23x16xf32> to vector<23xf32>
    %721 = vector.shape_cast %720 : vector<23xf32> to vector<23x1xf32>
    %722 = vector.broadcast %721 : vector<23x1xf32> to vector<23x16xf32>
    %723 = arith.subf %719, %722 : vector<23x16xf32>
    %724 = math.exp %723 : vector<23x16xf32>
    %cst_243 = arith.constant dense<0.000000e+00> : vector<23xf32>
    %725 = vector.multi_reduction <add>, %724, %cst_243 [1] : vector<23x16xf32> to vector<23xf32>
    %726 = vector.shape_cast %725 : vector<23xf32> to vector<23x1xf32>
    %727 = tpu.reciprocal %726 {approx = true} : vector<23x1xf32> -> vector<23x1xf32>
    %728 = arith.mulf %727, %677 : vector<23x1xf32>
    %729 = vector.broadcast %728 : vector<23x1xf32> to vector<23x16xf32>
    %730 = arith.mulf %724, %729 : vector<23x16xf32>
    %cst_244 = arith.constant dense<0.000000e+00> : vector<23x8xf32>
    %731 = tpu.matmul %730, %716, %cst_244 {dimension_numbers = #tpu.dot_dimension_numbers<[1], [0], [0], [1], [0, 0, 1, 1], [], []>} : vector<23x16xf32>, vector<16x8xf32>, vector<23x8xf32> -> vector<23x8xf32>
    %732 = vector.extract_strided_slice %661 {offsets = [0, 24], sizes = [23, 8], strides = [1, 1]} : vector<46x32xf32> to vector<23x8xf32>
    %733 = vector.extract_strided_slice %669 {offsets = [0, 24], sizes = [16, 8], strides = [1, 1]} : vector<32x32xf32> to vector<16x8xf32>
    %734 = vector.extract_strided_slice %670 {offsets = [0, 24], sizes = [16, 8], strides = [1, 1]} : vector<32x32xf32> to vector<16x8xf32>
    %cst_245 = arith.constant dense<0.000000e+00> : vector<23x16xf32>
    %735 = tpu.matmul %732, %733, %cst_245 {dimension_numbers = #tpu.dot_dimension_numbers<[1], [1], [0], [0], [0, 0, 1, 0], [], []>} : vector<23x8xf32>, vector<16x8xf32>, vector<23x16xf32> -> vector<23x16xf32>
    %cst_246 = arith.constant -4.2949673E+9 : f32
    %736 = vector.broadcast %cst_246 : f32 to vector<23x16xf32>
    %737 = arith.select %9, %736, %735 : vector<23x16xi1>, vector<23x16xf32>
    %cst_247 = arith.constant dense<0xFF800000> : vector<23xf32>
    %738 = vector.multi_reduction <maximumf>, %737, %cst_247 [1] : vector<23x16xf32> to vector<23xf32>
    %739 = vector.shape_cast %738 : vector<23xf32> to vector<23x1xf32>
    %740 = vector.broadcast %739 : vector<23x1xf32> to vector<23x16xf32>
    %741 = arith.subf %737, %740 : vector<23x16xf32>
    %742 = math.exp %741 : vector<23x16xf32>
    %cst_248 = arith.constant dense<0.000000e+00> : vector<23xf32>
    %743 = vector.multi_reduction <add>, %742, %cst_248 [1] : vector<23x16xf32> to vector<23xf32>
    %744 = vector.shape_cast %743 : vector<23xf32> to vector<23x1xf32>
    %745 = tpu.reciprocal %744 {approx = true} : vector<23x1xf32> -> vector<23x1xf32>
    %746 = arith.mulf %745, %677 : vector<23x1xf32>
    %747 = vector.broadcast %746 : vector<23x1xf32> to vector<23x16xf32>
    %748 = arith.mulf %742, %747 : vector<23x16xf32>
    %cst_249 = arith.constant dense<0.000000e+00> : vector<23x8xf32>
    %749 = tpu.matmul %748, %734, %cst_249 {dimension_numbers = #tpu.dot_dimension_numbers<[1], [0], [0], [1], [0, 0, 1, 1], [], []>} : vector<23x16xf32>, vector<16x8xf32>, vector<23x8xf32> -> vector<23x8xf32>
    %750 = tpu.concatenate %695, %713, %731, %749 in 1 : vector<23x8xf32>, vector<23x8xf32>, vector<23x8xf32>, vector<23x8xf32> -> vector<23x32xf32>
    %751 = vector.extract_strided_slice %676 {offsets = [23, 0], sizes = [23, 1], strides = [1, 1]} : vector<46x1xf32> to vector<23x1xf32>
    %752 = vector.extract_strided_slice %661 {offsets = [23, 0], sizes = [23, 8], strides = [1, 1]} : vector<46x32xf32> to vector<23x8xf32>
    %753 = vector.extract_strided_slice %669 {offsets = [16, 0], sizes = [16, 8], strides = [1, 1]} : vector<32x32xf32> to vector<16x8xf32>
    %754 = vector.extract_strided_slice %670 {offsets = [16, 0], sizes = [16, 8], strides = [1, 1]} : vector<32x32xf32> to vector<16x8xf32>
    %cst_250 = arith.constant dense<0.000000e+00> : vector<23x16xf32>
    %755 = tpu.matmul %752, %753, %cst_250 {dimension_numbers = #tpu.dot_dimension_numbers<[1], [1], [0], [0], [0, 0, 1, 0], [], []>} : vector<23x8xf32>, vector<16x8xf32>, vector<23x16xf32> -> vector<23x16xf32>
    %cst_251 = arith.constant -4.2949673E+9 : f32
    %756 = vector.broadcast %cst_251 : f32 to vector<23x16xf32>
    %757 = arith.select %13, %756, %755 : vector<23x16xi1>, vector<23x16xf32>
    %cst_252 = arith.constant dense<0xFF800000> : vector<23xf32>
    %758 = vector.multi_reduction <maximumf>, %757, %cst_252 [1] : vector<23x16xf32> to vector<23xf32>
    %759 = vector.shape_cast %758 : vector<23xf32> to vector<23x1xf32>
    %760 = vector.broadcast %759 : vector<23x1xf32> to vector<23x16xf32>
    %761 = arith.subf %757, %760 : vector<23x16xf32>
    %762 = math.exp %761 : vector<23x16xf32>
    %cst_253 = arith.constant dense<0.000000e+00> : vector<23xf32>
    %763 = vector.multi_reduction <add>, %762, %cst_253 [1] : vector<23x16xf32> to vector<23xf32>
    %764 = vector.shape_cast %763 : vector<23xf32> to vector<23x1xf32>
    %765 = tpu.reciprocal %764 {approx = true} : vector<23x1xf32> -> vector<23x1xf32>
    %766 = arith.mulf %765, %751 : vector<23x1xf32>
    %767 = vector.broadcast %766 : vector<23x1xf32> to vector<23x16xf32>
    %768 = arith.mulf %762, %767 : vector<23x16xf32>
    %cst_254 = arith.constant dense<0.000000e+00> : vector<23x8xf32>
    %769 = tpu.matmul %768, %754, %cst_254 {dimension_numbers = #tpu.dot_dimension_numbers<[1], [0], [0], [1], [0, 0, 1, 1], [], []>} : vector<23x16xf32>, vector<16x8xf32>, vector<23x8xf32> -> vector<23x8xf32>
    %770 = vector.extract_strided_slice %661 {offsets = [23, 8], sizes = [23, 8], strides = [1, 1]} : vector<46x32xf32> to vector<23x8xf32>
    %771 = vector.extract_strided_slice %669 {offsets = [16, 8], sizes = [16, 8], strides = [1, 1]} : vector<32x32xf32> to vector<16x8xf32>
    %772 = vector.extract_strided_slice %670 {offsets = [16, 8], sizes = [16, 8], strides = [1, 1]} : vector<32x32xf32> to vector<16x8xf32>
    %cst_255 = arith.constant dense<0.000000e+00> : vector<23x16xf32>
    %773 = tpu.matmul %770, %771, %cst_255 {dimension_numbers = #tpu.dot_dimension_numbers<[1], [1], [0], [0], [0, 0, 1, 0], [], []>} : vector<23x8xf32>, vector<16x8xf32>, vector<23x16xf32> -> vector<23x16xf32>
    %cst_256 = arith.constant -4.2949673E+9 : f32
    %774 = vector.broadcast %cst_256 : f32 to vector<23x16xf32>
    %775 = arith.select %13, %774, %773 : vector<23x16xi1>, vector<23x16xf32>
    %cst_257 = arith.constant dense<0xFF800000> : vector<23xf32>
    %776 = vector.multi_reduction <maximumf>, %775, %cst_257 [1] : vector<23x16xf32> to vector<23xf32>
    %777 = vector.shape_cast %776 : vector<23xf32> to vector<23x1xf32>
    %778 = vector.broadcast %777 : vector<23x1xf32> to vector<23x16xf32>
    %779 = arith.subf %775, %778 : vector<23x16xf32>
    %780 = math.exp %779 : vector<23x16xf32>
    %cst_258 = arith.constant dense<0.000000e+00> : vector<23xf32>
    %781 = vector.multi_reduction <add>, %780, %cst_258 [1] : vector<23x16xf32> to vector<23xf32>
    %782 = vector.shape_cast %781 : vector<23xf32> to vector<23x1xf32>
    %783 = tpu.reciprocal %782 {approx = true} : vector<23x1xf32> -> vector<23x1xf32>
    %784 = arith.mulf %783, %751 : vector<23x1xf32>
    %785 = vector.broadcast %784 : vector<23x1xf32> to vector<23x16xf32>
    %786 = arith.mulf %780, %785 : vector<23x16xf32>
    %cst_259 = arith.constant dense<0.000000e+00> : vector<23x8xf32>
    %787 = tpu.matmul %786, %772, %cst_259 {dimension_numbers = #tpu.dot_dimension_numbers<[1], [0], [0], [1], [0, 0, 1, 1], [], []>} : vector<23x16xf32>, vector<16x8xf32>, vector<23x8xf32> -> vector<23x8xf32>
    %788 = vector.extract_strided_slice %661 {offsets = [23, 16], sizes = [23, 8], strides = [1, 1]} : vector<46x32xf32> to vector<23x8xf32>
    %789 = vector.extract_strided_slice %669 {offsets = [16, 16], sizes = [16, 8], strides = [1, 1]} : vector<32x32xf32> to vector<16x8xf32>
    %790 = vector.extract_strided_slice %670 {offsets = [16, 16], sizes = [16, 8], strides = [1, 1]} : vector<32x32xf32> to vector<16x8xf32>
    %cst_260 = arith.constant dense<0.000000e+00> : vector<23x16xf32>
    %791 = tpu.matmul %788, %789, %cst_260 {dimension_numbers = #tpu.dot_dimension_numbers<[1], [1], [0], [0], [0, 0, 1, 0], [], []>} : vector<23x8xf32>, vector<16x8xf32>, vector<23x16xf32> -> vector<23x16xf32>
    %cst_261 = arith.constant -4.2949673E+9 : f32
    %792 = vector.broadcast %cst_261 : f32 to vector<23x16xf32>
    %793 = arith.select %13, %792, %791 : vector<23x16xi1>, vector<23x16xf32>
    %cst_262 = arith.constant dense<0xFF800000> : vector<23xf32>
    %794 = vector.multi_reduction <maximumf>, %793, %cst_262 [1] : vector<23x16xf32> to vector<23xf32>
    %795 = vector.shape_cast %794 : vector<23xf32> to vector<23x1xf32>
    %796 = vector.broadcast %795 : vector<23x1xf32> to vector<23x16xf32>
    %797 = arith.subf %793, %796 : vector<23x16xf32>
    %798 = math.exp %797 : vector<23x16xf32>
    %cst_263 = arith.constant dense<0.000000e+00> : vector<23xf32>
    %799 = vector.multi_reduction <add>, %798, %cst_263 [1] : vector<23x16xf32> to vector<23xf32>
    %800 = vector.shape_cast %799 : vector<23xf32> to vector<23x1xf32>
    %801 = tpu.reciprocal %800 {approx = true} : vector<23x1xf32> -> vector<23x1xf32>
    %802 = arith.mulf %801, %751 : vector<23x1xf32>
    %803 = vector.broadcast %802 : vector<23x1xf32> to vector<23x16xf32>
    %804 = arith.mulf %798, %803 : vector<23x16xf32>
    %cst_264 = arith.constant dense<0.000000e+00> : vector<23x8xf32>
    %805 = tpu.matmul %804, %790, %cst_264 {dimension_numbers = #tpu.dot_dimension_numbers<[1], [0], [0], [1], [0, 0, 1, 1], [], []>} : vector<23x16xf32>, vector<16x8xf32>, vector<23x8xf32> -> vector<23x8xf32>
    %806 = vector.extract_strided_slice %661 {offsets = [23, 24], sizes = [23, 8], strides = [1, 1]} : vector<46x32xf32> to vector<23x8xf32>
    %807 = vector.extract_strided_slice %669 {offsets = [16, 24], sizes = [16, 8], strides = [1, 1]} : vector<32x32xf32> to vector<16x8xf32>
    %808 = vector.extract_strided_slice %670 {offsets = [16, 24], sizes = [16, 8], strides = [1, 1]} : vector<32x32xf32> to vector<16x8xf32>
    %cst_265 = arith.constant dense<0.000000e+00> : vector<23x16xf32>
    %809 = tpu.matmul %806, %807, %cst_265 {dimension_numbers = #tpu.dot_dimension_numbers<[1], [1], [0], [0], [0, 0, 1, 0], [], []>} : vector<23x8xf32>, vector<16x8xf32>, vector<23x16xf32> -> vector<23x16xf32>
    %cst_266 = arith.constant -4.2949673E+9 : f32
    %810 = vector.broadcast %cst_266 : f32 to vector<23x16xf32>
    %811 = arith.select %13, %810, %809 : vector<23x16xi1>, vector<23x16xf32>
    %cst_267 = arith.constant dense<0xFF800000> : vector<23xf32>
    %812 = vector.multi_reduction <maximumf>, %811, %cst_267 [1] : vector<23x16xf32> to vector<23xf32>
    %813 = vector.shape_cast %812 : vector<23xf32> to vector<23x1xf32>
    %814 = vector.broadcast %813 : vector<23x1xf32> to vector<23x16xf32>
    %815 = arith.subf %811, %814 : vector<23x16xf32>
    %816 = math.exp %815 : vector<23x16xf32>
    %cst_268 = arith.constant dense<0.000000e+00> : vector<23xf32>
    %817 = vector.multi_reduction <add>, %816, %cst_268 [1] : vector<23x16xf32> to vector<23xf32>
    %818 = vector.shape_cast %817 : vector<23xf32> to vector<23x1xf32>
    %819 = tpu.reciprocal %818 {approx = true} : vector<23x1xf32> -> vector<23x1xf32>
    %820 = arith.mulf %819, %751 : vector<23x1xf32>
    %821 = vector.broadcast %820 : vector<23x1xf32> to vector<23x16xf32>
    %822 = arith.mulf %816, %821 : vector<23x16xf32>
    %cst_269 = arith.constant dense<0.000000e+00> : vector<23x8xf32>
    %823 = tpu.matmul %822, %808, %cst_269 {dimension_numbers = #tpu.dot_dimension_numbers<[1], [0], [0], [1], [0, 0, 1, 1], [], []>} : vector<23x16xf32>, vector<16x8xf32>, vector<23x8xf32> -> vector<23x8xf32>
    %824 = tpu.concatenate %769, %787, %805, %823 in 1 : vector<23x8xf32>, vector<23x8xf32>, vector<23x8xf32>, vector<23x8xf32> -> vector<23x32xf32>
    %825 = tpu.concatenate %750, %824 in 0 : vector<23x32xf32>, vector<23x32xf32> -> vector<46x32xf32>
    %826 = arith.addf %825, %652 : vector<46x32xf32>
    %c0_270 = arith.constant 0 : index
    %c0_271 = arith.constant 0 : index
    %827 = vector.load %arg26[%c0_270, %c0_271] : memref<1x32xf32, #tpu.memory_space<vmem>>, vector<1x32xf32>
    %c0_272 = arith.constant 0 : index
    %c0_273 = arith.constant 0 : index
    %828 = vector.load %arg27[%c0_272, %c0_273] : memref<1x32xf32, #tpu.memory_space<vmem>>, vector<1x32xf32>
    %cst_274 = arith.constant dense<0.000000e+00> : vector<46xf32>
    %829 = vector.multi_reduction <add>, %826, %cst_274 [1] : vector<46x32xf32> to vector<46xf32>
    %830 = vector.shape_cast %829 : vector<46xf32> to vector<46x1xf32>
    %cst_275 = arith.constant 3.200000e+01 : f32
    %831 = vector.broadcast %cst_275 : f32 to vector<46x1xf32>
    %832 = arith.divf %830, %831 : vector<46x1xf32>
    %833 = vector.broadcast %832 : vector<46x1xf32> to vector<46x32xf32>
    %834 = arith.subf %826, %833 : vector<46x32xf32>
    %835 = arith.mulf %834, %834 : vector<46x32xf32>
    %cst_276 = arith.constant dense<0.000000e+00> : vector<46xf32>
    %836 = vector.multi_reduction <add>, %835, %cst_276 [1] : vector<46x32xf32> to vector<46xf32>
    %837 = vector.shape_cast %836 : vector<46xf32> to vector<46x1xf32>
    %cst_277 = arith.constant 3.100000e+01 : f32
    %838 = vector.broadcast %cst_277 : f32 to vector<46x1xf32>
    %839 = arith.divf %837, %838 : vector<46x1xf32>
    %840 = math.sqrt %839 : vector<46x1xf32>
    %841 = vector.broadcast %832 : vector<46x1xf32> to vector<46x32xf32>
    %842 = arith.subf %826, %841 : vector<46x32xf32>
    %843 = vector.broadcast %827 : vector<1x32xf32> to vector<46x32xf32>
    %844 = arith.mulf %843, %842 : vector<46x32xf32>
    %cst_278 = arith.constant 9.99999993E-9 : f32
    %845 = vector.broadcast %cst_278 : f32 to vector<46x1xf32>
    %846 = arith.addf %840, %845 : vector<46x1xf32>
    %847 = vector.broadcast %846 : vector<46x1xf32> to vector<46x32xf32>
    %848 = arith.divf %844, %847 : vector<46x32xf32>
    %849 = vector.broadcast %828 : vector<1x32xf32> to vector<46x32xf32>
    %850 = arith.addf %848, %849 : vector<46x32xf32>
    %c0_279 = arith.constant 0 : index
    %c0_280 = arith.constant 0 : index
    %851 = vector.load %arg28[%c0_279, %c0_280] : memref<32x128xf32, #tpu.memory_space<vmem>>, vector<32x128xf32>
    %cst_281 = arith.constant dense<0.000000e+00> : vector<46x128xf32>
    %852 = tpu.matmul %850, %851, %cst_281 {dimension_numbers = #tpu.dot_dimension_numbers<[1], [0], [0], [1], [0, 0, 1, 1], [], []>} : vector<46x32xf32>, vector<32x128xf32>, vector<46x128xf32> -> vector<46x128xf32>
    %c0_282 = arith.constant 0 : index
    %c0_283 = arith.constant 0 : index
    %853 = vector.load %arg29[%c0_282, %c0_283] : memref<1x128xf32, #tpu.memory_space<vmem>>, vector<1x128xf32>
    %854 = vector.broadcast %853 : vector<1x128xf32> to vector<46x128xf32>
    %855 = arith.addf %852, %854 : vector<46x128xf32>
    %cst_284 = arith.constant 0.000000e+00 : f32
    %856 = vector.broadcast %cst_284 : f32 to vector<46x128xf32>
    %857 = arith.maximumf %855, %856 : vector<46x128xf32>
    %c0_285 = arith.constant 0 : index
    %c0_286 = arith.constant 0 : index
    %858 = vector.load %arg30[%c0_285, %c0_286] : memref<128x32xf32, #tpu.memory_space<vmem>>, vector<128x32xf32>
    %cst_287 = arith.constant dense<0.000000e+00> : vector<46x32xf32>
    %859 = tpu.matmul %857, %858, %cst_287 {dimension_numbers = #tpu.dot_dimension_numbers<[1], [0], [0], [1], [0, 0, 1, 1], [], []>} : vector<46x128xf32>, vector<128x32xf32>, vector<46x32xf32> -> vector<46x32xf32>
    %c0_288 = arith.constant 0 : index
    %c0_289 = arith.constant 0 : index
    %860 = vector.load %arg31[%c0_288, %c0_289] : memref<1x32xf32, #tpu.memory_space<vmem>>, vector<1x32xf32>
    %861 = vector.broadcast %860 : vector<1x32xf32> to vector<46x32xf32>
    %862 = arith.addf %859, %861 : vector<46x32xf32>
    %863 = arith.addf %862, %850 : vector<46x32xf32>
    %c0_290 = arith.constant 0 : index
    %c0_291 = arith.constant 0 : index
    %864 = vector.load %arg32[%c0_290, %c0_291] : memref<1x32xf32, #tpu.memory_space<vmem>>, vector<1x32xf32>
    %c0_292 = arith.constant 0 : index
    %c0_293 = arith.constant 0 : index
    %865 = vector.load %arg33[%c0_292, %c0_293] : memref<1x32xf32, #tpu.memory_space<vmem>>, vector<1x32xf32>
    %cst_294 = arith.constant dense<0.000000e+00> : vector<46xf32>
    %866 = vector.multi_reduction <add>, %863, %cst_294 [1] : vector<46x32xf32> to vector<46xf32>
    %867 = vector.shape_cast %866 : vector<46xf32> to vector<46x1xf32>
    %cst_295 = arith.constant 3.200000e+01 : f32
    %868 = vector.broadcast %cst_295 : f32 to vector<46x1xf32>
    %869 = arith.divf %867, %868 : vector<46x1xf32>
    %870 = vector.broadcast %869 : vector<46x1xf32> to vector<46x32xf32>
    %871 = arith.subf %863, %870 : vector<46x32xf32>
    %872 = arith.mulf %871, %871 : vector<46x32xf32>
    %cst_296 = arith.constant dense<0.000000e+00> : vector<46xf32>
    %873 = vector.multi_reduction <add>, %872, %cst_296 [1] : vector<46x32xf32> to vector<46xf32>
    %874 = vector.shape_cast %873 : vector<46xf32> to vector<46x1xf32>
    %cst_297 = arith.constant 3.100000e+01 : f32
    %875 = vector.broadcast %cst_297 : f32 to vector<46x1xf32>
    %876 = arith.divf %874, %875 : vector<46x1xf32>
    %877 = math.sqrt %876 : vector<46x1xf32>
    %878 = vector.broadcast %869 : vector<46x1xf32> to vector<46x32xf32>
    %879 = arith.subf %863, %878 : vector<46x32xf32>
    %880 = vector.broadcast %864 : vector<1x32xf32> to vector<46x32xf32>
    %881 = arith.mulf %880, %879 : vector<46x32xf32>
    %cst_298 = arith.constant 9.99999993E-9 : f32
    %882 = vector.broadcast %cst_298 : f32 to vector<46x1xf32>
    %883 = arith.addf %877, %882 : vector<46x1xf32>
    %884 = vector.broadcast %883 : vector<46x1xf32> to vector<46x32xf32>
    %885 = arith.divf %881, %884 : vector<46x32xf32>
    %886 = vector.broadcast %865 : vector<1x32xf32> to vector<46x32xf32>
    %887 = arith.addf %885, %886 : vector<46x32xf32>
    %c0_299 = arith.constant 0 : index
    %c0_300 = arith.constant 0 : index
    %888 = vector.load %arg34[%c0_299, %c0_300] : memref<46x32xf32, #tpu.memory_space<vmem>>, vector<46x32xf32>
    tpu.vector_store %arg34[%c0_299, %c0_300], %887 {strides = array<i32>} : memref<46x32xf32, #tpu.memory_space<vmem>>, vector<46x32xf32>,
    return
  }
}

</mosaic_0001>

<bundles_post_ra>
// kernel: transformer_decoder.1
= control target key start
LH: loop header
LB: loop body
LE: loop exit
PB: predicated region body
PF: predicated region fallthrough
CT: control target
= control target key end

     0   :  { %v18767_v0 = vmov 0.0|0.0   ;;  %s14793_s3 = smov 1   ;;  %vm14794_vm0 = vmmov 0   ;;  %v14795_v1 = vmov 0.0   ;;  %vm161_vm1 = vcmask 261120   ;;  %s14797_s10 = smov 2   ;;  %s18763_s0 = inlined_call_operand.smem [shape: u32[35], index: -1, kind: input, shape index: {}] }
   0x1   :  { %13522 = vmatprep.subr.bf16.mxu0 %v18767_v0  ;;  %s14851_s6 = sld [smem:[%s18763_s0 + %s14793_s3]]   ;;  %12332 = vmatprep.mubr.msk.f32.mxu0 %vm14794_vm0, %v14795_v1  ;;  %vm14867_vm2 = vmpackc.low %vm161_vm1, %vm161_vm1  ;;  %v18765_v12 = vmov 1.0   ;;  %vm438_vm3 = vcmask 1040384   ;;  %s14798_s14 = smov 3   ;;  %vm708_vm4 = vcmask 64512   ;;  %vm674_vm6 = vcmask 259072  }
   0x2   :  { %13526 = vmatprep.subr.bf16.mxu1 %v18767_v0  ;;  %12345 = vmatprep.mubr.msk.f32.mxu1 %vm14794_vm0, %v14795_v1  ;;  %s14861_s9 = sld [smem:[%s18763_s0]]   ;;  %s14799_s18 = smov 88   ;;  %vm15104_vm5 = vmpackc.low %vm708_vm4, %vm708_vm4  ;;  %vm18772_vm9 = vcmask 187392  }
   0x3   :  { %s11377_s13 = sld [smem:[%s18763_s0 + %s14797_s10]]   ;;  %s14800_s19 = smov 96  }
   0x4   :  { %s11378_s17 = sld [smem:[%s18763_s0 + %s14798_s14]]   ;;  %s14801_s20 = smov 80  }
   0x5   :  { %s14802_s21 = smov 120   ;;  %s14803_s22 = smov 72  }
   0x6   :  { %s14804_s23 = smov 112   ;;  %s14805_s24 = smov 104  }
   0x7   :  { %v148_v2 = vld [vmem:[%s14851_s6] sm:$0xff]  ;;  %v149_v3 = vld [vmem:[%s14851_s6 + $0x8] sm:$0xff]  ;;  %v150_v39 = vld [vmem:[%s14851_s6 + $0x10] sm:$0xff]  ;;  %s14806_s25 = smov 64   ;;  %s14807_s26 = smov 56  }
   0x8   :  { %v13523_v5 = vpack.c.bf16 %v149_v3, %v148_v2  ;;  %v14875_v6 = vld [vmem:[%s14861_s9] sm:$0xff]  ;;  %v14878_v7 = vld [vmem:[%s14861_s9 + $0x8] sm:$0xff]  ;;  %v14883_v9 = vld [vmem:[%s14861_s9 + $0x10] sm:$0xff]  ;;  %s14809_s27 = smov 48   ;;  %s14810_s28 = smov 40  }
   0x9   :  { %v13531_v8 = vpack.c.bf16 %v14878_v7, %v14875_v6  ;;  %v14886_v10 = vld [vmem:[%s14861_s9 + $0x18] sm:$0xff]  ;;  %v14889_v11 = vld [vmem:[%s14861_s9 + $0x20] sm:$0xff]  ;;  %v439_v13 = vrot.slane %v14883_v9, 7  ;;  %v14918_v19 = vld [vmem:[%s14861_s9 + $0x28] sm:$0x3f]  ;;  %s14811_s29 = smov 8  }
   0xa   :  { %13525 = vmatpush3.bf16.xpose.msk.msra.mxu0 %vm14867_vm2, %v13523_v5  ;;  %v440_v14 = vrot.slane %v14886_v10, 7  ;;  %v442_v15 = vrot.slane %v14889_v11, 7  ;;  %v444_v20 = vrot.slane %v14918_v19, 7  ;;  %v535_v21 = vld [vmem:[%s11377_s13] sm:$0xff]  ;;  %v536_v22 = vld [vmem:[%s11377_s13 + $0x8] sm:$0xff]  ;;  %v537_v25 = vld [vmem:[%s11377_s13 + $0x10] sm:$0xff]  ;;  %s11383_s4 = sld [smem:[%s18763_s0 + %s14811_s29]]  }
   0xb   :  { %13530 = vmatprep.subr.bf16.mxu0 %v18767_v0  ;;  %v13538_v24 = vpack.c.bf16 %v536_v22, %v535_v21  ;;  %v538_v26 = vld [vmem:[%s11377_s13 + $0x18] sm:$0xff]  ;;  %v11432_v49 = vld [vmem:[%s11378_s17] ss:$0 sm:$0xff]  ;;  %s14812_s30 = smov 16   ;;  %s14813_s1 = smov 24  }
   0xc   :  { %v441_v16 = vsel %vm438_vm3, %v439_v13, %v440_v14  ;;  %v443_v17 = vsel %vm438_vm3, %v440_v14, %v442_v15  ;;  %v445_v23 = vsel %vm438_vm3, %v442_v15, %v444_v20  ;;  %v13542_v27 = vpack.c.bf16 %v538_v26, %v537_v25  ;;  %v151_v40 = vld [vmem:[%s14851_s6 + $0x18] sm:$0xff]  ;;  %s14814_s5 = smov 6   ;;  %s14815_s10 = smov 4  }
   0xd   :  { %v13535_v18 = vpack.c.bf16 %v443_v17, %v441_v16  ;;  %v13527_v42 = vpack.c.bf16 %v151_v40, %v150_v39  ;;  %s11379_s13 = sld [smem:[%s18763_s0 + %s14815_s10]]   ;;  %s14816_s14 = smov 5  }
   0xe   :  { %s11380_s17 = sld [smem:[%s18763_s0 + %s14816_s14]]   ;;  %s14817_s2 = smov 9  }
   0xf   :  { %13529 = vmatpush3.bf16.xpose.msk.msra.mxu1 %vm14867_vm2, %v13527_v42  ;;  %v665_v42 = vsel %vm161_vm1, %v14883_v9, 0.0  ;;  %s14818_s7 = smov 7   ;;  %s14819_s11 = smov 12  }
  0x10   :  { %13546 = vmatprep.subr.bf16.mxu1 %v18767_v0  ;;  %s11382_s10 = sld [smem:[%s18763_s0 + %s14818_s7]]   ;;  %s14820_s15 = smov 14  }
  0x11   :  { %12333 = vmatmul.mubr.msk.f32.vlgmr.msra.gmra.mrb[0].mxu0 %vm161_vm1, %v18765_v12  ;;  %s11387_s14 = sld [smem:[%s18763_s0 + %s14819_s11]]   ;;  %s14821_s3 = smov 10  }
  0x12   :  { %13533 = vmatpush3.bf16.xpose.msk.msra.mxu0 %vm14867_vm2, %v13531_v8  ;;  %12335 = vmatprep.mubr.msk.f32.mxu0 %vm14794_vm0, %v14795_v1  ;;  %s11385_s7 = sld [smem:[%s18763_s0 + %s14821_s3]]   ;;  %s14822_s8 = smov 11  }
  0x13   :  { %12358 = vmatprep.subr.mxu0 %v14795_v1  ;;  %s11386_s11 = sld [smem:[%s18763_s0 + %s14822_s8]]   ;;  %s14823_s12 = smov 13  }
  0x14   :  { %s14824_s16 = smov 15   ;;  %s14825_s8 = smov 17  }
  0x15   :  { %12336 = vmatmul.mubr.msk.f32.gmra.mrb[2].mxu0 %vm161_vm1, %v18765_v12  ;;  %s11390_s3 = sld [smem:[%s18763_s0 + %s14824_s16]]   ;;  %s14827_s16 = smov 19  }
  0x16   :  { %12338 = vmatprep.mubr.msk.f32.mxu0 %vm14794_vm0, %v14795_v1  ;;  %12346 = vmatmul.mubr.msk.f32.vlgmr.msra.gmra.mrb[0].mxu1 %vm161_vm1, %v18765_v12 }
  0x17   :  { %12348 = vmatprep.mubr.msk.f32.mxu1 %vm14794_vm0, %v14795_v1 }
  0x19   :  { %12339 = vmatmul.mubr.msk.f32.gmra.mrb[4].mxu0 %vm161_vm1, %v18765_v12 }
  0x1a   :  { %12359 = vmatpush3.xpose.msk.msra.mxu0 %vm161_vm1, %v14883_v9  ;;  %12360 = vmatprep.mubr.msk.f32.mxu0 %vm14794_vm0, %v14795_v1 }
  0x1b   :  { %13534 = vmatprep.subr.bf16.mxu0 %v18767_v0  ;;  %12349 = vmatmul.mubr.msk.f32.gmra.mrb[2].mxu1 %vm161_vm1, %v18765_v12 }
  0x1c   :  { %12351 = vmatprep.mubr.msk.f32.mxu1 %vm14794_vm0, %v14795_v1 }
  0x1d   :  { %12361 = vmatmul.mubr.msk.f32.vlgmr.msra.gmra.mrb[6].mxu0 %vm161_vm1, %v18765_v12 }
  0x1e   :  { %13537 = vmatpush3.bf16.xpose.msk.msra.mxu0 %vm14867_vm2, %v13535_v18  ;;  %12363 = vmatprep.mubr.msk.f32.mxu0 %vm14794_vm0, %v14795_v1 }
  0x1f   :  { %12373 = vmatprep.subr.mxu0 %v14795_v1  ;;  %12352 = vmatmul.mubr.msk.f32.gmra.mrb[4].mxu1 %vm161_vm1, %v18765_v12 }
  0x20   :  { %12407 = vmatprep.mubr.msk.f32.mxu1 %vm14794_vm0, %v14795_v1 }
  0x21   :  { %12364 = vmatmul.mubr.msk.f32.gmra.mrb[8].mxu0 %vm161_vm1, %v18765_v12 }
  0x22   :  { %12366 = vmatprep.mubr.msk.f32.mxu0 %vm14794_vm0, %v14795_v1 }
  0x25   :  { %12367 = vmatmul.mubr.msk.f32.gmra.mrb[10].mxu0 %vm161_vm1, %v18765_v12 }
  0x26   :  { %12374 = vmatpush3.xpose.msk.msra.mxu0 %vm161_vm1, %v445_v23  ;;  %12375 = vmatprep.mubr.msk.f32.mxu0 %vm14794_vm0, %v14795_v1 }
  0x27   :  { %13539 = vmatprep.subr.bf16.mxu0 %v13538_v24 }
  0x29   :  { %12376 = vmatmul.mubr.msk.f32.vlgmr.msra.gmra.mrb[12].mxu0 %vm161_vm1, %v18765_v12 }
  0x2a   :  { %12378 = vmatprep.mubr.msk.f32.mxu0 %vm14794_vm0, %v14795_v1  ;;  %13541 = vmatpush3.bf16.msra.mxu0 %v13538_v24 }
  0x2b   :  { %13543 = vmatprep.subr.bf16.mxu0 %v13542_v27 }
  0x2d   :  { %12379 = vmatmul.mubr.msk.f32.gmra.mrb[14].mxu0 %vm161_vm1, %v18765_v12 }
  0x2e   :  { %12381 = vmatprep.mubr.msk.f32.mxu0 %vm14794_vm0, %v14795_v1  ;;  %13545 = vmatpush3.bf16.msra.mxu0 %v13542_v27 }
  0x2f   :  { %13550 = vmatprep.subr.bf16.mxu0 %v18767_v0 }
  0x31   :  { %12382 = vmatmul.mubr.msk.f32.gmra.mrb[16].mxu0 %vm161_vm1, %v18765_v12 }
  0x32   :  { %12392 = vmatprep.mubr.msk.f32.mxu0 %vm161_vm1, %v14875_v6 }
  0x35   :  { %12393 = vmatmul.mubr.msk.f32.vlgmr.msra.gmra.mrb[18].mxu0 %vm161_vm1, %v14878_v7 }
  0x36   :  { %12395 = vmatprep.mubr.msk.f32.mxu0 %vm161_vm1, %v14883_v9 }
  0x39   :  { %12396 = vmatmul.mubr.msk.f32.gmra.mrb[20].mxu0 %vm161_vm1, %v14886_v10 }
  0x3a   :  { %12398 = vmatprep.mubr.msk.f32.mxu0 %vm161_vm1, %v14889_v11 }
  0x3d   :  { %12399 = vmatmul.mubr.msk.f32.gmra.mrb[22].mxu0 %vm161_vm1, %v14918_v19 }
  0x3e   :  { %12422 = vmatprep.mubr.msk.f32.mxu0 %vm14794_vm0, %v14795_v1 }
  0xe4   :  { %v14963_v28 = vpop.f32.mrb[0].mxu0 }
  0xe5   :  { %v12334_v29 = vpop.f32.mrb[1].mxu0 }
  0xe8   :  { %v14965_v30 = vpop.f32.mrb[2].mxu0 }
  0xe9   :  { %v12337_v31 = vpop.f32.mrb[3].mxu0 }
  0xec   :  { %v14967_v32 = vpop.f32.mrb[4].mxu0 }
  0xed   :  { %18791 = vst [vmem:[#allocation2_spill] sm:$0xff] %v14967_v32  ;;  %v12340_v33 = vpop.f32.mrb[5].mxu0 }
  0xf0   :  { %v14969_v34 = vpop.f32.mrb[6].mxu0 }
  0xf1   :  { %v12362_v35 = vpop.f32.mrb[7].mxu0  ;;  %vm432_vm8 = vcmp.eq.f32.partialorder %v14969_v34, 0.0 }
  0xf4   :  { %v14971_v36 = vpop.f32.mrb[8].mxu0 }
  0xf5   :  { %v12365_v37 = vpop.f32.mrb[9].mxu0  ;;  %vm433_vm12 = vcmp.eq.f32.partialorder %v14971_v36, 0.0 }
  0xf8   :  { %v14973_v38 = vpop.f32.mrb[10].mxu0 }
  0xf9   :  { %v12368_v41 = vpop.f32.mrb[11].mxu0  ;;  %vm434_vm15 = vcmp.eq.f32.partialorder %v14973_v38, 0.0 }
  0xfc   :  { %v14979_v43 = vpop.f32.mrb[12].mxu0 }
  0xfd   :  { %v12377_v44 = vpop.f32.mrb[13].mxu0 }
  0xfe   :  { %v659_v44 = vsel %vm161_vm1, %v14875_v6, 0.0 }
 0x100   :  { %v14985_v45 = vpop.f32.mrb[14].mxu0 }
 0x101   :  { %v12380_v46 = vpop.f32.mrb[15].mxu0 }
 0x104   :  { %v14991_v47 = vpop.f32.mrb[16].mxu0 }
 0x105   :  { %v12383_v48 = vpop.f32.mrb[17].mxu0 }
 0x108   :  { %v12394_v50 = vpop.f32.mrb[18].mxu0 }
 0x109   :  { %v624_v51 = vadd.f32 %v12394_v50, %v11432_v49  ;;  %v618_v52 = vpop.f32.mrb[19].mxu0 }
 0x10a   :  { %v619_v53 = vadd.f32 %v11432_v49, %v618_v52 }
 0x10b   :  { %v648_v54 = vmax.f32 %v624_v51, 0.0 }
 0x10c   :  { %v647_v55 = vmax.f32 %v619_v53, 0.0  ;;  %v12397_v56 = vpop.f32.mrb[20].mxu0 }
 0x10d   :  { %v634_v57 = vadd.f32 %v12397_v56, %v11432_v49  ;;  %v628_v58 = vpop.f32.mrb[21].mxu0  ;;  %v15017_v26 = vmul.f32 0.35355338, %v648_v54 }
 0x10e   :  { %v629_v59 = vadd.f32 %v11432_v49, %v628_v58  ;;  %v15001_v60 = vpack.i.bf16 %v648_v54, %v647_v55  ;;  %v15014_v20 = vmul.f32 0.35355338, %v647_v55  ;;  %v668_v55 = vsel %vm161_vm1, %v14886_v10, 0.0 }
 0x10f   :  { %v650_v61 = vmax.f32 %v634_v57, 0.0  ;;  %v675_v10 = vsel %vm674_vm6, %v14918_v19, 0.0 }
 0x110   :  { %v15003_v62 = vmax.f32 %v629_v59, 0.0  ;;  %13954 = vrot.lane.b32.xlu1 %v15001_v60, %s14799_s18  ;;  %13949 = vrot.lane.b32.xlu0 %v15001_v60, %s14800_s19  ;;  %v12400_v63 = vpop.f32.mrb[22].mxu0  ;;  %v671_v59 = vsel %vm161_vm1, %v14889_v11, 0.0 }
 0x111   :  { %v644_v2 = vadd.f32 %v12400_v63, %v11432_v49  ;;  %v638_v3 = vpop.f32.mrb[23].mxu0  ;;  %v656_v5 = vmul.f32 0.35355338, %v650_v61  ;;  %v1735_v8 = vrot.slane %v650_v61, 7 }
 0x112   :  { %v639_v13 = vadd.f32 %v11432_v49, %v638_v3  ;;  %v1734_v14 = vrot.slane %v15003_v62, 7  ;;  %v15028_v33 = vmul.f32 0.35355338, %v15003_v62  ;;  %v662_v3 = vsel %vm161_vm1, %v14878_v7, 0.0 }
 0x113   :  { %v652_v15 = vmax.f32 %v644_v2, 0.0  ;;  %v1725_v21 = vrot.slane %v656_v5, 7 }
 0x114   :  { %955 = vrot.lane.b32.xlu1 %v15003_v62, %s14799_s18  ;;  %706 = vrot.lane.b32.xlu0 %v15003_v62, %s14800_s19  ;;  %v651_v16 = vmax.f32 %v639_v13, 0.0  ;;  %v1736_v24 = vsel %vm438_vm3, %v1734_v14, %v1735_v8  ;;  %v1724_v40 = vrot.slane %v15028_v33, 7 }
 0x115   :  { %v658_v17 = vmul.f32 0.35355338, %v652_v15  ;;  %v1739_v18 = vrot.slane %v652_v15, 7 }
 0x116   :  { %v657_v22 = vmul.f32 0.35355338, %v651_v16  ;;  %v1737_v23 = vrot.slane %v651_v16, 7  ;;  %v15072_v41 = vsel %vm438_vm3, %v1724_v40, %v1725_v21 }
 0x117   :  { %v1729_v25 = vrot.slane %v658_v17, 7 }
 0x118   :  { %v1727_v27 = vrot.slane %v657_v22, 7  ;;  %v1738_v29 = vsel %vm438_vm3, %v1735_v8, %v1737_v23  ;;  %v15021_v31 = vsel %vm438_vm3, %v1737_v23, %v1739_v18  ;;  %13959 = vrot.lane.b32.xlu0 %v15001_v60, %s14801_s20  ;;  %945 = vrot.lane.b32.xlu1 %v15014_v20, %s14802_s21 }
 0x119   :  { %v15030_v35 = vpack.i.bf16 %v1738_v29, %v1736_v24 }
 0x11a   :  { %v15033_v37 = vsel %vm438_vm3, %v1725_v21, %v1727_v27  ;;  %v15036_v39 = vsel %vm438_vm3, %v1727_v27, %v1729_v25 }
 0x11c   :  { %947 = vrot.lane.b32.xlu0 %v15017_v26, %s14802_s21  ;;  %949 = vrot.lane.b32.xlu1 %v15028_v33, %s14802_s21 }
 0x120   :  { %1197 = vrot.lane.b32.xlu0 %v15003_v62, %s14801_s20  ;;  %13964 = vrot.lane.b32.xlu1 %v15001_v60, %s14803_s22 }
 0x124   :  { %1187 = vrot.lane.b32.xlu0 %v15014_v20, %s14804_s23  ;;  %1189 = vrot.lane.b32.xlu1 %v15017_v26, %s14804_s23 }
 0x128   :  { %1191 = vrot.lane.b32.xlu0 %v15028_v33, %s14804_s23  ;;  %1439 = vrot.lane.b32.xlu1 %v15003_v62, %s14803_s22 }
 0x12c   :  { %13969 = vrot.lane.b32.xlu0 %v15030_v35, %s14800_s19  ;;  %1429 = vrot.lane.b32.xlu1 %v15014_v20, %s14805_s24 }
 0x130   :  { %1431 = vrot.lane.b32.xlu0 %v15017_v26, %s14805_s24  ;;  %1433 = vrot.lane.b32.xlu1 %v15028_v33, %s14805_s24 }
 0x134   :  { %1745 = vrot.lane.b32.xlu0 %v15021_v31, %s14800_s19  ;;  %13974 = vrot.lane.b32.xlu1 %v15030_v35, %s14799_s18 }
 0x138   :  { %2016 = vrot.lane.b32.xlu0 %v15021_v31, %s14799_s18  ;;  %13979 = vrot.lane.b32.xlu1 %v15030_v35, %s14801_s20 }
 0x13c   :  { %2006 = vrot.lane.b32.xlu0 %v15072_v41, %s14802_s21  ;;  %2008 = vrot.lane.b32.xlu1 %v15033_v37, %s14802_s21 }
 0x140   :  { %2010 = vrot.lane.b32.xlu0 %v15036_v39, %s14802_s21  ;;  %2273 = vrot.lane.b32.xlu1 %v15021_v31, %s14801_s20 }
 0x144   :  { %13984 = vrot.lane.b32.xlu0 %v15030_v35, %s14803_s22  ;;  %2263 = vrot.lane.b32.xlu1 %v15072_v41, %s14804_s23 }
 0x148   :  { %2265 = vrot.lane.b32.xlu0 %v15033_v37, %s14804_s23  ;;  %2267 = vrot.lane.b32.xlu1 %v15036_v39, %s14804_s23 }
 0x14c   :  { %2530 = vrot.lane.b32.xlu0 %v15021_v31, %s14803_s22  ;;  %2520 = vrot.lane.b32.xlu1 %v15072_v41, %s14805_s24 }
 0x150   :  { %2522 = vrot.lane.b32.xlu0 %v15033_v37, %s14805_s24  ;;  %2524 = vrot.lane.b32.xlu1 %v15036_v39, %s14805_s24 }
 0x16f   :  { %669 = vadd.xlane.f32.xlu0 %v668_v55 }
 0x173   :  { %672 = vadd.xlane.f32.xlu0 %v671_v59 }
 0x174   :  { %666 = vadd.xlane.f32.xlu1 %v665_v42 }
 0x177   :  { %676 = vadd.xlane.f32.xlu0 %v675_v10 }
 0x178   :  { %660 = vadd.xlane.f32.xlu1 %v659_v44 }
 0x17b   :  { %663 = vadd.xlane.f32.xlu0 %v662_v3 }
 0x182   :  { %v13950_v46 = vpop.permute.xlu0 %13949  ;;  %v13955_v50 = vpop.permute.xlu1 %13954 }
 0x183   :  { %v13952_v48 = vunpack.i.h.bf16 %v13950_v46  ;;  %v13951_v49 = vunpack.i.l.bf16 %v13950_v46  ;;  %v13957_v53 = vunpack.i.h.bf16 %v13955_v50  ;;  %v13956_v54 = vunpack.i.l.bf16 %v13955_v50 }
 0x185   :  { %v13547_v52 = vpack.c.bf16 %v13952_v48, %v13951_v49  ;;  %v13554_v58 = vpack.c.bf16 %v13957_v53, %v13956_v54  ;;  %v15208_v54 = vpop.f32.mrb[0].mxu1 }
 0x186   :  { %v956_v6 = vpop.permute.xlu1 %955  ;;  %v707_v9 = vpop.permute.xlu0 %706  ;;  %18794 = vst [vmem:[#allocation3_spill] sm:$0xff] %v15208_v54 }
 0x187   :  { %13549 = vmatpush3.bf16.xpose.msk.msra.mxu1 %vm15104_vm5, %v13547_v52  ;;  %v12347_v55 = vpop.f32.mrb[1].mxu1 }
 0x188   :  { %12405 = vmatprep.subr.mxu1 %v14795_v1 }
 0x189   :  { %13989 = vrot.lane.b32.xlu1 %v15001_v60, %s14806_s25 }
 0x18a   :  { %v13960_v56 = vpop.permute.xlu0 %13959  ;;  %v946_v57 = vpop.permute.xlu1 %945 }
 0x18b   :  { %v13962_v11 = vunpack.i.h.bf16 %v13960_v56  ;;  %v13961_v2 = vunpack.i.l.bf16 %v13960_v56 }
 0x18d   :  { %v13561_v8 = vpack.c.bf16 %v13962_v11, %v13961_v2 }
 0x18e   :  { %v948_v61 = vpop.permute.xlu0 %947  ;;  %v950_v63 = vpop.permute.xlu1 %949 }
 0x18f   :  { %12406 = vmatpush3.xpose.msk.msra.mxu1 %vm708_vm4, %v707_v9 }
 0x190   :  { %13553 = vmatprep.subr.bf16.mxu1 %v18767_v0 }
 0x192   :  { %12408 = vmatmul.mubr.msk.f32.vlgmr.msra.gmra.mrb[6].mxu1 %vm708_vm4, %v15014_v20  ;;  %v1198_v19 = vpop.permute.xlu0 %1197  ;;  %v13965_v5 = vpop.permute.xlu1 %13964 }
 0x193   :  { %13556 = vmatpush3.bf16.xpose.msk.msra.mxu1 %vm15104_vm5, %v13554_v58  ;;  %12410 = vmatprep.mubr.msk.f32.mxu1 %vm14794_vm0, %v14795_v1  ;;  %v13967_v14 = vunpack.i.h.bf16 %v13965_v5  ;;  %v13966_v15 = vunpack.i.l.bf16 %v13965_v5  ;;  %v15215_v58 = vpop.f32.mrb[2].mxu1 }
 0x194   :  { %12435 = vmatprep.subr.mxu1 %v14795_v1  ;;  %18795 = vst [vmem:[#allocation4_spill] sm:$0xff] %v15215_v58  ;;  %v12350_v59 = vpop.f32.mrb[3].mxu1 }
 0x195   :  { %v13568_v18 = vpack.c.bf16 %v13967_v14, %v13966_v15 }
 0x196   :  { %12411 = vmatmul.mubr.msk.f32.gmra.mrb[8].mxu1 %vm708_vm4, %v15017_v26  ;;  %v1188_v7 = vpop.permute.xlu0 %1187  ;;  %v1190_v13 = vpop.permute.xlu1 %1189 }
 0x197   :  { %12413 = vmatprep.mubr.msk.f32.mxu1 %vm14794_vm0, %v14795_v1 }
 0x19a   :  { %12414 = vmatmul.mubr.msk.f32.gmra.mrb[10].mxu1 %vm708_vm4, %v15028_v33  ;;  %v1192_v16 = vpop.permute.xlu0 %1191  ;;  %v1440_v17 = vpop.permute.xlu1 %1439 }
 0x19b   :  { %12436 = vmatpush3.xpose.msk.msra.mxu1 %vm708_vm4, %v956_v6  ;;  %12437 = vmatprep.mubr.msk.f32.mxu1 %vm14794_vm0, %v14795_v1 }
 0x19c   :  { %13560 = vmatprep.subr.bf16.mxu1 %v18767_v0 }
 0x19e   :  { %12438 = vmatmul.mubr.msk.f32.vlgmr.msra.gmra.mrb[12].mxu1 %vm708_vm4, %v946_v57  ;;  %v13970_v20 = vpop.permute.xlu0 %13969  ;;  %v1430_v21 = vpop.permute.xlu1 %1429 }
 0x19f   :  { %13563 = vmatpush3.bf16.xpose.msk.msra.mxu1 %vm15104_vm5, %v13561_v8  ;;  %12440 = vmatprep.mubr.msk.f32.mxu1 %vm14794_vm0, %v14795_v1  ;;  %v13972_v22 = vunpack.i.h.bf16 %v13970_v20  ;;  %v13971_v23 = vunpack.i.l.bf16 %v13970_v20 }
 0x1a0   :  { %12465 = vmatprep.subr.mxu1 %v14795_v1 }
 0x1a1   :  { %v13575_v26 = vpack.c.bf16 %v13972_v22, %v13971_v23 }
 0x1a2   :  { %12441 = vmatmul.mubr.msk.f32.gmra.mrb[14].mxu1 %vm708_vm4, %v948_v61  ;;  %v1432_v24 = vpop.permute.xlu0 %1431  ;;  %v1434_v25 = vpop.permute.xlu1 %1433 }
 0x1a3   :  { %12443 = vmatprep.mubr.msk.f32.mxu1 %vm14794_vm0, %v14795_v1  ;;  %v15223_v61 = vpop.f32.mrb[4].mxu1 }
 0x1a4   :  { %18796 = vst [vmem:[#allocation5_spill] sm:$0xff] %v15223_v61 }
 0x1a6   :  { %12444 = vmatmul.mubr.msk.f32.gmra.mrb[16].mxu1 %vm708_vm4, %v950_v63  ;;  %v1746_v27 = vpop.permute.xlu0 %1745  ;;  %v13975_v29 = vpop.permute.xlu1 %13974 }
 0x1a7   :  { %12466 = vmatpush3.xpose.msk.msra.mxu1 %vm708_vm4, %v1198_v19  ;;  %12467 = vmatprep.mubr.msk.f32.mxu1 %vm14794_vm0, %v14795_v1  ;;  %v13977_v33 = vunpack.i.h.bf16 %v13975_v29  ;;  %v13976_v40 = vunpack.i.l.bf16 %v13975_v29  ;;  %v12353_v63 = vpop.f32.mrb[5].mxu1 }
 0x1a8   :  { %13567 = vmatprep.subr.bf16.mxu1 %v18767_v0 }
 0x1a9   :  { %v13582_v44 = vpack.c.bf16 %v13977_v33, %v13976_v40 }
 0x1aa   :  { %12468 = vmatmul.mubr.msk.f32.vlgmr.msra.gmra.mrb[18].mxu1 %vm708_vm4, %v1188_v7  ;;  %v2017_v42 = vpop.permute.xlu0 %2016  ;;  %v13980_v46 = vpop.permute.xlu1 %13979 }
 0x1ab   :  { %13570 = vmatpush3.bf16.xpose.msk.msra.mxu1 %vm15104_vm5, %v13568_v18  ;;  %12470 = vmatprep.mubr.msk.f32.mxu1 %vm14794_vm0, %v14795_v1  ;;  %v13982_v49 = vunpack.i.h.bf16 %v13980_v46  ;;  %v13981_v50 = vunpack.i.l.bf16 %v13980_v46 }
 0x1ac   :  { %12495 = vmatprep.subr.mxu1 %v14795_v1 }
 0x1ad   :  { %v13589_v52 = vpack.c.bf16 %v13982_v49, %v13981_v50 }
 0x1ae   :  { %12471 = vmatmul.mubr.msk.f32.gmra.mrb[20].mxu1 %vm708_vm4, %v1190_v13  ;;  %v2007_v48 = vpop.permute.xlu0 %2006  ;;  %v2009_v6 = vpop.permute.xlu1 %2008 }
 0x1af   :  { %12473 = vmatprep.mubr.msk.f32.mxu1 %vm14794_vm0, %v14795_v1 }
 0x1b2   :  { %12474 = vmatmul.mubr.msk.f32.gmra.mrb[22].mxu1 %vm708_vm4, %v1192_v16 }
 0x1b3   :  { %12496 = vmatpush3.xpose.msk.msra.mxu1 %vm708_vm4, %v1440_v17  ;;  %12497 = vmatprep.mubr.msk.f32.mxu1 %vm14794_vm0, %v14795_v1  ;;  %v152_v17 = vlaneseq }
 0x1b4   :  { %13574 = vmatprep.subr.bf16.mxu1 %v18767_v0 }
 0x1b5   :  { %v15244_v18 = vshrl.u32 %v152_v17, 7  ;;  %v15246_v20 = vand.u32 127, %v152_v17 }
 0x1b6   :  { %12498 = vmatmul.mubr.msk.f32.vlgmr.msra.gmra.mrb[24].mxu1 %vm708_vm4, %v1430_v21 }
 0x1b7   :  { %13577 = vmatpush3.bf16.xpose.msk.msra.mxu1 %vm15104_vm5, %v13575_v26  ;;  %12500 = vmatprep.mubr.msk.f32.mxu1 %vm14794_vm0, %v14795_v1  ;;  %vm18764_vm7 = vcmp.gt.s32.totalorder %v15246_v20, %v15244_v18  ;;  %v15252_v21 = vadd.s32 8, %v15244_v18 }
 0x1b8   :  { %12525 = vmatprep.subr.mxu1 %v14795_v1  ;;  %vm15257_vm10 = vmor %vm432_vm8, %vm18764_vm7  ;;  %vm18769_vm8 = vcmask 186368  }
 0x1b9   :  { %vm18771_vm11 = vcmp.gt.s32.totalorder %v15246_v20, %v15252_v21 }
 0x1ba   :  { %12501 = vmatmul.mubr.msk.f32.gmra.mrb[26].mxu1 %vm708_vm4, %v1432_v24  ;;  %v15265_v24 = vadd.s32 16, %v15244_v18  ;;  %vm15276_vm13 = vmor %vm433_vm12, %vm18771_vm11 }
 0x1bb   :  { %12503 = vmatprep.mubr.msk.f32.mxu1 %vm14794_vm0, %v14795_v1 }
 0x1bc   :  { %vm18770_vm14 = vcmp.gt.s32.totalorder %v15246_v20, %v15265_v24 }
 0x1bd   :  { %vm15292_vm12 = vmor %vm434_vm15, %vm18770_vm14  ;;  %vm532_vm15 = vcmp.eq.f32.partialorder %v14979_v43, 0.0 }
 0x1be   :  { %12504 = vmatmul.mubr.msk.f32.gmra.mrb[28].mxu1 %vm708_vm4, %v1434_v25 }
 0x1bf   :  { %12526 = vmatpush3.xpose.msk.msra.mxu1 %vm708_vm4, %v1746_v27  ;;  %12527 = vmatprep.mubr.msk.f32.mxu1 %vm14794_vm0, %v14795_v1 }
 0x1c0   :  { %13581 = vmatprep.subr.bf16.mxu1 %v18767_v0 }
 0x1c2   :  { %12528 = vmatmul.mubr.msk.f32.vlgmr.msra.gmra.mrb[30].mxu1 %vm708_vm4, %v15072_v41  ;;  %v2011_v41 = vpop.permute.xlu0 %2010 }
 0x1c3   :  { %13584 = vmatpush3.bf16.xpose.msk.msra.mxu1 %vm15104_vm5, %v13582_v44  ;;  %12530 = vmatprep.mubr.msk.f32.mxu1 %vm14794_vm0, %v14795_v1 }
 0x1c4   :  { %12555 = vmatprep.subr.mxu1 %v14795_v1 }
 0x1c6   :  { %12531 = vmatmul.mubr.msk.f32.gmra.mrb[32].mxu1 %vm708_vm4, %v15033_v37  ;;  %v13985_v37 = vpop.permute.xlu0 %13984 }
 0x1c7   :  { %12533 = vmatprep.mubr.msk.f32.mxu1 %vm14794_vm0, %v14795_v1  ;;  %v13987_v9 = vunpack.i.h.bf16 %v13985_v37  ;;  %v13986_v53 = vunpack.i.l.bf16 %v13985_v37 }
 0x1c9   :  { %v13596_v56 = vpack.c.bf16 %v13987_v9, %v13986_v53 }
 0x1ca   :  { %12534 = vmatmul.mubr.msk.f32.gmra.mrb[34].mxu1 %vm708_vm4, %v15036_v39  ;;  %v2274_v39 = vpop.permute.xlu1 %2273  ;;  %v2266_v10 = vpop.permute.xlu0 %2265 }
 0x1cb   :  { %12556 = vmatpush3.xpose.msk.msra.mxu1 %vm708_vm4, %v2017_v42  ;;  %12557 = vmatprep.mubr.msk.f32.mxu1 %vm14794_vm0, %v14795_v1 }
 0x1cc   :  { %13588 = vmatprep.subr.bf16.mxu1 %v18767_v0 }
 0x1ce   :  { %12558 = vmatmul.mubr.msk.f32.vlgmr.msra.gmra.mrb[36].mxu1 %vm708_vm4, %v2007_v48  ;;  %v2264_v57 = vpop.permute.xlu1 %2263  ;;  %v2531_v2 = vpop.permute.xlu0 %2530 }
 0x1cf   :  { %13591 = vmatpush3.bf16.xpose.msk.msra.mxu1 %vm15104_vm5, %v13589_v52  ;;  %12560 = vmatprep.mubr.msk.f32.mxu1 %vm14794_vm0, %v14795_v1 }
 0x1d0   :  { %12585 = vmatprep.subr.mxu1 %v14795_v1 }
 0x1d2   :  { %12561 = vmatmul.mubr.msk.f32.gmra.mrb[38].mxu1 %vm708_vm4, %v2009_v6  ;;  %v2268_v11 = vpop.permute.xlu1 %2267  ;;  %v2523_v19 = vpop.permute.xlu0 %2522 }
 0x1d3   :  { %12563 = vmatprep.mubr.msk.f32.mxu1 %vm14794_vm0, %v14795_v1 }
 0x1d6   :  { %12564 = vmatmul.mubr.msk.f32.gmra.mrb[40].mxu1 %vm708_vm4, %v2011_v41  ;;  %v2521_v3 = vpop.permute.xlu1 %2520 }
 0x1d7   :  { %12586 = vmatpush3.xpose.msk.msra.mxu1 %vm708_vm4, %v2274_v39  ;;  %12587 = vmatprep.mubr.msk.f32.mxu1 %vm14794_vm0, %v14795_v1 }
 0x1d8   :  { %13595 = vmatprep.subr.bf16.mxu1 %v18767_v0 }
 0x1da   :  { %12588 = vmatmul.mubr.msk.f32.vlgmr.msra.gmra.mrb[42].mxu1 %vm708_vm4, %v2264_v57  ;;  %v2525_v5 = vpop.permute.xlu1 %2524 }
 0x1db   :  { %13598 = vmatpush3.bf16.xpose.msk.msra.mxu1 %vm15104_vm5, %v13596_v56  ;;  %12590 = vmatprep.mubr.msk.f32.mxu1 %vm14794_vm0, %v14795_v1 }
 0x1dc   :  { %12615 = vmatprep.subr.mxu1 %v14795_v1 }
 0x1de   :  { %12591 = vmatmul.mubr.msk.f32.gmra.mrb[44].mxu1 %vm708_vm4, %v2266_v10 }
 0x1df   :  { %12593 = vmatprep.mubr.msk.f32.mxu1 %vm14794_vm0, %v14795_v1 }
 0x1e2   :  { %12594 = vmatmul.mubr.msk.f32.gmra.mrb[46].mxu1 %vm708_vm4, %v2268_v11 }
 0x1e3   :  { %12616 = vmatpush3.xpose.msk.msra.mxu1 %vm708_vm4, %v2531_v2  ;;  %12617 = vmatprep.mubr.msk.f32.mxu1 %vm14794_vm0, %v14795_v1 }
 0x1e6   :  { %12618 = vmatmul.mubr.msk.f32.vlgmr.msra.gmra.mrb[48].mxu1 %vm708_vm4, %v2521_v3 }
 0x1e7   :  { %12620 = vmatprep.mubr.msk.f32.mxu1 %vm14794_vm0, %v14795_v1 }
 0x1ea   :  { %12621 = vmatmul.mubr.msk.f32.gmra.mrb[50].mxu1 %vm708_vm4, %v2523_v19 }
 0x1eb   :  { %12623 = vmatprep.mubr.msk.f32.mxu1 %vm14794_vm0, %v14795_v1 }
 0x1ee   :  { %12624 = vmatmul.mubr.msk.f32.gmra.mrb[52].mxu1 %vm708_vm4, %v2525_v5 }
 0x201   :  { %v15239_v8 = vpop.xlane.xlu1 %666 }
 0x205   :  { %v15241_v7 = vpop.xlane.xlu1 %660 }
 0x209   :  { %v13990_v13 = vpop.permute.xlu1 %13989 }
 0x20a   :  { %v13992_v14 = vunpack.i.h.bf16 %v13990_v13  ;;  %v13991_v15 = vunpack.i.l.bf16 %v13990_v13 }
 0x20c   :  { %v13551_v16 = vpack.c.bf16 %v13992_v14, %v13991_v15 }
 0x20e   :  { %13552 = vmatpush3.bf16.msra.mxu0 %v13551_v16 }
 0x20f   :  { %12420 = vmatprep.subr.mxu0 %v14795_v1 }
 0x265   :  { %v790_v23 = vpop.f32.mrb[6].mxu1 }
 0x266   :  { %v15269_v34 = vsel %vm15257_vm10, -4.2949673e+09, %v790_v23  ;;  %v12409_v25 = vpop.f32.mrb[7].mxu1 }
 0x267   :  { %v808_v26 = vsel %vm18772_vm9, %v15269_v34, -inf }
 0x268   :  { %809 = vmax.xlane.f32.xlu0 %v808_v26 }
 0x269   :  { %v795_v36 = vpop.f32.mrb[8].mxu1 }
 0x26a   :  { %v15285_v29 = vsel %vm15276_vm13, -4.2949673e+09, %v795_v36  ;;  %v12412_v33 = vpop.f32.mrb[9].mxu1 }
 0x26b   :  { %v811_v40 = vsel %vm18772_vm9, %v15285_v29, -inf }
 0x26c   :  { %812 = vmax.xlane.f32.xlu0 %v811_v40 }
 0x26d   :  { %v800_v44 = vpop.f32.mrb[10].mxu1 }
 0x26e   :  { %v15298_v38 = vsel %vm15292_vm12, -4.2949673e+09, %v800_v44  ;;  %v12415_v46 = vpop.f32.mrb[11].mxu1 }
 0x26f   :  { %v815_v48 = vsel %vm18769_vm8, %v15298_v38, -inf }
 0x270   :  { %816 = vmax.xlane.f32.xlu0 %v815_v48 }
 0x271   :  { %v1035_v49 = vpop.f32.mrb[12].mxu1 }
 0x272   :  { %v15304_v50 = vsel %vm15257_vm10, -4.2949673e+09, %v1035_v49  ;;  %v12439_v41 = vpop.f32.mrb[13].mxu1 }
 0x273   :  { %v1052_v52 = vsel %vm18772_vm9, %v15304_v50, -inf }
 0x274   :  { %1053 = vmax.xlane.f32.xlu0 %v1052_v52 }
 0x275   :  { %v1040_v6 = vpop.f32.mrb[14].mxu1 }
 0x276   :  { %v15310_v37 = vsel %vm15276_vm13, -4.2949673e+09, %v1040_v6  ;;  %v12442_v39 = vpop.f32.mrb[15].mxu1 }
 0x277   :  { %v1055_v9 = vsel %vm18772_vm9, %v15310_v37, -inf }
 0x278   :  { %1056 = vmax.xlane.f32.xlu0 %v1055_v9 }
 0x279   :  { %v1045_v53 = vpop.f32.mrb[16].mxu1 }
 0x27a   :  { %v15316_v55 = vsel %vm15292_vm12, -4.2949673e+09, %v1045_v53  ;;  %v12445_v56 = vpop.f32.mrb[17].mxu1 }
 0x27b   :  { %v1058_v57 = vsel %vm18769_vm8, %v15316_v55, -inf }
 0x27c   :  { %1059 = vmax.xlane.f32.xlu0 %v1058_v57 }
 0x27d   :  { %v1277_v59 = vpop.f32.mrb[18].mxu1 }
 0x27e   :  { %v15322_v10 = vsel %vm15257_vm10, -4.2949673e+09, %v1277_v59  ;;  %v12469_v63 = vpop.f32.mrb[19].mxu1 }
 0x27f   :  { %v1294_v11 = vsel %vm18772_vm9, %v15322_v10, -inf }
 0x280   :  { %1295 = vmax.xlane.f32.xlu0 %v1294_v11 }
 0x281   :  { %v1282_v2 = vpop.f32.mrb[20].mxu1 }
 0x282   :  { %v15328_v3 = vsel %vm15276_vm13, -4.2949673e+09, %v1282_v2  ;;  %v12472_v19 = vpop.f32.mrb[21].mxu1 }
 0x283   :  { %v1297_v5 = vsel %vm18772_vm9, %v15328_v3, -inf }
 0x284   :  { %1298 = vmax.xlane.f32.xlu1 %v1297_v5 }
 0x285   :  { %v1287_v13 = vpop.f32.mrb[22].mxu1 }
 0x286   :  { %v15334_v14 = vsel %vm15292_vm12, -4.2949673e+09, %v1287_v13  ;;  %v12475_v15 = vpop.f32.mrb[23].mxu1 }
 0x287   :  { %v1300_v16 = vsel %vm18769_vm8, %v15334_v14, -inf }
 0x288   :  { %1301 = vmax.xlane.f32.xlu0 %v1300_v16 }
 0x289   :  { %v1519_v17 = vpop.f32.mrb[24].mxu1 }
 0x28a   :  { %v15340_v23 = vsel %vm15257_vm10, -4.2949673e+09, %v1519_v17  ;;  %v12499_v25 = vpop.f32.mrb[25].mxu1  ;;  %vm15360_vm10 = vmor %vm532_vm15, %vm18764_vm7  ;;  %vm534_vm15 = vcmp.eq.f32.partialorder %v14991_v47, 0.0 }
 0x28b   :  { %v1536_v26 = vsel %vm18772_vm9, %v15340_v23, -inf  ;;  %vm15388_vm7 = vmor %vm534_vm15, %vm18770_vm14 }
 0x28c   :  { %1537 = vmax.xlane.f32.xlu1 %v1536_v26 }
 0x28d   :  { %v1524_v36 = vpop.f32.mrb[26].mxu1 }
 0x28e   :  { %v15346_v33 = vsel %vm15276_vm13, -4.2949673e+09, %v1524_v36  ;;  %v12502_v40 = vpop.f32.mrb[27].mxu1  ;;  %vm533_vm13 = vcmp.eq.f32.partialorder %v14985_v45, 0.0 }
 0x28f   :  { %v1539_v44 = vsel %vm18772_vm9, %v15346_v33, -inf }
 0x290   :  { %1540 = vmax.xlane.f32.xlu0 %v1539_v44 }
 0x291   :  { %v1529_v46 = vpop.f32.mrb[28].mxu1 }
 0x292   :  { %v15353_v22 = vsel %vm15292_vm12, -4.2949673e+09, %v1529_v46  ;;  %v12505_v48 = vpop.f32.mrb[29].mxu1  ;;  %vm15374_vm12 = vmor %vm533_vm13, %vm18771_vm11  ;;  %vm18776_vm11 = vcmp.eq.f32.partialorder %v15208_v54, 0.0 }
 0x293   :  { %v1542_v49 = vsel %vm18769_vm8, %v15353_v22, -inf }
 0x294   :  { %1543 = vmax.xlane.f32.xlu1 %v1542_v49 }
 0x295   :  { %v1825_v41 = vpop.f32.mrb[30].mxu1 }
 0x296   :  { %v15367_v43 = vsel %vm15360_vm10, -4.2949673e+09, %v1825_v41  ;;  %v12529_v42 = vpop.f32.mrb[31].mxu1 }
 0x297   :  { %v1842_v52 = vsel %vm18772_vm9, %v15367_v43, -inf }
 0x298   :  { %1843 = vmax.xlane.f32.xlu0 %v1842_v52 }
 0x299   :  { %v1830_v39 = vpop.f32.mrb[32].mxu1 }
 0x29a   :  { %v15381_v45 = vsel %vm15374_vm12, -4.2949673e+09, %v1830_v39  ;;  %v12532_v9 = vpop.f32.mrb[33].mxu1 }
 0x29b   :  { %v1845_v53 = vsel %vm18772_vm9, %v15381_v45, -inf }
 0x29c   :  { %1846 = vmax.xlane.f32.xlu1 %v1845_v53 }
 0x29d   :  { %v1835_v57 = vpop.f32.mrb[34].mxu1 }
 0x29e   :  { %v15394_v47 = vsel %vm15388_vm7, -4.2949673e+09, %v1835_v57  ;;  %v12535_v59 = vpop.f32.mrb[35].mxu1 }
 0x29f   :  { %v1848_v63 = vsel %vm18769_vm8, %v15394_v47, -inf }
 0x2a0   :  { %1849 = vmax.xlane.f32.xlu0 %v1848_v63 }
 0x2a1   :  { %v2096_v11 = vpop.f32.mrb[36].mxu1 }
 0x2a2   :  { %v15400_v2 = vsel %vm15360_vm10, -4.2949673e+09, %v2096_v11  ;;  %v12559_v19 = vpop.f32.mrb[37].mxu1 }
 0x2a3   :  { %v2113_v5 = vsel %vm18772_vm9, %v15400_v2, -inf }
 0x2a4   :  { %2114 = vmax.xlane.f32.xlu0 %v2113_v5 }
 0x2a5   :  { %v2101_v13 = vpop.f32.mrb[38].mxu1 }
 0x2a6   :  { %v15406_v15 = vsel %vm15374_vm12, -4.2949673e+09, %v2101_v13  ;;  %v12562_v16 = vpop.f32.mrb[39].mxu1 }
 0x2a7   :  { %v2116_v27 = vsel %vm18772_vm9, %v15406_v15, -inf }
 0x2a9   :  { %v2106_v17 = vpop.f32.mrb[40].mxu1 }
 0x2aa   :  { %v15410_v25 = vsel %vm15388_vm7, -4.2949673e+09, %v2106_v17  ;;  %v12565_v26 = vpop.f32.mrb[41].mxu1  ;;  %v15450_v17 = vpop.xlane.xlu0 %669 }
 0x2ab   :  { %v2119_v13 = vsel %vm18769_vm8, %v15410_v25, -inf  ;;  %vm681_vm15 = vcmp.ne.f32.partialorder %v15450_v17, 0.0 }
 0x2ad   :  { %13994 = vrot.lane.b32.xlu1 %v15001_v60, %s14807_s26  ;;  %v2353_v36 = vpop.f32.mrb[42].mxu1 }
 0x2ae   :  { %v15416_v40 = vsel %vm15360_vm10, -4.2949673e+09, %v2353_v36  ;;  %v12589_v44 = vpop.f32.mrb[43].mxu1  ;;  %v15454_v36 = vpop.xlane.xlu0 %672 }
 0x2af   :  { %v2370_v6 = vsel %vm18772_vm9, %v15416_v40, -inf }
 0x2b1   :  { %v2358_v46 = vpop.f32.mrb[44].mxu1 }
 0x2b2   :  { %v15420_v48 = vsel %vm15374_vm12, -4.2949673e+09, %v2358_v46  ;;  %v12592_v49 = vpop.f32.mrb[45].mxu1 }
 0x2b3   :  { %v2373_v56 = vsel %vm18772_vm9, %v15420_v48, -inf  ;;  %v15460_v49 = vpop.xlane.xlu0 %676 }
 0x2b5   :  { %v2363_v41 = vpop.f32.mrb[46].mxu1 }
 0x2b6   :  { %v15424_v42 = vsel %vm15388_vm7, -4.2949673e+09, %v2363_v41  ;;  %v12595_v52 = vpop.f32.mrb[47].mxu1 }
 0x2b7   :  { %v2376_v26 = vsel %vm18769_vm8, %v15424_v42, -inf  ;;  %v15462_v41 = vpop.xlane.xlu0 %663 }
 0x2b8   :  { %vm679_vm13 = vcmp.ne.f32.partialorder %v15462_v41, 0.0 }
 0x2b9   :  { %v2610_v39 = vpop.f32.mrb[48].mxu1 }
 0x2ba   :  { %v15428_v9 = vsel %vm15360_vm10, -4.2949673e+09, %v2610_v39  ;;  %849 = vrot.lane.b32.xlu0 %v15003_v62, %s14806_s25  ;;  %v12619_v53 = vpop.f32.mrb[49].mxu1  ;;  %vm678_vm10 = vcmp.ne.f32.partialorder %v15241_v7, 0.0 }
 0x2bb   :  { %v2627_v44 = vsel %vm18772_vm9, %v15428_v9, -inf }
 0x2bd   :  { %v2615_v57 = vpop.f32.mrb[50].mxu1 }
 0x2be   :  { %v15434_v59 = vsel %vm15374_vm12, -4.2949673e+09, %v2615_v57  ;;  %v12622_v63 = vpop.f32.mrb[51].mxu1  ;;  %vm680_vm12 = vcmp.ne.f32.partialorder %v15239_v8, 0.0 }
 0x2bf   :  { %v2630_v46 = vsel %vm18772_vm9, %v15434_v59, -inf }
 0x2c1   :  { %v2620_v11 = vpop.f32.mrb[52].mxu1 }
 0x2c2   :  { %v15438_v19 = vsel %vm15388_vm7, -4.2949673e+09, %v2620_v11  ;;  %v12625_v5 = vpop.f32.mrb[53].mxu1  ;;  %vm18773_vm7 = vcmask 1046528  }
 0x2c3   :  { %v2633_v16 = vsel %vm18769_vm8, %v15438_v19, -inf }
 0x2d1   :  { %2117 = vmax.xlane.f32.xlu1 %v2116_v27 }
 0x2d5   :  { %2120 = vmax.xlane.f32.xlu1 %v2119_v13 }
 0x2d9   :  { %2371 = vmax.xlane.f32.xlu1 %v2370_v6  ;;  %2634 = vmax.xlane.f32.xlu0 %v2633_v16 }
 0x2dd   :  { %2374 = vmax.xlane.f32.xlu1 %v2373_v56 }
 0x2e1   :  { %2377 = vmax.xlane.f32.xlu1 %v2376_v26 }
 0x2e5   :  { %2628 = vmax.xlane.f32.xlu1 %v2627_v44 }
 0x2e9   :  { %2631 = vmax.xlane.f32.xlu1 %v2630_v46 }
 0x2f5   :  { %v810_v52 = vpop.xlane.xlu0 %809 }
 0x2f6   :  { %v818_v39 = vsub.f32 %v15269_v34, %v810_v52 }
 0x2f8   :  { %v821_v53 = vmul.f32 1.442695, %v818_v39 }
 0x2f9   :  { %v813_v57 = vpop.xlane.xlu0 %812 }
 0x2fa   :  { %14250 = vpow2.f32 %v821_v53  ;;  %v819_v63 = vsub.f32 %v15285_v29, %v813_v57 }
 0x2fc   :  { %v823_v11 = vmul.f32 1.442695, %v819_v63 }
 0x2fd   :  { %v817_v5 = vpop.xlane.xlu0 %816 }
 0x2fe   :  { %14252 = vpow2.f32 %v823_v11  ;;  %v820_v27 = vsub.f32 %v15298_v38, %v817_v5 }
 0x300   :  { %v825_v13 = vmul.f32 1.442695, %v820_v27 }
 0x301   :  { %v1054_v6 = vpop.xlane.xlu0 %1053 }
 0x302   :  { %14254 = vpow2.f32 %v825_v13  ;;  %v1061_v16 = vsub.f32 %v15304_v50, %v1054_v6 }
 0x304   :  { %v15468_v56 = vpop.eup %14250  ;;  %v1064_v26 = vmul.f32 1.442695, %v1061_v16 }
 0x305   :  { %v1057_v44 = vpop.xlane.xlu0 %1056  ;;  %v827_v34 = vsel %vm18772_vm9, %v15468_v56, 0.0 }
 0x306   :  { %14256 = vpow2.f32 %v1064_v26  ;;  %v1062_v29 = vsub.f32 %v15310_v37, %v1057_v44  ;;  %828 = vadd.xlane.f32.xlu0 %v827_v34 }
 0x308   :  { %v15473_v46 = vpop.eup %14252  ;;  %v1066_v52 = vmul.f32 1.442695, %v1062_v29 }
 0x309   :  { %v1060_v38 = vpop.xlane.xlu0 %1059  ;;  %v830_v39 = vsel %vm18772_vm9, %v15473_v46, 0.0 }
 0x30a   :  { %14258 = vpow2.f32 %v1066_v52  ;;  %v1063_v50 = vsub.f32 %v15316_v55, %v1060_v38  ;;  %831 = vadd.xlane.f32.xlu0 %v830_v39 }
 0x30c   :  { %v15478_v53 = vpop.eup %14254  ;;  %v1068_v57 = vmul.f32 1.442695, %v1063_v50 }
 0x30d   :  { %v1296_v63 = vpop.xlane.xlu0 %1295  ;;  %v833_v11 = vsel %vm18769_vm8, %v15478_v53, 0.0 }
 0x30e   :  { %14260 = vpow2.f32 %v1068_v57  ;;  %v1303_v37 = vsub.f32 %v15322_v10, %v1296_v63  ;;  %834 = vadd.xlane.f32.xlu0 %v833_v11 }
 0x310   :  { %v15483_v5 = vpop.eup %14256  ;;  %v1306_v27 = vmul.f32 1.442695, %v1303_v37 }
 0x311   :  { %v1299_v13 = vpop.xlane.xlu1 %1298  ;;  %v1070_v6 = vsel %vm18772_vm9, %v15483_v5, 0.0 }
 0x312   :  { %14262 = vpow2.f32 %v1306_v27  ;;  %v1304_v55 = vsub.f32 %v15328_v3, %v1299_v13  ;;  %1071 = vadd.xlane.f32.xlu1 %v1070_v6 }
 0x314   :  { %v15488_v16 = vpop.eup %14258  ;;  %v1308_v26 = vmul.f32 1.442695, %v1304_v55 }
 0x315   :  { %v1302_v44 = vpop.xlane.xlu0 %1301  ;;  %v1073_v34 = vsel %vm18772_vm9, %v15488_v16, 0.0 }
 0x316   :  { %14264 = vpow2.f32 %v1308_v26  ;;  %v1305_v10 = vsub.f32 %v15334_v14, %v1302_v44  ;;  %1074 = vadd.xlane.f32.xlu0 %v1073_v34 }
 0x318   :  { %v15493_v29 = vpop.eup %14260  ;;  %v1310_v52 = vmul.f32 1.442695, %v1305_v10 }
 0x319   :  { %v1538_v38 = vpop.xlane.xlu1 %1537  ;;  %v1076_v39 = vsel %vm18769_vm8, %v15493_v29, 0.0 }
 0x31a   :  { %14266 = vpow2.f32 %v1310_v52  ;;  %v1545_v3 = vsub.f32 %v15340_v23, %v1538_v38  ;;  %1077 = vadd.xlane.f32.xlu0 %v1076_v39 }
 0x31c   :  { %v15498_v50 = vpop.eup %14262  ;;  %v1548_v57 = vmul.f32 1.442695, %v1545_v3 }
 0x31d   :  { %v1312_v63 = vsel %vm18772_vm9, %v15498_v50, 0.0  ;;  %v1541_v11 = vpop.xlane.xlu0 %1540 }
 0x31e   :  { %14268 = vpow2.f32 %v1548_v57  ;;  %1313 = vadd.xlane.f32.xlu0 %v1312_v63 }
 0x320   :  { %v15502_v14 = vpop.eup %14264 }
 0x321   :  { %v1315_v37 = vsel %vm18772_vm9, %v15502_v14, 0.0  ;;  %v15508_v13 = vpop.xlane.xlu1 %1543 }
 0x322   :  { %1316 = vadd.xlane.f32.xlu1 %v1315_v37 }
 0x324   :  { %v15506_v27 = vpop.eup %14266 }
 0x325   :  { %v1844_v23 = vpop.xlane.xlu0 %1843  ;;  %v1318_v6 = vsel %vm18769_vm8, %v15506_v27, 0.0 }
 0x326   :  { %v1851_v55 = vsub.f32 %v15367_v43, %v1844_v23  ;;  %1319 = vadd.xlane.f32.xlu0 %v1318_v6 }
 0x328   :  { %v15513_v26 = vpop.eup %14268  ;;  %v1854_v44 = vmul.f32 1.442695, %v1851_v55 }
 0x329   :  { %v1847_v34 = vpop.xlane.xlu1 %1846  ;;  %v1554_v10 = vsel %vm18772_vm9, %v15513_v26, 0.0 }
 0x32a   :  { %14270 = vpow2.f32 %v1854_v44  ;;  %v1852_v52 = vsub.f32 %v15381_v45, %v1847_v34  ;;  %1555 = vadd.xlane.f32.xlu0 %v1554_v10 }
 0x32c   :  { %v1856_v38 = vmul.f32 1.442695, %v1852_v52  ;;  %v14808_v52 = vmov 0  }
 0x32d   :  { %v1850_v39 = vpop.xlane.xlu0 %1849  ;;  %14023 = vset.pattern.permute.xlu0 %v14808_v52  ;;  %14029 = vset.pattern.permute.xlu1 %v14808_v52 }
 0x32e   :  { %14272 = vpow2.f32 %v1856_v38  ;;  %v1853_v3 = vsub.f32 %v15394_v47, %v1850_v39  ;;  %v15538_v38 = vpop.permute.xlu1 %13994 }
 0x330   :  { %v1858_v57 = vmul.f32 1.442695, %v1853_v3 }
 0x331   :  { %v2115_v63 = vpop.xlane.xlu0 %2114 }
 0x332   :  { %14274 = vpow2.f32 %v1858_v57  ;;  %v2122_v43 = vsub.f32 %v15400_v2, %v2115_v63 }
 0x334   :  { %v15520_v37 = vpop.eup %14270  ;;  %v2125_v23 = vmul.f32 1.442695, %v2122_v43 }
 0x335   :  { %v850_v6 = vpop.permute.xlu0 %849  ;;  %v1860_v55 = vsel %vm18772_vm9, %v15520_v37, 0.0 }
 0x336   :  { %14276 = vpow2.f32 %v2125_v23  ;;  %12421 = vmatpush3.msk.msra.mxu0 %vm18773_vm7, %v850_v6  ;;  %1861 = vadd.xlane.f32.xlu1 %v1860_v55  ;;  %v1546_v23 = vsub.f32 %v15346_v33, %v1541_v11 }
 0x337   :  { %13557 = vmatprep.subr.bf16.mxu0 %v18767_v0 }
 0x338   :  { %v15526_v45 = vpop.eup %14272 }
 0x339   :  { %v1863_v47 = vsel %vm18772_vm9, %v15526_v45, 0.0 }
 0x33a   :  { %1864 = vadd.xlane.f32.xlu0 %v1863_v47 }
 0x33c   :  { %v15530_v2 = vpop.eup %14274 }
 0x33d   :  { %v1866_v44 = vsel %vm18769_vm8, %v15530_v2, 0.0 }
 0x33e   :  { %1867 = vadd.xlane.f32.xlu1 %v1866_v44  ;;  %v1550_v44 = vmul.f32 1.442695, %v1546_v23 }
 0x340   :  { %v15534_v34 = vpop.eup %14276 }
 0x341   :  { %v2131_v10 = vsel %vm18772_vm9, %v15534_v34, 0.0 }
 0x342   :  { %2132 = vadd.xlane.f32.xlu1 %v2131_v10 }
 0x35e   :  { %v2118_v39 = vpop.xlane.xlu1 %2117 }
 0x35f   :  { %v2123_v3 = vsub.f32 %v15406_v15, %v2118_v39 }
 0x361   :  { %v2127_v57 = vmul.f32 1.442695, %v2123_v3 }
 0x362   :  { %v2121_v63 = vpop.xlane.xlu1 %2120 }
 0x363   :  { %14278 = vpow2.f32 %v2127_v57  ;;  %v2124_v43 = vsub.f32 %v15410_v25, %v2121_v63 }
 0x365   :  { %v2129_v6 = vmul.f32 1.442695, %v2124_v43 }
 0x366   :  { %v2372_v55 = vpop.xlane.xlu1 %2371  ;;  %v15567_v63 = vpop.xlane.xlu0 %2634 }
 0x367   :  { %14280 = vpow2.f32 %v2129_v6  ;;  %v2379_v47 = vsub.f32 %v15416_v40, %v2372_v55 }
 0x369   :  { %v2382_v10 = vmul.f32 1.442695, %v2379_v47  ;;  %v1547_v47 = vsub.f32 %v15353_v22, %v15508_v13 }
 0x36a   :  { %v2375_v52 = vpop.xlane.xlu1 %2374 }
 0x36b   :  { %14282 = vpow2.f32 %v2382_v10  ;;  %v2380_v12 = vsub.f32 %v15420_v48, %v2375_v52 }
 0x36c   :  { %14284 = vpow2.f32 %v1550_v44 }
 0x36d   :  { %v15545_v0 = vpop.eup %14278  ;;  %v2384_v15 = vmul.f32 1.442695, %v2380_v12 }
 0x36e   :  { %v2134_v25 = vsel %vm18772_vm9, %v15545_v0, 0.0  ;;  %v2378_v43 = vpop.xlane.xlu1 %2377 }
 0x36f   :  { %14286 = vpow2.f32 %v2384_v15  ;;  %2135 = vadd.xlane.f32.xlu1 %v2134_v25  ;;  %v2381_v44 = vsub.f32 %v15424_v42, %v2378_v43  ;;  %v15576_v15 = vsel %vm678_vm10, 1.0, %v14795_v1  ;;  %v1552_v25 = vmul.f32 1.442695, %v1547_v47 }
 0x370   :  { %vm682_vm10 = vcmp.ne.f32.partialorder %v15454_v36, 0.0 }
 0x371   :  { %v15549_v33 = vpop.eup %14280  ;;  %v11443_v17 = vsel %vm682_vm10, 1.0, %v14795_v1 }
 0x372   :  { %v2137_v40 = vsel %vm18769_vm8, %v15549_v33, 0.0  ;;  %v2629_v6 = vpop.xlane.xlu1 %2628  ;;  %v1879_v36 = vrot.slane %v11443_v17, 7 }
 0x373   :  { %2138 = vadd.xlane.f32.xlu1 %v2137_v40  ;;  %v2636_v40 = vsub.f32 %v15428_v9, %v2629_v6 }
 0x375   :  { %v15553_v11 = vpop.eup %14282  ;;  %v2639_v42 = vmul.f32 1.442695, %v2636_v40 }
 0x376   :  { %v2388_v48 = vsel %vm18772_vm9, %v15553_v11, 0.0  ;;  %v15557_v39 = vpop.eup %14284  ;;  %v2632_v10 = vpop.xlane.xlu1 %2631 }
 0x377   :  { %2389 = vadd.xlane.f32.xlu1 %v2388_v48  ;;  %v1557_v3 = vsel %vm18772_vm9, %v15557_v39, 0.0  ;;  %v2637_v22 = vsub.f32 %v15434_v59, %v2632_v10 }
 0x379   :  { %v15559_v12 = vpop.eup %14286  ;;  %v2641_v6 = vmul.f32 1.442695, %v2637_v22 }
 0x37a   :  { %v2391_v57 = vsel %vm18772_vm9, %v15559_v12, 0.0 }
 0x37b   :  { %1558 = vadd.xlane.f32.xlu1 %v1557_v3  ;;  %2392 = vadd.xlane.f32.xlu0 %v2391_v57  ;;  %v13997_v3 = vunpack.i.h.bf16 %v15538_v38  ;;  %v13996_v57 = vunpack.i.l.bf16 %v15538_v38  ;;  %v15596_v38 = vsel %vm680_vm12, 1.0, %v14795_v1  ;;  %vm1710_vm12 = vcmask 130048  }
 0x37d   :  { %v13558_v9 = vpack.c.bf16 %v13997_v3, %v13996_v57 }
 0x38c   :  { %13999 = vrot.lane.b32.xlu1 %v15001_v60, %s14809_s27 }
 0x391   :  { %1092 = vrot.lane.b32.xlu0 %v15003_v62, %s14807_s26 }
 0x393   :  { %v829_v23 = vpop.xlane.xlu0 %828 }
 0x394   :  { %14288 = vrcp.f32 %v829_v23  ;;  %v2386_v23 = vmul.f32 1.442695, %v2381_v44 }
 0x397   :  { %v832_v55 = vpop.xlane.xlu0 %831 }
 0x398   :  { %14290 = vrcp.f32 %v832_v55  ;;  %v15586_v55 = vsel %vm679_vm13, 1.0, %v14795_v1  ;;  %vm683_vm13 = vcmp.ne.f32.partialorder %v15460_v49, 0.0  ;;  %v2638_v49 = vsub.f32 %v15438_v19, %v15567_v63 }
 0x39b   :  { %v835_v52 = vpop.xlane.xlu0 %834 }
 0x39c   :  { %14292 = vrcp.f32 %v835_v52 }
 0x39d   :  { %14294 = vpow2.f32 %v1552_v25 }
 0x39e   :  { %v14289_v48 = vpop.eup %14288  ;;  %14296 = vpow2.f32 %v2386_v23 }
 0x39f   :  { %v839_v7 = vmul.f32 %v14289_v48, %v15576_v15  ;;  %14298 = vpow2.f32 %v2639_v42  ;;  %v1072_v22 = vpop.xlane.xlu1 %1071 }
 0x3a0   :  { %14300 = vpow2.f32 %v2641_v6 }
 0x3a1   :  { %v842_v13 = vmul.f32 %v15468_v56, %v839_v7 }
 0x3a2   :  { %v14291_v43 = vpop.eup %14290 }
 0x3a3   :  { %12423 = vmatmul.mubr.msk.f32.vlgmr.msra.gmra.mrb[24].mxu0 %vm18772_vm9, %v842_v13  ;;  %v840_v59 = vmul.f32 %v14291_v43, %v15586_v55 }
 0x3a4   :  { %13559 = vmatpush3.bf16.msra.mxu0 %v13558_v9  ;;  %12425 = vmatprep.mubr.msk.f32.mxu0 %vm14794_vm0, %v14795_v1 }
 0x3a5   :  { %v843_v41 = vmul.f32 %v15473_v46, %v840_v59  ;;  %12450 = vmatprep.subr.mxu0 %v14795_v1  ;;  %v1876_v59 = vrot.slane %v15596_v38, 7 }
 0x3a6   :  { %v14293_v56 = vpop.eup %14292 }
 0x3a7   :  { %12426 = vmatmul.mubr.msk.f32.gmra.mrb[26].mxu0 %vm18772_vm9, %v843_v41  ;;  %v841_v8 = vmul.f32 %v14293_v56, %v15596_v38  ;;  %v15603_v44 = vpop.eup %14294 }
 0x3a8   :  { %12428 = vmatprep.mubr.msk.f32.mxu0 %vm14794_vm0, %v14795_v1  ;;  %v15606_v46 = vpop.eup %14296  ;;  %v1560_v25 = vsel %vm18769_vm8, %v15603_v44, 0.0 }
 0x3a9   :  { %v844_v47 = vmul.f32 %v15478_v53, %v841_v8  ;;  %v15610_v10 = vpop.eup %14298  ;;  %v2394_v52 = vsel %vm18769_vm8, %v15606_v46, 0.0  ;;  %v1075_v53 = vpop.xlane.xlu0 %1074 }
 0x3aa   :  { %v15616_v40 = vpop.eup %14300  ;;  %v2645_v48 = vsel %vm18772_vm9, %v15610_v10, 0.0 }
 0x3ab   :  { %12429 = vmatmul.mubr.msk.f32.gmra.mrb[28].mxu0 %vm18772_vm9, %v844_v47  ;;  %v2648_v3 = vsel %vm18772_vm9, %v15616_v40, 0.0  ;;  %v11444_v47 = vsel %vm683_vm13, 1.0, %v14795_v1 }
 0x3ac   :  { %12452 = vmatprep.mubr.msk.f32.mxu0 %vm14794_vm0, %v14795_v1 }
 0x3ad   :  { %v1078_v57 = vpop.xlane.xlu0 %1077 }
 0x3af   :  { %v15626_v42 = vpop.xlane.xlu1 %1316 }
 0x3b0   :  { %2395 = vadd.xlane.f32.xlu1 %v2394_v52  ;;  %1561 = vadd.xlane.f32.xlu0 %v1560_v25 }
 0x3b1   :  { %v15622_v23 = vpop.xlane.xlu0 %1313 }
 0x3b4   :  { %2646 = vadd.xlane.f32.xlu1 %v2645_v48  ;;  %2649 = vadd.xlane.f32.xlu0 %v2648_v3  ;;  %v1881_v3 = vrot.slane %v11444_v47, 7 }
 0x3b5   :  { %v15624_v7 = vpop.xlane.xlu0 %1319 }
 0x3b9   :  { %v15630_v13 = vpop.xlane.xlu0 %1555 }
 0x3c3   :  { %v1862_v43 = vpop.xlane.xlu1 %1861 }
 0x3c4   :  { %14302 = vrcp.f32 %v1862_v43 }
 0x3c5   :  { %14004 = vrot.lane.b32.xlu1 %v15001_v60, %s14810_s28  ;;  %v11442_v60 = vsel %vm681_vm15, 1.0, %v14795_v1  ;;  %vm1714_vm15 = vcmask 195584  }
 0x3c6   :  { %v1877_v41 = vrot.slane %v11442_v60, 7  ;;  %v2643_v60 = vmul.f32 1.442695, %v2638_v49 }
 0x3c7   :  { %v1865_v9 = vpop.xlane.xlu0 %1864 }
 0x3c8   :  { %14304 = vrcp.f32 %v1865_v9  ;;  %v15656_v48 = vsel %vm438_vm3, %v1877_v41, %v1879_v36 }
 0x3c9   :  { %1911 = vrot.lane.b32.xlu1 %v15021_v31, %s14806_s25 }
 0x3ca   :  { %1334 = vrot.lane.b32.xlu0 %v15003_v62, %s14809_s27 }
 0x3cb   :  { %v1868_v6 = vpop.xlane.xlu1 %1867 }
 0x3cc   :  { %14306 = vrcp.f32 %v1868_v6  ;;  %v15662_v6 = vsel %vm438_vm3, %v1879_v36, %v1881_v3 }
 0x3cd   :  { %2168 = vrot.lane.b32.xlu1 %v15021_v31, %s14807_s26 }
 0x3ce   :  { %1576 = vrot.lane.b32.xlu0 %v15003_v62, %s14810_s28  ;;  %v14303_v8 = vpop.eup %14302  ;;  %v15651_v62 = vsel %vm438_vm3, %v1876_v59, %v1877_v41 }
 0x3cf   :  { %v2133_v56 = vpop.xlane.xlu1 %2132  ;;  %v1886_v52 = vmul.f32 %v14303_v8, %v15651_v62 }
 0x3d0   :  { %14308 = vrcp.f32 %v2133_v56 }
 0x3d1   :  { %14310 = vpow2.f32 %v2643_v60 }
 0x3d2   :  { %14009 = vrot.lane.b32.xlu0 %v15030_v35, %s14806_s25  ;;  %v14305_v25 = vpop.eup %14304  ;;  %14312 = vrcp.f32 %v1072_v22 }
 0x3d3   :  { %v1887_v43 = vmul.f32 %v14305_v25, %v15656_v48 }
 0x3d6   :  { %14014 = vrot.lane.b32.xlu0 %v15030_v35, %s14807_s26  ;;  %v14307_v9 = vpop.eup %14306 }
 0x3d7   :  { %v1888_v59 = vmul.f32 %v14307_v9, %v15662_v6 }
 0x3da   :  { %1891 = vperm.xlu0 %14023, %v1886_v52   ;;  %v14309_v17 = vpop.eup %14308 }
 0x3db   :  { %v2143_v41 = vmul.f32 %v14309_v17, %v15651_v62  ;;  %v15666_v56 = vpop.eup %14310 }
 0x3dc   :  { %v2651_v19 = vsel %vm18769_vm8, %v15666_v56, 0.0  ;;  %v14313_v47 = vpop.eup %14312 }
 0x3dd   :  { %v1082_v25 = vmul.f32 %v14313_v47, %v15576_v15  ;;  %v18809_v47 = vmov 0.0|0.0  }
 0x3de   :  { %1896 = vperm.xlu0 %14023, %v1887_v43  }
 0x3df   :  { %v1085_v9 = vmul.f32 %v15483_v5, %v1082_v25 }
 0x3e2   :  { %1901 = vperm.xlu0 %14023, %v1888_v59  }
 0x3e6   :  { %2148 = vperm.xlu0 %14023, %v2143_v41  }
 0x3f1   :  { %2652 = vadd.xlane.f32.xlu1 %v2651_v19 }
 0x3fc   :  { %v2136_v63 = vpop.xlane.xlu1 %2135 }
 0x3fd   :  { %14314 = vrcp.f32 %v2136_v63 }
 0x3fe   :  { %14316 = vrcp.f32 %v1075_v53 }
 0x400   :  { %v2139_v8 = vpop.xlane.xlu1 %2138 }
 0x401   :  { %14318 = vrcp.f32 %v2139_v8 }
 0x402   :  { %14019 = vrot.lane.b32.xlu1 %v15030_v35, %s14809_s27  ;;  %14320 = vrcp.f32 %v1078_v57 }
 0x404   :  { %v2390_v36 = vpop.xlane.xlu1 %2389 }
 0x405   :  { %14322 = vrcp.f32 %v2390_v36 }
 0x407   :  { %v14315_v52 = vpop.eup %14314 }
 0x408   :  { %v1559_v3 = vpop.xlane.xlu1 %1558  ;;  %v2393_v49 = vpop.xlane.xlu0 %2392  ;;  %v2144_v43 = vmul.f32 %v14315_v52, %v15656_v48 }
 0x409   :  { %v14317_v22 = vpop.eup %14316  ;;  %14324 = vrcp.f32 %v2393_v49 }
 0x40a   :  { %2153 = vperm.xlu0 %14023, %v2144_v43   ;;  %v1083_v17 = vmul.f32 %v14317_v22, %v15586_v55  ;;  %14326 = vrcp.f32 %v15622_v23 }
 0x40b   :  { %v14319_v53 = vpop.eup %14318  ;;  %14328 = vrcp.f32 %v15626_v42 }
 0x40c   :  { %v14000_v60 = vpop.permute.xlu1 %13999  ;;  %v1093_v59 = vpop.permute.xlu0 %1092  ;;  %v2145_v57 = vmul.f32 %v14319_v53, %v15662_v6  ;;  %v1086_v52 = vmul.f32 %v15488_v16, %v1083_v17  ;;  %14330 = vrcp.f32 %v15624_v7 }
 0x40d   :  { %v14321_v41 = vpop.eup %14320  ;;  %v14002_v19 = vunpack.i.h.bf16 %v14000_v60  ;;  %v14001_v63 = vunpack.i.l.bf16 %v14000_v60  ;;  %12451 = vmatpush3.msk.msra.mxu0 %vm18773_vm7, %v1093_v59 }
 0x40e   :  { %2158 = vperm.xlu0 %14023, %v2145_v57   ;;  %12453 = vmatmul.mubr.msk.f32.vlgmr.msra.gmra.mrb[30].mxu0 %vm18772_vm9, %v1085_v9  ;;  %v1084_v25 = vmul.f32 %v14321_v41, %v15596_v38 }
 0x40f   :  { %v14323_v8 = vpop.eup %14322  ;;  %v13565_v36 = vpack.c.bf16 %v14002_v19, %v14001_v63  ;;  %13564 = vmatprep.subr.bf16.mxu0 %v18809_v47  ;;  %12455 = vmatprep.mubr.msk.f32.mxu0 %vm14794_vm0, %v14795_v1 }
 0x410   :  { %v2400_v5 = vmul.f32 %v14323_v8, %v15651_v62  ;;  %v1087_v43 = vmul.f32 %v15493_v29, %v1084_v25 }
 0x411   :  { %13566 = vmatpush3.bf16.msra.mxu0 %v13565_v36 }
 0x412   :  { %2405 = vperm.xlu0 %14023, %v2400_v5   ;;  %12456 = vmatmul.mubr.msk.f32.gmra.mrb[32].mxu0 %vm18772_vm9, %v1086_v52 }
 0x413   :  { %12458 = vmatprep.mubr.msk.f32.mxu0 %vm14794_vm0, %v14795_v1  ;;  %12480 = vmatprep.subr.mxu0 %v14795_v1  ;;  %v14325_v49 = vpop.eup %14324 }
 0x414   :  { %v2401_v22 = vmul.f32 %v14325_v49, %v15656_v48  ;;  %v14327_v53 = vpop.eup %14326 }
 0x415   :  { %v1324_v9 = vmul.f32 %v14327_v53, %v15576_v15 }
 0x416   :  { %12459 = vmatmul.mubr.msk.f32.gmra.mrb[34].mxu0 %vm18772_vm9, %v1087_v43  ;;  %2410 = vperm.xlu0 %14023, %v2401_v22  }
 0x417   :  { %12482 = vmatprep.mubr.msk.f32.mxu0 %vm14794_vm0, %v14795_v1 }
 0x41a   :  { %2425 = vrot.lane.b32.xlu0 %v15021_v31, %s14809_s27 }
 0x41e   :  { %14025 = vrot.lane.b32.xlu0 %v15030_v35, %s14810_s28  ;;  %v14329_v35 = vpop.eup %14328 }
 0x41f   :  { %v1325_v7 = vmul.f32 %v14329_v35, %v15586_v55  ;;  %v14331_v57 = vpop.eup %14330 }
 0x420   :  { %v1326_v8 = vmul.f32 %v14331_v57, %v15596_v38 }
 0x421   :  { %v1328_v63 = vmul.f32 %v15502_v14, %v1325_v7 }
 0x422   :  { %2682 = vrot.lane.b32.xlu0 %v15021_v31, %s14810_s28  ;;  %v1327_v31 = vmul.f32 %v15498_v50, %v1324_v9  ;;  %v1329_v14 = vmul.f32 %v15506_v27, %v1326_v8 }
 0x43d   :  { %v2396_v16 = vpop.xlane.xlu1 %2395  ;;  %v1562_v29 = vpop.xlane.xlu0 %1561 }
 0x43e   :  { %14332 = vrcp.f32 %v2396_v16 }
 0x43f   :  { %14334 = vrcp.f32 %v15630_v13 }
 0x441   :  { %v2647_v60 = vpop.xlane.xlu1 %2646  ;;  %v2650_v59 = vpop.xlane.xlu0 %2649 }
 0x442   :  { %14336 = vrcp.f32 %v2647_v60 }
 0x443   :  { %14338 = vrcp.f32 %v1559_v3 }
 0x444   :  { %14340 = vrcp.f32 %v2650_v59 }
 0x445   :  { %v14005_v23 = vpop.permute.xlu1 %14004  ;;  %v1335_v42 = vpop.permute.xlu0 %1334  ;;  %14342 = vrcp.f32 %v1562_v29 }
 0x446   :  { %v14007_v17 = vunpack.i.h.bf16 %v14005_v23  ;;  %v14006_v41 = vunpack.i.l.bf16 %v14005_v23  ;;  %12481 = vmatpush3.msk.msra.mxu0 %vm18773_vm7, %v1335_v42 }
 0x447   :  { %12483 = vmatmul.mubr.msk.f32.vlgmr.msra.gmra.mrb[36].mxu0 %vm18772_vm9, %v1327_v31  ;;  %13571 = vmatprep.subr.bf16.mxu0 %v18809_v47 }
 0x448   :  { %v14333_v13 = vpop.eup %14332  ;;  %v13572_v19 = vpack.c.bf16 %v14007_v17, %v14006_v41  ;;  %12485 = vmatprep.mubr.msk.f32.mxu0 %vm14794_vm0, %v14795_v1 }
 0x449   :  { %v1577_v50 = vpop.permute.xlu0 %1576  ;;  %v2402_v3 = vmul.f32 %v14333_v13, %v15662_v6  ;;  %v14335_v36 = vpop.eup %14334 }
 0x44a   :  { %13573 = vmatpush3.bf16.msra.mxu0 %v13572_v19  ;;  %v1566_v25 = vmul.f32 %v14335_v36, %v15576_v15 }
 0x44b   :  { %2415 = vperm.xlu1 %14029, %v2402_v3   ;;  %12486 = vmatmul.mubr.msk.f32.gmra.mrb[38].mxu0 %vm18772_vm9, %v1328_v63 }
 0x44c   :  { %v14337_v5 = vpop.eup %14336  ;;  %12510 = vmatprep.subr.mxu0 %v14795_v1  ;;  %12488 = vmatprep.mubr.msk.f32.mxu0 %vm14794_vm0, %v14795_v1  ;;  %v1569_v15 = vmul.f32 %v15513_v26, %v1566_v25  ;;  %v1912_v26 = vpop.permute.xlu1 %1911 }
 0x44d   :  { %v14339_v52 = vpop.eup %14338  ;;  %v14010_v49 = vpop.permute.xlu0 %14009  ;;  %v2657_v43 = vmul.f32 %v14337_v5, %v15651_v62 }
 0x44e   :  { %v14341_v22 = vpop.eup %14340  ;;  %v14012_v16 = vunpack.i.h.bf16 %v14010_v49  ;;  %v14011_v29 = vunpack.i.l.bf16 %v14010_v49  ;;  %12511 = vmatpush3.msk.msra.mxu0 %vm18773_vm7, %v1577_v50  ;;  %v1567_v27 = vmul.f32 %v14339_v52, %v15586_v55 }
 0x44f   :  { %2662 = vperm.xlu1 %14029, %v2657_v43   ;;  %12489 = vmatmul.mubr.msk.f32.gmra.mrb[40].mxu0 %vm18772_vm9, %v1329_v14  ;;  %v2658_v62 = vmul.f32 %v14341_v22, %v15656_v48  ;;  %v14343_v9 = vpop.eup %14342 }
 0x450   :  { %v13579_v53 = vpack.c.bf16 %v14012_v16, %v14011_v29  ;;  %12512 = vmatprep.mubr.msk.f32.mxu0 %vm14794_vm0, %v14795_v1  ;;  %13578 = vmatprep.subr.bf16.mxu0 %v18809_v47  ;;  %v1570_v59 = vmul.f32 %v15557_v39, %v1567_v27  ;;  %v1568_v35 = vmul.f32 %v14343_v9, %v15596_v38  ;;  %v2169_v57 = vpop.permute.xlu1 %2168 }
 0x451   :  { %v14015_v60 = vpop.permute.xlu0 %14014 }
 0x452   :  { %v1571_v48 = vmul.f32 %v15603_v44, %v1568_v35  ;;  %v14017_v31 = vunpack.i.h.bf16 %v14015_v60  ;;  %v14016_v23 = vunpack.i.l.bf16 %v14015_v60 }
 0x453   :  { %2667 = vperm.xlu1 %14029, %v2658_v62   ;;  %12513 = vmatmul.mubr.msk.f32.vlgmr.msra.gmra.mrb[42].mxu0 %vm18772_vm9, %v1569_v15 }
 0x454   :  { %13580 = vmatpush3.bf16.msra.mxu0 %v13579_v53  ;;  %12515 = vmatprep.mubr.msk.f32.mxu0 %vm14794_vm0, %v14795_v1  ;;  %v13586_v42 = vpack.c.bf16 %v14017_v31, %v14016_v23 }
 0x455   :  { %12540 = vmatprep.subr.mxu0 %v14795_v1 }
 0x457   :  { %12516 = vmatmul.mubr.msk.f32.gmra.mrb[44].mxu0 %vm18772_vm9, %v1570_v59 }
 0x458   :  { %12541 = vmatpush3.msk.msra.mxu0 %vm18773_vm7, %v1912_v26  ;;  %12518 = vmatprep.mubr.msk.f32.mxu0 %vm14794_vm0, %v14795_v1 }
 0x459   :  { %v1892_v55 = vpop.permute.xlu0 %1891  ;;  %13585 = vmatprep.subr.bf16.mxu0 %v18809_v47 }
 0x45a   :  { %v1904_v39 = vmul.f32 %v15520_v37, %v1892_v55 }
 0x45b   :  { %12519 = vmatmul.mubr.msk.f32.gmra.mrb[46].mxu0 %vm18772_vm9, %v1571_v48 }
 0x45c   :  { %12542 = vmatprep.mubr.msk.f32.mxu0 %vm14794_vm0, %v14795_v1 }
 0x45d   :  { %v1897_v38 = vpop.permute.xlu0 %1896 }
 0x45e   :  { %v1905_v44 = vmul.f32 %v15526_v45, %v1897_v38  ;;  %v14778_v38 = vld [vmem:[%s14851_s6] sm:$0xff] }
 0x45f   :  { %12543 = vmatmul.mubr.msk.f32.vlgmr.msra.gmra.mrb[48].mxu0 %vm18772_vm9, %v1904_v39 }
 0x460   :  { %13587 = vmatpush3.bf16.msra.mxu0 %v13586_v42  ;;  %12545 = vmatprep.mubr.msk.f32.mxu0 %vm14794_vm0, %v14795_v1 }
 0x461   :  { %v1902_v7 = vpop.permute.xlu0 %1901  ;;  %12570 = vmatprep.subr.mxu0 %v14795_v1 }
 0x462   :  { %v1906_v37 = vmul.f32 %v15530_v2, %v1902_v7 }
 0x463   :  { %12546 = vmatmul.mubr.msk.f32.gmra.mrb[50].mxu0 %vm18772_vm9, %v1905_v44 }
 0x464   :  { %12571 = vmatpush3.msk.msra.mxu0 %vm18773_vm7, %v2169_v57  ;;  %12548 = vmatprep.mubr.msk.f32.mxu0 %vm14794_vm0, %v14795_v1 }
 0x465   :  { %13592 = vmatprep.subr.bf16.mxu0 %v18809_v47  ;;  %v2149_v17 = vpop.permute.xlu0 %2148 }
 0x466   :  { %v2161_v45 = vmul.f32 %v15534_v34, %v2149_v17 }
 0x467   :  { %12549 = vmatmul.mubr.msk.f32.gmra.mrb[52].mxu0 %vm18772_vm9, %v1906_v37 }
 0x468   :  { %12572 = vmatprep.mubr.msk.f32.mxu0 %vm14794_vm0, %v14795_v1 }
 0x46b   :  { %12573 = vmatmul.mubr.msk.f32.vlgmr.msra.gmra.mrb[54].mxu0 %vm18772_vm9, %v2161_v45 }
 0x46c   :  { %12575 = vmatprep.mubr.msk.f32.mxu0 %vm14794_vm0, %v14795_v1 }
 0x476   :  { %v15764_v41 = vpop.f32.mrb[24].mxu0 }
 0x477   :  { %v12424_v13 = vpop.f32.mrb[25].mxu0 }
 0x47a   :  { %v15766_v19 = vpop.f32.mrb[26].mxu0 }
 0x47b   :  { %v12427_v2 = vpop.f32.mrb[27].mxu0 }
 0x47e   :  { %v2653_v50 = vpop.xlane.xlu1 %2652  ;;  %v15768_v3 = vpop.f32.mrb[28].mxu0 }
 0x47f   :  { %14344 = vrcp.f32 %v2653_v50  ;;  %v12430_v63 = vpop.f32.mrb[29].mxu0 }
 0x482   :  { %v14020_v8 = vpop.permute.xlu1 %14019 }
 0x483   :  { %v14022_v36 = vunpack.i.h.bf16 %v14020_v8  ;;  %v14021_v5 = vunpack.i.l.bf16 %v14020_v8 }
 0x485   :  { %v13593_v34 = vpack.c.bf16 %v14022_v36, %v14021_v5 }
 0x487   :  { %13594 = vmatpush3.bf16.msra.mxu0 %v13593_v34 }
 0x488   :  { %12600 = vmatprep.subr.mxu0 %v14795_v1 }
 0x489   :  { %v14345_v52 = vpop.eup %14344  ;;  %v2154_v25 = vpop.permute.xlu0 %2153 }
 0x48a   :  { %v2162_v49 = vmul.f32 %v15545_v0, %v2154_v25  ;;  %v2659_v43 = vmul.f32 %v14345_v52, %v15662_v6 }
 0x48c   :  { %2672 = vperm.xlu1 %14029, %v2659_v43   ;;  %12576 = vmatmul.mubr.msk.f32.gmra.mrb[56].mxu0 %vm18772_vm9, %v2162_v49 }
 0x48d   :  { %v2159_v14 = vpop.permute.xlu0 %2158  ;;  %12578 = vmatprep.mubr.msk.f32.mxu0 %vm14794_vm0, %v14795_v1 }
 0x48e   :  { %v2163_v22 = vmul.f32 %v15549_v33, %v2159_v14 }
 0x490   :  { %12579 = vmatmul.mubr.msk.f32.gmra.mrb[58].mxu0 %vm18772_vm9, %v2163_v22 }
 0x491   :  { %v2406_v16 = vpop.permute.xlu0 %2405  ;;  %12602 = vmatprep.mubr.msk.f32.mxu0 %vm14794_vm0, %v14795_v1 }
 0x492   :  { %v2418_v0 = vmul.f32 %v15553_v11, %v2406_v16 }
 0x495   :  { %v2411_v29 = vpop.permute.xlu0 %2410 }
 0x496   :  { %v2419_v33 = vmul.f32 %v15559_v12, %v2411_v29 }
 0x499   :  { %v2426_v53 = vpop.permute.xlu0 %2425 }
 0x49a   :  { %12601 = vmatpush3.msk.msra.mxu0 %vm18773_vm7, %v2426_v53 }
 0x49b   :  { %12603 = vmatmul.mubr.msk.f32.vlgmr.msra.gmra.mrb[60].mxu0 %vm18772_vm9, %v2418_v0  ;;  %13599 = vmatprep.subr.bf16.mxu0 %v18809_v47 }
 0x49c   :  { %12605 = vmatprep.mubr.msk.f32.mxu0 %vm14794_vm0, %v14795_v1 }
 0x49d   :  { %v14026_v6 = vpop.permute.xlu0 %14025 }
 0x49e   :  { %v14028_v15 = vunpack.i.h.bf16 %v14026_v6  ;;  %v14027_v62 = vunpack.i.l.bf16 %v14026_v6 }
 0x49f   :  { %12606 = vmatmul.mubr.msk.f32.gmra.mrb[62].mxu0 %vm18772_vm9, %v2419_v33 }
 0x4a0   :  { %v13600_v27 = vpack.c.bf16 %v14028_v15, %v14027_v62  ;;  %12608 = vmatprep.mubr.msk.f32.mxu0 %vm14794_vm0, %v14795_v1 }
 0x4a1   :  { %v2683_v11 = vpop.permute.xlu0 %2682 }
 0x4a2   :  { %13601 = vmatpush3.bf16.msra.mxu0 %v13600_v27 }
 0x4a3   :  { %12630 = vmatprep.subr.mxu0 %v14795_v1 }
 0x4a6   :  { %12631 = vmatpush3.msk.msra.mxu0 %vm18773_vm7, %v2683_v11 }
 0x4ca   :  { %v2416_v9 = vpop.permute.xlu1 %2415 }
 0x4cb   :  { %v2420_v60 = vmul.f32 %v15606_v46, %v2416_v9 }
 0x4cd   :  { %12609 = vmatmul.mubr.msk.f32.gmra.mrb[64].mxu0 %vm18772_vm9, %v2420_v60 }
 0x4ce   :  { %v2663_v12 = vpop.permute.xlu1 %2662  ;;  %12632 = vmatprep.mubr.msk.f32.mxu0 %vm14794_vm0, %v14795_v1 }
 0x4cf   :  { %v2675_v59 = vmul.f32 %v15610_v10, %v2663_v12 }
 0x4d1   :  { %12633 = vmatmul.mubr.msk.f32.vlgmr.msra.gmra.mrb[66].mxu0 %vm18772_vm9, %v2675_v59 }
 0x4d2   :  { %v2668_v35 = vpop.permute.xlu1 %2667  ;;  %12635 = vmatprep.mubr.msk.f32.mxu0 %vm14794_vm0, %v14795_v1 }
 0x4d3   :  { %v2676_v26 = vmul.f32 %v15616_v40, %v2668_v35 }
 0x4d5   :  { %12636 = vmatmul.mubr.msk.f32.gmra.mrb[68].mxu0 %vm18772_vm9, %v2676_v26 }
 0x4d6   :  { %12638 = vmatprep.mubr.msk.f32.mxu0 %vm14794_vm0, %v14795_v1 }
 0x4e1   :  { %v1173_v46 = vpop.f32.mrb[30].mxu0 }
 0x4e2   :  { %1674 = vrot.lane.b32.xlu0 %v1173_v46, %s14811_s29  ;;  %v12454_v55 = vpop.f32.mrb[31].mxu0 }
 0x4e5   :  { %v1178_v10 = vpop.f32.mrb[32].mxu0 }
 0x4e6   :  { %v12457_v48 = vpop.f32.mrb[33].mxu0  ;;  %1676 = vrot.lane.b32.xlu1 %v1178_v10, %s14811_s29 }
 0x4e7   :  { %v14779_v48 = vld [vmem:[%s14861_s9] sm:$0xff] }
 0x4e9   :  { %v1183_v31 = vpop.f32.mrb[34].mxu0 }
 0x4ea   :  { %v12460_v23 = vpop.f32.mrb[35].mxu0  ;;  %1678 = vrot.lane.b32.xlu1 %v1183_v31, %s14811_s29 }
 0x50b   :  { %v2673_v40 = vpop.permute.xlu1 %2672 }
 0x50c   :  { %v2677_v39 = vmul.f32 %v15666_v56, %v2673_v40 }
 0x50e   :  { %12639 = vmatmul.mubr.msk.f32.gmra.mrb[70].mxu0 %vm18772_vm9, %v2677_v39  ;;  %vm18775_vm9 = vcmp.eq.f32.partialorder %v15215_v58, 0.0 }
 0x50f   :  { %12666 = vmatprep.mubr.msk.f32.mxu0 %vm161_vm1, %v14778_v38 }
 0x51a   :  { %v1415_v42 = vpop.f32.mrb[36].mxu0 }
 0x51b   :  { %1686 = vrot.lane.b32.xlu0 %v1415_v42, %s14812_s30  ;;  %v12484_v44 = vpop.f32.mrb[37].mxu0 }
 0x51e   :  { %v1420_v7 = vpop.f32.mrb[38].mxu0 }
 0x51f   :  { %1688 = vrot.lane.b32.xlu1 %v1420_v7, %s14812_s30  ;;  %v12487_v57 = vpop.f32.mrb[39].mxu0 }
 0x522   :  { %v1425_v37 = vpop.f32.mrb[40].mxu0 }
 0x523   :  { %1690 = vrot.lane.b32.xlu0 %v1425_v37, %s14812_s30  ;;  %v12490_v17 = vpop.f32.mrb[41].mxu0 }
 0x524   :  { %v14780_v17 = vld [vmem:[%s14861_s9 + $0x8] sm:$0xff] }
 0x526   :  { %v1657_v45 = vpop.f32.mrb[42].mxu0 }
 0x527   :  { %1698 = vrot.lane.b32.xlu0 %v1657_v45, %s14813_s1  ;;  %v12514_v56 = vpop.f32.mrb[43].mxu0 }
 0x52a   :  { %v1662_v13 = vpop.f32.mrb[44].mxu0 }
 0x52b   :  { %1700 = vrot.lane.b32.xlu1 %v1662_v13, %s14813_s1  ;;  %v12517_v2 = vpop.f32.mrb[45].mxu0 }
 0x52e   :  { %v1667_v50 = vpop.f32.mrb[46].mxu0 }
 0x52f   :  { %v12520_v63 = vpop.f32.mrb[47].mxu0 }
 0x532   :  { %v15816_v8 = vpop.f32.mrb[48].mxu0 }
 0x533   :  { %v12544_v36 = vpop.f32.mrb[49].mxu0 }
 0x536   :  { %v15818_v5 = vpop.f32.mrb[50].mxu0 }
 0x537   :  { %v12547_v34 = vpop.f32.mrb[51].mxu0 }
 0x53a   :  { %v15820_v52 = vpop.f32.mrb[52].mxu0 }
 0x53b   :  { %v12550_v25 = vpop.f32.mrb[53].mxu0 }
 0x53e   :  { %v2249_v49 = vpop.f32.mrb[54].mxu0 }
 0x53f   :  { %2780 = vrot.lane.b32.xlu0 %v2249_v49, %s14811_s29  ;;  %v12574_v43 = vpop.f32.mrb[55].mxu0 }
 0x554   :  { %v1675_v9 = vpop.permute.xlu0 %1674 }
 0x555   :  { %v1707_v46 = vsel %vm708_vm4, %v15764_v41, %v1675_v9 }
 0x558   :  { %v1677_v38 = vpop.permute.xlu1 %1676 }
 0x559   :  { %v1708_v41 = vsel %vm708_vm4, %v15766_v19, %v1677_v38 }
 0x55c   :  { %v1679_v42 = vpop.permute.xlu1 %1678 }
 0x55d   :  { %v1709_v49 = vsel %vm708_vm4, %v15768_v3, %v1679_v42  ;;  %v14784_v42 = vld [vmem:[%s14861_s9 + $0x20] sm:$0xff] }
 0x55f   :  { %v2254_v14 = vpop.f32.mrb[56].mxu0 }
 0x560   :  { %2782 = vrot.lane.b32.xlu1 %v2254_v14, %s14811_s29  ;;  %v12577_v22 = vpop.f32.mrb[57].mxu0 }
 0x563   :  { %v2259_v16 = vpop.f32.mrb[58].mxu0 }
 0x564   :  { %v12580_v29 = vpop.f32.mrb[59].mxu0 }
 0x56e   :  { %v2506_v0 = vpop.f32.mrb[60].mxu0 }
 0x56f   :  { %2792 = vrot.lane.b32.xlu0 %v2506_v0, %s14812_s30  ;;  %v12604_v53 = vpop.f32.mrb[61].mxu0 }
 0x572   :  { %v2511_v33 = vpop.f32.mrb[62].mxu0 }
 0x573   :  { %2794 = vrot.lane.b32.xlu0 %v2511_v33, %s14812_s30  ;;  %v12607_v6 = vpop.f32.mrb[63].mxu0 }
 0x574   :  { %v14781_v6 = vld [vmem:[%s14861_s9 + $0x10] sm:$0xff] }
 0x577   :  { %1702 = vrot.lane.b32.xlu0 %v1667_v50, %s14813_s1 }
 0x58d   :  { %v1687_v59 = vpop.permute.xlu0 %1686 }
 0x58e   :  { %v1711_v55 = vsel %vm1710_vm12, %v1707_v46, %v1687_v59 }
 0x591   :  { %v1689_v44 = vpop.permute.xlu1 %1688 }
 0x592   :  { %v1712_v57 = vsel %vm1710_vm12, %v1708_v41, %v1689_v44 }
 0x595   :  { %v1691_v35 = vpop.permute.xlu0 %1690 }
 0x596   :  { %v1713_v14 = vsel %vm1710_vm12, %v1709_v49, %v1691_v35 }
 0x599   :  { %v1699_v26 = vpop.permute.xlu0 %1698 }
 0x59a   :  { %v1715_v10 = vsel %vm1714_vm15, %v1711_v55, %v1699_v26 }
 0x59b   :  { %v2835_v31 = vadd.f32 %v14779_v48, %v1715_v10 }
 0x59d   :  { %v2843_v23 = vsel %vm161_vm1, %v2835_v31, 0.0  ;;  %v1701_v7 = vpop.permute.xlu1 %1700 }
 0x59e   :  { %v1716_v37 = vsel %vm1714_vm15, %v1712_v57, %v1701_v7 }
 0x59f   :  { %v2836_v45 = vadd.f32 %v14780_v17, %v1716_v37 }
 0x5a0   :  { %v2516_v15 = vpop.f32.mrb[64].mxu0 }
 0x5a1   :  { %2796 = vrot.lane.b32.xlu0 %v2516_v15, %s14812_s30  ;;  %v12610_v62 = vpop.f32.mrb[65].mxu0  ;;  %v2846_v56 = vsel %vm161_vm1, %v2836_v45, 0.0 }
 0x5a4   :  { %v2763_v27 = vpop.f32.mrb[66].mxu0 }
 0x5a5   :  { %2804 = vrot.lane.b32.xlu1 %v2763_v27, %s14813_s1  ;;  %v12634_v11 = vpop.f32.mrb[67].mxu0 }
 0x5a6   :  { %v14782_v11 = vld [vmem:[%s14861_s9 + $0x18] sm:$0xff] }
 0x5a8   :  { %v2768_v60 = vpop.f32.mrb[68].mxu0 }
 0x5a9   :  { %2806 = vrot.lane.b32.xlu1 %v2768_v60, %s14813_s1  ;;  %v12637_v12 = vpop.f32.mrb[69].mxu0 }
 0x5ad   :  { %2784 = vrot.lane.b32.xlu1 %v2259_v16, %s14811_s29 }
 0x5b1   :  { %v2781_v13 = vpop.permute.xlu0 %2780 }
 0x5b2   :  { %v2813_v36 = vsel %vm708_vm4, %v15816_v8, %v2781_v13 }
 0x5c0   :  { %2844 = vadd.xlane.f32.xlu0 %v2843_v23 }
 0x5d2   :  { %v2783_v63 = vpop.permute.xlu1 %2782 }
 0x5d3   :  { %v2814_v16 = vsel %vm708_vm4, %v15818_v5, %v2783_v63 }
 0x5e1   :  { %v2773_v40 = vpop.f32.mrb[70].mxu0  ;;  %v2793_v2 = vpop.permute.xlu0 %2792 }
 0x5e2   :  { %2808 = vrot.lane.b32.xlu1 %v2773_v40, %s14813_s1  ;;  %v12640_v39 = vpop.f32.mrb[71].mxu0  ;;  %v2816_v34 = vsel %vm1710_vm12, %v2813_v36, %v2793_v2  ;;  %v14783_v40 = vld [vmem:[%s14861_s9 + $0x28] sm:$0x3f]  ;;  %s11381_s9 = sld [smem:[%s18763_s0 + %s14814_s5]]  }
 0x5e3   :  { %s11384_s5 = sld [smem:[%s18763_s0 + %s14817_s2]]  }
 0x5e4   :  { %s16709_s2 = sld [smem:[%s18763_s0 + %s14820_s15]]  }
 0x5e5   :  { %v2795_v50 = vpop.permute.xlu0 %2794  ;;  %s11388_s15 = sld [smem:[%s18763_s0 + %s14823_s12]]   ;;  %s14826_s12 = smov 18  }
 0x5e6   :  { %v2817_v8 = vsel %vm1710_vm12, %v2814_v16, %v2795_v50  ;;  %v3127_v16 = vld [vmem:[%s11383_s4 + $0x10] sm:$0xff] }
 0x5e9   :  { %v1703_v19 = vpop.permute.xlu0 %1702 }
 0x5ea   :  { %v1717_v29 = vsel %vm1714_vm15, %v1713_v14, %v1703_v19  ;;  %v3125_v19 = vld [vmem:[%s11383_s4] sm:$0xff] }
 0x606   :  { %2847 = vadd.xlane.f32.xlu1 %v2846_v56 }
 0x613   :  { %v2797_v60 = vpop.permute.xlu0 %2796 }
 0x617   :  { %v2805_v25 = vpop.permute.xlu1 %2804 }
 0x618   :  { %v2819_v43 = vsel %vm1714_vm15, %v2816_v34, %v2805_v25  ;;  %v3126_v25 = vld [vmem:[%s11383_s4 + $0x8] sm:$0xff] }
 0x619   :  { %v2825_v22 = vrot.slane %v2819_v43, 1  ;;  %v13610_v14 = vpack.c.bf16 %v3126_v25, %v3125_v19 }
 0x61b   :  { %v2807_v0 = vpop.permute.xlu1 %2806  ;;  %v2834_v53 = vsel %vm18773_vm7, %v1717_v29, %v2825_v22  ;;  %13611 = vmatprep.subr.bf16.mxu0 %v13610_v14  ;;  %v3128_v29 = vld [vmem:[%s11383_s4 + $0x18] sm:$0xff] }
 0x61c   :  { %v2820_v33 = vsel %vm1714_vm15, %v2817_v8, %v2807_v0  ;;  %v2837_v3 = vadd.f32 %v14781_v6, %v2834_v53  ;;  %13613 = vmatpush3.bf16.msra.mxu0 %v13610_v14  ;;  %v13614_v0 = vpack.c.bf16 %v3128_v29, %v3127_v16  ;;  %v14785_v53 = vld [vmem:[%s14851_s6 + $0x8] sm:$0xff]  ;;  %v14787_v6 = vld [vmem:[%s14851_s6 + $0x18] sm:$0xff] }
 0x61d   :  { %v2826_v15 = vrot.slane %v2820_v33, 1  ;;  %v14786_v33 = vld [vmem:[%s14851_s6 + $0x10] sm:$0xff] }
 0x61e   :  { %v2849_v62 = vsel %vm161_vm1, %v2837_v3, 0.0  ;;  %13615 = vmatprep.subr.bf16.mxu0 %v13614_v0 }
 0x61f   :  { %2850 = vadd.xlane.f32.xlu0 %v2849_v62  ;;  %v2827_v27 = vsel %vm18773_vm7, %v2825_v22, %v2826_v15  ;;  %v2785_v12 = vpop.permute.xlu1 %2784 }
 0x620   :  { %v2838_v5 = vadd.f32 %v14782_v11, %v2827_v27  ;;  %v2815_v35 = vsel %vm708_vm4, %v15820_v52, %v2785_v12  ;;  %13617 = vmatpush3.bf16.msra.mxu0 %v13614_v0  ;;  %v2991_v27 = vld [vmem:[%s11381_s9 + $0x10] sm:$0xff]  ;;  %v2992_v11 = vld [vmem:[%s11381_s9 + $0x18] sm:$0xff] }
 0x621   :  { %v2818_v46 = vsel %vm1710_vm12, %v2815_v35, %v2797_v60  ;;  %13622 = vmatprep.subr.bf16.mxu0 %v18809_v47 }
 0x622   :  { %v2852_v9 = vsel %vm161_vm1, %v2838_v5, 0.0 }
 0x623   :  { %2853 = vadd.xlane.f32.xlu0 %v2852_v9  ;;  %12667 = vmatmul.mubr.msk.f32.vlgmr.msra.gmra.mrb[72].mxu0 %vm161_vm1, %v14785_v53 }
 0x624   :  { %12669 = vmatprep.mubr.msk.f32.mxu0 %vm161_vm1, %v14786_v33 }
 0x627   :  { %12670 = vmatmul.mubr.msk.f32.gmra.mrb[74].mxu0 %vm161_vm1, %v14787_v6 }
 0x628   :  { %12689 = vmatprep.mubr.msk.f32.mxu0 %vm14794_vm0, %v14795_v1 }
 0x64d   :  { %v2845_v59 = vpop.xlane.xlu0 %2844 }
 0x64e   :  { %v2862_v26 = vmul.f32 0.03125, %v2845_v59 }
 0x650   :  { %v15866_v23 = vsub.f32 %v2835_v31, %v2862_v26 }
 0x652   :  { %v2874_v41 = vmul.f32 %v15866_v23, %v15866_v23 }
 0x654   :  { %v2809_v55 = vpop.permute.xlu1 %2808  ;;  %v2880_v31 = vsel %vm161_vm1, %v2874_v41, 0.0 }
 0x655   :  { %v2821_v10 = vsel %vm1714_vm15, %v2818_v46, %v2809_v55 }
 0x656   :  { %v2828_v48 = vrot.slane %v2821_v10, 1 }
 0x658   :  { %v15869_v39 = vadd.f32 %v14783_v40, %v2828_v48  ;;  %v2829_v38 = vsel %vm18773_vm7, %v2826_v15, %v2828_v48  ;;  %v2990_v15 = vld [vmem:[%s11381_s9 + $0x8] sm:$0xff]  ;;  %vm18774_vm7 = vcmp.eq.f32.partialorder %v15223_v61, 0.0 }
 0x659   :  { %v15873_v44 = vadd.f32 %v14784_v42, %v2829_v38 }
 0x65a   :  { %v2858_v52 = vsel %vm674_vm6, %v15869_v39, 0.0 }
 0x65b   :  { %2859 = vadd.xlane.f32.xlu0 %v2858_v52  ;;  %v2855_v7 = vsel %vm161_vm1, %v15873_v44, 0.0 }
 0x65c   :  { %2856 = vadd.xlane.f32.xlu1 %v2855_v7 }
 0x660   :  { %2881 = vadd.xlane.f32.xlu1 %v2880_v31  ;;  %v15932_v31 = vld [vmem:[%s11379_s13] ss:$0 sm:$0xff]  ;;  %s14838_s13 = smov 31  }
 0x693   :  { %v2848_v57 = vpop.xlane.xlu1 %2847 }
 0x694   :  { %v2863_v37 = vmul.f32 0.03125, %v2848_v57  ;;  %v2953_v57 = vmul.f32 %v15932_v31, %v15866_v23 }
 0x696   :  { %v15882_v17 = vsub.f32 %v2836_v45, %v2863_v37 }
 0x698   :  { %v2875_v56 = vmul.f32 %v15882_v17, %v15882_v17  ;;  %v2954_v16 = vmul.f32 %v15932_v31, %v15882_v17 }
 0x69a   :  { %v2883_v13 = vsel %vm161_vm1, %v2875_v56, 0.0  ;;  %v15936_v56 = vld [vmem:[%s11380_s17] ss:$0 sm:$0xff]  ;;  %s14839_s17 = smov 32  }
 0x69b   :  { %2884 = vadd.xlane.f32.xlu0 %v2883_v13 }
 0x6ac   :  { %v2851_v2 = vpop.xlane.xlu0 %2850 }
 0x6ad   :  { %v2864_v50 = vmul.f32 0.03125, %v2851_v2 }
 0x6af   :  { %v15891_v63 = vsub.f32 %v2837_v3, %v2864_v50  ;;  %v2989_v3 = vld [vmem:[%s11381_s9] sm:$0xff]  ;;  %s14837_s9 = smov 29  }
 0x6b0   :  { %v2854_v36 = vpop.xlane.xlu0 %2853  ;;  %v13602_v62 = vpack.c.bf16 %v2990_v15, %v2989_v3 }
 0x6b1   :  { %v2865_v34 = vmul.f32 0.03125, %v2854_v36  ;;  %v2876_v45 = vmul.f32 %v15891_v63, %v15891_v63 }
 0x6b2   :  { %13603 = vmatprep.subr.bf16.mxu1 %v13602_v62 }
 0x6b3   :  { %v15895_v49 = vsub.f32 %v2838_v5, %v2865_v34  ;;  %v2886_v43 = vsel %vm161_vm1, %v2876_v45, 0.0  ;;  %13605 = vmatpush3.bf16.msra.mxu1 %v13602_v62  ;;  %v13606_v5 = vpack.c.bf16 %v2992_v11, %v2991_v27 }
 0x6b4   :  { %2887 = vadd.xlane.f32.xlu1 %v2886_v43 }
 0x6b5   :  { %v2877_v22 = vmul.f32 %v15895_v49, %v15895_v49  ;;  %13607 = vmatprep.subr.bf16.mxu1 %v13606_v5 }
 0x6b7   :  { %v2889_v8 = vsel %vm161_vm1, %v2877_v22, 0.0  ;;  %13609 = vmatpush3.bf16.msra.mxu1 %v13606_v5 }
 0x6b8   :  { %2890 = vadd.xlane.f32.xlu0 %v2889_v8  ;;  %13618 = vmatprep.subr.bf16.mxu1 %v18809_v47 }
 0x6e8   :  { %v2860_v9 = vpop.xlane.xlu0 %2859 }
 0x6e9   :  { %v2867_v60 = vmul.f32 0.03125, %v2860_v9  ;;  %v2857_v12 = vpop.xlane.xlu1 %2856 }
 0x6ea   :  { %v2866_v59 = vmul.f32 0.03125, %v2857_v12 }
 0x6eb   :  { %v15915_v35 = vsub.f32 %v15869_v39, %v2867_v60 }
 0x6ec   :  { %v15918_v26 = vsub.f32 %v15873_v44, %v2866_v59 }
 0x6ed   :  { %v2882_v46 = vpop.xlane.xlu1 %2881  ;;  %v2879_v55 = vmul.f32 %v15915_v35, %v15915_v35 }
 0x6ee   :  { %v2899_v10 = vmul.f32 0.032258064, %v2882_v46  ;;  %v2878_v48 = vmul.f32 %v15918_v26, %v15918_v26  ;;  %v2955_v46 = vmul.f32 %v15932_v31, %v15891_v63 }
 0x6ef   :  { %v2895_v40 = vsel %vm674_vm6, %v2879_v55, 0.0 }
 0x6f0   :  { %14346 = vrsqrt.f32 %v2899_v10  ;;  %2896 = vadd.xlane.f32.xlu0 %v2895_v40  ;;  %v2892_v38 = vsel %vm161_vm1, %v2878_v48, 0.0  ;;  %vm2907_vm10 = vcmp.eq.f32.partialorder %v2899_v10, inf  ;;  %v2910_v44 = vand.u32 2147483648, %v2899_v10 }
 0x6f1   :  { %2893 = vadd.xlane.f32.xlu1 %v2892_v38  ;;  %vm2909_vm13 = vcmp.eq.f32.partialorder %v2899_v10, 0.0  ;;  %v2956_v48 = vmul.f32 %v15932_v31, %v15895_v49 }
 0x6fa   :  { %v14347_v39 = vpop.eup %14346 }
 0x6fb   :  { %v2906_v42 = vmul.f32 %v14347_v39, %v2899_v10 }
 0x6fd   :  { %v2908_v52 = vsel %vm2907_vm10, %v2899_v10, %v2906_v42 }
 0x6fe   :  { %v2911_v7 = vsel %vm2909_vm13, %v2910_v44, %v2908_v52 }
 0x6ff   :  { %v2959_v41 = vadd.f32 1e-08, %v2911_v7 }
 0x701   :  { %14348 = vrcp.f32 %v2959_v41 }
 0x70b   :  { %v14349_v37 = vpop.eup %14348 }
 0x70c   :  { %v2966_v13 = vmul.f32 %v14349_v37, %v2953_v57 }
 0x70e   :  { %v15939_v2 = vadd.f32 %v15936_v56, %v2966_v13 }
 0x710   :  { %12649 = vmatprep.mubr.msk.f32.mxu1 %vm161_vm1, %v15939_v2 }
 0x728   :  { %v2885_v50 = vpop.xlane.xlu0 %2884 }
 0x729   :  { %v2900_v36 = vmul.f32 0.032258064, %v2885_v50 }
 0x72b   :  { %14350 = vrsqrt.f32 %v2900_v36  ;;  %vm2914_vm10 = vcmp.eq.f32.partialorder %v2900_v36, inf  ;;  %v2917_v19 = vand.u32 2147483648, %v2900_v36  ;;  %vm2916_vm13 = vcmp.eq.f32.partialorder %v2900_v36, 0.0 }
 0x735   :  { %v14351_v34 = vpop.eup %14350 }
 0x736   :  { %v2913_v45 = vmul.f32 %v14351_v34, %v2900_v36  ;;  %v11534_v34 = vld [vmem:[%s11384_s5] ss:$0 sm:$0xff]  ;;  %s14836_s5 = smov 27  }
 0x738   :  { %v2915_v25 = vsel %vm2914_vm10, %v2900_v36, %v2913_v45 }
 0x739   :  { %v2918_v23 = vsel %vm2916_vm13, %v2917_v19, %v2915_v25 }
 0x73a   :  { %v2960_v43 = vadd.f32 1e-08, %v2918_v23  ;;  %v12668_v23 = vpop.f32.mrb[72].mxu0 }
 0x73c   :  { %14352 = vrcp.f32 %v2960_v43 }
 0x741   :  { %v2888_v14 = vpop.xlane.xlu1 %2887 }
 0x742   :  { %v2901_v22 = vmul.f32 0.032258064, %v2888_v14  ;;  %v3208_v14 = vadd.f32 %v12668_v23, %v11534_v34 }
 0x744   :  { %14354 = vrsqrt.f32 %v2901_v22  ;;  %vm2921_vm10 = vcmp.eq.f32.partialorder %v2901_v22, inf  ;;  %v2924_v15 = vand.u32 2147483648, %v2901_v22  ;;  %vm2923_vm13 = vcmp.eq.f32.partialorder %v2901_v22, 0.0 }
 0x745   :  { %v2891_v29 = vpop.xlane.xlu0 %2890 }
 0x746   :  { %v14353_v8 = vpop.eup %14352  ;;  %v2902_v0 = vmul.f32 0.032258064, %v2891_v29 }
 0x747   :  { %v2968_v53 = vmul.f32 %v14353_v8, %v2954_v16  ;;  %v3222_v8 = vmax.f32 %v3208_v14, 0.0 }
 0x748   :  { %14356 = vrsqrt.f32 %v2902_v0  ;;  %vm2928_vm8 = vcmp.eq.f32.partialorder %v2902_v0, inf  ;;  %v2931_v9 = vand.u32 2147483648, %v2902_v0  ;;  %vm2930_vm14 = vcmp.eq.f32.partialorder %v2902_v0, 0.0 }
 0x749   :  { %v15946_v33 = vadd.f32 %v15936_v56, %v2968_v53 }
 0x74b   :  { %12650 = vmatmul.mubr.msk.f32.vlgmr.msra.gmra.mrb[54].mxu1 %vm161_vm1, %v15946_v33 }
 0x74e   :  { %v14355_v6 = vpop.eup %14354 }
 0x74f   :  { %v2920_v3 = vmul.f32 %v14355_v6, %v2901_v22 }
 0x751   :  { %v2922_v62 = vsel %vm2921_vm10, %v2901_v22, %v2920_v3  ;;  %v3202_v22 = vpop.f32.mrb[73].mxu0 }
 0x752   :  { %v14357_v27 = vpop.eup %14356  ;;  %v2925_v11 = vsel %vm2923_vm13, %v2924_v15, %v2922_v62  ;;  %v3203_v29 = vadd.f32 %v11534_v34, %v3202_v22  ;;  %v2958_v15 = vmul.f32 %v15932_v31, %v15915_v35  ;;  %v2957_v62 = vmul.f32 %v15932_v31, %v15918_v26  ;;  %v12671_v35 = vpop.f32.mrb[74].mxu0 }
 0x753   :  { %v2927_v17 = vmul.f32 %v14357_v27, %v2902_v0  ;;  %v2961_v5 = vadd.f32 1e-08, %v2925_v11  ;;  %v3218_v26 = vadd.f32 %v12671_v35, %v11534_v34  ;;  %v3212_v31 = vpop.f32.mrb[75].mxu0 }
 0x755   :  { %v2929_v60 = vsel %vm2928_vm8, %v2902_v0, %v2927_v17  ;;  %14358 = vrcp.f32 %v2961_v5  ;;  %v3221_v0 = vmax.f32 %v3203_v29, 0.0 }
 0x756   :  { %v2932_v12 = vsel %vm2930_vm14, %v2931_v9, %v2929_v60  ;;  %v3213_v60 = vadd.f32 %v11534_v34, %v3212_v31 }
 0x757   :  { %v2962_v59 = vadd.f32 1e-08, %v2932_v12  ;;  %v15967_v53 = vpack.i.bf16 %v3222_v8, %v3221_v0  ;;  %v13619_v6 = vpack.c.bf16 %v3222_v8, %v3221_v0  ;;  %v3224_v12 = vmax.f32 %v3218_v26, 0.0 }
 0x759   :  { %14360 = vrcp.f32 %v2962_v59  ;;  %14031 = vrot.lane.b32.xlu1 %v15967_v53, %s14802_s21  ;;  %13621 = vmatpush3.bf16.xpose.msk.msra.mxu1 %vm15104_vm5, %v13619_v6  ;;  %v3223_v59 = vmax.f32 %v3213_v60, 0.0 }
 0x75a   :  { %13625 = vmatprep.subr.bf16.mxu1 %v18809_v47 }
 0x75d   :  { %14036 = vrot.lane.b32.xlu1 %v15967_v53, %s14804_s23 }
 0x75f   :  { %v14359_v55 = vpop.eup %14358 }
 0x760   :  { %v2970_v10 = vmul.f32 %v14359_v55, %v2955_v46  ;;  %v15992_v46 = vpack.i.bf16 %v3224_v12, %v3223_v59  ;;  %v15994_v55 = vpack.c.bf16 %v3224_v12, %v3223_v59 }
 0x762   :  { %v15955_v40 = vadd.f32 %v15936_v56, %v2970_v10 }
 0x763   :  { %v14361_v38 = vpop.eup %14360 }
 0x764   :  { %12652 = vmatprep.mubr.msk.f32.mxu1 %vm161_vm1, %v15955_v40  ;;  %v2972_v39 = vmul.f32 %v14361_v38, %v2956_v48 }
 0x766   :  { %v15960_v42 = vadd.f32 %v15936_v56, %v2972_v39 }
 0x768   :  { %12653 = vmatmul.mubr.msk.f32.gmra.mrb[56].mxu1 %vm161_vm1, %v15960_v42 }
 0x77d   :  { %v2897_v63 = vpop.xlane.xlu0 %2896 }
 0x77e   :  { %v2904_v44 = vmul.f32 0.032258064, %v2897_v63  ;;  %v2894_v52 = vpop.xlane.xlu1 %2893 }
 0x77f   :  { %v2903_v7 = vmul.f32 0.032258064, %v2894_v52 }
 0x780   :  { %14362 = vrsqrt.f32 %v2904_v44  ;;  %vm2942_vm14 = vcmp.eq.f32.partialorder %v2904_v44, inf  ;;  %v2945_v57 = vand.u32 2147483648, %v2904_v44  ;;  %vm2944_vm8 = vcmp.eq.f32.partialorder %v2904_v44, 0.0 }
 0x781   :  { %14364 = vrsqrt.f32 %v2903_v7  ;;  %vm2935_vm10 = vcmp.eq.f32.partialorder %v2903_v7, inf  ;;  %v2938_v45 = vand.u32 2147483648, %v2903_v7  ;;  %vm2937_vm13 = vcmp.eq.f32.partialorder %v2903_v7, 0.0 }
 0x78a   :  { %v14363_v49 = vpop.eup %14362 }
 0x78b   :  { %v2941_v41 = vmul.f32 %v14363_v49, %v2904_v44  ;;  %v14365_v37 = vpop.eup %14364 }
 0x78c   :  { %v2934_v50 = vmul.f32 %v14365_v37, %v2903_v7 }
 0x78d   :  { %v2943_v13 = vsel %vm2942_vm14, %v2904_v44, %v2941_v41  ;;  %vm18788_vm14 = vcmp.eq.f32.partialorder %v14963_v28, 0.0 }
 0x78e   :  { %v2946_v36 = vsel %vm2944_vm8, %v2945_v57, %v2943_v13  ;;  %v2936_v25 = vsel %vm2935_vm10, %v2903_v7, %v2934_v50  ;;  %vm18787_vm8 = vcmp.eq.f32.partialorder %v14965_v30, 0.0  ;;  %vm18777_vm10 = vcmask 129024  }
 0x78f   :  { %v2964_v19 = vadd.f32 1e-08, %v2946_v36  ;;  %v2939_v43 = vsel %vm2937_vm13, %v2938_v45, %v2936_v25  ;;  %vm18786_vm13 = vcmp.eq.f32.partialorder %v14967_v32, 0.0 }
 0x790   :  { %v2963_v16 = vadd.f32 1e-08, %v2939_v43 }
 0x791   :  { %14366 = vrcp.f32 %v2964_v19 }
 0x792   :  { %14368 = vrcp.f32 %v2963_v16 }
 0x79b   :  { %v14367_v3 = vpop.eup %14366 }
 0x79c   :  { %v14369_v27 = vpop.eup %14368  ;;  %v2976_v11 = vmul.f32 %v14367_v3, %v2958_v15 }
 0x79d   :  { %v2974_v17 = vmul.f32 %v14369_v27, %v2957_v62 }
 0x79e   :  { %v15984_v9 = vadd.f32 %v15936_v56, %v2976_v11 }
 0x79f   :  { %v15981_v5 = vadd.f32 %v15936_v56, %v2974_v17  ;;  %v11527_v56 = vld [vmem:[%s11382_s10] ss:$0 sm:$0xff] }
 0x7a1   :  { %12655 = vmatprep.mubr.msk.f32.mxu1 %vm161_vm1, %v15981_v5 }
 0x7a2   :  { %12656 = vmatmul.mubr.msk.f32.gmra.mrb[58].mxu1 %vm161_vm1, %v15984_v9 }
 0x7a3   :  { %12676 = vmatprep.mubr.msk.f32.mxu1 %vm14794_vm0, %v14795_v1 }
 0x7cb   :  { %v14032_v48 = vpop.permute.xlu1 %14031 }
 0x7cc   :  { %v14034_v63 = vunpack.i.h.bf16 %v14032_v48  ;;  %v14033_v44 = vunpack.i.l.bf16 %v14032_v48 }
 0x7ce   :  { %v13626_v57 = vpack.c.bf16 %v14034_v63, %v14033_v44 }
 0x7cf   :  { %v14037_v26 = vpop.permute.xlu1 %14036 }
 0x7d0   :  { %v14039_v31 = vunpack.i.h.bf16 %v14037_v26  ;;  %v14038_v60 = vunpack.i.l.bf16 %v14037_v26 }
 0x7d2   :  { %v13633_v12 = vpack.c.bf16 %v14039_v31, %v14038_v60 }
 0x81e   :  { %v12651_v10 = vpop.f32.mrb[54].mxu1 }
 0x81f   :  { %v3090_v38 = vadd.f32 %v12651_v10, %v11527_v56  ;;  %v3084_v39 = vpop.f32.mrb[55].mxu1 }
 0x820   :  { %v3085_v52 = vadd.f32 %v11527_v56, %v3084_v39 }
 0x821   :  { %v3114_v7 = vmax.f32 %v3090_v38, 0.0 }
 0x822   :  { %v3113_v49 = vmax.f32 %v3085_v52, 0.0 }
 0x823   :  { %v3120_v41 = vmul.f32 0.35355338, %v3114_v7 }
 0x824   :  { %v3119_v37 = vmul.f32 0.35355338, %v3113_v49 }
 0x825   :  { %3493 = vrot.lane.b32.xlu1 %v3120_v41, %s14802_s21 }
 0x826   :  { %3491 = vrot.lane.b32.xlu0 %v3119_v37, %s14802_s21  ;;  %12677 = vmatmul.mubr.msk.f32.vlgmr.msra.gmra.mrb[60].mxu1 %vm708_vm4, %v3119_v37 }
 0x827   :  { %12679 = vmatprep.mubr.msk.f32.mxu1 %vm14794_vm0, %v14795_v1  ;;  %13628 = vmatpush3.bf16.xpose.msk.msra.mxu1 %vm15104_vm5, %v13626_v57 }
 0x828   :  { %13632 = vmatprep.subr.bf16.mxu1 %v18809_v47 }
 0x829   :  { %3725 = vrot.lane.b32.xlu1 %v3119_v37, %s14804_s23 }
 0x82a   :  { %12680 = vmatmul.mubr.msk.f32.gmra.mrb[62].mxu1 %vm708_vm4, %v3120_v41 }
 0x82b   :  { %12682 = vmatprep.mubr.msk.f32.mxu1 %vm14794_vm0, %v14795_v1 }
 0x82d   :  { %3727 = vrot.lane.b32.xlu1 %v3120_v41, %s14804_s23 }
 0x831   :  { %3959 = vrot.lane.b32.xlu1 %v3119_v37, %s14805_s24 }
 0x83b   :  { %v12654_v13 = vpop.f32.mrb[56].mxu1 }
 0x83c   :  { %v3100_v50 = vadd.f32 %v12654_v13, %v11527_v56  ;;  %v3094_v36 = vpop.f32.mrb[57].mxu1 }
 0x83d   :  { %v3095_v34 = vadd.f32 %v11527_v56, %v3094_v36 }
 0x83e   :  { %v3116_v45 = vmax.f32 %v3100_v50, 0.0 }
 0x83f   :  { %v3115_v19 = vmax.f32 %v3095_v34, 0.0 }
 0x840   :  { %v3122_v25 = vmul.f32 0.35355338, %v3116_v45 }
 0x841   :  { %v3121_v23 = vmul.f32 0.35355338, %v3115_v19 }
 0x842   :  { %v4242_v43 = vrot.slane %v3122_v25, 7 }
 0x843   :  { %3963 = vrot.lane.b32.xlu1 %v3121_v23, %s14805_s24  ;;  %3495 = vrot.lane.b32.xlu0 %v3121_v23, %s14802_s21  ;;  %v4241_v14 = vrot.slane %v3121_v23, 7 }
 0x844   :  { %12683 = vmatmul.mubr.msk.f32.gmra.mrb[64].mxu1 %vm708_vm4, %v3121_v23 }
 0x845   :  { %v16017_v22 = vsel %vm438_vm3, %v4241_v14, %v4242_v43  ;;  %12702 = vmatprep.mubr.msk.f32.mxu1 %vm14794_vm0, %v14795_v1 }
 0x847   :  { %4503 = vrot.lane.b32.xlu1 %v16017_v22, %s14802_s21  ;;  %14041 = vrot.lane.b32.xlu0 %v15967_v53, %s14805_s24 }
 0x84b   :  { %3729 = vrot.lane.b32.xlu0 %v3121_v23, %s14804_s23 }
 0x84f   :  { %3961 = vrot.lane.b32.xlu0 %v3120_v41, %s14805_s24 }
 0x853   :  { %14046 = vrot.lane.b32.xlu0 %v15992_v46, %s14802_s21 }
 0x857   :  { %14051 = vrot.lane.b32.xlu0 %v15992_v46, %s14804_s23 }
 0x875   :  { %v12657_v16 = vpop.f32.mrb[58].mxu1 }
 0x876   :  { %v3110_v29 = vadd.f32 %v12657_v16, %v11527_v56  ;;  %v3104_v8 = vpop.f32.mrb[59].mxu1 }
 0x877   :  { %v3105_v0 = vadd.f32 %v11527_v56, %v3104_v8 }
 0x878   :  { %v3118_v6 = vmax.f32 %v3110_v29, 0.0 }
 0x879   :  { %v3117_v3 = vmax.f32 %v3105_v0, 0.0 }
 0x87a   :  { %v3124_v15 = vmul.f32 0.35355338, %v3118_v6 }
 0x87b   :  { %v3123_v62 = vmul.f32 0.35355338, %v3117_v3 }
 0x87c   :  { %v4246_v27 = vrot.slane %v3124_v15, 7 }
 0x87d   :  { %v4244_v11 = vrot.slane %v3123_v62, 7 }
 0x87f   :  { %v4245_v17 = vsel %vm438_vm3, %v4242_v43, %v4244_v11  ;;  %v16033_v35 = vsel %vm438_vm3, %v4244_v11, %v4246_v27 }
 0x880   :  { %4505 = vrot.lane.b32.xlu1 %v4245_v17, %s14802_s21  ;;  %4507 = vrot.lane.b32.xlu0 %v16033_v35, %s14802_s21 }
 0x884   :  { %4752 = vrot.lane.b32.xlu1 %v16017_v22, %s14804_s23  ;;  %14056 = vrot.lane.b32.xlu0 %v15992_v46, %s14805_s24 }
 0x888   :  { %4754 = vrot.lane.b32.xlu1 %v4245_v17, %s14804_s23  ;;  %4756 = vrot.lane.b32.xlu0 %v16033_v35, %s14804_s23 }
 0x88c   :  { %5001 = vrot.lane.b32.xlu1 %v16017_v22, %s14805_s24  ;;  %5003 = vrot.lane.b32.xlu0 %v4245_v17, %s14805_s24 }
 0x890   :  { %5005 = vrot.lane.b32.xlu1 %v16033_v35, %s14805_s24 }
 0x897   :  { %v3494_v56 = vpop.permute.xlu1 %3493 }
 0x898   :  { %v3492_v59 = vpop.permute.xlu0 %3491 }
 0x899   :  { %12703 = vmatmul.mubr.msk.f32.vlgmr.msra.gmra.mrb[66].mxu1 %vm708_vm4, %v3492_v59 }
 0x89a   :  { %13635 = vmatpush3.bf16.xpose.msk.msra.mxu1 %vm15104_vm5, %v13633_v12  ;;  %12705 = vmatprep.mubr.msk.f32.mxu1 %vm14794_vm0, %v14795_v1 }
 0x89b   :  { %13639 = vmatprep.subr.bf16.mxu1 %v18809_v47  ;;  %v3726_v48 = vpop.permute.xlu1 %3725 }
 0x89d   :  { %12706 = vmatmul.mubr.msk.f32.gmra.mrb[68].mxu1 %vm708_vm4, %v3494_v56 }
 0x89e   :  { %12708 = vmatprep.mubr.msk.f32.mxu1 %vm14794_vm0, %v14795_v1 }
 0x89f   :  { %v3728_v52 = vpop.permute.xlu1 %3727 }
 0x8a3   :  { %v3960_v41 = vpop.permute.xlu1 %3959 }
 0x8b5   :  { %v3496_v10 = vpop.permute.xlu0 %3495  ;;  %v3964_v50 = vpop.permute.xlu1 %3963 }
 0x8b6   :  { %12709 = vmatmul.mubr.msk.f32.gmra.mrb[70].mxu1 %vm708_vm4, %v3496_v10 }
 0x8b7   :  { %12728 = vmatprep.mubr.msk.f32.mxu1 %vm14794_vm0, %v14795_v1 }
 0x8b9   :  { %v14042_v38 = vpop.permute.xlu0 %14041  ;;  %v4504_v25 = vpop.permute.xlu1 %4503 }
 0x8ba   :  { %v14044_v39 = vunpack.i.h.bf16 %v14042_v38  ;;  %v14043_v63 = vunpack.i.l.bf16 %v14042_v38  ;;  %12729 = vmatmul.mubr.msk.f32.vlgmr.msra.gmra.mrb[72].mxu1 %vm708_vm4, %v3726_v48 }
 0x8bb   :  { %12731 = vmatprep.mubr.msk.f32.mxu1 %vm14794_vm0, %v14795_v1 }
 0x8bc   :  { %v13640_v44 = vpack.c.bf16 %v14044_v39, %v14043_v63 }
 0x8bd   :  { %v3730_v7 = vpop.permute.xlu0 %3729 }
 0x8be   :  { %12732 = vmatmul.mubr.msk.f32.gmra.mrb[74].mxu1 %vm708_vm4, %v3728_v52 }
 0x8bf   :  { %13642 = vmatpush3.bf16.xpose.msk.msra.mxu1 %vm15104_vm5, %v13640_v44  ;;  %12734 = vmatprep.mubr.msk.f32.mxu1 %vm14794_vm0, %v14795_v1 }
 0x8c0   :  { %13646 = vmatprep.subr.bf16.mxu1 %v18809_v47 }
 0x8c1   :  { %v3962_v49 = vpop.permute.xlu0 %3961 }
 0x8c2   :  { %12735 = vmatmul.mubr.msk.f32.gmra.mrb[76].mxu1 %vm708_vm4, %v3730_v7 }
 0x8c3   :  { %12754 = vmatprep.mubr.msk.f32.mxu1 %vm14794_vm0, %v14795_v1 }
 0x8c5   :  { %v14047_v57 = vpop.permute.xlu0 %14046 }
 0x8c6   :  { %12755 = vmatmul.mubr.msk.f32.vlgmr.msra.gmra.mrb[78].mxu1 %vm708_vm4, %v3960_v41  ;;  %v14049_v37 = vunpack.i.h.bf16 %v14047_v57  ;;  %v14048_v13 = vunpack.i.l.bf16 %v14047_v57 }
 0x8c7   :  { %13649 = vmatpush3.bf16.xpose.msk.msra.mxu1 %vm15104_vm5, %v15994_v55  ;;  %12757 = vmatprep.mubr.msk.f32.mxu1 %vm14794_vm0, %v14795_v1 }
 0x8c8   :  { %13653 = vmatprep.subr.bf16.mxu1 %v18809_v47  ;;  %v13654_v55 = vpack.c.bf16 %v14049_v37, %v14048_v13 }
 0x8c9   :  { %v14052_v36 = vpop.permute.xlu0 %14051 }
 0x8ca   :  { %12758 = vmatmul.mubr.msk.f32.gmra.mrb[80].mxu1 %vm708_vm4, %v3962_v49  ;;  %v14054_v34 = vunpack.i.h.bf16 %v14052_v36  ;;  %v14053_v45 = vunpack.i.l.bf16 %v14052_v36 }
 0x8cb   :  { %12760 = vmatprep.mubr.msk.f32.mxu1 %vm14794_vm0, %v14795_v1 }
 0x8cc   :  { %v13661_v19 = vpack.c.bf16 %v14054_v34, %v14053_v45 }
 0x8ce   :  { %12761 = vmatmul.mubr.msk.f32.gmra.mrb[82].mxu1 %vm708_vm4, %v3964_v50 }
 0x8cf   :  { %12780 = vmatprep.mubr.msk.f32.mxu1 %vm14794_vm0, %v14795_v1 }
 0x8d2   :  { %12781 = vmatmul.mubr.msk.f32.vlgmr.msra.gmra.mrb[84].mxu1 %vm708_vm4, %v16017_v22 }
 0x8d3   :  { %12783 = vmatprep.mubr.msk.f32.mxu1 %vm14794_vm0, %v14795_v1  ;;  %13656 = vmatpush3.bf16.xpose.msk.msra.mxu1 %vm15104_vm5, %v13654_v55 }
 0x8d4   :  { %13660 = vmatprep.subr.bf16.mxu1 %v18809_v47 }
 0x8d6   :  { %12784 = vmatmul.mubr.msk.f32.gmra.mrb[86].mxu1 %vm708_vm4, %v4245_v17 }
 0x8d7   :  { %12786 = vmatprep.mubr.msk.f32.mxu1 %vm14794_vm0, %v14795_v1 }
 0x8da   :  { %12787 = vmatmul.mubr.msk.f32.gmra.mrb[88].mxu1 %vm708_vm4, %v16033_v35 }
 0x8db   :  { %12806 = vmatprep.mubr.msk.f32.mxu1 %vm14794_vm0, %v14795_v1 }
 0x8de   :  { %12807 = vmatmul.mubr.msk.f32.vlgmr.msra.gmra.mrb[90].mxu1 %vm708_vm4, %v4504_v25 }
 0x8df   :  { %13663 = vmatpush3.bf16.xpose.msk.msra.mxu1 %vm15104_vm5, %v13661_v19  ;;  %12809 = vmatprep.mubr.msk.f32.mxu1 %vm14794_vm0, %v14795_v1 }
 0x8e0   :  { %13667 = vmatprep.subr.bf16.mxu1 %v18809_v47 }
 0x8f2   :  { %v4506_v23 = vpop.permute.xlu1 %4505  ;;  %v4508_v43 = vpop.permute.xlu0 %4507 }
 0x8f3   :  { %12810 = vmatmul.mubr.msk.f32.gmra.mrb[92].mxu1 %vm708_vm4, %v4506_v23 }
 0x8f4   :  { %12812 = vmatprep.mubr.msk.f32.mxu1 %vm14794_vm0, %v14795_v1 }
 0x8f6   :  { %v14057_v14 = vpop.permute.xlu0 %14056  ;;  %v4753_v8 = vpop.permute.xlu1 %4752 }
 0x8f7   :  { %v14059_v22 = vunpack.i.h.bf16 %v14057_v14  ;;  %v14058_v16 = vunpack.i.l.bf16 %v14057_v14  ;;  %12813 = vmatmul.mubr.msk.f32.gmra.mrb[94].mxu1 %vm708_vm4, %v4508_v43 }
 0x8f8   :  { %12832 = vmatprep.mubr.msk.f32.mxu1 %vm14794_vm0, %v14795_v1 }
 0x8f9   :  { %v3342_v29 = vpop.f32.mrb[60].mxu1  ;;  %v13668_v3 = vpack.c.bf16 %v14059_v22, %v14058_v16 }
 0x8fa   :  { %v16114_v0 = vsel %vm18788_vm14, -4.2949673e+09, %v3342_v29  ;;  %v12678_v6 = vpop.f32.mrb[61].mxu1  ;;  %v4755_v35 = vpop.permute.xlu1 %4754 }
 0x8fb   :  { %v3359_v15 = vsel %vm1710_vm12, %v16114_v0, -inf  ;;  %12833 = vmatmul.mubr.msk.f32.vlgmr.msra.gmra.mrb[96].mxu1 %vm708_vm4, %v4753_v8  ;;  %v4757_v26 = vpop.permute.xlu0 %4756 }
 0x8fc   :  { %3360 = vmax.xlane.f32.xlu0 %v3359_v15  ;;  %13670 = vmatpush3.bf16.xpose.msk.msra.mxu1 %vm15104_vm5, %v13668_v3 }
 0x8fd   :  { %v3347_v62 = vpop.f32.mrb[62].mxu1  ;;  %12835 = vmatprep.mubr.msk.f32.mxu1 %vm14794_vm0, %v14795_v1 }
 0x8fe   :  { %v16126_v27 = vsel %vm18787_vm8, -4.2949673e+09, %v3347_v62  ;;  %v12681_v11 = vpop.f32.mrb[63].mxu1  ;;  %v5002_v31 = vpop.permute.xlu1 %5001 }
 0x8ff   :  { %v3362_v17 = vsel %vm1710_vm12, %v16126_v27, -inf  ;;  %12836 = vmatmul.mubr.msk.f32.gmra.mrb[98].mxu1 %vm708_vm4, %v4755_v35  ;;  %v5004_v60 = vpop.permute.xlu0 %5003 }
 0x900   :  { %3363 = vmax.xlane.f32.xlu0 %v3362_v17  ;;  %12838 = vmatprep.mubr.msk.f32.mxu1 %vm14794_vm0, %v14795_v1 }
 0x902   :  { %v5006_v12 = vpop.permute.xlu1 %5005 }
 0x903   :  { %12839 = vmatmul.mubr.msk.f32.gmra.mrb[100].mxu1 %vm708_vm4, %v4757_v26 }
 0x904   :  { %12858 = vmatprep.mubr.msk.f32.mxu1 %vm14794_vm0, %v14795_v1 }
 0x907   :  { %12859 = vmatmul.mubr.msk.f32.vlgmr.msra.gmra.mrb[102].mxu1 %vm708_vm4, %v5002_v31 }
 0x908   :  { %12861 = vmatprep.mubr.msk.f32.mxu1 %vm14794_vm0, %v14795_v1 }
 0x90b   :  { %12862 = vmatmul.mubr.msk.f32.gmra.mrb[104].mxu1 %vm708_vm4, %v5004_v60 }
 0x90c   :  { %12864 = vmatprep.mubr.msk.f32.mxu1 %vm14794_vm0, %v14795_v1 }
 0x90f   :  { %12865 = vmatmul.mubr.msk.f32.gmra.mrb[106].mxu1 %vm708_vm4, %v5006_v12 }
 0x917   :  { %v3352_v59 = vpop.f32.mrb[64].mxu1 }
 0x918   :  { %v16148_v56 = vsel %vm18786_vm13, -4.2949673e+09, %v3352_v59  ;;  %v12684_v10 = vpop.f32.mrb[65].mxu1 }
 0x919   :  { %v3366_v48 = vsel %vm18777_vm10, %v16148_v56, -inf }
 0x91a   :  { %3367 = vmax.xlane.f32.xlu0 %v3366_v48 }
 0x96c   :  { %v3577_v38 = vpop.f32.mrb[66].mxu1 }
 0x96d   :  { %v16154_v39 = vsel %vm18788_vm14, -4.2949673e+09, %v3577_v38  ;;  %v12704_v63 = vpop.f32.mrb[67].mxu1 }
 0x96e   :  { %v3594_v44 = vsel %vm1710_vm12, %v16154_v39, -inf }
 0x96f   :  { %3595 = vmax.xlane.f32.xlu0 %v3594_v44 }
 0x970   :  { %v3582_v52 = vpop.f32.mrb[68].mxu1 }
 0x971   :  { %v16160_v7 = vsel %vm18787_vm8, -4.2949673e+09, %v3582_v52  ;;  %v12707_v49 = vpop.f32.mrb[69].mxu1 }
 0x972   :  { %v3597_v41 = vsel %vm1710_vm12, %v16160_v7, -inf }
 0x973   :  { %3598 = vmax.xlane.f32.xlu0 %v3597_v41 }
 0x989   :  { %v3587_v57 = vpop.f32.mrb[70].mxu1 }
 0x98a   :  { %v16166_v37 = vsel %vm18786_vm13, -4.2949673e+09, %v3587_v57  ;;  %v12710_v13 = vpop.f32.mrb[71].mxu1 }
 0x98b   :  { %v3600_v50 = vsel %vm18777_vm10, %v16166_v37, -inf }
 0x98c   :  { %3601 = vmax.xlane.f32.xlu0 %v3600_v50  ;;  %v3361_v50 = vpop.xlane.xlu0 %3360 }
 0x98d   :  { %v3811_v55 = vpop.f32.mrb[72].mxu1 }
 0x98e   :  { %v12730_v36 = vpop.f32.mrb[73].mxu1  ;;  %v16179_v62 = vsel %vm18788_vm14, -4.2949673e+09, %v3811_v55 }
 0x98f   :  { %v3828_v26 = vsel %vm1710_vm12, %v16179_v62, -inf  ;;  %v3231_v36 = vsel %vm161_vm1, %v15955_v40, 0.0 }
 0x991   :  { %v3816_v34 = vpop.f32.mrb[74].mxu1 }
 0x992   :  { %v12733_v45 = vpop.f32.mrb[75].mxu1  ;;  %v16217_v13 = vsel %vm18787_vm8, -4.2949673e+09, %v3816_v34 }
 0x993   :  { %v3831_v55 = vsel %vm1710_vm12, %v16217_v13, -inf }
 0x995   :  { %v3821_v19 = vpop.f32.mrb[76].mxu1 }
 0x996   :  { %v12736_v25 = vpop.f32.mrb[77].mxu1  ;;  %v16192_v60 = vsel %vm18786_vm13, -4.2949673e+09, %v3821_v19  ;;  %v3369_v19 = vsub.f32 %v16114_v0, %v3361_v50 }
 0x997   :  { %v3834_v48 = vsel %vm18777_vm10, %v16192_v60, -inf  ;;  %v3364_v25 = vpop.xlane.xlu0 %3363 }
 0x999   :  { %v4045_v23 = vpop.f32.mrb[78].mxu1 }
 0x99a   :  { %v12756_v43 = vpop.f32.mrb[79].mxu1  ;;  %v16225_v45 = vsel %vm18788_vm14, -4.2949673e+09, %v4045_v23  ;;  %v3370_v23 = vsub.f32 %v16126_v27, %v3364_v25 }
 0x99b   :  { %v4062_v34 = vsel %vm1710_vm12, %v16225_v45, -inf  ;;  %v3225_v43 = vsel %vm161_vm1, %v15939_v2, 0.0 }
 0x99c   :  { %v3374_v0 = vmul.f32 1.442695, %v3370_v23 }
 0x99d   :  { %v4050_v14 = vpop.f32.mrb[80].mxu1 }
 0x99e   :  { %v12759_v22 = vpop.f32.mrb[81].mxu1  ;;  %v16205_v63 = vsel %vm18787_vm8, -4.2949673e+09, %v4050_v14 }
 0x99f   :  { %v4065_v41 = vsel %vm1710_vm12, %v16205_v63, -inf  ;;  %v3372_v22 = vmul.f32 1.442695, %v3369_v19 }
 0x9a1   :  { %v4055_v16 = vpop.f32.mrb[82].mxu1  ;;  %14370 = vpow2.f32 %v3372_v22 }
 0x9a2   :  { %v12762_v29 = vpop.f32.mrb[83].mxu1  ;;  %v16234_v14 = vsel %vm18786_vm13, -4.2949673e+09, %v4055_v16  ;;  %14372 = vpow2.f32 %v3374_v0 }
 0x9a3   :  { %v4068_v29 = vsel %vm18777_vm10, %v16234_v14, -inf }
 0x9a5   :  { %v4326_v8 = vpop.f32.mrb[84].mxu1 }
 0x9a6   :  { %v16173_v6 = vsel %vm18776_vm11, -4.2949673e+09, %v4326_v8  ;;  %v12782_v3 = vpop.f32.mrb[85].mxu1 }
 0x9a7   :  { %v4343_v15 = vsel %vm1710_vm12, %v16173_v6, -inf  ;;  %v3368_v8 = vpop.xlane.xlu0 %3367  ;;  %v3234_v3 = vsel %vm161_vm1, %v15960_v42, 0.0 }
 0x9a8   :  { %4344 = vmax.xlane.f32.xlu0 %v4343_v15  ;;  %v3371_v16 = vsub.f32 %v16148_v56, %v3368_v8  ;;  %v3237_v15 = vsel %vm161_vm1, %v15981_v5, 0.0 }
 0x9a9   :  { %v4331_v11 = vpop.f32.mrb[86].mxu1 }
 0x9aa   :  { %v16184_v17 = vsel %vm18775_vm9, -4.2949673e+09, %v4331_v11  ;;  %v12785_v35 = vpop.f32.mrb[87].mxu1 }
 0x9ab   :  { %v4346_v31 = vsel %vm1710_vm12, %v16184_v17, -inf }
 0x9ac   :  { %3829 = vmax.xlane.f32.xlu0 %v3828_v26  ;;  %4347 = vmax.xlane.f32.xlu1 %v4346_v31  ;;  %v3376_v26 = vmul.f32 1.442695, %v3371_v16 }
 0x9ad   :  { %v4336_v12 = vpop.f32.mrb[88].mxu1 }
 0x9ae   :  { %v16197_v59 = vsel %vm18774_vm7, -4.2949673e+09, %v4336_v12  ;;  %v12788_v10 = vpop.f32.mrb[89].mxu1  ;;  %v3240_v12 = vsel %vm674_vm6, %v15984_v9, 0.0  ;;  %14374 = vpow2.f32 %v3376_v26 }
 0x9af   :  { %v4349_v38 = vsel %vm18777_vm10, %v16197_v59, -inf  ;;  %v16252_v10 = vpop.eup %14370 }
 0x9b0   :  { %3835 = vmax.xlane.f32.xlu1 %v3834_v48  ;;  %4350 = vmax.xlane.f32.xlu0 %v4349_v38  ;;  %v3378_v38 = vsel %vm1710_vm12, %v16252_v10, 0.0 }
 0x9b1   :  { %v4589_v44 = vpop.f32.mrb[90].mxu1 }
 0x9b2   :  { %v16209_v52 = vsel %vm18776_vm11, -4.2949673e+09, %v4589_v44  ;;  %v12808_v49 = vpop.f32.mrb[91].mxu1  ;;  %v16256_v44 = vpop.eup %14372 }
 0x9b3   :  { %v4606_v57 = vsel %vm1710_vm12, %v16209_v52, -inf }
 0x9b4   :  { %4066 = vmax.xlane.f32.xlu1 %v4065_v41  ;;  %4607 = vmax.xlane.f32.xlu0 %v4606_v57  ;;  %v3381_v57 = vsel %vm1710_vm12, %v16256_v44, 0.0 }
 0x9b8   :  { %3232 = vadd.xlane.f32.xlu1 %v3231_v36  ;;  %3832 = vmax.xlane.f32.xlu0 %v3831_v55  ;;  %v3228_v36 = vsel %vm161_vm1, %v15946_v33, 0.0  ;;  %v16262_v19 = vpop.eup %14374 }
 0x9bc   :  { %3226 = vadd.xlane.f32.xlu1 %v3225_v43  ;;  %4063 = vmax.xlane.f32.xlu0 %v4062_v34  ;;  %v3384_v43 = vsel %vm18777_vm10, %v16262_v19, 0.0 }
 0x9c0   :  { %4069 = vmax.xlane.f32.xlu0 %v4068_v29 }
 0x9c4   :  { %3235 = vadd.xlane.f32.xlu0 %v3234_v3 }
 0x9c6   :  { %v4594_v11 = vpop.f32.mrb[92].mxu1 }
 0x9c7   :  { %v16246_v27 = vsel %vm18775_vm9, -4.2949673e+09, %v4594_v11  ;;  %v12811_v35 = vpop.f32.mrb[93].mxu1 }
 0x9c8   :  { %3238 = vadd.xlane.f32.xlu0 %v3237_v15  ;;  %v4609_v31 = vsel %vm1710_vm12, %v16246_v27, -inf }
 0x9c9   :  { %4610 = vmax.xlane.f32.xlu1 %v4609_v31 }
 0x9ca   :  { %v4599_v56 = vpop.f32.mrb[94].mxu1 }
 0x9cb   :  { %v12814_v48 = vpop.f32.mrb[95].mxu1 }
 0x9cc   :  { %3241 = vadd.xlane.f32.xlu0 %v3240_v12 }
 0x9ce   :  { %v4838_v49 = vpop.f32.mrb[96].mxu1 }
 0x9cf   :  { %v12834_v41 = vpop.f32.mrb[97].mxu1 }
 0x9d0   :  { %3379 = vadd.xlane.f32.xlu0 %v3378_v38  ;;  %v16274_v38 = vsel %vm18774_vm7, -4.2949673e+09, %v4599_v56 }
 0x9d2   :  { %v4843_v50 = vpop.f32.mrb[98].mxu1 }
 0x9d3   :  { %v12837_v55 = vpop.f32.mrb[99].mxu1  ;;  %v16290_v56 = vsel %vm18775_vm9, -4.2949673e+09, %v4843_v50 }
 0x9d4   :  { %3382 = vadd.xlane.f32.xlu0 %v3381_v57  ;;  %v16284_v57 = vsel %vm18776_vm11, -4.2949673e+09, %v4838_v49 }
 0x9d5   :  { %v4855_v55 = vsel %vm1710_vm12, %v16284_v57, -inf }
 0x9d6   :  { %v4848_v25 = vpop.f32.mrb[100].mxu1 }
 0x9d7   :  { %v12840_v34 = vpop.f32.mrb[101].mxu1 }
 0x9d8   :  { %3229 = vadd.xlane.f32.xlu0 %v3228_v36  ;;  %v4858_v36 = vsel %vm1710_vm12, %v16290_v56, -inf  ;;  %v16296_v34 = vsel %vm18774_vm7, -4.2949673e+09, %v4848_v25 }
 0x9da   :  { %v5087_v22 = vpop.f32.mrb[102].mxu1 }
 0x9db   :  { %v12860_v23 = vpop.f32.mrb[103].mxu1  ;;  %v16303_v50 = vsel %vm18776_vm11, -4.2949673e+09, %v5087_v22 }
 0x9dc   :  { %3385 = vadd.xlane.f32.xlu0 %v3384_v43  ;;  %v4861_v23 = vsel %vm18777_vm10, %v16296_v34, -inf }
 0x9de   :  { %v5092_v29 = vpop.f32.mrb[104].mxu1 }
 0x9df   :  { %v12863_v0 = vpop.f32.mrb[105].mxu1  ;;  %v16309_v25 = vsel %vm18775_vm9, -4.2949673e+09, %v5092_v29 }
 0x9e2   :  { %v5097_v8 = vpop.f32.mrb[106].mxu1 }
 0x9e3   :  { %v12866_v3 = vpop.f32.mrb[107].mxu1 }
 0x9e4   :  { %v5104_v3 = vsel %vm1710_vm12, %v16303_v50, -inf }
 0x9fc   :  { %v3596_v16 = vpop.xlane.xlu0 %3595 }
 0x9fd   :  { %v3603_v15 = vsub.f32 %v16154_v39, %v3596_v16  ;;  %v4612_v39 = vsel %vm18777_vm10, %v16274_v38, -inf  ;;  %v16315_v16 = vsel %vm18774_vm7, -4.2949673e+09, %v5097_v8 }
 0x9ff   :  { %v3606_v11 = vmul.f32 1.442695, %v3603_v15  ;;  %v5110_v15 = vsel %vm18777_vm10, %v16315_v16, -inf }
 0xa00   :  { %v3599_v35 = vpop.xlane.xlu0 %3598 }
 0xa01   :  { %14376 = vpow2.f32 %v3606_v11  ;;  %v3604_v26 = vsub.f32 %v16160_v7, %v3599_v35 }
 0xa03   :  { %v3608_v31 = vmul.f32 1.442695, %v3604_v26 }
 0xa05   :  { %14378 = vpow2.f32 %v3608_v31 }
 0xa0b   :  { %v16268_v12 = vpop.eup %14376 }
 0xa0c   :  { %v3612_v48 = vsel %vm1710_vm12, %v16268_v12, 0.0 }
 0xa0d   :  { %3613 = vadd.xlane.f32.xlu1 %v3612_v48 }
 0xa0f   :  { %v16276_v41 = vpop.eup %14378 }
 0xa10   :  { %v3615_v7 = vsel %vm1710_vm12, %v16276_v41, 0.0 }
 0xa11   :  { %3616 = vadd.xlane.f32.xlu0 %v3615_v7  ;;  %4613 = vmax.xlane.f32.xlu1 %v4612_v39 }
 0xa15   :  { %4856 = vmax.xlane.f32.xlu1 %v4855_v55 }
 0xa19   :  { %v3602_v43 = vpop.xlane.xlu0 %3601  ;;  %4859 = vmax.xlane.f32.xlu1 %v4858_v36 }
 0xa1a   :  { %v3605_v49 = vsub.f32 %v16166_v37, %v3602_v43  ;;  %v5107_v37 = vsel %vm1710_vm12, %v16309_v25, -inf }
 0xa1c   :  { %v3610_v0 = vmul.f32 1.442695, %v3605_v49 }
 0xa1d   :  { %4862 = vmax.xlane.f32.xlu1 %v4861_v23 }
 0xa1e   :  { %14380 = vpow2.f32 %v3610_v0 }
 0xa21   :  { %5105 = vmax.xlane.f32.xlu1 %v5104_v3 }
 0xa25   :  { %5108 = vmax.xlane.f32.xlu1 %v5107_v37 }
 0xa28   :  { %v16317_v22 = vpop.eup %14380 }
 0xa29   :  { %5111 = vmax.xlane.f32.xlu1 %v5110_v15  ;;  %v3618_v11 = vsel %vm18777_vm10, %v16317_v22, 0.0 }
 0xa2a   :  { %3619 = vadd.xlane.f32.xlu0 %v3618_v11 }
 0xa35   :  { %v4345_v29 = vpop.xlane.xlu0 %4344 }
 0xa36   :  { %v4352_v35 = vsub.f32 %v16173_v6, %v4345_v29 }
 0xa38   :  { %v4355_v26 = vmul.f32 1.442695, %v4352_v35 }
 0xa39   :  { %v3830_v31 = vpop.xlane.xlu0 %3829  ;;  %v4348_v48 = vpop.xlane.xlu1 %4347 }
 0xa3a   :  { %14382 = vpow2.f32 %v4355_v26  ;;  %v3837_v8 = vsub.f32 %v16179_v62, %v3830_v31  ;;  %v4353_v39 = vsub.f32 %v16184_v17, %v4348_v48 }
 0xa3c   :  { %v3840_v7 = vmul.f32 1.442695, %v3837_v8  ;;  %v4357_v55 = vmul.f32 1.442695, %v4353_v39 }
 0xa3d   :  { %v4351_v36 = vpop.xlane.xlu0 %4350  ;;  %v3836_v43 = vpop.xlane.xlu1 %3835 }
 0xa3e   :  { %14384 = vpow2.f32 %v3840_v7  ;;  %v3839_v0 = vsub.f32 %v16192_v60, %v3836_v43  ;;  %v4354_v39 = vsub.f32 %v16197_v59, %v4351_v36 }
 0xa3f   :  { %14386 = vpow2.f32 %v4357_v55 }
 0xa40   :  { %v3844_v17 = vmul.f32 1.442695, %v3839_v0  ;;  %v4359_v55 = vmul.f32 1.442695, %v4354_v39 }
 0xa41   :  { %v4608_v49 = vpop.xlane.xlu0 %4607  ;;  %v4067_v48 = vpop.xlane.xlu1 %4066 }
 0xa42   :  { %v4615_v43 = vsub.f32 %v16209_v52, %v4608_v49 }
 0xa44   :  { %v16326_v23 = vpop.eup %14382 }
 0xa45   :  { %v3833_v6 = vpop.xlane.xlu0 %3832  ;;  %v4361_v3 = vsel %vm1710_vm12, %v16326_v23, 0.0  ;;  %v16352_v8 = vpop.xlane.xlu1 %3232 }
 0xa46   :  { %v3838_v37 = vsub.f32 %v16217_v13, %v3833_v6  ;;  %4362 = vadd.xlane.f32.xlu1 %v4361_v3  ;;  %v4618_v6 = vmul.f32 1.442695, %v4615_v43  ;;  %vm3245_vm9 = vcmp.ne.f32.partialorder %v16352_v8, 0.0 }
 0xa48   :  { %v16332_v62 = vpop.eup %14384  ;;  %v3842_v15 = vmul.f32 1.442695, %v3838_v37 }
 0xa49   :  { %v16334_v11 = vpop.eup %14386  ;;  %v3846_v29 = vsel %vm1710_vm12, %v16332_v62, 0.0  ;;  %v16355_v7 = vpop.xlane.xlu1 %3226 }
 0xa4a   :  { %14388 = vpow2.f32 %v3842_v15  ;;  %v4364_v60 = vsel %vm1710_vm12, %v16334_v11, 0.0  ;;  %3847 = vadd.xlane.f32.xlu1 %v3846_v29  ;;  %v4064_v49 = vpop.xlane.xlu0 %4063 }
 0xa4b   :  { %4365 = vadd.xlane.f32.xlu0 %v4364_v60  ;;  %14390 = vpow2.f32 %v3844_v17 }
 0xa4c   :  { %14392 = vpow2.f32 %v4359_v55 }
 0xa4d   :  { %14394 = vpow2.f32 %v4618_v6 }
 0xa4e   :  { %v4070_v55 = vpop.xlane.xlu0 %4069 }
 0xa54   :  { %v16340_v35 = vpop.eup %14388 }
 0xa55   :  { %v3849_v13 = vsel %vm1710_vm12, %v16340_v35, 0.0  ;;  %v16344_v26 = vpop.eup %14390 }
 0xa56   :  { %3850 = vadd.xlane.f32.xlu1 %v3849_v13  ;;  %v3852_v31 = vsel %vm18777_vm10, %v16344_v26, 0.0  ;;  %v4611_v0 = vpop.xlane.xlu1 %4610  ;;  %v16359_v17 = vpop.eup %14392 }
 0xa57   :  { %v4616_v3 = vsub.f32 %v16246_v27, %v4611_v0  ;;  %v4367_v15 = vsel %vm18777_vm10, %v16359_v17, 0.0  ;;  %v16363_v29 = vpop.eup %14394 }
 0xa58   :  { %v4624_v59 = vsel %vm1710_vm12, %v16363_v29, 0.0 }
 0xa59   :  { %v4620_v37 = vmul.f32 1.442695, %v4616_v3  ;;  %v4071_v3 = vsub.f32 %v16225_v45, %v4064_v49 }
 0xa5a   :  { %3853 = vadd.xlane.f32.xlu1 %v3852_v31  ;;  %v4072_v31 = vsub.f32 %v16205_v63, %v4067_v48  ;;  %v4073_v63 = vsub.f32 %v16234_v14, %v4070_v55 }
 0xa5b   :  { %14396 = vpow2.f32 %v4620_v37 }
 0xa5c   :  { %v4076_v6 = vmul.f32 1.442695, %v4072_v31  ;;  %v4078_v45 = vmul.f32 1.442695, %v4073_v63 }
 0xa61   :  { %14061 = vrot.lane.b32.xlu0 %v15967_v53, %s14800_s19 }
 0xa65   :  { %v16367_v52 = vpop.eup %14396 }
 0xa66   :  { %v4627_v27 = vsel %vm1710_vm12, %v16367_v52, 0.0 }
 0xa6b   :  { %14066 = vrot.lane.b32.xlu1 %v15967_v53, %s14799_s18 }
 0xa8f   :  { %4368 = vadd.xlane.f32.xlu1 %v4367_v15 }
 0xa93   :  { %4625 = vadd.xlane.f32.xlu1 %v4624_v59 }
 0xa97   :  { %4628 = vadd.xlane.f32.xlu1 %v4627_v27  ;;  %v16378_v27 = vpop.xlane.xlu0 %3235 }
 0xa98   :  { %vm3246_vm7 = vcmp.ne.f32.partialorder %v16378_v27, 0.0 }
 0xa9a   :  { %v16371_v36 = vpop.xlane.xlu1 %3613 }
 0xa9b   :  { %v16384_v31 = vpop.xlane.xlu0 %3238 }
 0xa9c   :  { %vm3247_vm11 = vcmp.ne.f32.partialorder %v16384_v31, 0.0 }
 0xa9d   :  { %v16443_v8 = vsel %vm3247_vm11, 1.0, %v14795_v1 }
 0xa9e   :  { %v4614_v60 = vpop.xlane.xlu1 %4613 }
 0xa9f   :  { %v4617_v13 = vsub.f32 %v16274_v38, %v4614_v60  ;;  %v4074_v38 = vmul.f32 1.442695, %v4071_v3 }
 0xaa1   :  { %v4622_v39 = vmul.f32 1.442695, %v4617_v13 }
 0xaa2   :  { %v4857_v43 = vpop.xlane.xlu1 %4856 }
 0xaa3   :  { %14398 = vpow2.f32 %v4622_v39  ;;  %v4864_v0 = vsub.f32 %v16284_v57, %v4857_v43 }
 0xaa5   :  { %v4867_v37 = vmul.f32 1.442695, %v4864_v0 }
 0xaa6   :  { %v4860_v15 = vpop.xlane.xlu1 %4859 }
 0xaa7   :  { %14400 = vpow2.f32 %v4867_v37  ;;  %v4865_v59 = vsub.f32 %v16290_v56, %v4860_v15  ;;  %v16396_v37 = vpop.xlane.xlu0 %3241 }
 0xaa8   :  { %14402 = vpow2.f32 %v4076_v6  ;;  %vm3248_vm11 = vcmp.ne.f32.partialorder %v16396_v37, 0.0 }
 0xaa9   :  { %v4869_v48 = vmul.f32 1.442695, %v4865_v59 }
 0xaaa   :  { %v4863_v60 = vpop.xlane.xlu1 %4862 }
 0xaab   :  { %14404 = vpow2.f32 %v4869_v48  ;;  %v4866_v13 = vsub.f32 %v16296_v34, %v4863_v60 }
 0xaac   :  { %14406 = vpow2.f32 %v4074_v38 }
 0xaad   :  { %v16382_v57 = vpop.eup %14398  ;;  %v4871_v49 = vmul.f32 1.442695, %v4866_v13 }
 0xaae   :  { %v5106_v39 = vpop.xlane.xlu1 %5105  ;;  %v4630_v56 = vsel %vm18777_vm10, %v16382_v57, 0.0 }
 0xaaf   :  { %14408 = vpow2.f32 %v4871_v49  ;;  %v5113_v43 = vsub.f32 %v16303_v50, %v5106_v39  ;;  %4631 = vadd.xlane.f32.xlu1 %v4630_v56 }
 0xab0   :  { %14410 = vpow2.f32 %v4078_v45  ;;  %v3380_v45 = vpop.xlane.xlu0 %3379 }
 0xab1   :  { %v16389_v14 = vpop.eup %14400  ;;  %v5116_v55 = vmul.f32 1.442695, %v5113_v43 }
 0xab2   :  { %v5109_v34 = vpop.xlane.xlu1 %5108  ;;  %v4873_v0 = vsel %vm1710_vm12, %v16389_v14, 0.0  ;;  %v16393_v6 = vpop.eup %14402 }
 0xab3   :  { %14412 = vpow2.f32 %v5116_v55  ;;  %v5114_v3 = vsub.f32 %v16309_v25, %v5109_v34  ;;  %4874 = vadd.xlane.f32.xlu1 %v4873_v0  ;;  %v4083_v63 = vsel %vm1710_vm12, %v16393_v6, 0.0 }
 0xab4   :  { %v3383_v34 = vpop.xlane.xlu0 %3382 }
 0xab5   :  { %v16398_v15 = vpop.eup %14404  ;;  %v5118_v50 = vmul.f32 1.442695, %v5114_v3 }
 0xab6   :  { %v5112_v59 = vpop.xlane.xlu1 %5111  ;;  %v4876_v38 = vsel %vm1710_vm12, %v16398_v15, 0.0  ;;  %v16404_v48 = vpop.eup %14406 }
 0xab7   :  { %14414 = vpow2.f32 %v5118_v50  ;;  %v5115_v60 = vsub.f32 %v16315_v16, %v5112_v59  ;;  %4877 = vadd.xlane.f32.xlu0 %v4876_v38  ;;  %4084 = vadd.xlane.f32.xlu1 %v4083_v63  ;;  %v4080_v49 = vsel %vm1710_vm12, %v16404_v48, 0.0 }
 0xab8   :  { %v3230_v59 = vpop.xlane.xlu0 %3229 }
 0xab9   :  { %v16407_v25 = vpop.eup %14408  ;;  %v5120_v13 = vmul.f32 1.442695, %v5115_v60 }
 0xaba   :  { %v4879_v39 = vsel %vm18777_vm10, %v16407_v25, 0.0  ;;  %v16413_v56 = vpop.eup %14410 }
 0xabb   :  { %14416 = vpow2.f32 %v5120_v13  ;;  %4081 = vadd.xlane.f32.xlu0 %v4080_v49  ;;  %4880 = vadd.xlane.f32.xlu1 %v4879_v39  ;;  %v4086_v16 = vsel %vm18777_vm10, %v16413_v56, 0.0  ;;  %v11542_v39 = vsel %vm3246_vm7, 1.0, %v14795_v1  ;;  %vm18810_vm7 = vcmask 1046528  }
 0xabc   :  { %v3386_v63 = vpop.xlane.xlu0 %3385  ;;  %14418 = vrcp.f32 %v3380_v45  ;;  %v16437_v45 = vsel %vm3245_vm9, 1.0, %v14795_v1  ;;  %v4378_v27 = vrot.slane %v11542_v39, 7  ;;  %vm3244_vm9 = vcmp.ne.f32.partialorder %v3230_v59, 0.0 }
 0xabd   :  { %v16415_v43 = vpop.eup %14412  ;;  %v4380_v39 = vrot.slane %v16443_v8, 7  ;;  %v16458_v32 = vsel %vm3244_vm9, 1.0, %v14795_v1  ;;  %vm18812_vm9 = vmmov %vm18810_vm7 }
 0xabe   :  { %v5122_v55 = vsel %vm1710_vm12, %v16415_v43, 0.0 }
 0xabf   :  { %4087 = vadd.xlane.f32.xlu0 %v4086_v16  ;;  %5123 = vadd.xlane.f32.xlu1 %v5122_v55  ;;  %v16464_v8 = vsel %vm438_vm3, %v4378_v27, %v4380_v39 }
 0xac0   :  { %v3617_v60 = vpop.xlane.xlu0 %3616 }
 0xac1   :  { %v16421_v0 = vpop.eup %14414 }
 0xac2   :  { %v5125_v3 = vsel %vm1710_vm12, %v16421_v0, 0.0 }
 0xac3   :  { %5126 = vadd.xlane.f32.xlu1 %v5125_v3 }
 0xac4   :  { %v3620_v49 = vpop.xlane.xlu0 %3619 }
 0xac5   :  { %v16425_v50 = vpop.eup %14416 }
 0xac6   :  { %v5128_v38 = vsel %vm18777_vm10, %v16425_v50, 0.0  ;;  %vm3243_vm10 = vcmp.ne.f32.partialorder %v16355_v7, 0.0  ;;  %v14419_v55 = vpop.eup %14418 }
 0xac7   :  { %5129 = vadd.xlane.f32.xlu1 %v5128_v38  ;;  %v16446_v38 = vsel %vm3243_vm10, 1.0, %v14795_v1  ;;  %vm18811_vm10 = vmmov %vm18810_vm7 }
 0xac8   :  { %v3390_v31 = vmul.f32 %v14419_v55, %v16446_v38 }
 0xad3   :  { %v4363_v13 = vpop.xlane.xlu1 %4362 }
 0xad4   :  { %14420 = vrcp.f32 %v4363_v13 }
 0xad5   :  { %14422 = vrcp.f32 %v3383_v34  ;;  %14071 = vrot.lane.b32.xlu0 %v15967_v53, %s14801_s20  ;;  %v4377_v34 = vrot.slane %v16437_v45, 7 }
 0xad6   :  { %14424 = vrcp.f32 %v3386_v63 }
 0xad7   :  { %v16449_v61 = vsel %vm438_vm3, %v4377_v34, %v4378_v27 }
 0xad8   :  { %v4366_v16 = vpop.xlane.xlu0 %4365  ;;  %14076 = vrot.lane.b32.xlu1 %v15967_v53, %s14803_s22 }
 0xad9   :  { %14426 = vrcp.f32 %v4366_v16  ;;  %v16453_v16 = vpop.xlane.xlu1 %3847 }
 0xada   :  { %14428 = vrcp.f32 %v16371_v36 }
 0xadb   :  { %14430 = vrcp.f32 %v3617_v60 }
 0xadc   :  { %v14062_v3 = vpop.permute.xlu0 %14061  ;;  %14432 = vrcp.f32 %v3620_v49 }
 0xadd   :  { %v14064_v53 = vunpack.i.h.bf16 %v14062_v3  ;;  %v14063_v63 = vunpack.i.l.bf16 %v14062_v3  ;;  %v3393_v3 = vmul.f32 %v16252_v10, %v3390_v31 }
 0xade   :  { %v14421_v13 = vpop.eup %14420 }
 0xadf   :  { %v14423_v7 = vpop.eup %14422  ;;  %v13623_v58 = vpack.c.bf16 %v14064_v53, %v14063_v63  ;;  %v4387_v54 = vmul.f32 %v14421_v13, %v16449_v61 }
 0xae0   :  { %v14425_v34 = vpop.eup %14424  ;;  %v3391_v59 = vmul.f32 %v14423_v7, %v16458_v32 }
 0xae1   :  { %13624 = vmatpush3.bf16.msra.mxu0 %v13623_v58  ;;  %4392 = vperm.xlu0 %14023, %v4387_v54   ;;  %v3392_v58 = vmul.f32 %v14425_v34, %v16437_v45 }
 0xae2   :  { %13629 = vmatprep.subr.bf16.mxu0 %v18809_v47  ;;  %v3394_v54 = vmul.f32 %v16256_v44, %v3391_v59 }
 0xae3   :  { %v14427_v55 = vpop.eup %14426  ;;  %v16466_v53 = vpop.xlane.xlu1 %3850  ;;  %v3395_v27 = vmul.f32 %v16262_v19, %v3392_v58 }
 0xae4   :  { %12690 = vmatmul.mubr.msk.f32.vlgmr.msra.gmra.mrb[76].mxu0 %vm1710_vm12, %v3393_v3  ;;  %v4388_v36 = vmul.f32 %v14427_v55, %v16464_v8  ;;  %v14429_v60 = vpop.eup %14428 }
 0xae5   :  { %12692 = vmatprep.mubr.msk.f32.mxu0 %vm14794_vm0, %v14795_v1  ;;  %v3624_v31 = vmul.f32 %v14429_v60, %v16446_v38  ;;  %v14431_v49 = vpop.eup %14430 }
 0xae6   :  { %4397 = vperm.xlu0 %14023, %v4388_v36   ;;  %v3625_v3 = vmul.f32 %v14431_v49, %v16458_v32  ;;  %v14433_v19 = vpop.eup %14432 }
 0xae7   :  { %v16474_v10 = vpop.xlane.xlu1 %3853  ;;  %v3627_v34 = vmul.f32 %v16268_v12, %v3624_v31  ;;  %v3626_v55 = vmul.f32 %v14433_v19, %v16437_v45 }
 0xae8   :  { %12693 = vmatmul.mubr.msk.f32.gmra.mrb[78].mxu0 %vm1710_vm12, %v3394_v54  ;;  %v3628_v59 = vmul.f32 %v16276_v41, %v3625_v3  ;;  %v11544_v41 = vsel %vm3248_vm11, 1.0, %v14795_v1 }
 0xae9   :  { %12695 = vmatprep.mubr.msk.f32.mxu0 %vm14794_vm0, %v14795_v1  ;;  %v3629_v12 = vmul.f32 %v16317_v22, %v3626_v55  ;;  %v4382_v58 = vrot.slane %v11544_v41, 7 }
 0xaea   :  { %14081 = vrot.lane.b32.xlu0 %v15992_v46, %s14800_s19 }
 0xaeb   :  { %v14067_v63 = vpop.permute.xlu1 %14066 }
 0xaec   :  { %12696 = vmatmul.mubr.msk.f32.gmra.mrb[80].mxu0 %vm1710_vm12, %v3395_v27  ;;  %v14069_v44 = vunpack.i.h.bf16 %v14067_v63  ;;  %v14068_v13 = vunpack.i.l.bf16 %v14067_v63  ;;  %v16504_v63 = vsel %vm438_vm3, %v4380_v39, %v4382_v58 }
 0xaed   :  { %12715 = vmatprep.mubr.msk.f32.mxu0 %vm14794_vm0, %v14795_v1 }
 0xaee   :  { %v13630_v7 = vpack.c.bf16 %v14069_v44, %v14068_v13 }
 0xaf0   :  { %13631 = vmatpush3.bf16.msra.mxu0 %v13630_v7 }
 0xaf1   :  { %13636 = vmatprep.subr.bf16.mxu0 %v18809_v47 }
 0xaf3   :  { %12716 = vmatmul.mubr.msk.f32.vlgmr.msra.gmra.mrb[82].mxu0 %vm1710_vm12, %v3627_v34 }
 0xaf4   :  { %12718 = vmatprep.mubr.msk.f32.mxu0 %vm14794_vm0, %v14795_v1 }
 0xaf7   :  { %12719 = vmatmul.mubr.msk.f32.gmra.mrb[84].mxu0 %vm1710_vm12, %v3628_v59 }
 0xaf8   :  { %12721 = vmatprep.mubr.msk.f32.mxu0 %vm14794_vm0, %v14795_v1 }
 0xafb   :  { %12722 = vmatmul.mubr.msk.f32.gmra.mrb[86].mxu0 %vm1710_vm12, %v3629_v12 }
 0xafc   :  { %12741 = vmatprep.mubr.msk.f32.mxu0 %vm14794_vm0, %v14795_v1 }
 0xb1c   :  { %v4369_v36 = vpop.xlane.xlu1 %4368 }
 0xb1d   :  { %14434 = vrcp.f32 %v4369_v36 }
 0xb20   :  { %v4626_v54 = vpop.xlane.xlu1 %4625 }
 0xb21   :  { %14436 = vrcp.f32 %v4626_v54 }
 0xb24   :  { %v4629_v60 = vpop.xlane.xlu1 %4628 }
 0xb25   :  { %14438 = vrcp.f32 %v4629_v60 }
 0xb27   :  { %v14435_v27 = vpop.eup %14434 }
 0xb28   :  { %v4389_v22 = vmul.f32 %v14435_v27, %v16504_v63 }
 0xb2a   :  { %4402 = vperm.xlu1 %14029, %v4389_v22  }
 0xb2b   :  { %v14437_v44 = vpop.eup %14436 }
 0xb2c   :  { %v4636_v13 = vmul.f32 %v14437_v44, %v16449_v61 }
 0xb2e   :  { %4641 = vperm.xlu0 %14023, %v4636_v13  }
 0xb2f   :  { %v14439_v37 = vpop.eup %14438 }
 0xb30   :  { %v4637_v31 = vmul.f32 %v14439_v37, %v16464_v8 }
 0xb32   :  { %14086 = vrot.lane.b32.xlu0 %v15992_v46, %s14799_s18  ;;  %4646 = vperm.xlu1 %14029, %v4637_v31  }
 0xb3c   :  { %v4632_v49 = vpop.xlane.xlu1 %4631 }
 0xb3d   :  { %14440 = vrcp.f32 %v4632_v49 }
 0xb40   :  { %v4875_v7 = vpop.xlane.xlu1 %4874 }
 0xb41   :  { %14442 = vrcp.f32 %v4875_v7 }
 0xb42   :  { %14444 = vrcp.f32 %v16453_v16 }
 0xb44   :  { %v4878_v39 = vpop.xlane.xlu0 %4877  ;;  %v4085_v34 = vpop.xlane.xlu1 %4084 }
 0xb45   :  { %14446 = vrcp.f32 %v4878_v39 }
 0xb46   :  { %14448 = vrcp.f32 %v16466_v53 }
 0xb47   :  { %v14441_v3 = vpop.eup %14440 }
 0xb48   :  { %v4082_v19 = vpop.xlane.xlu0 %4081  ;;  %v4881_v59 = vpop.xlane.xlu1 %4880  ;;  %v4638_v55 = vmul.f32 %v14441_v3, %v16504_v63 }
 0xb49   :  { %14450 = vrcp.f32 %v4881_v59 }
 0xb4a   :  { %4651 = vperm.xlu1 %14029, %v4638_v55   ;;  %14452 = vrcp.f32 %v16474_v10 }
 0xb4b   :  { %v14443_v12 = vpop.eup %14442 }
 0xb4c   :  { %v4088_v36 = vpop.xlane.xlu0 %4087  ;;  %v5124_v41 = vpop.xlane.xlu1 %5123  ;;  %v4885_v54 = vmul.f32 %v14443_v12, %v16449_v61 }
 0xb4d   :  { %v14445_v16 = vpop.eup %14444  ;;  %14454 = vrcp.f32 %v5124_v41 }
 0xb4e   :  { %4890 = vperm.xlu0 %14023, %v4885_v54   ;;  %14456 = vrcp.f32 %v4082_v19  ;;  %v3858_v13 = vmul.f32 %v14445_v16, %v16446_v38 }
 0xb4f   :  { %v14447_v58 = vpop.eup %14446 }
 0xb50   :  { %v14072_v60 = vpop.permute.xlu0 %14071  ;;  %v5127_v27 = vpop.xlane.xlu1 %5126  ;;  %v4886_v22 = vmul.f32 %v14447_v58, %v16464_v8  ;;  %v3861_v39 = vmul.f32 %v16332_v62, %v3858_v13 }
 0xb51   :  { %v14074_v44 = vunpack.i.h.bf16 %v14072_v60  ;;  %v14073_v53 = vunpack.i.l.bf16 %v14072_v60  ;;  %14458 = vrcp.f32 %v5127_v27  ;;  %v14449_v37 = vpop.eup %14448 }
 0xb52   :  { %4895 = vperm.xlu1 %14029, %v4886_v22   ;;  %14091 = vrot.lane.b32.xlu0 %v15992_v46, %s14801_s20  ;;  %14460 = vrcp.f32 %v4085_v34  ;;  %v3859_v3 = vmul.f32 %v14449_v37, %v16458_v32 }
 0xb53   :  { %v13637_v10 = vpack.c.bf16 %v14074_v44, %v14073_v53  ;;  %v14451_v31 = vpop.eup %14450 }
 0xb54   :  { %v5130_v49 = vpop.xlane.xlu1 %5129  ;;  %v4887_v7 = vmul.f32 %v14451_v31, %v16504_v63  ;;  %v14453_v19 = vpop.eup %14452  ;;  %v3862_v62 = vmul.f32 %v16340_v35, %v3859_v3 }
 0xb55   :  { %14462 = vrcp.f32 %v5130_v49  ;;  %13638 = vmatpush3.bf16.msra.mxu0 %v13637_v10  ;;  %v3860_v16 = vmul.f32 %v14453_v19, %v16437_v45 }
 0xb56   :  { %13643 = vmatprep.subr.bf16.mxu0 %v18809_v47  ;;  %4900 = vperm.xlu1 %14029, %v4887_v7   ;;  %14464 = vrcp.f32 %v4088_v36 }
 0xb57   :  { %v14455_v59 = vpop.eup %14454  ;;  %v3863_v22 = vmul.f32 %v16344_v26, %v3860_v16 }
 0xb58   :  { %v14077_v55 = vpop.permute.xlu1 %14076  ;;  %12742 = vmatmul.mubr.msk.f32.vlgmr.msra.gmra.mrb[88].mxu0 %vm1710_vm12, %v3861_v39  ;;  %v5134_v41 = vmul.f32 %v14455_v59, %v16449_v61  ;;  %v14457_v54 = vpop.eup %14456 }
 0xb59   :  { %v14079_v12 = vunpack.i.h.bf16 %v14077_v55  ;;  %v14078_v34 = vunpack.i.l.bf16 %v14077_v55  ;;  %12744 = vmatprep.mubr.msk.f32.mxu0 %vm14794_vm0, %v14795_v1  ;;  %v4092_v36 = vmul.f32 %v14457_v54, %v16446_v38 }
 0xb5a   :  { %5139 = vperm.xlu0 %14023, %v5134_v41  }
 0xb5b   :  { %v14459_v58 = vpop.eup %14458  ;;  %v13644_v60 = vpack.c.bf16 %v14079_v12, %v14078_v34  ;;  %v4095_v53 = vmul.f32 %v16404_v48, %v4092_v36 }
 0xb5c   :  { %12745 = vmatmul.mubr.msk.f32.gmra.mrb[90].mxu0 %vm1710_vm12, %v3862_v62  ;;  %v5135_v27 = vmul.f32 %v14459_v58, %v16464_v8  ;;  %v14461_v61 = vpop.eup %14460 }
 0xb5d   :  { %13645 = vmatpush3.bf16.msra.mxu0 %v13644_v60  ;;  %12747 = vmatprep.mubr.msk.f32.mxu0 %vm14794_vm0, %v14795_v1  ;;  %v4093_v38 = vmul.f32 %v14461_v61, %v16458_v32 }
 0xb5e   :  { %5144 = vperm.xlu1 %14029, %v5135_v27   ;;  %13650 = vmatprep.subr.bf16.mxu0 %v18809_v47 }
 0xb5f   :  { %v14463_v35 = vpop.eup %14462  ;;  %14096 = vrot.lane.b32.xlu0 %v15992_v46, %s14803_s22  ;;  %v4096_v46 = vmul.f32 %v16393_v6, %v4093_v38 }
 0xb60   :  { %v4393_v44 = vpop.permute.xlu0 %4392  ;;  %12748 = vmatmul.mubr.msk.f32.gmra.mrb[92].mxu0 %vm1710_vm12, %v3863_v22  ;;  %v5136_v8 = vmul.f32 %v14463_v35, %v16504_v63  ;;  %v14465_v26 = vpop.eup %14464 }
 0xb61   :  { %12767 = vmatprep.mubr.msk.f32.mxu0 %vm14794_vm0, %v14795_v1  ;;  %v4094_v37 = vmul.f32 %v14465_v26, %v16437_v45  ;;  %v4405_v6 = vmul.f32 %v16326_v23, %v4393_v44 }
 0xb62   :  { %5149 = vperm.xlu1 %14029, %v5136_v8  }
 0xb63   :  { %v4097_v32 = vmul.f32 %v16413_v56, %v4094_v37 }
 0xb64   :  { %12768 = vmatmul.mubr.msk.f32.vlgmr.msra.gmra.mrb[94].mxu0 %vm1710_vm12, %v4095_v53 }
 0xb65   :  { %v4398_v13 = vpop.permute.xlu0 %4397  ;;  %12770 = vmatprep.mubr.msk.f32.mxu0 %vm14794_vm0, %v14795_v1 }
 0xb66   :  { %v4406_v45 = vmul.f32 %v16334_v11, %v4398_v13 }
 0xb68   :  { %12771 = vmatmul.mubr.msk.f32.gmra.mrb[96].mxu0 %vm1710_vm12, %v4096_v46 }
 0xb69   :  { %v14082_v63 = vpop.permute.xlu0 %14081  ;;  %12773 = vmatprep.mubr.msk.f32.mxu0 %vm14794_vm0, %v14795_v1 }
 0xb6a   :  { %v14084_v48 = vunpack.i.h.bf16 %v14082_v63  ;;  %v14083_v10 = vunpack.i.l.bf16 %v14082_v63 }
 0xb6c   :  { %v13651_v31 = vpack.c.bf16 %v14084_v48, %v14083_v10  ;;  %12774 = vmatmul.mubr.msk.f32.gmra.mrb[98].mxu0 %vm1710_vm12, %v4097_v32 }
 0xb6d   :  { %12793 = vmatprep.mubr.msk.f32.mxu0 %vm14794_vm0, %v14795_v1 }
 0xb6e   :  { %13652 = vmatpush3.bf16.msra.mxu0 %v13651_v31 }
 0xb6f   :  { %13657 = vmatprep.subr.bf16.mxu0 %v18809_v47 }
 0xb71   :  { %12794 = vmatmul.mubr.msk.f32.vlgmr.msra.gmra.mrb[100].mxu0 %vm1710_vm12, %v4405_v6 }
 0xb72   :  { %12796 = vmatprep.mubr.msk.f32.mxu0 %vm14794_vm0, %v14795_v1 }
 0xb75   :  { %12797 = vmatmul.mubr.msk.f32.gmra.mrb[102].mxu0 %vm1710_vm12, %v4406_v45 }
 0xb76   :  { %12799 = vmatprep.mubr.msk.f32.mxu0 %vm14794_vm0, %v14795_v1 }
 0xba9   :  { %v4403_v56 = vpop.permute.xlu1 %4402 }
 0xbaa   :  { %v4407_v49 = vmul.f32 %v16359_v17, %v4403_v56 }
 0xbac   :  { %12800 = vmatmul.mubr.msk.f32.gmra.mrb[104].mxu0 %vm1710_vm12, %v4407_v49 }
 0xbad   :  { %v4642_v23 = vpop.permute.xlu0 %4641  ;;  %12819 = vmatprep.mubr.msk.f32.mxu0 %vm14794_vm0, %v14795_v1 }
 0xbae   :  { %v4654_v11 = vmul.f32 %v16363_v29, %v4642_v23 }
 0xbb1   :  { %v14087_v7 = vpop.permute.xlu0 %14086  ;;  %v4647_v55 = vpop.permute.xlu1 %4646 }
 0xbb2   :  { %v14089_v39 = vunpack.i.h.bf16 %v14087_v7  ;;  %v14088_v3 = vunpack.i.l.bf16 %v14087_v7  ;;  %v4655_v17 = vmul.f32 %v16367_v52, %v4647_v55 }
 0xbb4   :  { %v13658_v19 = vpack.c.bf16 %v14089_v39, %v14088_v3 }
 0xbb6   :  { %13659 = vmatpush3.bf16.msra.mxu0 %v13658_v19 }
 0xbb7   :  { %v16571_v59 = vpop.f32.mrb[76].mxu0  ;;  %13664 = vmatprep.subr.bf16.mxu0 %v18809_v47 }
 0xbb8   :  { %v12691_v12 = vpop.f32.mrb[77].mxu0 }
 0xbb9   :  { %12820 = vmatmul.mubr.msk.f32.vlgmr.msra.gmra.mrb[106].mxu0 %vm1710_vm12, %v4654_v11 }
 0xbba   :  { %12822 = vmatprep.mubr.msk.f32.mxu0 %vm14794_vm0, %v14795_v1 }
 0xbbb   :  { %v16578_v34 = vpop.f32.mrb[78].mxu0 }
 0xbbc   :  { %v12694_v41 = vpop.f32.mrb[79].mxu0 }
 0xbbd   :  { %12823 = vmatmul.mubr.msk.f32.gmra.mrb[108].mxu0 %vm1710_vm12, %v4655_v17 }
 0xbbe   :  { %12825 = vmatprep.mubr.msk.f32.mxu0 %vm14794_vm0, %v14795_v1 }
 0xbbf   :  { %v16583_v29 = vpop.f32.mrb[80].mxu0 }
 0xbc0   :  { %v12697_v54 = vpop.f32.mrb[81].mxu0 }
 0xbc6   :  { %v3711_v62 = vpop.f32.mrb[82].mxu0 }
 0xbc7   :  { %4196 = vrot.lane.b32.xlu0 %v3711_v62, %s14811_s29  ;;  %v12717_v16 = vpop.f32.mrb[83].mxu0 }
 0xbc9   :  { %v4652_v58 = vpop.permute.xlu1 %4651 }
 0xbca   :  { %v4656_v60 = vmul.f32 %v16382_v57, %v4652_v58  ;;  %v3716_v27 = vpop.f32.mrb[84].mxu0 }
 0xbcb   :  { %4198 = vrot.lane.b32.xlu1 %v3716_v27, %s14811_s29  ;;  %v12720_v52 = vpop.f32.mrb[85].mxu0 }
 0xbcc   :  { %12826 = vmatmul.mubr.msk.f32.gmra.mrb[110].mxu0 %vm1710_vm12, %v4656_v60 }
 0xbcd   :  { %v4891_v61 = vpop.permute.xlu0 %4890  ;;  %12845 = vmatprep.mubr.msk.f32.mxu0 %vm14794_vm0, %v14795_v1 }
 0xbce   :  { %v3721_v36 = vpop.f32.mrb[86].mxu0  ;;  %v4903_v57 = vmul.f32 %v16389_v14, %v4891_v61 }
 0xbcf   :  { %4200 = vrot.lane.b32.xlu1 %v3721_v36, %s14811_s29  ;;  %v12723_v22 = vpop.f32.mrb[87].mxu0 }
 0xbd1   :  { %v14092_v35 = vpop.permute.xlu0 %14091  ;;  %v4896_v38 = vpop.permute.xlu1 %4895 }
 0xbd2   :  { %v14094_v44 = vunpack.i.h.bf16 %v14092_v35  ;;  %v14093_v8 = vunpack.i.l.bf16 %v14092_v35  ;;  %v4904_v13 = vmul.f32 %v16398_v15, %v4896_v38 }
 0xbd4   :  { %v13665_v53 = vpack.c.bf16 %v14094_v44, %v14093_v8 }
 0xbd5   :  { %v4901_v46 = vpop.permute.xlu1 %4900 }
 0xbd6   :  { %13666 = vmatpush3.bf16.msra.mxu0 %v13665_v53  ;;  %v4905_v63 = vmul.f32 %v16407_v25, %v4901_v46 }
 0xbd7   :  { %13671 = vmatprep.subr.bf16.mxu0 %v18809_v47 }
 0xbd9   :  { %12846 = vmatmul.mubr.msk.f32.vlgmr.msra.gmra.mrb[112].mxu0 %vm1710_vm12, %v4903_v57  ;;  %v5140_v26 = vpop.permute.xlu0 %5139 }
 0xbda   :  { %12848 = vmatprep.mubr.msk.f32.mxu0 %vm14794_vm0, %v14795_v1  ;;  %v5152_v15 = vmul.f32 %v16415_v43, %v5140_v26 }
 0xbdd   :  { %12849 = vmatmul.mubr.msk.f32.gmra.mrb[114].mxu0 %vm1710_vm12, %v4904_v13  ;;  %v14097_v37 = vpop.permute.xlu0 %14096  ;;  %v5145_v32 = vpop.permute.xlu1 %5144 }
 0xbde   :  { %12851 = vmatprep.mubr.msk.f32.mxu0 %vm14794_vm0, %v14795_v1  ;;  %v14099_v14 = vunpack.i.h.bf16 %v14097_v37  ;;  %v14098_v48 = vunpack.i.l.bf16 %v14097_v37  ;;  %v5153_v31 = vmul.f32 %v16421_v0, %v5145_v32 }
 0xbe0   :  { %v13672_v10 = vpack.c.bf16 %v14099_v14, %v14098_v48 }
 0xbe1   :  { %12852 = vmatmul.mubr.msk.f32.gmra.mrb[116].mxu0 %vm1710_vm12, %v4905_v63  ;;  %v5150_v25 = vpop.permute.xlu1 %5149 }
 0xbe2   :  { %12871 = vmatprep.mubr.msk.f32.mxu0 %vm14794_vm0, %v14795_v1  ;;  %13673 = vmatpush3.bf16.msra.mxu0 %v13672_v10  ;;  %v5154_v6 = vmul.f32 %v16425_v50, %v5150_v25 }
 0xbe5   :  { %12872 = vmatmul.mubr.msk.f32.vlgmr.msra.gmra.mrb[118].mxu0 %vm1710_vm12, %v5152_v15 }
 0xbe6   :  { %12874 = vmatprep.mubr.msk.f32.mxu0 %vm14794_vm0, %v14795_v1 }
 0xbe9   :  { %12875 = vmatmul.mubr.msk.f32.gmra.mrb[120].mxu0 %vm1710_vm12, %v5153_v31 }
 0xbea   :  { %12877 = vmatprep.mubr.msk.f32.mxu0 %vm14794_vm0, %v14795_v1 }
 0xbed   :  { %12878 = vmatmul.mubr.msk.f32.gmra.mrb[122].mxu0 %vm1710_vm12, %v5154_v6 }
 0xc2b   :  { %v3945_v45 = vpop.f32.mrb[88].mxu0 }
 0xc2c   :  { %4208 = vrot.lane.b32.xlu0 %v3945_v45, %s14812_s30  ;;  %v12743_v43 = vpop.f32.mrb[89].mxu0 }
 0xc2f   :  { %v3950_v56 = vpop.f32.mrb[90].mxu0 }
 0xc30   :  { %4210 = vrot.lane.b32.xlu1 %v3950_v56, %s14812_s30  ;;  %v12746_v49 = vpop.f32.mrb[91].mxu0 }
 0xc33   :  { %v3955_v23 = vpop.f32.mrb[92].mxu0 }
 0xc34   :  { %4212 = vrot.lane.b32.xlu0 %v3955_v23, %s14812_s30  ;;  %v12749_v0 = vpop.f32.mrb[93].mxu0 }
 0xc37   :  { %v4179_v7 = vpop.f32.mrb[94].mxu0 }
 0xc38   :  { %4220 = vrot.lane.b32.xlu0 %v4179_v7, %s14813_s1  ;;  %v12769_v39 = vpop.f32.mrb[95].mxu0 }
 0xc39   :  { %v4197_v26 = vpop.permute.xlu0 %4196 }
 0xc3a   :  { %v4229_v32 = vsel %vm708_vm4, %v16571_v59, %v4197_v26 }
 0xc3b   :  { %v4184_v3 = vpop.f32.mrb[96].mxu0 }
 0xc3c   :  { %4222 = vrot.lane.b32.xlu0 %v4184_v3, %s14813_s1  ;;  %v12772_v50 = vpop.f32.mrb[97].mxu0 }
 0xc3d   :  { %v4199_v6 = vpop.permute.xlu1 %4198 }
 0xc3e   :  { %v4230_v23 = vsel %vm708_vm4, %v16578_v34, %v4199_v6 }
 0xc3f   :  { %v4189_v19 = vpop.f32.mrb[98].mxu0 }
 0xc40   :  { %4224 = vrot.lane.b32.xlu0 %v4189_v19, %s14813_s1  ;;  %v12775_v11 = vpop.f32.mrb[99].mxu0 }
 0xc41   :  { %v4201_v43 = vpop.permute.xlu1 %4200 }
 0xc44   :  { %v4489_v55 = vpop.f32.mrb[100].mxu0 }
 0xc45   :  { %v12795_v12 = vpop.f32.mrb[101].mxu0 }
 0xc48   :  { %v16621_v17 = vpop.f32.mrb[102].mxu0 }
 0xc49   :  { %v12798_v41 = vpop.f32.mrb[103].mxu0 }
 0xc7f   :  { %v16623_v54 = vpop.f32.mrb[104].mxu0 }
 0xc80   :  { %v12801_v62 = vpop.f32.mrb[105].mxu0 }
 0xc8c   :  { %v4738_v16 = vpop.f32.mrb[106].mxu0 }
 0xc8d   :  { %5253 = vrot.lane.b32.xlu1 %v4738_v16, %s14811_s29  ;;  %v12821_v58 = vpop.f32.mrb[107].mxu0  ;;  %v4231_v16 = vsel %vm708_vm4, %v16583_v29, %v4201_v43 }
 0xc90   :  { %v4743_v60 = vpop.f32.mrb[108].mxu0 }
 0xc91   :  { %5255 = vrot.lane.b32.xlu1 %v4743_v60, %s14811_s29  ;;  %v12824_v27 = vpop.f32.mrb[109].mxu0 }
 0xc9e   :  { %v4209_v37 = vpop.permute.xlu0 %4208 }
 0xc9f   :  { %v4748_v52 = vpop.f32.mrb[110].mxu0  ;;  %v4232_v15 = vsel %vm1710_vm12, %v4229_v32, %v4209_v37 }
 0xca0   :  { %5257 = vrot.lane.b32.xlu1 %v4748_v52, %s14811_s29  ;;  %v12827_v61 = vpop.f32.mrb[111].mxu0 }
 0xca2   :  { %v4211_v56 = vpop.permute.xlu1 %4210 }
 0xca3   :  { %v4233_v0 = vsel %vm1710_vm12, %v4230_v23, %v4211_v56  ;;  %v5461_v56 = vld [vmem:[%s11387_s14 + $0x8] sm:$0xff] }
 0xca6   :  { %v4213_v48 = vpop.permute.xlu0 %4212 }
 0xcaa   :  { %v4221_v10 = vpop.permute.xlu0 %4220 }
 0xcab   :  { %v4235_v31 = vsel %vm1714_vm15, %v4232_v15, %v4221_v10 }
 0xcac   :  { %v4987_v36 = vpop.f32.mrb[112].mxu0  ;;  %v5308_v25 = vadd.f32 %v4235_v31, %v15939_v2 }
 0xcad   :  { %5265 = vrot.lane.b32.xlu0 %v4987_v36, %s14812_s30  ;;  %v12847_v22 = vpop.f32.mrb[113].mxu0 }
 0xcae   :  { %v5316_v45 = vsel %vm161_vm1, %v5308_v25, 0.0  ;;  %v4223_v49 = vpop.permute.xlu0 %4222 }
 0xcaf   :  { %v4236_v59 = vsel %vm1714_vm15, %v4233_v0, %v4223_v49  ;;  %v5462_v49 = vld [vmem:[%s11387_s14 + $0x10] sm:$0xff]  ;;  %v5463_v0 = vld [vmem:[%s11387_s14 + $0x18] sm:$0xff] }
 0xcb0   :  { %v4992_v35 = vpop.f32.mrb[114].mxu0  ;;  %v5309_v7 = vadd.f32 %v4236_v59, %v15946_v33  ;;  %v4234_v33 = vsel %vm1710_vm12, %v4231_v16, %v4213_v48  ;;  %v13678_v59 = vpack.c.bf16 %v5463_v0, %v5462_v49  ;;  %v5598_v49 = vld [vmem:[%s16709_s2 + $0x40] sm:$0xff] }
 0xcb1   :  { %5267 = vrot.lane.b32.xlu0 %v4992_v35, %s14812_s30  ;;  %v12850_v44 = vpop.f32.mrb[115].mxu0 }
 0xcb2   :  { %v5319_v39 = vsel %vm161_vm1, %v5309_v7, 0.0  ;;  %v4225_v3 = vpop.permute.xlu0 %4224 }
 0xcb3   :  { %v4237_v27 = vsel %vm1714_vm15, %v4234_v33, %v4225_v3 }
 0xcb4   :  { %v4997_v8 = vpop.f32.mrb[116].mxu0 }
 0xcb5   :  { %5269 = vrot.lane.b32.xlu0 %v4997_v8, %s14812_s30  ;;  %v12853_v53 = vpop.f32.mrb[117].mxu0 }
 0xcb8   :  { %v5236_v38 = vpop.f32.mrb[118].mxu0 }
 0xcb9   :  { %5277 = vrot.lane.b32.xlu1 %v5236_v38, %s14813_s1  ;;  %v12873_v57 = vpop.f32.mrb[119].mxu0 }
 0xcbc   :  { %v5241_v13 = vpop.f32.mrb[120].mxu0 }
 0xcbd   :  { %5279 = vrot.lane.b32.xlu1 %v5241_v13, %s14813_s1  ;;  %v12876_v46 = vpop.f32.mrb[121].mxu0 }
 0xcc0   :  { %v5246_v63 = vpop.f32.mrb[122].mxu0 }
 0xcc1   :  { %5281 = vrot.lane.b32.xlu1 %v5246_v63, %s14813_s1  ;;  %v12879_v14 = vpop.f32.mrb[123].mxu0 }
 0xcd4   :  { %5317 = vadd.xlane.f32.xlu0 %v5316_v45 }
 0xce5   :  { %5320 = vadd.xlane.f32.xlu1 %v5319_v39 }
 0xcff   :  { %v5254_v2 = vpop.permute.xlu1 %5253 }
 0xd00   :  { %v5286_v12 = vsel %vm708_vm4, %v4489_v55, %v5254_v2 }
 0xd03   :  { %v5256_v50 = vpop.permute.xlu1 %5255 }
 0xd04   :  { %v5287_v52 = vsel %vm708_vm4, %v16621_v17, %v5256_v50 }
 0xd12   :  { %v5258_v11 = vpop.permute.xlu1 %5257 }
 0xd13   :  { %v5288_v8 = vsel %vm708_vm4, %v16623_v54, %v5258_v11 }
 0xd1f   :  { %v5266_v19 = vpop.permute.xlu0 %5265 }
 0xd20   :  { %v5289_v62 = vsel %vm1710_vm12, %v5286_v12, %v5266_v19 }
 0xd23   :  { %v5268_v41 = vpop.permute.xlu0 %5267 }
 0xd24   :  { %v5290_v61 = vsel %vm1710_vm12, %v5287_v52, %v5268_v41 }
 0xd27   :  { %v5270_v22 = vpop.permute.xlu0 %5269 }
 0xd28   :  { %v5291_v38 = vsel %vm1710_vm12, %v5288_v8, %v5270_v22 }
 0xd2b   :  { %v5278_v34 = vpop.permute.xlu1 %5277 }
 0xd2c   :  { %v5292_v58 = vsel %vm1714_vm15, %v5289_v62, %v5278_v34 }
 0xd2d   :  { %v5298_v60 = vrot.slane %v5292_v58, 1 }
 0xd2f   :  { %v5280_v55 = vpop.permute.xlu1 %5279  ;;  %v5307_v36 = vsel %vm18810_vm7, %v4237_v27, %v5298_v60 }
 0xd30   :  { %v5293_v35 = vsel %vm1714_vm15, %v5290_v61, %v5280_v55  ;;  %v5310_v29 = vadd.f32 %v5307_v36, %v15955_v40 }
 0xd31   :  { %v5299_v44 = vrot.slane %v5293_v35, 1 }
 0xd32   :  { %v5322_v53 = vsel %vm161_vm1, %v5310_v29, 0.0 }
 0xd33   :  { %5323 = vadd.xlane.f32.xlu0 %v5322_v53  ;;  %v5282_v17 = vpop.permute.xlu1 %5281  ;;  %v5300_v57 = vsel %vm18811_vm10, %v5298_v60, %v5299_v44 }
 0xd34   :  { %v5294_v26 = vsel %vm1714_vm15, %v5291_v38, %v5282_v17  ;;  %v5311_v13 = vadd.f32 %v5300_v57, %v15960_v42 }
 0xd35   :  { %v5301_v46 = vrot.slane %v5294_v26, 1 }
 0xd36   :  { %v5325_v37 = vsel %vm161_vm1, %v5311_v13, 0.0 }
 0xd37   :  { %5326 = vadd.xlane.f32.xlu0 %v5325_v37  ;;  %v5313_v40 = vadd.f32 %v5301_v46, %v15984_v9  ;;  %v5302_v54 = vsel %vm18812_vm9, %v5299_v44, %v5301_v46  ;;  %v5591_v46 = vld [vmem:[%s16709_s2 + $0x8] sm:$0xff]  ;;  %v5592_v37 = vld [vmem:[%s16709_s2 + $0x10] sm:$0xff] }
 0xd38   :  { %v5312_v63 = vadd.f32 %v5302_v54, %v15981_v5 }
 0xd39   :  { %v5331_v14 = vsel %vm674_vm6, %v5313_v40, 0.0 }
 0xd3a   :  { %v5328_v48 = vsel %vm161_vm1, %v5312_v63, 0.0 }
 0xd3b   :  { %5332 = vadd.xlane.f32.xlu0 %v5331_v14  ;;  %5329 = vadd.xlane.f32.xlu1 %v5328_v48  ;;  %v5594_v14 = vld [vmem:[%s16709_s2 + $0x20] sm:$0xff]  ;;  %v5595_v48 = vld [vmem:[%s16709_s2 + $0x28] sm:$0xff] }
 0xd61   :  { %v5318_v10 = vpop.xlane.xlu0 %5317 }
 0xd62   :  { %v5334_v32 = vmul.f32 0.03125, %v5318_v10  ;;  %v16723_v10 = vld [vmem:[%s11385_s7] ss:$0 sm:$0xff]  ;;  %s11391_s7 = sld [smem:[%s18763_s0 + %s14812_s30]]  }
 0xd64   :  { %v16672_v15 = vsub.f32 %v5308_v25, %v5334_v32  ;;  %v5460_v25 = vld [vmem:[%s11387_s14] sm:$0xff]  ;;  %v13690_v32 = vpack.c.bf16 %v5595_v48, %v5594_v14 }
 0xd65   :  { %v13674_v23 = vpack.c.bf16 %v5461_v56, %v5460_v25 }
 0xd66   :  { %v5346_v42 = vmul.f32 %v16672_v15, %v16672_v15 }
 0xd67   :  { %13675 = vmatprep.subr.bf16.mxu1 %v13674_v23 }
 0xd68   :  { %v5352_v31 = vsel %vm161_vm1, %v5346_v42, 0.0  ;;  %13677 = vmatpush3.bf16.msra.mxu1 %v13674_v23  ;;  %v5596_v42 = vld [vmem:[%s16709_s2 + $0x30] sm:$0xff]  ;;  %v5599_v23 = vld [vmem:[%s16709_s2 + $0x48] sm:$0xff] }
 0xd69   :  { %5353 = vadd.xlane.f32.xlu1 %v5352_v31  ;;  %13679 = vmatprep.subr.bf16.mxu1 %v13678_v59  ;;  %v5597_v31 = vld [vmem:[%s16709_s2 + $0x38] sm:$0xff] }
 0xd6c   :  { %13681 = vmatpush3.bf16.msra.mxu1 %v13678_v59 }
 0xd6d   :  { %13714 = vmatprep.subr.bf16.mxu1 %v18809_v47 }
 0xd72   :  { %v5321_v9 = vpop.xlane.xlu1 %5320 }
 0xd73   :  { %v5335_v6 = vmul.f32 0.03125, %v5321_v9  ;;  %v5424_v9 = vmul.f32 %v16723_v10, %v16672_v15 }
 0xd75   :  { %v16677_v45 = vsub.f32 %v5309_v7, %v5335_v6 }
 0xd77   :  { %v5347_v5 = vmul.f32 %v16677_v45, %v16677_v45 }
 0xd79   :  { %v5355_v43 = vsel %vm161_vm1, %v5347_v5, 0.0  ;;  %v16729_v5 = vld [vmem:[%s11386_s11] ss:$0 sm:$0xff]  ;;  %s11392_s11 = sld [smem:[%s18763_s0 + %s14825_s8]]  }
 0xd7a   :  { %5356 = vadd.xlane.f32.xlu0 %v5355_v43  ;;  %v13694_v43 = vpack.c.bf16 %v5597_v31, %v5596_v42  ;;  %s11402_s8 = sld [smem:[%s18763_s0 + %s14836_s5]]  }
 0xdc0   :  { %v5324_v7 = vpop.xlane.xlu0 %5323 }
 0xdc1   :  { %v5336_v39 = vmul.f32 0.03125, %v5324_v7 }
 0xdc3   :  { %v16686_v2 = vsub.f32 %v5310_v29, %v5336_v39  ;;  %v13698_v39 = vpack.c.bf16 %v5599_v23, %v5598_v49 }
 0xdc4   :  { %v5327_v3 = vpop.xlane.xlu0 %5326 }
 0xdc5   :  { %v5337_v50 = vmul.f32 0.03125, %v5327_v3  ;;  %v5348_v19 = vmul.f32 %v16686_v2, %v16686_v2 }
 0xdc7   :  { %v16690_v11 = vsub.f32 %v5311_v13, %v5337_v50  ;;  %v5358_v12 = vsel %vm161_vm1, %v5348_v19, 0.0  ;;  %v5590_v13 = vld [vmem:[%s16709_s2] sm:$0xff]  ;;  %v5600_v50 = vld [vmem:[%s16709_s2 + $0x50] sm:$0xff]  ;;  %v5601_v19 = vld [vmem:[%s16709_s2 + $0x58] sm:$0xff] }
 0xdc8   :  { %v5333_v41 = vpop.xlane.xlu0 %5332  ;;  %5359 = vadd.xlane.f32.xlu1 %v5358_v12  ;;  %v5330_v62 = vpop.xlane.xlu1 %5329  ;;  %v13682_v54 = vpack.c.bf16 %v5591_v46, %v5590_v13 }
 0xdc9   :  { %v5339_v34 = vmul.f32 0.03125, %v5333_v41  ;;  %v5338_v16 = vmul.f32 0.03125, %v5330_v62  ;;  %v5349_v58 = vmul.f32 %v16690_v11, %v16690_v11  ;;  %v13702_v41 = vpack.c.bf16 %v5601_v19, %v5600_v50  ;;  %v5602_v62 = vld [vmem:[%s16709_s2 + $0x60] sm:$0xff] }
 0xdca   :  { %13683 = vmatprep.subr.bf16.mxu0 %v13682_v54 }
 0xdcb   :  { %v16695_v33 = vsub.f32 %v5313_v40, %v5339_v34  ;;  %v16697_v60 = vsub.f32 %v5312_v63, %v5338_v16  ;;  %v5361_v27 = vsel %vm161_vm1, %v5349_v58, 0.0  ;;  %v5593_v40 = vld [vmem:[%s16709_s2 + $0x18] sm:$0xff]  ;;  %13685 = vmatpush3.bf16.msra.mxu0 %v13682_v54  ;;  %v5603_v34 = vld [vmem:[%s16709_s2 + $0x68] sm:$0xff]  ;;  %v5425_v58 = vmul.f32 %v16723_v10, %v16677_v45 }
 0xdcc   :  { %5362 = vadd.xlane.f32.xlu0 %v5361_v27  ;;  %v13686_v63 = vpack.c.bf16 %v5593_v40, %v5592_v37  ;;  %v13706_v16 = vpack.c.bf16 %v5603_v34, %v5602_v62 }
 0xdcd   :  { %v5351_v52 = vmul.f32 %v16695_v33, %v16695_v33  ;;  %v5350_v61 = vmul.f32 %v16697_v60, %v16697_v60  ;;  %v5428_v34 = vmul.f32 %v16723_v10, %v16697_v60  ;;  %v11611_v60 = vld [vmem:[%s11388_s15] ss:$0 sm:$0xff]  ;;  %s11393_s15 = sld [smem:[%s18763_s0 + %s14826_s12]]  }
 0xdce   :  { %13687 = vmatprep.subr.bf16.mxu0 %v13686_v63  ;;  %s11404_s12 = sld [smem:[%s18763_s0 + %s14837_s9]]  }
 0xdcf   :  { %v5367_v55 = vsel %vm674_vm6, %v5351_v52, 0.0  ;;  %v5364_v36 = vsel %vm161_vm1, %v5350_v61, 0.0  ;;  %13689 = vmatpush3.bf16.msra.mxu0 %v13686_v63 }
 0xdd0   :  { %5368 = vadd.xlane.f32.xlu0 %v5367_v55  ;;  %5365 = vadd.xlane.f32.xlu1 %v5364_v36 }
 0xdd1   :  { %13691 = vmatprep.subr.bf16.mxu0 %v13690_v32 }
 0xdd3   :  { %13693 = vmatpush3.bf16.msra.mxu0 %v13690_v32 }
 0xdd4   :  { %13695 = vmatprep.subr.bf16.mxu0 %v13694_v43 }
 0xdd7   :  { %13697 = vmatpush3.bf16.msra.mxu0 %v13694_v43 }
 0xdd8   :  { %13699 = vmatprep.subr.bf16.mxu0 %v13698_v39 }
 0xddb   :  { %13701 = vmatpush3.bf16.msra.mxu0 %v13698_v39 }
 0xddc   :  { %13703 = vmatprep.subr.bf16.mxu0 %v13702_v41 }
 0xddf   :  { %13705 = vmatpush3.bf16.msra.mxu0 %v13702_v41  ;;  %v5429_v41 = vmul.f32 %v16723_v10, %v16695_v33  ;;  %v5604_v33 = vld [vmem:[%s16709_s2 + $0x70] sm:$0xff] }
 0xde0   :  { %13707 = vmatprep.subr.bf16.mxu0 %v13706_v16 }
 0xde3   :  { %13709 = vmatpush3.bf16.msra.mxu0 %v13706_v16 }
 0xdf6   :  { %v5354_v22 = vpop.xlane.xlu1 %5353 }
 0xdf7   :  { %v5370_v35 = vmul.f32 0.032258064, %v5354_v22 }
 0xdf9   :  { %14466 = vrsqrt.f32 %v5370_v35  ;;  %vm5378_vm11 = vcmp.eq.f32.partialorder %v5370_v35, inf  ;;  %v5381_v8 = vand.u32 2147483648, %v5370_v35  ;;  %vm5380_vm7 = vcmp.eq.f32.partialorder %v5370_v35, 0.0 }
 0xe03   :  { %v14467_v29 = vpop.eup %14466 }
 0xe04   :  { %v5377_v44 = vmul.f32 %v14467_v29, %v5370_v35 }
 0xe06   :  { %v5379_v53 = vsel %vm5378_vm11, %v5370_v35, %v5377_v44 }
 0xe07   :  { %v5382_v38 = vsel %vm5380_vm7, %v5381_v8, %v5379_v53  ;;  %v5357_v17 = vpop.xlane.xlu0 %5356 }
 0xe08   :  { %v5430_v57 = vadd.f32 1e-08, %v5382_v38  ;;  %v5371_v26 = vmul.f32 0.032258064, %v5357_v17 }
 0xe0a   :  { %14468 = vrcp.f32 %v5430_v57  ;;  %vm5385_vm10 = vcmp.eq.f32.partialorder %v5371_v26, inf  ;;  %v5388_v59 = vand.u32 2147483648, %v5371_v26  ;;  %vm5387_vm9 = vcmp.eq.f32.partialorder %v5371_v26, 0.0 }
 0xe0b   :  { %14470 = vrsqrt.f32 %v5371_v26 }
 0xe14   :  { %v14469_v6 = vpop.eup %14468 }
 0xe15   :  { %v14471_v25 = vpop.eup %14470  ;;  %v5437_v56 = vmul.f32 %v14469_v6, %v5424_v9 }
 0xe16   :  { %v5384_v0 = vmul.f32 %v14471_v25, %v5371_v26 }
 0xe17   :  { %v16734_v7 = vadd.f32 %v16729_v5, %v5437_v56 }
 0xe18   :  { %v5386_v15 = vsel %vm5385_vm10, %v5371_v26, %v5384_v0 }
 0xe19   :  { %v5389_v3 = vsel %vm5387_vm9, %v5388_v59, %v5386_v15  ;;  %12888 = vmatprep.mubr.msk.f32.mxu1 %vm161_vm1, %v16734_v7  ;;  %v5426_v59 = vmul.f32 %v16723_v10, %v16686_v2 }
 0xe1a   :  { %v5431_v12 = vadd.f32 1e-08, %v5389_v3  ;;  %v5427_v3 = vmul.f32 %v16723_v10, %v16690_v11 }
 0xe1c   :  { %14472 = vrcp.f32 %v5431_v12 }
 0xe26   :  { %v14473_v27 = vpop.eup %14472 }
 0xe27   :  { %v5439_v52 = vmul.f32 %v14473_v27, %v5425_v58 }
 0xe29   :  { %v16745_v61 = vadd.f32 %v16729_v5, %v5439_v52 }
 0xe2b   :  { %12889 = vmatmul.mubr.msk.f32.vlgmr.msra.gmra.mrb[108].mxu1 %vm161_vm1, %v16745_v61 }
 0xe55   :  { %v5360_v55 = vpop.xlane.xlu1 %5359 }
 0xe56   :  { %v5372_v36 = vmul.f32 0.032258064, %v5360_v55  ;;  %v5605_v55 = vld [vmem:[%s16709_s2 + $0x78] sm:$0xff] }
 0xe58   :  { %14474 = vrsqrt.f32 %v5372_v36  ;;  %vm5392_vm11 = vcmp.eq.f32.partialorder %v5372_v36, inf  ;;  %v5395_v17 = vand.u32 2147483648, %v5372_v36  ;;  %vm5394_vm7 = vcmp.eq.f32.partialorder %v5372_v36, 0.0 }
 0xe59   :  { %v5363_v22 = vpop.xlane.xlu0 %5362 }
 0xe5a   :  { %v5373_v35 = vmul.f32 0.032258064, %v5363_v22 }
 0xe5c   :  { %14476 = vrsqrt.f32 %v5373_v35  ;;  %vm5399_vm10 = vcmp.eq.f32.partialorder %v5373_v35, inf  ;;  %v5402_v40 = vand.u32 2147483648, %v5373_v35  ;;  %vm5401_vm9 = vcmp.eq.f32.partialorder %v5373_v35, 0.0 }
 0xe5d   :  { %v5369_v29 = vpop.xlane.xlu0 %5368  ;;  %v5366_v44 = vpop.xlane.xlu1 %5365 }
 0xe5e   :  { %v5375_v8 = vmul.f32 0.032258064, %v5369_v29  ;;  %v5374_v53 = vmul.f32 0.032258064, %v5366_v44 }
 0xe60   :  { %14478 = vrsqrt.f32 %v5375_v8  ;;  %vm5413_vm13 = vcmp.eq.f32.partialorder %v5375_v8, inf  ;;  %vm5415_vm8 = vcmp.eq.f32.partialorder %v5375_v8, 0.0  ;;  %v5416_v31 = vand.u32 2147483648, %v5375_v8 }
 0xe61   :  { %14480 = vrsqrt.f32 %v5374_v53  ;;  %v5409_v43 = vand.u32 2147483648, %v5374_v53 }
 0xe62   :  { %v14475_v45 = vpop.eup %14474 }
 0xe63   :  { %v5391_v38 = vmul.f32 %v14475_v45, %v5372_v36 }
 0xe65   :  { %v5393_v57 = vsel %vm5392_vm11, %v5372_v36, %v5391_v38  ;;  %vm5406_vm11 = vcmp.eq.f32.partialorder %v5374_v53, inf  ;;  %v13710_v36 = vpack.c.bf16 %v5605_v55, %v5604_v33 }
 0xe66   :  { %v14477_v26 = vpop.eup %14476  ;;  %v5396_v13 = vsel %vm5394_vm7, %v5395_v17, %v5393_v57  ;;  %vm5408_vm7 = vcmp.eq.f32.partialorder %v5374_v53, 0.0 }
 0xe67   :  { %v5398_v46 = vmul.f32 %v14477_v26, %v5373_v35  ;;  %v5432_v37 = vadd.f32 1e-08, %v5396_v13  ;;  %13711 = vmatprep.subr.bf16.mxu0 %v13710_v36 }
 0xe68   :  { %13713 = vmatpush3.bf16.msra.mxu0 %v13710_v36 }
 0xe69   :  { %v5400_v54 = vsel %vm5399_vm10, %v5373_v35, %v5398_v46  ;;  %14482 = vrcp.f32 %v5432_v37  ;;  %13730 = vmatprep.subr.bf16.mxu0 %v18809_v47 }
 0xe6a   :  { %v14479_v63 = vpop.eup %14478  ;;  %v5403_v14 = vsel %vm5401_vm9, %v5402_v40, %v5400_v54 }
 0xe6b   :  { %v14481_v48 = vpop.eup %14480  ;;  %v5412_v32 = vmul.f32 %v14479_v63, %v5375_v8  ;;  %v5433_v42 = vadd.f32 1e-08, %v5403_v14  ;;  %v11618_v63 = vld [vmem:[%s11390_s3] ss:$0 sm:$0xff]  ;;  %s11394_s3 = sld [smem:[%s18763_s0 + %s14827_s16]]  }
 0xe6c   :  { %v5405_v9 = vmul.f32 %v14481_v48, %v5374_v53  ;;  %s11406_s16 = sld [smem:[%s18763_s0 + %s14838_s13]]  }
 0xe6d   :  { %v5414_v6 = vsel %vm5413_vm13, %v5375_v8, %v5412_v32  ;;  %14484 = vrcp.f32 %v5433_v42 }
 0xe6e   :  { %v5407_v25 = vsel %vm5406_vm11, %v5374_v53, %v5405_v9  ;;  %v5417_v56 = vsel %vm5415_vm8, %v5416_v31, %v5414_v6 }
 0xe6f   :  { %v5410_v49 = vsel %vm5408_vm7, %v5409_v43, %v5407_v25  ;;  %v5435_v23 = vadd.f32 1e-08, %v5417_v56 }
 0xe70   :  { %v5434_v0 = vadd.f32 1e-08, %v5410_v49 }
 0xe71   :  { %14486 = vrcp.f32 %v5435_v23 }
 0xe72   :  { %14488 = vrcp.f32 %v5434_v0 }
 0xe73   :  { %v14483_v15 = vpop.eup %14482 }
 0xe74   :  { %v5441_v39 = vmul.f32 %v14483_v15, %v5426_v59 }
 0xe76   :  { %v16754_v50 = vadd.f32 %v16729_v5, %v5441_v39 }
 0xe77   :  { %v14485_v19 = vpop.eup %14484 }
 0xe78   :  { %12891 = vmatprep.mubr.msk.f32.mxu1 %vm161_vm1, %v16754_v50  ;;  %v5443_v12 = vmul.f32 %v14485_v19, %v5427_v3 }
 0xe7a   :  { %v16761_v2 = vadd.f32 %v16729_v5, %v5443_v12 }
 0xe7b   :  { %v14487_v62 = vpop.eup %14486 }
 0xe7c   :  { %v14489_v11 = vpop.eup %14488  ;;  %12892 = vmatmul.mubr.msk.f32.gmra.mrb[110].mxu1 %vm161_vm1, %v16761_v2  ;;  %v5447_v16 = vmul.f32 %v14487_v62, %v5429_v41 }
 0xe7d   :  { %v5445_v58 = vmul.f32 %v14489_v11, %v5428_v34 }
 0xe7e   :  { %v16768_v27 = vadd.f32 %v16729_v5, %v5447_v16 }
 0xe7f   :  { %v16771_v52 = vadd.f32 %v16729_v5, %v5445_v58 }
 0xe81   :  { %12894 = vmatprep.mubr.msk.f32.mxu1 %vm161_vm1, %v16771_v52 }
 0xe82   :  { %12895 = vmatmul.mubr.msk.f32.gmra.mrb[112].mxu1 %vm161_vm1, %v16768_v27 }
 0xe83   :  { %12944 = vmatprep.mubr.msk.f32.mxu1 %vm14794_vm0, %v14795_v1 }
 0xefe   :  { %v12890_v10 = vpop.f32.mrb[108].mxu1 }
 0xeff   :  { %v5561_v5 = vadd.f32 %v12890_v10, %v11611_v60  ;;  %v5555_v22 = vpop.f32.mrb[109].mxu1 }
 0xf00   :  { %v5556_v35 = vadd.f32 %v11611_v60, %v5555_v22 }
 0xf01   :  { %v5585_v44 = vmax.f32 %v5561_v5, 0.0 }
 0xf02   :  { %v5584_v29 = vmax.f32 %v5556_v35, 0.0 }
 0xf04   :  { %12929 = vmatprep.mubr.f32.mxu0 %v5584_v29 }
 0xf05   :  { %12930 = vmatmul.mubr.f32.vlgmr.msra.gmra.mrb[124].mxu0 %v5585_v44 }
 0xf4f   :  { %v12893_v8 = vpop.f32.mrb[110].mxu1 }
 0xf50   :  { %v5571_v53 = vadd.f32 %v12893_v8, %v11611_v60  ;;  %v5565_v45 = vpop.f32.mrb[111].mxu1 }
 0xf51   :  { %v5566_v38 = vadd.f32 %v11611_v60, %v5565_v45 }
 0xf52   :  { %v5587_v57 = vmax.f32 %v5571_v53, 0.0 }
 0xf53   :  { %v5586_v17 = vmax.f32 %v5566_v38, 0.0 }
 0xf55   :  { %v12896_v26 = vpop.f32.mrb[112].mxu1  ;;  %12932 = vmatprep.mubr.f32.mxu0 %v5586_v17 }
 0xf56   :  { %v5581_v13 = vadd.f32 %v12896_v26, %v11611_v60  ;;  %v5575_v46 = vpop.f32.mrb[113].mxu1  ;;  %12933 = vmatmul.mubr.f32.gmra.mrb[126].mxu0 %v5587_v57 }
 0xf57   :  { %v5576_v37 = vadd.f32 %v11611_v60, %v5575_v46 }
 0xf58   :  { %v5589_v54 = vmax.f32 %v5581_v13, 0.0 }
 0xf59   :  { %v5588_v40 = vmax.f32 %v5576_v37, 0.0 }
 0xf5b   :  { %12935 = vmatprep.mubr.f32.mxu0 %v5588_v40 }
 0xf5c   :  { %12936 = vmatmul.mubr.f32.gmra.mrb[128].mxu0 %v5589_v54 }
 0xf5d   :  { %12991 = vmatprep.mubr.msk.f32.mxu0 %vm14794_vm0, %v14795_v1 }
 0xfd8   :  { %v12931_v14 = vpop.f32.mrb[124].mxu0 }
 0xfd9   :  { %v5685_v48 = vadd.f32 %v12931_v14, %v11618_v63  ;;  %v5679_v32 = vpop.f32.mrb[125].mxu0 }
 0xfda   :  { %v5680_v42 = vadd.f32 %v11618_v63, %v5679_v32 }
 0xfdb   :  { %v5709_v31 = vadd.f32 %v5685_v48, %v16745_v61 }
 0xfdc   :  { %v5708_v9 = vadd.f32 %v5680_v42, %v16734_v7 }
 0xfdd   :  { %v5719_v6 = vsel %vm161_vm1, %v5709_v31, 0.0 }
 0xfde   :  { %5720 = vadd.xlane.f32.xlu0 %v5719_v6  ;;  %v5716_v43 = vsel %vm161_vm1, %v5708_v9, 0.0 }
 0xfdf   :  { %5717 = vadd.xlane.f32.xlu1 %v5716_v43 }
0x1029   :  { %v12934_v25 = vpop.f32.mrb[126].mxu0 }
0x102a   :  { %v5695_v56 = vadd.f32 %v12934_v25, %v11618_v63  ;;  %v5689_v49 = vpop.f32.mrb[127].mxu0 }
0x102b   :  { %v5690_v23 = vadd.f32 %v11618_v63, %v5689_v49 }
0x102c   :  { %v5711_v0 = vadd.f32 %v5695_v56, %v16761_v2 }
0x102d   :  { %v5710_v59 = vadd.f32 %v5690_v23, %v16754_v50 }
0x102e   :  { %v5725_v15 = vsel %vm161_vm1, %v5711_v0, 0.0 }
0x102f   :  { %v12937_v39 = vpop.f32.mrb[128].mxu0  ;;  %5726 = vadd.xlane.f32.xlu0 %v5725_v15  ;;  %v5722_v7 = vsel %vm161_vm1, %v5710_v59, 0.0 }
0x1030   :  { %v5705_v61 = vadd.f32 %v12937_v39, %v11618_v63  ;;  %v5699_v3 = vpop.f32.mrb[129].mxu0  ;;  %5723 = vadd.xlane.f32.xlu1 %v5722_v7  ;;  %v16831_v7 = vld [vmem:[%s11391_s7] ss:$0 sm:$0xff] }
0x1031   :  { %v5700_v19 = vadd.f32 %v11618_v63, %v5699_v3 }
0x1032   :  { %v5713_v12 = vadd.f32 %v5705_v61, %v16768_v27 }
0x1033   :  { %v5712_v41 = vadd.f32 %v5700_v19, %v16771_v52 }
0x1034   :  { %v5731_v62 = vsel %vm674_vm6, %v5713_v12, 0.0 }
0x1035   :  { %5732 = vadd.xlane.f32.xlu0 %v5731_v62  ;;  %v5728_v2 = vsel %vm161_vm1, %v5712_v41, 0.0 }
0x1036   :  { %5729 = vadd.xlane.f32.xlu1 %v5728_v2 }
0x106b   :  { %v5721_v50 = vpop.xlane.xlu0 %5720 }
0x106c   :  { %v5735_v34 = vmul.f32 0.03125, %v5721_v50  ;;  %v5718_v11 = vpop.xlane.xlu1 %5717 }
0x106d   :  { %v5734_v16 = vmul.f32 0.03125, %v5718_v11 }
0x106e   :  { %v5741_v58 = vsub.f32 %v5709_v31, %v5735_v34 }
0x106f   :  { %v5740_v33 = vsub.f32 %v5708_v9, %v5734_v16 }
0x1070   :  { %v5747_v55 = vmul.f32 %v5741_v58, %v5741_v58  ;;  %v5825_v61 = vmul.f32 %v16831_v7, %v5741_v58 }
0x1071   :  { %v5746_v36 = vmul.f32 %v5740_v33, %v5740_v33  ;;  %v5824_v19 = vmul.f32 %v16831_v7, %v5740_v33 }
0x1072   :  { %v5755_v60 = vsel %vm161_vm1, %v5747_v55, 0.0 }
0x1073   :  { %5756 = vadd.xlane.f32.xlu0 %v5755_v60  ;;  %v5752_v27 = vsel %vm161_vm1, %v5746_v36, 0.0 }
0x1074   :  { %5753 = vadd.xlane.f32.xlu1 %v5752_v27 }
0x10bc   :  { %v5727_v52 = vpop.xlane.xlu0 %5726 }
0x10bd   :  { %v5737_v10 = vmul.f32 0.03125, %v5727_v52  ;;  %v5724_v5 = vpop.xlane.xlu1 %5723 }
0x10be   :  { %v5736_v22 = vmul.f32 0.03125, %v5724_v5 }
0x10bf   :  { %v16804_v35 = vsub.f32 %v5711_v0, %v5737_v10 }
0x10c0   :  { %v16806_v29 = vsub.f32 %v5710_v59, %v5736_v22 }
0x10c1   :  { %v5749_v44 = vmul.f32 %v16804_v35, %v16804_v35 }
0x10c2   :  { %v5733_v8 = vpop.xlane.xlu0 %5732  ;;  %v5748_v53 = vmul.f32 %v16806_v29, %v16806_v29 }
0x10c3   :  { %v5739_v45 = vmul.f32 0.03125, %v5733_v8  ;;  %v5730_v38 = vpop.xlane.xlu1 %5729  ;;  %v5761_v17 = vsel %vm161_vm1, %v5749_v44, 0.0 }
0x10c4   :  { %v5738_v57 = vmul.f32 0.03125, %v5730_v38  ;;  %5762 = vadd.xlane.f32.xlu0 %v5761_v17  ;;  %v5758_v26 = vsel %vm161_vm1, %v5748_v53, 0.0 }
0x10c5   :  { %v16814_v13 = vsub.f32 %v5713_v12, %v5739_v45  ;;  %5759 = vadd.xlane.f32.xlu1 %v5758_v26  ;;  %v16835_v12 = vld [vmem:[%s11392_s11] ss:$0 sm:$0xff]  ;;  %s14830_s11 = smov 21  }
0x10c6   :  { %v16816_v46 = vsub.f32 %v5712_v41, %v5738_v57  ;;  %s11396_s14 = sld [smem:[%s18763_s0 + %s14830_s11]]  }
0x10c7   :  { %v5751_v37 = vmul.f32 %v16814_v13, %v16814_v13 }
0x10c8   :  { %v5750_v40 = vmul.f32 %v16816_v46, %v16816_v46 }
0x10c9   :  { %v5767_v54 = vsel %vm674_vm6, %v5751_v37, 0.0 }
0x10ca   :  { %5768 = vadd.xlane.f32.xlu0 %v5767_v54  ;;  %v5764_v63 = vsel %vm161_vm1, %v5750_v40, 0.0 }
0x10cb   :  { %5765 = vadd.xlane.f32.xlu1 %v5764_v63 }
0x1100   :  { %v5757_v14 = vpop.xlane.xlu0 %5756 }
0x1101   :  { %v5771_v48 = vmul.f32 0.032258064, %v5757_v14  ;;  %v5754_v32 = vpop.xlane.xlu1 %5753 }
0x1102   :  { %v5770_v42 = vmul.f32 0.032258064, %v5754_v32 }
0x1103   :  { %14490 = vrsqrt.f32 %v5771_v48  ;;  %vm5785_vm8 = vcmp.eq.f32.partialorder %v5771_v48, inf  ;;  %v5788_v43 = vand.u32 2147483648, %v5771_v48  ;;  %vm5787_vm13 = vcmp.eq.f32.partialorder %v5771_v48, 0.0 }
0x1104   :  { %14492 = vrsqrt.f32 %v5770_v42  ;;  %vm5778_vm10 = vcmp.eq.f32.partialorder %v5770_v42, inf  ;;  %v5781_v49 = vand.u32 2147483648, %v5770_v42  ;;  %vm5780_vm9 = vcmp.eq.f32.partialorder %v5770_v42, 0.0 }
0x110d   :  { %v14491_v31 = vpop.eup %14490 }
0x110e   :  { %v14493_v9 = vpop.eup %14492  ;;  %v5784_v6 = vmul.f32 %v14491_v31, %v5771_v48 }
0x110f   :  { %v5777_v25 = vmul.f32 %v14493_v9, %v5770_v42 }
0x1110   :  { %v5786_v56 = vsel %vm5785_vm8, %v5771_v48, %v5784_v6 }
0x1111   :  { %v5789_v23 = vsel %vm5787_vm13, %v5788_v43, %v5786_v56  ;;  %v5779_v0 = vsel %vm5778_vm10, %v5770_v42, %v5777_v25 }
0x1112   :  { %v5831_v59 = vadd.f32 1e-08, %v5789_v23  ;;  %v5782_v15 = vsel %vm5780_vm9, %v5781_v49, %v5779_v0  ;;  %v5827_v49 = vmul.f32 %v16831_v7, %v16804_v35  ;;  %v5826_v23 = vmul.f32 %v16831_v7, %v16806_v29 }
0x1113   :  { %v5830_v39 = vadd.f32 1e-08, %v5782_v15 }
0x1114   :  { %14494 = vrcp.f32 %v5831_v59 }
0x1115   :  { %14496 = vrcp.f32 %v5830_v39 }
0x111e   :  { %v14495_v3 = vpop.eup %14494 }
0x111f   :  { %v14497_v41 = vpop.eup %14496  ;;  %v5839_v62 = vmul.f32 %v14495_v3, %v5825_v61  ;;  %v5828_v61 = vmul.f32 %v16831_v7, %v16816_v46 }
0x1120   :  { %v5837_v2 = vmul.f32 %v14497_v41, %v5824_v19  ;;  %v18813_v41 = vmov 1.0  }
0x1121   :  { %v16838_v50 = vadd.f32 %v16835_v12, %v5839_v62  ;;  %v5829_v62 = vmul.f32 %v16831_v7, %v16814_v13 }
0x1122   :  { %v16841_v34 = vadd.f32 %v16835_v12, %v5837_v2 }
0x1124   :  { %v13715_v11 = vpack.c.bf16 %v16838_v50, %v16841_v34 }
0x1126   :  { %13717 = vmatpush3.bf16.xpose.msk.msra.mxu1 %vm14867_vm2, %v13715_v11 }
0x1127   :  { %12942 = vmatprep.subr.mxu1 %v14795_v1 }
0x1151   :  { %v5763_v16 = vpop.xlane.xlu0 %5762 }
0x1152   :  { %v5773_v58 = vmul.f32 0.032258064, %v5763_v16  ;;  %v5760_v33 = vpop.xlane.xlu1 %5759 }
0x1153   :  { %v5772_v55 = vmul.f32 0.032258064, %v5760_v33 }
0x1154   :  { %14498 = vrsqrt.f32 %v5773_v58  ;;  %vm5799_vm11 = vcmp.eq.f32.partialorder %v5773_v58, inf  ;;  %v5802_v44 = vand.u32 2147483648, %v5773_v58  ;;  %vm5801_vm7 = vcmp.eq.f32.partialorder %v5773_v58, 0.0 }
0x1155   :  { %14500 = vrsqrt.f32 %v5772_v55  ;;  %vm5792_vm8 = vcmp.eq.f32.partialorder %v5772_v55, inf  ;;  %v5795_v45 = vand.u32 2147483648, %v5772_v55  ;;  %vm5794_vm13 = vcmp.eq.f32.partialorder %v5772_v55, 0.0 }
0x1157   :  { %v5769_v36 = vpop.xlane.xlu0 %5768 }
0x1158   :  { %v5775_v60 = vmul.f32 0.032258064, %v5769_v36  ;;  %v5766_v27 = vpop.xlane.xlu1 %5765  ;;  %v6051_v36 = vld [vmem:[%s11393_s15] sm:$0xff] }
0x1159   :  { %v5774_v52 = vmul.f32 0.032258064, %v5766_v27 }
0x115a   :  { %14502 = vrsqrt.f32 %v5775_v60  ;;  %vm5813_vm10 = vcmp.eq.f32.partialorder %v5775_v60, inf  ;;  %v5816_v14 = vand.u32 2147483648, %v5775_v60  ;;  %vm5815_vm9 = vcmp.eq.f32.partialorder %v5775_v60, 0.0 }
0x115b   :  { %14504 = vrsqrt.f32 %v5774_v52  ;;  %v5809_v42 = vand.u32 2147483648, %v5774_v52 }
0x115e   :  { %v14499_v10 = vpop.eup %14498 }
0x115f   :  { %v14501_v5 = vpop.eup %14500  ;;  %v5798_v22 = vmul.f32 %v14499_v10, %v5773_v58  ;;  %v6053_v10 = vld [vmem:[%s11393_s15 + $0x10] sm:$0xff] }
0x1160   :  { %v5791_v8 = vmul.f32 %v14501_v5, %v5772_v55  ;;  %v6054_v5 = vld [vmem:[%s11393_s15 + $0x18] sm:$0xff] }
0x1161   :  { %v5800_v53 = vsel %vm5799_vm11, %v5773_v58, %v5798_v22  ;;  %vm5806_vm11 = vcmp.eq.f32.partialorder %v5774_v52, inf  ;;  %v13726_v4 = vpack.c.bf16 %v6054_v5, %v6053_v10 }
0x1162   :  { %v5803_v38 = vsel %vm5801_vm7, %v5802_v44, %v5800_v53  ;;  %v5793_v17 = vsel %vm5792_vm8, %v5772_v55, %v5791_v8  ;;  %vm5808_vm7 = vcmp.eq.f32.partialorder %v5774_v52, 0.0 }
0x1163   :  { %v5833_v57 = vadd.f32 1e-08, %v5803_v38  ;;  %v5796_v26 = vsel %vm5794_vm13, %v5795_v45, %v5793_v17  ;;  %vm18815_vm13 = vcmp.gt.s32.totalorder %v15246_v20, %v15244_v18 }
0x1164   :  { %v14503_v37 = vpop.eup %14502  ;;  %v5832_v40 = vadd.f32 1e-08, %v5796_v26 }
0x1165   :  { %v14505_v54 = vpop.eup %14504  ;;  %14506 = vrcp.f32 %v5833_v57  ;;  %v5812_v63 = vmul.f32 %v14503_v37, %v5775_v60 }
0x1166   :  { %14508 = vrcp.f32 %v5832_v40  ;;  %v5805_v48 = vmul.f32 %v14505_v54, %v5774_v52 }
0x1167   :  { %v5814_v32 = vsel %vm5813_vm10, %v5775_v60, %v5812_v63  ;;  %v6052_v60 = vld [vmem:[%s11393_s15 + $0x8] sm:$0xff]  ;;  %v11633_v63 = vld [vmem:[%s11394_s3] ss:$0 sm:$0xff]  ;;  %s14831_s15 = smov 25   ;;  %s14832_s3 = smov 23  }
0x1168   :  { %v5817_v31 = vsel %vm5815_vm9, %v5816_v14, %v5814_v32  ;;  %v5807_v9 = vsel %vm5806_vm11, %v5774_v52, %v5805_v48  ;;  %v13722_v52 = vpack.c.bf16 %v6052_v60, %v6051_v36  ;;  %vm18818_vm11 = vcmask 187392   ;;  %s11400_s2 = sld [smem:[%s18763_s0 + %s14831_s15]]  }
0x1169   :  { %v5810_v6 = vsel %vm5808_vm7, %v5809_v42, %v5807_v9  ;;  %v5835_v43 = vadd.f32 1e-08, %v5817_v31  ;;  %vm18819_vm7 = vcmp.gt.s32.totalorder %v15246_v20, %v15252_v21 }
0x116a   :  { %v5834_v25 = vadd.f32 1e-08, %v5810_v6 }
0x116c   :  { %14510 = vrcp.f32 %v5834_v25 }
0x116d   :  { %14512 = vrcp.f32 %v5835_v43 }
0x116f   :  { %v14507_v56 = vpop.eup %14506 }
0x1170   :  { %v14509_v0 = vpop.eup %14508  ;;  %v5843_v15 = vmul.f32 %v14507_v56, %v5827_v49 }
0x1171   :  { %v5841_v59 = vmul.f32 %v14509_v0, %v5826_v23 }
0x1172   :  { %v16860_v3 = vadd.f32 %v16835_v12, %v5843_v15 }
0x1173   :  { %v16853_v39 = vadd.f32 %v16835_v12, %v5841_v59 }
0x1174   :  { %v5956_v11 = vrot.slane %v16860_v3, 7 }
0x1175   :  { %12943 = vmatpush3.xpose.msk.msra.mxu1 %vm161_vm1, %v16853_v39  ;;  %v5955_v46 = vrot.slane %v16853_v39, 7 }
0x1176   :  { %v14511_v19 = vpop.eup %14510  ;;  %13718 = vmatprep.subr.bf16.mxu1 %v18809_v47 }
0x1177   :  { %v5845_v35 = vmul.f32 %v14511_v19, %v5828_v61  ;;  %v14513_v29 = vpop.eup %14512  ;;  %v5957_v13 = vsel %vm438_vm3, %v5955_v46, %v5956_v11 }
0x1178   :  { %12945 = vmatmul.mubr.msk.f32.vlgmr.msra.gmra.mrb[114].mxu1 %vm161_vm1, %v18813_v41  ;;  %v5847_v58 = vmul.f32 %v14513_v29, %v5829_v62 }
0x1179   :  { %v16868_v2 = vadd.f32 %v16835_v12, %v5845_v35  ;;  %12947 = vmatprep.mubr.msk.f32.mxu1 %vm14794_vm0, %v14795_v1 }
0x117a   :  { %v16885_v55 = vadd.f32 %v16835_v12, %v5847_v58 }
0x117b   :  { %v5958_v16 = vrot.slane %v16868_v2, 7 }
0x117c   :  { %12948 = vmatmul.mubr.msk.f32.gmra.mrb[116].mxu1 %vm161_vm1, %v18813_v41  ;;  %v5960_v27 = vrot.slane %v16885_v55, 7 }
0x117d   :  { %v5959_v7 = vsel %vm438_vm3, %v5956_v11, %v5958_v16  ;;  %12950 = vmatprep.mubr.msk.f32.mxu1 %vm14794_vm0, %v14795_v1 }
0x117e   :  { %v13719_v33 = vpack.c.bf16 %v5959_v7, %v5957_v13  ;;  %v5961_v12 = vsel %vm438_vm3, %v5958_v16, %v5960_v27 }
0x1180   :  { %13721 = vmatpush3.bf16.xpose.msk.msra.mxu1 %vm14867_vm2, %v13719_v33  ;;  %vm18814_vm2 = vcmask 1046528  }
0x1181   :  { %12951 = vmatmul.mubr.msk.f32.gmra.mrb[118].mxu1 %vm161_vm1, %v18813_v41  ;;  %12957 = vmatprep.subr.mxu1 %v14795_v1 }
0x1182   :  { %12959 = vmatprep.mubr.msk.f32.mxu1 %vm14794_vm0, %v14795_v1 }
0x1188   :  { %12958 = vmatpush3.xpose.msk.msra.mxu1 %vm161_vm1, %v5961_v12 }
0x1189   :  { %13723 = vmatprep.subr.bf16.mxu1 %v13722_v52 }
0x118b   :  { %12960 = vmatmul.mubr.msk.f32.vlgmr.msra.gmra.mrb[120].mxu1 %vm161_vm1, %v18813_v41 }
0x118c   :  { %12962 = vmatprep.mubr.msk.f32.mxu1 %vm14794_vm0, %v14795_v1  ;;  %13725 = vmatpush3.bf16.msra.mxu1 %v13722_v52 }
0x118d   :  { %13727 = vmatprep.subr.bf16.mxu1 %v13726_v4 }
0x118f   :  { %12963 = vmatmul.mubr.msk.f32.gmra.mrb[122].mxu1 %vm161_vm1, %v18813_v41 }
0x1190   :  { %12965 = vmatprep.mubr.msk.f32.mxu1 %vm14794_vm0, %v14795_v1  ;;  %13729 = vmatpush3.bf16.msra.mxu1 %v13726_v4 }
0x1191   :  { %13734 = vmatprep.subr.bf16.mxu1 %v18809_v47 }
0x1193   :  { %12966 = vmatmul.mubr.msk.f32.gmra.mrb[124].mxu1 %vm161_vm1, %v18813_v41 }
0x1194   :  { %12976 = vmatprep.mubr.msk.f32.mxu1 %vm161_vm1, %v16841_v34 }
0x1197   :  { %12977 = vmatmul.mubr.msk.f32.vlgmr.msra.gmra.mrb[126].mxu1 %vm161_vm1, %v16838_v50 }
0x1198   :  { %12979 = vmatprep.mubr.msk.f32.mxu1 %vm161_vm1, %v16853_v39 }
0x119b   :  { %12980 = vmatmul.mubr.msk.f32.gmra.mrb[128].mxu1 %vm161_vm1, %v16860_v3 }
0x119c   :  { %12982 = vmatprep.mubr.msk.f32.mxu1 %vm161_vm1, %v16868_v2 }
0x119f   :  { %12983 = vmatmul.mubr.msk.f32.gmra.mrb[130].mxu1 %vm161_vm1, %v16885_v55 }
0x11a0   :  { %13006 = vmatprep.mubr.msk.f32.mxu1 %vm14794_vm0, %v14795_v1 }
0x124b   :  { %v16922_v22 = vpop.f32.mrb[114].mxu1 }
0x124c   :  { %v12946_v44 = vpop.f32.mrb[115].mxu1  ;;  %vm5949_vm8 = vcmp.eq.f32.partialorder %v16922_v22, 0.0 }
0x124d   :  { %vm17186_vm10 = vmor %vm5949_vm8, %vm18815_vm13 }
0x124e   :  { %vm18822_vm13 = vmmov %vm18818_vm11 }
0x124f   :  { %v16924_v8 = vpop.f32.mrb[116].mxu1 }
0x1250   :  { %v12949_v53 = vpop.f32.mrb[117].mxu1  ;;  %vm5950_vm9 = vcmp.eq.f32.partialorder %v16924_v8, 0.0 }
0x1254   :  { %v16926_v45 = vpop.f32.mrb[118].mxu1 }
0x1255   :  { %v12952_v38 = vpop.f32.mrb[119].mxu1  ;;  %vm5951_vm8 = vcmp.eq.f32.partialorder %v16926_v45, 0.0 }
0x125e   :  { %v16928_v17 = vpop.f32.mrb[120].mxu1 }
0x125f   :  { %v12961_v57 = vpop.f32.mrb[121].mxu1 }
0x1262   :  { %v16933_v26 = vpop.f32.mrb[122].mxu1 }
0x1263   :  { %v12964_v37 = vpop.f32.mrb[123].mxu1 }
0x1264   :  { %v6184_v37 = vsel %vm161_vm1, %v16860_v3, 0.0 }
0x1266   :  { %v16935_v40 = vpop.f32.mrb[124].mxu1 }
0x1267   :  { %v12967_v54 = vpop.f32.mrb[125].mxu1 }
0x1268   :  { %v6187_v54 = vsel %vm161_vm1, %v16868_v2, 0.0 }
0x126a   :  { %v12978_v14 = vpop.f32.mrb[126].mxu1 }
0x126b   :  { %v6140_v48 = vadd.f32 %v12978_v14, %v11633_v63  ;;  %v6134_v32 = vpop.f32.mrb[127].mxu1  ;;  %v6181_v14 = vsel %vm161_vm1, %v16853_v39, 0.0 }
0x126c   :  { %v6135_v42 = vadd.f32 %v11633_v63, %v6134_v32  ;;  %v6175_v32 = vsel %vm161_vm1, %v16841_v34, 0.0 }
0x126d   :  { %v6164_v31 = vmax.f32 %v6140_v48, 0.0  ;;  %v6178_v48 = vsel %vm161_vm1, %v16838_v50, 0.0 }
0x126e   :  { %v6163_v9 = vmax.f32 %v6135_v42, 0.0  ;;  %v12981_v6 = vpop.f32.mrb[128].mxu1 }
0x126f   :  { %v6150_v43 = vadd.f32 %v12981_v6, %v11633_v63  ;;  %v6144_v25 = vpop.f32.mrb[129].mxu1  ;;  %v16950_v36 = vmul.f32 0.35355338, %v6164_v31 }
0x1270   :  { %v6145_v56 = vadd.f32 %v11633_v63, %v6144_v25  ;;  %v16937_v49 = vpack.i.bf16 %v6164_v31, %v6163_v9  ;;  %v16952_v60 = vmul.f32 0.35355338, %v6163_v9 }
0x1271   :  { %v6166_v23 = vmax.f32 %v6150_v43, 0.0 }
0x1272   :  { %v16939_v0 = vmax.f32 %v6145_v56, 0.0  ;;  %v12984_v59 = vpop.f32.mrb[130].mxu1  ;;  %14101 = vrot.lane.b32.xlu1 %v16937_v49, %s14800_s19 }
0x1273   :  { %v6160_v15 = vadd.f32 %v12984_v59, %v11633_v63  ;;  %v6154_v61 = vpop.f32.mrb[131].mxu1  ;;  %v6172_v35 = vmul.f32 0.35355338, %v6166_v23  ;;  %v7244_v41 = vrot.slane %v6166_v23, 7 }
0x1274   :  { %v6155_v19 = vadd.f32 %v11633_v63, %v6154_v61  ;;  %6221 = vrot.lane.b32.xlu0 %v16939_v0, %s14800_s19  ;;  %v7243_v46 = vrot.slane %v16939_v0, 7  ;;  %v16976_v53 = vmul.f32 0.35355338, %v16939_v0  ;;  %v6190_v63 = vsel %vm674_vm6, %v16885_v55, 0.0 }
0x1275   :  { %v6168_v29 = vmax.f32 %v6160_v15, 0.0  ;;  %v7234_v7 = vrot.slane %v6172_v35, 7 }
0x1276   :  { %v6167_v62 = vmax.f32 %v6155_v19, 0.0  ;;  %14106 = vrot.lane.b32.xlu1 %v16937_v49, %s14799_s18  ;;  %v7245_v5 = vsel %vm438_vm3, %v7243_v46, %v7244_v41  ;;  %v7233_v38 = vrot.slane %v16976_v53, 7 }
0x1277   :  { %v6174_v11 = vmul.f32 0.35355338, %v6168_v29  ;;  %v7248_v16 = vrot.slane %v6168_v29, 7 }
0x1278   :  { %v6173_v58 = vmul.f32 0.35355338, %v6167_v62  ;;  %v7246_v13 = vrot.slane %v6167_v62, 7  ;;  %14111 = vrot.lane.b32.xlu0 %v16937_v49, %s14801_s20  ;;  %v17006_v57 = vsel %vm438_vm3, %v7233_v38, %v7234_v7 }
0x1279   :  { %v7238_v33 = vrot.slane %v6174_v11, 7 }
0x127a   :  { %v7236_v27 = vrot.slane %v6173_v58, 7  ;;  %v7247_v52 = vsel %vm438_vm3, %v7244_v41, %v7246_v13  ;;  %v16956_v10 = vsel %vm438_vm3, %v7246_v13, %v7248_v16  ;;  %6466 = vrot.lane.b32.xlu1 %v16939_v0, %s14799_s18 }
0x127b   :  { %v16961_v12 = vpack.i.bf16 %v7247_v52, %v7245_v5 }
0x127c   :  { %6458 = vrot.lane.b32.xlu0 %v16950_v36, %s14802_s21  ;;  %v16966_v4 = vsel %vm438_vm3, %v7236_v27, %v7238_v33  ;;  %v16969_v44 = vsel %vm438_vm3, %v7234_v7, %v7236_v27 }
0x127e   :  { %6456 = vrot.lane.b32.xlu1 %v16952_v60, %s14802_s21 }
0x1280   :  { %6708 = vrot.lane.b32.xlu0 %v16939_v0, %s14801_s20 }
0x1282   :  { %6460 = vrot.lane.b32.xlu1 %v16976_v53, %s14802_s21 }
0x1284   :  { %6698 = vrot.lane.b32.xlu0 %v16952_v60, %s14804_s23 }
0x1286   :  { %14116 = vrot.lane.b32.xlu1 %v16937_v49, %s14803_s22 }
0x1288   :  { %6702 = vrot.lane.b32.xlu0 %v16976_v53, %s14804_s23 }
0x128a   :  { %6700 = vrot.lane.b32.xlu1 %v16950_v36, %s14804_s23 }
0x128c   :  { %14121 = vrot.lane.b32.xlu0 %v16961_v12, %s14800_s19 }
0x128e   :  { %6950 = vrot.lane.b32.xlu1 %v16939_v0, %s14803_s22 }
0x1290   :  { %6942 = vrot.lane.b32.xlu0 %v16950_v36, %s14805_s24 }
0x1292   :  { %6940 = vrot.lane.b32.xlu1 %v16952_v60, %s14805_s24 }
0x1294   :  { %7254 = vrot.lane.b32.xlu0 %v16956_v10, %s14800_s19 }
0x1296   :  { %6944 = vrot.lane.b32.xlu1 %v16976_v53, %s14805_s24 }
0x1298   :  { %7525 = vrot.lane.b32.xlu0 %v16956_v10, %s14799_s18 }
0x129a   :  { %14126 = vrot.lane.b32.xlu1 %v16961_v12, %s14799_s18 }
0x129c   :  { %7515 = vrot.lane.b32.xlu0 %v17006_v57, %s14802_s21 }
0x129e   :  { %14131 = vrot.lane.b32.xlu1 %v16961_v12, %s14801_s20 }
0x12a0   :  { %7519 = vrot.lane.b32.xlu0 %v16966_v4, %s14802_s21 }
0x12a2   :  { %7517 = vrot.lane.b32.xlu1 %v16969_v44, %s14802_s21 }
0x12a4   :  { %14136 = vrot.lane.b32.xlu0 %v16961_v12, %s14803_s22 }
0x12a6   :  { %7782 = vrot.lane.b32.xlu1 %v16956_v10, %s14801_s20 }
0x12a8   :  { %7774 = vrot.lane.b32.xlu0 %v16969_v44, %s14804_s23 }
0x12aa   :  { %7772 = vrot.lane.b32.xlu1 %v17006_v57, %s14804_s23 }
0x12ac   :  { %8039 = vrot.lane.b32.xlu0 %v16956_v10, %s14803_s22 }
0x12ae   :  { %7776 = vrot.lane.b32.xlu1 %v16966_v4, %s14804_s23 }
0x12b0   :  { %8031 = vrot.lane.b32.xlu0 %v16969_v44, %s14805_s24 }
0x12b2   :  { %8029 = vrot.lane.b32.xlu1 %v17006_v57, %s14805_s24 }
0x12b6   :  { %8033 = vrot.lane.b32.xlu1 %v16966_v4, %s14805_s24 }
0x12cf   :  { %6185 = vadd.xlane.f32.xlu0 %v6184_v37 }
0x12d3   :  { %6188 = vadd.xlane.f32.xlu0 %v6187_v54 }
0x12d7   :  { %6191 = vadd.xlane.f32.xlu0 %v6190_v63 }
0x12da   :  { %6182 = vadd.xlane.f32.xlu1 %v6181_v14 }
0x12db   :  { %6179 = vadd.xlane.f32.xlu0 %v6178_v48 }
0x12de   :  { %6176 = vadd.xlane.f32.xlu1 %v6175_v32 }
0x12e4   :  { %v14102_v42 = vpop.permute.xlu1 %14101 }
0x12e5   :  { %v14104_v31 = vunpack.i.h.bf16 %v14102_v42  ;;  %v14103_v9 = vunpack.i.l.bf16 %v14102_v42 }
0x12e6   :  { %v6222_v25 = vpop.permute.xlu0 %6221 }
0x12e7   :  { %v13731_v6 = vpack.c.bf16 %v14104_v31, %v14103_v9 }
0x12e8   :  { %v14107_v43 = vpop.permute.xlu1 %14106 }
0x12e9   :  { %13733 = vmatpush3.bf16.xpose.msk.msra.mxu0 %vm15104_vm5, %v13731_v6  ;;  %v14109_v23 = vunpack.i.h.bf16 %v14107_v43  ;;  %v14108_v59 = vunpack.i.l.bf16 %v14107_v43 }
0x12ea   :  { %12989 = vmatprep.subr.mxu0 %v14795_v1  ;;  %v14112_v15 = vpop.permute.xlu0 %14111 }
0x12eb   :  { %v13738_v19 = vpack.c.bf16 %v14109_v23, %v14108_v59  ;;  %v14114_v41 = vunpack.i.h.bf16 %v14112_v15  ;;  %v14113_v62 = vunpack.i.l.bf16 %v14112_v15 }
0x12ec   :  { %v6467_v56 = vpop.permute.xlu1 %6466 }
0x12ed   :  { %v13745_v16 = vpack.c.bf16 %v14114_v41, %v14113_v62 }
0x12ee   :  { %v6459_v35 = vpop.permute.xlu0 %6458 }
0x12ef   :  { %14141 = vrot.lane.b32.xlu1 %v16937_v49, %s14806_s25 }
0x12f0   :  { %v6457_v61 = vpop.permute.xlu1 %6456 }
0x12f1   :  { %12990 = vmatpush3.xpose.msk.msra.mxu0 %vm708_vm4, %v6222_v25  ;;  %6361 = vrot.lane.b32.xlu0 %v16939_v0, %s14806_s25 }
0x12f2   :  { %13737 = vmatprep.subr.bf16.mxu0 %v18809_v47  ;;  %v6709_v46 = vpop.permute.xlu0 %6708 }
0x12f3   :  { %14146 = vrot.lane.b32.xlu1 %v16937_v49, %s14807_s26 }
0x12f4   :  { %12992 = vmatmul.mubr.msk.f32.vlgmr.msra.gmra.mrb[130].mxu0 %vm708_vm4, %v16952_v60  ;;  %v6461_v29 = vpop.permute.xlu1 %6460 }
0x12f5   :  { %13740 = vmatpush3.bf16.xpose.msk.msra.mxu0 %vm15104_vm5, %v13738_v19  ;;  %12994 = vmatprep.mubr.msk.f32.mxu0 %vm14794_vm0, %v14795_v1 }
0x12f6   :  { %13019 = vmatprep.subr.mxu0 %v14795_v1  ;;  %v6699_v58 = vpop.permute.xlu0 %6698 }
0x12f8   :  { %12995 = vmatmul.mubr.msk.f32.gmra.mrb[132].mxu0 %vm708_vm4, %v16950_v36  ;;  %v14117_v11 = vpop.permute.xlu1 %14116 }
0x12f9   :  { %12997 = vmatprep.mubr.msk.f32.mxu0 %vm14794_vm0, %v14795_v1  ;;  %v14119_v7 = vunpack.i.h.bf16 %v14117_v11  ;;  %v14118_v33 = vunpack.i.l.bf16 %v14117_v11 }
0x12fa   :  { %v6703_v36 = vpop.permute.xlu0 %6702 }
0x12fb   :  { %v13752_v27 = vpack.c.bf16 %v14119_v7, %v14118_v33 }
0x12fc   :  { %12998 = vmatmul.mubr.msk.f32.gmra.mrb[134].mxu0 %vm708_vm4, %v16976_v53  ;;  %v6701_v13 = vpop.permute.xlu1 %6700 }
0x12fd   :  { %13020 = vmatpush3.xpose.msk.msra.mxu0 %vm708_vm4, %v6467_v56  ;;  %13021 = vmatprep.mubr.msk.f32.mxu0 %vm14794_vm0, %v14795_v1 }
0x12fe   :  { %13744 = vmatprep.subr.bf16.mxu0 %v18809_v47  ;;  %v14122_v52 = vpop.permute.xlu0 %14121 }
0x12ff   :  { %v14124_v53 = vunpack.i.h.bf16 %v14122_v52  ;;  %v14123_v38 = vunpack.i.l.bf16 %v14122_v52 }
0x1300   :  { %13022 = vmatmul.mubr.msk.f32.vlgmr.msra.gmra.mrb[136].mxu0 %vm708_vm4, %v6457_v61  ;;  %v6951_v60 = vpop.permute.xlu1 %6950 }
0x1301   :  { %13747 = vmatpush3.bf16.xpose.msk.msra.mxu0 %vm15104_vm5, %v13745_v16  ;;  %13024 = vmatprep.mubr.msk.f32.mxu0 %vm14794_vm0, %v14795_v1  ;;  %v13759_v63 = vpack.c.bf16 %v14124_v53, %v14123_v38 }
0x1302   :  { %13049 = vmatprep.subr.mxu0 %v14795_v1  ;;  %v6943_v37 = vpop.permute.xlu0 %6942 }
0x1304   :  { %13025 = vmatmul.mubr.msk.f32.gmra.mrb[138].mxu0 %vm708_vm4, %v6459_v35  ;;  %v6941_v5 = vpop.permute.xlu1 %6940 }
0x1305   :  { %13027 = vmatprep.mubr.msk.f32.mxu0 %vm14794_vm0, %v14795_v1 }
0x1306   :  { %v7255_v14 = vpop.permute.xlu0 %7254 }
0x1308   :  { %13028 = vmatmul.mubr.msk.f32.gmra.mrb[140].mxu0 %vm708_vm4, %v6461_v29  ;;  %v6945_v54 = vpop.permute.xlu1 %6944 }
0x1309   :  { %13050 = vmatpush3.xpose.msk.msra.mxu0 %vm708_vm4, %v6709_v46  ;;  %13051 = vmatprep.mubr.msk.f32.mxu0 %vm14794_vm0, %v14795_v1 }
0x130a   :  { %13751 = vmatprep.subr.bf16.mxu0 %v18809_v47  ;;  %v7526_v31 = vpop.permute.xlu0 %7525 }
0x130c   :  { %13052 = vmatmul.mubr.msk.f32.vlgmr.msra.gmra.mrb[142].mxu0 %vm708_vm4, %v6699_v58  ;;  %v14127_v48 = vpop.permute.xlu1 %14126 }
0x130d   :  { %13754 = vmatpush3.bf16.xpose.msk.msra.mxu0 %vm15104_vm5, %v13752_v27  ;;  %13054 = vmatprep.mubr.msk.f32.mxu0 %vm14794_vm0, %v14795_v1  ;;  %v14129_v32 = vunpack.i.h.bf16 %v14127_v48  ;;  %v14128_v42 = vunpack.i.l.bf16 %v14127_v48 }
0x130e   :  { %13079 = vmatprep.subr.mxu0 %v14795_v1  ;;  %v7516_v6 = vpop.permute.xlu0 %7515 }
0x130f   :  { %v13766_v9 = vpack.c.bf16 %v14129_v32, %v14128_v42 }
0x1310   :  { %13055 = vmatmul.mubr.msk.f32.gmra.mrb[144].mxu0 %vm708_vm4, %v6701_v13  ;;  %v14132_v43 = vpop.permute.xlu1 %14131 }
0x1311   :  { %13057 = vmatprep.mubr.msk.f32.mxu0 %vm14794_vm0, %v14795_v1  ;;  %v14134_v25 = vunpack.i.h.bf16 %v14132_v43  ;;  %v14133_v56 = vunpack.i.l.bf16 %v14132_v43 }
0x1313   :  { %v13773_v23 = vpack.c.bf16 %v14134_v25, %v14133_v56 }
0x1314   :  { %13058 = vmatmul.mubr.msk.f32.gmra.mrb[146].mxu0 %vm708_vm4, %v6703_v36  ;;  %v7518_v59 = vpop.permute.xlu1 %7517 }
0x1315   :  { %13080 = vmatpush3.xpose.msk.msra.mxu0 %vm708_vm4, %v6951_v60  ;;  %13081 = vmatprep.mubr.msk.f32.mxu0 %vm14794_vm0, %v14795_v1 }
0x1316   :  { %13758 = vmatprep.subr.bf16.mxu0 %v18809_v47 }
0x1318   :  { %13082 = vmatmul.mubr.msk.f32.vlgmr.msra.gmra.mrb[148].mxu0 %vm708_vm4, %v6941_v5 }
0x1319   :  { %13761 = vmatpush3.bf16.xpose.msk.msra.mxu0 %vm15104_vm5, %v13759_v63  ;;  %13084 = vmatprep.mubr.msk.f32.mxu0 %vm14794_vm0, %v14795_v1 }
0x131a   :  { %13109 = vmatprep.subr.mxu0 %v14795_v1 }
0x131c   :  { %13085 = vmatmul.mubr.msk.f32.gmra.mrb[150].mxu0 %vm708_vm4, %v6943_v37 }
0x131d   :  { %13087 = vmatprep.mubr.msk.f32.mxu0 %vm14794_vm0, %v14795_v1 }
0x1320   :  { %13088 = vmatmul.mubr.msk.f32.gmra.mrb[152].mxu0 %vm708_vm4, %v6945_v54 }
0x1321   :  { %13110 = vmatpush3.xpose.msk.msra.mxu0 %vm708_vm4, %v7255_v14  ;;  %13111 = vmatprep.mubr.msk.f32.mxu0 %vm14794_vm0, %v14795_v1 }
0x1322   :  { %13765 = vmatprep.subr.bf16.mxu0 %v18809_v47 }
0x1324   :  { %13112 = vmatmul.mubr.msk.f32.vlgmr.msra.gmra.mrb[154].mxu0 %vm708_vm4, %v17006_v57  ;;  %v7520_v57 = vpop.permute.xlu0 %7519 }
0x1325   :  { %13768 = vmatpush3.bf16.xpose.msk.msra.mxu0 %vm15104_vm5, %v13766_v9  ;;  %13114 = vmatprep.mubr.msk.f32.mxu0 %vm14794_vm0, %v14795_v1 }
0x1326   :  { %13139 = vmatprep.subr.mxu0 %v14795_v1 }
0x1328   :  { %13115 = vmatmul.mubr.msk.f32.gmra.mrb[156].mxu0 %vm708_vm4, %v16969_v44  ;;  %v7783_v44 = vpop.permute.xlu1 %7782 }
0x1329   :  { %13117 = vmatprep.mubr.msk.f32.mxu0 %vm14794_vm0, %v14795_v1 }
0x132c   :  { %13118 = vmatmul.mubr.msk.f32.gmra.mrb[158].mxu0 %vm708_vm4, %v16966_v4  ;;  %v14137_v4 = vpop.permute.xlu0 %14136  ;;  %v7773_v35 = vpop.permute.xlu1 %7772 }
0x132d   :  { %13140 = vmatpush3.xpose.msk.msra.mxu0 %vm708_vm4, %v7526_v31  ;;  %13141 = vmatprep.mubr.msk.f32.mxu0 %vm14794_vm0, %v14795_v1  ;;  %v14139_v15 = vunpack.i.h.bf16 %v14137_v4  ;;  %v14138_v61 = vunpack.i.l.bf16 %v14137_v4 }
0x132e   :  { %13772 = vmatprep.subr.bf16.mxu0 %v18809_v47 }
0x132f   :  { %v13780_v19 = vpack.c.bf16 %v14139_v15, %v14138_v61 }
0x1330   :  { %13142 = vmatmul.mubr.msk.f32.vlgmr.msra.gmra.mrb[160].mxu0 %vm708_vm4, %v7516_v6  ;;  %v7775_v29 = vpop.permute.xlu0 %7774  ;;  %v7777_v41 = vpop.permute.xlu1 %7776 }
0x1331   :  { %13775 = vmatpush3.bf16.xpose.msk.msra.mxu0 %vm15104_vm5, %v13773_v23  ;;  %13144 = vmatprep.mubr.msk.f32.mxu0 %vm14794_vm0, %v14795_v1 }
0x1332   :  { %13169 = vmatprep.subr.mxu0 %v14795_v1 }
0x1334   :  { %13145 = vmatmul.mubr.msk.f32.gmra.mrb[162].mxu0 %vm708_vm4, %v7518_v59  ;;  %v8040_v62 = vpop.permute.xlu0 %8039  ;;  %v8030_v46 = vpop.permute.xlu1 %8029 }
0x1335   :  { %13147 = vmatprep.mubr.msk.f32.mxu0 %vm14794_vm0, %v14795_v1 }
0x1338   :  { %13148 = vmatmul.mubr.msk.f32.gmra.mrb[164].mxu0 %vm708_vm4, %v7520_v57  ;;  %v8032_v11 = vpop.permute.xlu0 %8031  ;;  %v8034_v16 = vpop.permute.xlu1 %8033 }
0x1339   :  { %13170 = vmatpush3.xpose.msk.msra.mxu0 %vm708_vm4, %v7783_v44  ;;  %13171 = vmatprep.mubr.msk.f32.mxu0 %vm14794_vm0, %v14795_v1 }
0x133a   :  { %13779 = vmatprep.subr.bf16.mxu0 %v18809_v47 }
0x133c   :  { %13172 = vmatmul.mubr.msk.f32.vlgmr.msra.gmra.mrb[166].mxu0 %vm708_vm4, %v7773_v35 }
0x133d   :  { %13782 = vmatpush3.bf16.xpose.msk.msra.mxu0 %vm15104_vm5, %v13780_v19  ;;  %13174 = vmatprep.mubr.msk.f32.mxu0 %vm14794_vm0, %v14795_v1 }
0x133e   :  { %13199 = vmatprep.subr.mxu0 %v14795_v1 }
0x1340   :  { %13175 = vmatmul.mubr.msk.f32.gmra.mrb[168].mxu0 %vm708_vm4, %v7775_v29 }
0x1341   :  { %13177 = vmatprep.mubr.msk.f32.mxu0 %vm14794_vm0, %v14795_v1 }
0x1344   :  { %13178 = vmatmul.mubr.msk.f32.gmra.mrb[170].mxu0 %vm708_vm4, %v7777_v41 }
0x1345   :  { %13200 = vmatpush3.xpose.msk.msra.mxu0 %vm708_vm4, %v8040_v62  ;;  %13201 = vmatprep.mubr.msk.f32.mxu0 %vm14794_vm0, %v14795_v1 }
0x1348   :  { %13202 = vmatmul.mubr.msk.f32.vlgmr.msra.gmra.mrb[172].mxu0 %vm708_vm4, %v8030_v46 }
0x1349   :  { %13204 = vmatprep.mubr.msk.f32.mxu0 %vm14794_vm0, %v14795_v1 }
0x134c   :  { %13205 = vmatmul.mubr.msk.f32.gmra.mrb[174].mxu0 %vm708_vm4, %v8032_v11 }
0x134d   :  { %13207 = vmatprep.mubr.msk.f32.mxu0 %vm14794_vm0, %v14795_v1 }
0x1350   :  { %13208 = vmatmul.mubr.msk.f32.gmra.mrb[176].mxu0 %vm708_vm4, %v8034_v16 }
0x135c   :  { %v17167_v58 = vpop.xlane.xlu0 %6185 }
0x1360   :  { %v17169_v13 = vpop.xlane.xlu0 %6188 }
0x1364   :  { %v17173_v33 = vpop.xlane.xlu0 %6191 }
0x1367   :  { %v17171_v7 = vpop.xlane.xlu1 %6182 }
0x1368   :  { %v17177_v5 = vpop.xlane.xlu0 %6179 }
0x136b   :  { %v17175_v36 = vpop.xlane.xlu1 %6176 }
0x136c   :  { %v6362_v38 = vpop.permute.xlu0 %6361 }
0x136f   :  { %v14142_v60 = vpop.permute.xlu1 %14141 }
0x1370   :  { %v14144_v27 = vunpack.i.h.bf16 %v14142_v60  ;;  %v14143_v52 = vunpack.i.l.bf16 %v14142_v60 }
0x1372   :  { %v13735_v53 = vpack.c.bf16 %v14144_v27, %v14143_v52 }
0x1374   :  { %13736 = vmatpush3.bf16.msra.mxu1 %v13735_v53 }
0x1375   :  { %13004 = vmatprep.subr.mxu1 %v14795_v1 }
0x1378   :  { %13005 = vmatpush3.msk.msra.mxu1 %vm18814_vm2, %v6362_v38  ;;  %vm17200_vm2 = vmor %vm5950_vm9, %vm18819_vm7  ;;  %vm18826_vm9 = vcmask 186368  }
0x1379   :  { %13741 = vmatprep.subr.bf16.mxu1 %v18809_v47  ;;  %vm18827_vm7 = vmmov %vm18822_vm13 }
0x13c7   :  { %v6304_v54 = vpop.f32.mrb[130].mxu0 }
0x13c8   :  { %v17193_v63 = vsel %vm17186_vm10, -4.2949673e+09, %v6304_v54  ;;  %v12993_v14 = vpop.f32.mrb[131].mxu0 }
0x13c9   :  { %v6321_v48 = vsel %vm18818_vm11, %v17193_v63, -inf  ;;  %vm18823_vm11 = vcmp.gt.s32.totalorder %v15246_v20, %v15265_v24 }
0x13ca   :  { %6322 = vmax.xlane.f32.xlu0 %v6321_v48  ;;  %vm17214_vm14 = vmor %vm5951_vm8, %vm18823_vm11 }
0x13cb   :  { %v6309_v32 = vpop.f32.mrb[132].mxu0  ;;  %vm18828_vm8 = vmmov %vm18827_vm7 }
0x13cc   :  { %v17207_v8 = vsel %vm17200_vm2, -4.2949673e+09, %v6309_v32  ;;  %v12996_v42 = vpop.f32.mrb[133].mxu0  ;;  %vm18830_vm11 = vmmov %vm18827_vm7 }
0x13cd   :  { %v6324_v31 = vsel %vm18822_vm13, %v17207_v8, -inf  ;;  %vm18829_vm13 = vmmov %vm18826_vm9 }
0x13ce   :  { %6325 = vmax.xlane.f32.xlu0 %v6324_v31 }
0x13cf   :  { %v6314_v6 = vpop.f32.mrb[134].mxu0 }
0x13d0   :  { %v17220_v45 = vsel %vm17214_vm14, -4.2949673e+09, %v6314_v6  ;;  %v12999_v43 = vpop.f32.mrb[135].mxu0 }
0x13d1   :  { %v6327_v25 = vsel %vm18826_vm9, %v17220_v45, -inf  ;;  %vm18831_vm9 = vmmov %vm18827_vm7 }
0x13d2   :  { %6328 = vmax.xlane.f32.xlu0 %v6327_v25 }
0x13d3   :  { %v6546_v56 = vpop.f32.mrb[136].mxu0 }
0x13d4   :  { %v17226_v57 = vsel %vm17186_vm10, -4.2949673e+09, %v6546_v56  ;;  %v13023_v23 = vpop.f32.mrb[137].mxu0 }
0x13d5   :  { %v6563_v59 = vsel %vm18827_vm7, %v17226_v57, -inf  ;;  %vm18832_vm7 = vmmov %vm18829_vm13 }
0x13d6   :  { %6564 = vmax.xlane.f32.xlu0 %v6563_v59 }
0x13d7   :  { %v6551_v4 = vpop.f32.mrb[138].mxu0 }
0x13d8   :  { %v17232_v44 = vsel %vm17200_vm2, -4.2949673e+09, %v6551_v4  ;;  %v13026_v15 = vpop.f32.mrb[139].mxu0 }
0x13d9   :  { %v6566_v61 = vsel %vm18828_vm8, %v17232_v44, -inf }
0x13da   :  { %6567 = vmax.xlane.f32.xlu0 %v6566_v61 }
0x13db   :  { %v6556_v19 = vpop.f32.mrb[140].mxu0 }
0x13dc   :  { %v17238_v35 = vsel %vm17214_vm14, -4.2949673e+09, %v6556_v19  ;;  %v13029_v29 = vpop.f32.mrb[141].mxu0 }
0x13dd   :  { %v6569_v41 = vsel %vm18829_vm13, %v17238_v35, -inf  ;;  %vm18833_vm13 = vmmov %vm18828_vm8 }
0x13de   :  { %6570 = vmax.xlane.f32.xlu0 %v6569_v41 }
0x13df   :  { %v6788_v62 = vpop.f32.mrb[142].mxu0 }
0x13e0   :  { %v17244_v46 = vsel %vm17186_vm10, -4.2949673e+09, %v6788_v62  ;;  %v13053_v11 = vpop.f32.mrb[143].mxu0 }
0x13e1   :  { %v6805_v16 = vsel %vm18830_vm11, %v17244_v46, -inf  ;;  %vm6048_vm11 = vcmp.eq.f32.partialorder %v16928_v17, 0.0 }
0x13e2   :  { %6806 = vmax.xlane.f32.xlu0 %v6805_v16 }
0x13e3   :  { %v6793_v60 = vpop.f32.mrb[144].mxu0 }
0x13e4   :  { %v17250_v27 = vsel %vm17200_vm2, -4.2949673e+09, %v6793_v60  ;;  %v13056_v52 = vpop.f32.mrb[145].mxu0 }
0x13e5   :  { %v6808_v53 = vsel %vm18831_vm9, %v17250_v27, -inf }
0x13e6   :  { %6809 = vmax.xlane.f32.xlu1 %v6808_v53 }
0x13e7   :  { %v6798_v38 = vpop.f32.mrb[146].mxu0 }
0x13e8   :  { %v17256_v54 = vsel %vm17214_vm14, -4.2949673e+09, %v6798_v38  ;;  %v13059_v14 = vpop.f32.mrb[147].mxu0 }
0x13e9   :  { %v6811_v48 = vsel %vm18832_vm7, %v17256_v54, -inf }
0x13ea   :  { %6812 = vmax.xlane.f32.xlu0 %v6811_v48 }
0x13eb   :  { %v7030_v32 = vpop.f32.mrb[148].mxu0 }
0x13ec   :  { %v17262_v42 = vsel %vm17186_vm10, -4.2949673e+09, %v7030_v32  ;;  %v13083_v31 = vpop.f32.mrb[149].mxu0  ;;  %vm18834_vm10 = vmmov %vm18832_vm7  ;;  %vm6049_vm7 = vcmp.eq.f32.partialorder %v16933_v26, 0.0 }
0x13ed   :  { %v7047_v6 = vsel %vm18828_vm8, %v17262_v42, -inf }
0x13ee   :  { %7048 = vmax.xlane.f32.xlu1 %v7047_v6 }
0x13ef   :  { %v7035_v43 = vpop.f32.mrb[150].mxu0 }
0x13f0   :  { %v17268_v25 = vsel %vm17200_vm2, -4.2949673e+09, %v7035_v43  ;;  %v13086_v56 = vpop.f32.mrb[151].mxu0  ;;  %vm18835_vm2 = vcmp.gt.s32.totalorder %v15246_v20, %v15244_v18 }
0x13f1   :  { %v7050_v23 = vsel %vm18833_vm13, %v17268_v25, -inf  ;;  %vm17282_vm9 = vmor %vm6048_vm11, %vm18835_vm2  ;;  %vm6050_vm11 = vcmp.eq.f32.partialorder %v16935_v40, 0.0  ;;  %vm18843_vm2 = vcmp.gt.s32.totalorder %v15246_v20, %v15265_v24 }
0x13f2   :  { %7051 = vmax.xlane.f32.xlu0 %v7050_v23 }
0x13f3   :  { %v7040_v59 = vpop.f32.mrb[152].mxu0 }
0x13f4   :  { %v17275_v37 = vsel %vm17214_vm14, -4.2949673e+09, %v7040_v59  ;;  %v13089_v4 = vpop.f32.mrb[153].mxu0  ;;  %vm18838_vm14 = vmmov %vm18828_vm8  ;;  %vm18839_vm8 = vcmp.gt.s32.totalorder %v15246_v20, %v15252_v21 }
0x13f5   :  { %v7053_v15 = vsel %vm18834_vm10, %v17275_v37, -inf  ;;  %vm17296_vm13 = vmor %vm6049_vm7, %vm18839_vm8  ;;  %vm18846_vm7 = vcmask 186368  }
0x13f6   :  { %7054 = vmax.xlane.f32.xlu1 %v7053_v15  ;;  %vm18842_vm10 = vmmov %vm18838_vm14 }
0x13f7   :  { %v7334_v61 = vpop.f32.mrb[154].mxu0  ;;  %vm18847_vm8 = vmmov %vm18842_vm10 }
0x13f8   :  { %v17289_v17 = vsel %vm17282_vm9, -4.2949673e+09, %v7334_v61  ;;  %v13113_v9 = vpop.f32.mrb[155].mxu0 }
0x13f9   :  { %v7351_v19 = vsel %vm18838_vm14, %v17289_v17, -inf  ;;  %vm17310_vm14 = vmor %vm6050_vm11, %vm18843_vm2 }
0x13fa   :  { %7352 = vmax.xlane.f32.xlu0 %v7351_v19  ;;  %vm18848_vm11 = vmmov %vm18847_vm8 }
0x13fb   :  { %v7339_v29 = vpop.f32.mrb[156].mxu0  ;;  %vm18850_vm2 = vmmov %vm18847_vm8 }
0x13fc   :  { %v17303_v26 = vsel %vm17296_vm13, -4.2949673e+09, %v7339_v29  ;;  %v13116_v41 = vpop.f32.mrb[157].mxu0 }
0x13fd   :  { %v7354_v62 = vsel %vm18842_vm10, %v17303_v26, -inf  ;;  %vm18849_vm10 = vmmov %vm18846_vm7 }
0x13fe   :  { %7355 = vmax.xlane.f32.xlu1 %v7354_v62 }
0x13ff   :  { %v7344_v11 = vpop.f32.mrb[158].mxu0 }
0x1400   :  { %v17316_v40 = vsel %vm17310_vm14, -4.2949673e+09, %v7344_v11  ;;  %v13119_v16 = vpop.f32.mrb[159].mxu0 }
0x1401   :  { %v7357_v60 = vsel %vm18846_vm7, %v17316_v40, -inf  ;;  %vm18851_vm7 = vmmov %vm18850_vm2 }
0x1402   :  { %7358 = vmax.xlane.f32.xlu0 %v7357_v60 }
0x1403   :  { %v7605_v52 = vpop.f32.mrb[160].mxu0 }
0x1404   :  { %v17322_v53 = vsel %vm17282_vm9, -4.2949673e+09, %v7605_v52  ;;  %v13143_v20 = vpop.f32.mrb[161].mxu0 }
0x1405   :  { %v7622_v24 = vsel %vm18847_vm8, %v17322_v53, -inf  ;;  %vm18852_vm8 = vmmov %vm18849_vm10 }
0x1406   :  { %7623 = vmax.xlane.f32.xlu0 %v7622_v24 }
0x1407   :  { %v7610_v38 = vpop.f32.mrb[162].mxu0 }
0x1408   :  { %v17328_v14 = vsel %vm17296_vm13, -4.2949673e+09, %v7610_v38  ;;  %v13146_v48 = vpop.f32.mrb[163].mxu0 }
0x1409   :  { %v7625_v32 = vsel %vm18848_vm11, %v17328_v14, -inf  ;;  %vm18853_vm11 = vmmov %vm18850_vm2 }
0x140a   :  { %7626 = vmax.xlane.f32.xlu1 %v7625_v32 }
0x140b   :  { %v7615_v31 = vpop.f32.mrb[164].mxu0 }
0x140c   :  { %v17334_v6 = vsel %vm17310_vm14, -4.2949673e+09, %v7615_v31  ;;  %v13149_v43 = vpop.f32.mrb[165].mxu0 }
0x140d   :  { %v7628_v56 = vsel %vm18849_vm10, %v17334_v6, -inf  ;;  %vm18854_vm10 = vmmov %vm18850_vm2 }
0x140e   :  { %7629 = vmax.xlane.f32.xlu1 %v7628_v56 }
0x140f   :  { %v7862_v23 = vpop.f32.mrb[166].mxu0 }
0x1410   :  { %v17340_v59 = vsel %vm17282_vm9, -4.2949673e+09, %v7862_v23  ;;  %v13173_v4 = vpop.f32.mrb[167].mxu0 }
0x1411   :  { %v7879_v15 = vsel %vm18850_vm2, %v17340_v59, -inf }
0x1412   :  { %7880 = vmax.xlane.f32.xlu1 %v7879_v15 }
0x1413   :  { %v7867_v61 = vpop.f32.mrb[168].mxu0 }
0x1414   :  { %v17346_v9 = vsel %vm17296_vm13, -4.2949673e+09, %v7867_v61  ;;  %v13176_v19 = vpop.f32.mrb[169].mxu0 }
0x1415   :  { %v7882_v29 = vsel %vm18851_vm7, %v17346_v9, -inf }
0x1416   :  { %7883 = vmax.xlane.f32.xlu1 %v7882_v29 }
0x1417   :  { %v7872_v41 = vpop.f32.mrb[170].mxu0 }
0x1418   :  { %v17352_v62 = vsel %vm17310_vm14, -4.2949673e+09, %v7872_v41  ;;  %v13179_v11 = vpop.f32.mrb[171].mxu0 }
0x1419   :  { %v7885_v16 = vsel %vm18852_vm8, %v17352_v62, -inf }
0x141a   :  { %7886 = vmax.xlane.f32.xlu1 %v7885_v16 }
0x141b   :  { %v8119_v60 = vpop.f32.mrb[172].mxu0 }
0x141c   :  { %v17358_v52 = vsel %vm17282_vm9, -4.2949673e+09, %v8119_v60  ;;  %6603 = vrot.lane.b32.xlu0 %v16939_v0, %s14807_s26  ;;  %v13203_v20 = vpop.f32.mrb[173].mxu0  ;;  %vm18855_vm9 = vmmov %vm18852_vm8 }
0x141d   :  { %v8136_v24 = vsel %vm18853_vm11, %v17358_v52, -inf }
0x141e   :  { %8137 = vmax.xlane.f32.xlu1 %v8136_v24 }
0x141f   :  { %v8124_v38 = vpop.f32.mrb[174].mxu0 }
0x1420   :  { %v17366_v48 = vsel %vm17296_vm13, -4.2949673e+09, %v8124_v38  ;;  %v13206_v32 = vpop.f32.mrb[175].mxu0  ;;  %vm18856_vm13 = vmmov %vm18850_vm2 }
0x1421   :  { %v8139_v31 = vsel %vm18854_vm10, %v17366_v48, -inf  ;;  %vm18861_vm10 = vmmov %vm18851_vm7 }
0x1422   :  { %8140 = vmax.xlane.f32.xlu1 %v8139_v31 }
0x1423   :  { %v8129_v22 = vpop.f32.mrb[176].mxu0 }
0x1424   :  { %v17372_v43 = vsel %vm17310_vm14, -4.2949673e+09, %v8129_v22  ;;  %v13209_v56 = vpop.f32.mrb[177].mxu0  ;;  %vm18857_vm14 = vmmov %vm18850_vm2 }
0x1425   :  { %v8142_v23 = vsel %vm18855_vm9, %v17372_v43, -inf  ;;  %vm18858_vm2 = vmmov %vm18852_vm8 }
0x1426   :  { %vm18859_vm8 = vmmov %vm18851_vm7 }
0x1427   :  { %vm18860_vm11 = vmmov %vm18858_vm2 }
0x1428   :  { %vm18862_vm9 = vmmov %vm18851_vm7 }
0x1433   :  { %14151 = vrot.lane.b32.xlu1 %v16937_v49, %s14809_s27 }
0x143b   :  { %8143 = vmax.xlane.f32.xlu0 %v8142_v23 }
0x1457   :  { %v6323_v18 = vpop.xlane.xlu0 %6322 }
0x1458   :  { %v6330_v4 = vsub.f32 %v17193_v63, %v6323_v18  ;;  %v17394_v18 = vpop.permute.xlu1 %14146 }
0x145a   :  { %v6333_v15 = vmul.f32 1.442695, %v6330_v4 }
0x145b   :  { %v6326_v61 = vpop.xlane.xlu0 %6325 }
0x145c   :  { %14514 = vpow2.f32 %v6333_v15  ;;  %v6331_v19 = vsub.f32 %v17207_v8, %v6326_v61 }
0x145e   :  { %v6335_v29 = vmul.f32 1.442695, %v6331_v19 }
0x145f   :  { %v6329_v21 = vpop.xlane.xlu0 %6328 }
0x1460   :  { %14516 = vpow2.f32 %v6335_v29  ;;  %v6332_v41 = vsub.f32 %v17220_v45, %v6329_v21 }
0x1462   :  { %v6337_v11 = vmul.f32 1.442695, %v6332_v41 }
0x1463   :  { %v6565_v16 = vpop.xlane.xlu0 %6564 }
0x1464   :  { %14518 = vpow2.f32 %v6337_v11  ;;  %v6572_v60 = vsub.f32 %v17226_v57, %v6565_v16 }
0x1466   :  { %v17382_v20 = vpop.eup %14514  ;;  %v6575_v24 = vmul.f32 1.442695, %v6572_v60 }
0x1467   :  { %v6568_v38 = vpop.xlane.xlu0 %6567  ;;  %v6339_v63 = vsel %vm18856_vm13, %v17382_v20, 0.0  ;;  %vm18863_vm13 = vmmov %vm18858_vm2 }
0x1468   :  { %14520 = vpow2.f32 %v6575_v24  ;;  %v6573_v8 = vsub.f32 %v17232_v44, %v6568_v38  ;;  %6340 = vadd.xlane.f32.xlu0 %v6339_v63 }
0x146a   :  { %v17387_v32 = vpop.eup %14516  ;;  %v6577_v31 = vmul.f32 1.442695, %v6573_v8 }
0x146b   :  { %v6571_v45 = vpop.xlane.xlu0 %6570  ;;  %v6342_v22 = vsel %vm18857_vm14, %v17387_v32, 0.0  ;;  %vm18864_vm14 = vmmov %vm18851_vm7 }
0x146c   :  { %14522 = vpow2.f32 %v6577_v31  ;;  %v6574_v57 = vsub.f32 %v17238_v35, %v6571_v45  ;;  %6343 = vadd.xlane.f32.xlu0 %v6342_v22 }
0x146e   :  { %v17392_v56 = vpop.eup %14518  ;;  %v6579_v23 = vmul.f32 1.442695, %v6574_v57 }
0x146f   :  { %v6807_v4 = vpop.xlane.xlu0 %6806  ;;  %v6345_v44 = vsel %vm18858_vm2, %v17392_v56, 0.0  ;;  %vm18865_vm2 = vmmov %vm18851_vm7 }
0x1470   :  { %14524 = vpow2.f32 %v6579_v23  ;;  %v6814_v15 = vsub.f32 %v17244_v46, %v6807_v4  ;;  %6346 = vadd.xlane.f32.xlu0 %v6345_v44 }
0x1472   :  { %v17399_v61 = vpop.eup %14520  ;;  %v6817_v19 = vmul.f32 1.442695, %v6814_v15 }
0x1473   :  { %v6810_v29 = vpop.xlane.xlu1 %6809  ;;  %v6581_v35 = vsel %vm18851_vm7, %v17399_v61, 0.0  ;;  %vm18866_vm7 = vmmov %vm18860_vm11 }
0x1474   :  { %14526 = vpow2.f32 %v6817_v19  ;;  %v6815_v21 = vsub.f32 %v17250_v27, %v6810_v29  ;;  %6582 = vadd.xlane.f32.xlu1 %v6581_v35 }
0x1476   :  { %v17404_v41 = vpop.eup %14522  ;;  %v6819_v11 = vmul.f32 1.442695, %v6815_v21 }
0x1477   :  { %v6813_v16 = vpop.xlane.xlu0 %6812  ;;  %v6584_v60 = vsel %vm18859_vm8, %v17404_v41, 0.0  ;;  %vm18867_vm8 = vmmov %vm18865_vm2 }
0x1478   :  { %14528 = vpow2.f32 %v6819_v11  ;;  %v6816_v46 = vsub.f32 %v17256_v54, %v6813_v16  ;;  %6585 = vadd.xlane.f32.xlu0 %v6584_v60 }
0x147a   :  { %v17409_v24 = vpop.eup %14524  ;;  %v6821_v38 = vmul.f32 1.442695, %v6816_v46 }
0x147b   :  { %v7049_v63 = vpop.xlane.xlu1 %7048  ;;  %v6587_v8 = vsel %vm18860_vm11, %v17409_v24, 0.0  ;;  %vm18868_vm11 = vmmov %vm18865_vm2 }
0x147c   :  { %14530 = vpow2.f32 %v6821_v38  ;;  %v7056_v27 = vsub.f32 %v17262_v42, %v7049_v63  ;;  %6588 = vadd.xlane.f32.xlu0 %v6587_v8 }
0x147e   :  { %v17414_v31 = vpop.eup %14526  ;;  %v7059_v45 = vmul.f32 1.442695, %v7056_v27 }
0x147f   :  { %v7052_v22 = vpop.xlane.xlu0 %7051  ;;  %v6823_v57 = vsel %vm18861_vm10, %v17414_v31, 0.0  ;;  %vm18869_vm10 = vmmov %vm18866_vm7 }
0x1480   :  { %14532 = vpow2.f32 %v7059_v45  ;;  %v7057_v54 = vsub.f32 %v17268_v25, %v7052_v22  ;;  %6824 = vadd.xlane.f32.xlu0 %v6823_v57 }
0x1482   :  { %v17419_v23 = vpop.eup %14528  ;;  %v7061_v4 = vmul.f32 1.442695, %v7057_v54 }
0x1483   :  { %v7055_v44 = vpop.xlane.xlu1 %7054  ;;  %v6826_v15 = vsel %vm18862_vm9, %v17419_v23, 0.0  ;;  %vm18870_vm9 = vmmov %vm18865_vm2 }
0x1484   :  { %14534 = vpow2.f32 %v7061_v4  ;;  %v7058_v42 = vsub.f32 %v17275_v37, %v7055_v44  ;;  %6827 = vadd.xlane.f32.xlu1 %v6826_v15 }
0x1486   :  { %v17424_v19 = vpop.eup %14530  ;;  %v7063_v29 = vmul.f32 1.442695, %v7058_v42 }
0x1487   :  { %v7353_v35 = vpop.xlane.xlu0 %7352  ;;  %v6829_v21 = vsel %vm18863_vm13, %v17424_v19, 0.0  ;;  %vm18871_vm13 = vmmov %vm18865_vm2 }
0x1488   :  { %14536 = vpow2.f32 %v7063_v29  ;;  %v7360_v25 = vsub.f32 %v17289_v17, %v7353_v35  ;;  %6830 = vadd.xlane.f32.xlu0 %v6829_v21 }
0x148a   :  { %v17429_v11 = vpop.eup %14532  ;;  %v7363_v16 = vmul.f32 1.442695, %v7360_v25 }
0x148b   :  { %v7356_v60 = vpop.xlane.xlu1 %7355  ;;  %v7065_v46 = vsel %vm18864_vm14, %v17429_v11, 0.0  ;;  %vm18872_vm14 = vmmov %vm18866_vm7 }
0x148c   :  { %14538 = vpow2.f32 %v7363_v16  ;;  %v7361_v37 = vsub.f32 %v17303_v26, %v7356_v60  ;;  %7066 = vadd.xlane.f32.xlu0 %v7065_v46 }
0x148e   :  { %v17434_v38 = vpop.eup %14534  ;;  %v7365_v63 = vmul.f32 1.442695, %v7361_v37 }
0x148f   :  { %v7359_v8 = vpop.xlane.xlu0 %7358  ;;  %v7068_v27 = vsel %vm18865_vm2, %v17434_v38, 0.0 }
0x1490   :  { %14540 = vpow2.f32 %v7365_v63  ;;  %v7362_v17 = vsub.f32 %v17316_v40, %v7359_v8  ;;  %7069 = vadd.xlane.f32.xlu1 %v7068_v27 }
0x1492   :  { %v17439_v45 = vpop.eup %14536  ;;  %v7367_v22 = vmul.f32 1.442695, %v7362_v17 }
0x1493   :  { %v7624_v57 = vpop.xlane.xlu0 %7623  ;;  %v7071_v54 = vsel %vm18866_vm7, %v17439_v45, 0.0  ;;  %vm18873_vm7 = vmmov %vm18865_vm2 }
0x1494   :  { %14542 = vpow2.f32 %v7367_v22  ;;  %v7631_v26 = vsub.f32 %v17322_v53, %v7624_v57  ;;  %7072 = vadd.xlane.f32.xlu0 %v7071_v54 }
0x1496   :  { %v17444_v4 = vpop.eup %14538  ;;  %v7634_v44 = vmul.f32 1.442695, %v7631_v26 }
0x1497   :  { %v7627_v15 = vpop.xlane.xlu1 %7626  ;;  %v7369_v42 = vsel %vm18867_vm8, %v17444_v4, 0.0  ;;  %vm18874_vm8 = vmmov %vm18869_vm10 }
0x1498   :  { %14544 = vpow2.f32 %v7634_v44  ;;  %v7632_v40 = vsub.f32 %v17328_v14, %v7627_v15  ;;  %7370 = vadd.xlane.f32.xlu1 %v7369_v42 }
0x149a   :  { %v17449_v29 = vpop.eup %14540  ;;  %v7636_v35 = vmul.f32 1.442695, %v7632_v40 }
0x149b   :  { %v7630_v21 = vpop.xlane.xlu1 %7629  ;;  %v7372_v25 = vsel %vm18868_vm11, %v17449_v29, 0.0  ;;  %vm18875_vm11 = vmmov %vm18865_vm2 }
0x149c   :  { %14546 = vpow2.f32 %v7636_v35  ;;  %v7633_v53 = vsub.f32 %v17334_v6, %v7630_v21  ;;  %7373 = vadd.xlane.f32.xlu0 %v7372_v25 }
0x149e   :  { %v17454_v16 = vpop.eup %14542  ;;  %v7638_v60 = vmul.f32 1.442695, %v7633_v53 }
0x149f   :  { %v7881_v46 = vpop.xlane.xlu1 %7880  ;;  %v7375_v37 = vsel %vm18869_vm10, %v17454_v16, 0.0  ;;  %vm18876_vm10 = vmmov %vm18865_vm2 }
0x14a0   :  { %14548 = vpow2.f32 %v7638_v60  ;;  %v7888_v14 = vsub.f32 %v17340_v59, %v7881_v46  ;;  %7376 = vadd.xlane.f32.xlu1 %v7375_v37 }
0x14a2   :  { %v17459_v63 = vpop.eup %14544  ;;  %v7891_v8 = vmul.f32 1.442695, %v7888_v14 }
0x14a3   :  { %v7884_v27 = vpop.xlane.xlu1 %7883  ;;  %v7640_v17 = vsel %vm18870_vm9, %v17459_v63, 0.0  ;;  %vm18877_vm9 = vmmov %vm18874_vm8 }
0x14a4   :  { %14550 = vpow2.f32 %v7891_v8  ;;  %v7889_v6 = vsub.f32 %v17346_v9, %v7884_v27  ;;  %7641 = vadd.xlane.f32.xlu1 %v7640_v17  ;;  %v6604_v27 = vpop.permute.xlu0 %6603 }
0x14a6   :  { %v17464_v22 = vpop.eup %14546  ;;  %v7893_v57 = vmul.f32 1.442695, %v7889_v6 }
0x14a7   :  { %v7887_v54 = vpop.xlane.xlu1 %7886  ;;  %v7643_v26 = vsel %vm18871_vm13, %v17464_v22, 0.0  ;;  %vm6193_vm13 = vcmp.ne.f32.partialorder %v17175_v36, 0.0 }
0x14a8   :  { %14552 = vpow2.f32 %v7893_v57  ;;  %v7890_v59 = vsub.f32 %v17352_v62, %v7887_v54  ;;  %7644 = vadd.xlane.f32.xlu1 %v7643_v26 }
0x14aa   :  { %v17469_v44 = vpop.eup %14548  ;;  %v7895_v15 = vmul.f32 1.442695, %v7890_v59 }
0x14ab   :  { %v8138_v42 = vpop.xlane.xlu1 %8137  ;;  %v7646_v40 = vsel %vm18872_vm14, %v17469_v44, 0.0  ;;  %vm6194_vm14 = vcmp.ne.f32.partialorder %v17177_v5, 0.0 }
0x14ac   :  { %14554 = vpow2.f32 %v7895_v15  ;;  %v8145_v9 = vsub.f32 %v17358_v52, %v8138_v42  ;;  %7647 = vadd.xlane.f32.xlu1 %v7646_v40 }
0x14ae   :  { %v17474_v35 = vpop.eup %14550  ;;  %v8148_v21 = vmul.f32 1.442695, %v8145_v9 }
0x14af   :  { %v7897_v25 = vsel %vm18865_vm2, %v17474_v35, 0.0  ;;  %v8141_v14 = vpop.xlane.xlu1 %8140  ;;  %vm6195_vm2 = vcmp.ne.f32.partialorder %v17171_v7, 0.0 }
0x14b0   :  { %14556 = vpow2.f32 %v8148_v21  ;;  %7898 = vadd.xlane.f32.xlu1 %v7897_v25  ;;  %v8146_v8 = vsub.f32 %v17366_v48, %v8141_v14  ;;  %v17508_v21 = vsel %vm6193_vm13, 1.0, %v14795_v1  ;;  %v14149_v25 = vunpack.i.h.bf16 %v17394_v18  ;;  %vm18882_vm13 = vmmov %vm18873_vm7 }
0x14b1   :  { %v17518_v14 = vsel %vm6194_vm14, 1.0, %v14795_v1  ;;  %v17530_v7 = vsel %vm6195_vm2, 1.0, %v14795_v1  ;;  %vm18883_vm14 = vmmov %vm18873_vm7  ;;  %vm6196_vm2 = vcmp.ne.f32.partialorder %v17167_v58, 0.0 }
0x14b2   :  { %v17478_v62 = vpop.eup %14552  ;;  %v8150_v17 = vmul.f32 1.442695, %v8146_v8 }
0x14b3   :  { %v7900_v53 = vsel %vm18873_vm7, %v17478_v62, 0.0 }
0x14b4   :  { %7901 = vadd.xlane.f32.xlu0 %v7900_v53  ;;  %14558 = vpow2.f32 %v8150_v17  ;;  %v14148_v53 = vunpack.i.l.bf16 %v17394_v18 }
0x14b6   :  { %v17482_v60 = vpop.eup %14554  ;;  %v13742_v8 = vpack.c.bf16 %v14149_v25, %v14148_v53 }
0x14b7   :  { %v7903_v52 = vsel %vm18874_vm8, %v17482_v60, 0.0  ;;  %vm18878_vm8 = vmmov %vm18873_vm7 }
0x14b8   :  { %7904 = vadd.xlane.f32.xlu1 %v7903_v52 }
0x14ba   :  { %v17486_v46 = vpop.eup %14556 }
0x14bb   :  { %v8154_v37 = vsel %vm18875_vm11, %v17486_v46, 0.0  ;;  %vm18879_vm11 = vcmask 1046528  }
0x14bc   :  { %8155 = vadd.xlane.f32.xlu1 %v8154_v37 }
0x14be   :  { %v17496_v26 = vpop.eup %14558 }
0x14bf   :  { %v8157_v59 = vsel %vm18876_vm10, %v17496_v26, 0.0  ;;  %vm18880_vm10 = vmmov %vm18873_vm7 }
0x14c8   :  { %v8144_v6 = vpop.xlane.xlu0 %8143 }
0x14c9   :  { %v8147_v57 = vsub.f32 %v17372_v43, %v8144_v6  ;;  %v14152_v43 = vpop.permute.xlu1 %14151 }
0x14ca   :  { %6845 = vrot.lane.b32.xlu0 %v16939_v0, %s14809_s27 }
0x14cb   :  { %v8152_v54 = vmul.f32 1.442695, %v8147_v57 }
0x14cd   :  { %14156 = vrot.lane.b32.xlu1 %v16937_v49, %s14810_s28  ;;  %14560 = vpow2.f32 %v8152_v54 }
0x14d7   :  { %v17500_v15 = vpop.eup %14560 }
0x14d8   :  { %v8160_v49 = vsel %vm18877_vm9, %v17500_v15, 0.0  ;;  %vm18881_vm9 = vmmov %vm18873_vm7 }
0x14e9   :  { %8158 = vadd.xlane.f32.xlu0 %v8157_v59  ;;  %v14154_v59 = vunpack.i.h.bf16 %v14152_v43 }
0x14f1   :  { %8161 = vadd.xlane.f32.xlu1 %v8160_v49  ;;  %v14153_v49 = vunpack.i.l.bf16 %v14152_v43 }
0x14f5   :  { %v6341_v48 = vpop.xlane.xlu0 %6340 }
0x14f6   :  { %14562 = vrcp.f32 %v6341_v48 }
0x14f9   :  { %v6344_v42 = vpop.xlane.xlu0 %6343 }
0x14fa   :  { %14564 = vrcp.f32 %v6344_v42 }
0x14fd   :  { %v6347_v40 = vpop.xlane.xlu0 %6346 }
0x14fe   :  { %14566 = vrcp.f32 %v6347_v40  ;;  %v13749_v40 = vpack.c.bf16 %v14154_v59, %v14153_v49 }
0x14ff   :  { %7087 = vrot.lane.b32.xlu0 %v16939_v0, %s14810_s28 }
0x1500   :  { %v14563_v9 = vpop.eup %14562 }
0x1501   :  { %v6351_v52 = vmul.f32 %v14563_v9, %v17508_v21  ;;  %v6583_v37 = vpop.xlane.xlu1 %6582 }
0x1502   :  { %14568 = vrcp.f32 %v6583_v37 }
0x1503   :  { %v6354_v36 = vmul.f32 %v17382_v20, %v6351_v52  ;;  %14161 = vrot.lane.b32.xlu0 %v16961_v12, %s14806_s25 }
0x1504   :  { %v14565_v0 = vpop.eup %14564 }
0x1505   :  { %13007 = vmatmul.mubr.msk.f32.vlgmr.msra.gmra.mrb[132].mxu1 %vm18873_vm7, %v6354_v36  ;;  %v6586_v18 = vpop.xlane.xlu0 %6585  ;;  %v6352_v5 = vmul.f32 %v14565_v0, %v17518_v14  ;;  %vm6197_vm7 = vcmp.ne.f32.partialorder %v17169_v13, 0.0 }
0x1506   :  { %13743 = vmatpush3.bf16.msra.mxu1 %v13742_v8  ;;  %14570 = vrcp.f32 %v6586_v18  ;;  %13009 = vmatprep.mubr.msk.f32.mxu1 %vm14794_vm0, %v14795_v1 }
0x1507   :  { %7420 = vrot.lane.b32.xlu0 %v16956_v10, %s14806_s25  ;;  %13034 = vmatprep.subr.mxu1 %v14795_v1  ;;  %v6355_v20 = vmul.f32 %v17387_v32, %v6352_v5  ;;  %v7385_v5 = vrot.slane %v17530_v7, 7  ;;  %s11407_s25 = sld [smem:[%s18763_s0 + %s14839_s17]]  }
0x1508   :  { %v14567_v17 = vpop.eup %14566 }
0x1509   :  { %13010 = vmatmul.mubr.msk.f32.gmra.mrb[134].mxu1 %vm18878_vm8, %v6355_v20  ;;  %v6589_v6 = vpop.xlane.xlu0 %6588  ;;  %v6353_v57 = vmul.f32 %v14567_v17, %v17530_v7  ;;  %v11644_v20 = vsel %vm6197_vm7, 1.0, %v14795_v1  ;;  %vm6198_vm8 = vcmp.ne.f32.partialorder %v17173_v33, 0.0 }
0x150a   :  { %13035 = vmatpush3.msk.msra.mxu1 %vm18879_vm11, %v6604_v27  ;;  %14572 = vrcp.f32 %v6589_v6  ;;  %13012 = vmatprep.mubr.msk.f32.mxu1 %vm14794_vm0, %v14795_v1  ;;  %v11645_v58 = vsel %vm6198_vm8, 1.0, %v14795_v1 }
0x150b   :  { %v6356_v54 = vmul.f32 %v17392_v56, %v6353_v57  ;;  %13748 = vmatprep.subr.bf16.mxu1 %v18809_v47 }
0x150c   :  { %v14569_v32 = vpop.eup %14568 }
0x150d   :  { %v6593_v48 = vmul.f32 %v14569_v32, %v17508_v21  ;;  %13013 = vmatmul.mubr.msk.f32.gmra.mrb[136].mxu1 %vm18880_vm10, %v6356_v54  ;;  %v7388_v54 = vrot.slane %v11644_v20, 7  ;;  %vm18884_vm10 = vmmov %vm18881_vm9 }
0x150e   :  { %13036 = vmatprep.mubr.msk.f32.mxu1 %vm14794_vm0, %v14795_v1 }
0x150f   :  { %v6596_v27 = vmul.f32 %v17399_v61, %v6593_v48  ;;  %v6825_v61 = vpop.xlane.xlu0 %6824 }
0x1510   :  { %v14571_v42 = vpop.eup %14570 }
0x1511   :  { %13037 = vmatmul.mubr.msk.f32.vlgmr.msra.gmra.mrb[138].mxu1 %vm18881_vm9, %v6596_v27  ;;  %v6594_v56 = vmul.f32 %v14571_v42, %v17518_v14  ;;  %v7390_v27 = vrot.slane %v11645_v58, 7 }
0x1512   :  { %13750 = vmatpush3.bf16.msra.mxu1 %v13749_v40  ;;  %13039 = vmatprep.mubr.msk.f32.mxu1 %vm14794_vm0, %v14795_v1 }
0x1513   :  { %v6597_v43 = vmul.f32 %v17404_v41, %v6594_v56  ;;  %13064 = vmatprep.subr.mxu1 %v14795_v1  ;;  %v6828_v41 = vpop.xlane.xlu1 %6827  ;;  %v17580_v56 = vsel %vm438_vm3, %v7388_v54, %v7390_v27 }
0x1514   :  { %v14573_v9 = vpop.eup %14572 }
0x1515   :  { %13040 = vmatmul.mubr.msk.f32.gmra.mrb[140].mxu1 %vm18882_vm13, %v6597_v43  ;;  %v6595_v25 = vmul.f32 %v14573_v9, %v17530_v7  ;;  %v6831_v52 = vpop.xlane.xlu0 %6830  ;;  %vm18885_vm13 = vmmov %vm18881_vm9 }
0x1516   :  { %13042 = vmatprep.mubr.msk.f32.mxu1 %vm14794_vm0, %v14795_v1 }
0x1517   :  { %v6598_v53 = vmul.f32 %v17409_v24, %v6595_v25  ;;  %v11643_v24 = vsel %vm6196_vm2, 1.0, %v14795_v1  ;;  %vm18887_vm2 = vmmov %vm18881_vm9 }
0x1518   :  { %v7386_v6 = vrot.slane %v11643_v24, 7  ;;  %vm18888_vm7 = vmmov %vm18887_vm2 }
0x1519   :  { %13043 = vmatmul.mubr.msk.f32.gmra.mrb[142].mxu1 %vm18883_vm14, %v6598_v53  ;;  %v17558_v37 = vpop.xlane.xlu0 %7066  ;;  %vm18886_vm14 = vmmov %vm18879_vm11 }
0x151a   :  { %13066 = vmatprep.mubr.msk.f32.mxu1 %vm14794_vm0, %v14795_v1  ;;  %v17571_v32 = vsel %vm438_vm3, %v7385_v5, %v7386_v6  ;;  %v17576_v48 = vsel %vm438_vm3, %v7386_v6, %v7388_v54  ;;  %vm18889_vm8 = vmmov %vm18887_vm2 }
0x151d   :  { %v17560_v36 = vpop.xlane.xlu1 %7069 }
0x1521   :  { %v17562_v0 = vpop.xlane.xlu0 %7072 }
0x1525   :  { %v7371_v8 = vpop.xlane.xlu1 %7370 }
0x1526   :  { %14574 = vrcp.f32 %v7371_v8 }
0x1529   :  { %v7374_v18 = vpop.xlane.xlu0 %7373 }
0x152a   :  { %14576 = vrcp.f32 %v7374_v18 }
0x152d   :  { %v7377_v17 = vpop.xlane.xlu1 %7376 }
0x152e   :  { %14578 = vrcp.f32 %v7377_v17 }
0x1530   :  { %v14575_v57 = vpop.eup %14574 }
0x1531   :  { %v7642_v13 = vpop.xlane.xlu1 %7641  ;;  %v7395_v59 = vmul.f32 %v14575_v57, %v17571_v32 }
0x1532   :  { %14580 = vrcp.f32 %v7642_v13 }
0x1533   :  { %7400 = vperm.xlu0 %14023, %v7395_v59   ;;  %14582 = vrcp.f32 %v6825_v61 }
0x1534   :  { %v14577_v49 = vpop.eup %14576 }
0x1535   :  { %v7645_v33 = vpop.xlane.xlu1 %7644  ;;  %v7396_v42 = vmul.f32 %v14577_v49, %v17576_v48 }
0x1536   :  { %14584 = vrcp.f32 %v7645_v33 }
0x1537   :  { %7405 = vperm.xlu0 %14023, %v7396_v42   ;;  %14586 = vrcp.f32 %v6828_v41 }
0x1538   :  { %v14579_v40 = vpop.eup %14578 }
0x1539   :  { %v7648_v43 = vpop.xlane.xlu1 %7647  ;;  %v7397_v9 = vmul.f32 %v14579_v40, %v17580_v56 }
0x153a   :  { %14588 = vrcp.f32 %v7648_v43 }
0x153b   :  { %7410 = vperm.xlu0 %14023, %v7397_v9   ;;  %14590 = vrcp.f32 %v6831_v52 }
0x153c   :  { %v14581_v25 = vpop.eup %14580 }
0x153d   :  { %v7899_v53 = vpop.xlane.xlu1 %7898  ;;  %v7652_v61 = vmul.f32 %v14581_v25, %v17571_v32  ;;  %v14583_v8 = vpop.eup %14582 }
0x153e   :  { %14592 = vrcp.f32 %v7899_v53  ;;  %v6835_v24 = vmul.f32 %v14583_v8, %v17508_v21 }
0x153f   :  { %7657 = vperm.xlu1 %14029, %v7652_v61   ;;  %14166 = vrot.lane.b32.xlu0 %v16961_v12, %s14807_s26 }
0x1540   :  { %v14585_v18 = vpop.eup %14584  ;;  %v6838_v52 = vmul.f32 %v17414_v31, %v6835_v24 }
0x1541   :  { %v7902_v41 = vpop.xlane.xlu0 %7901  ;;  %v7653_v5 = vmul.f32 %v14585_v18, %v17576_v48  ;;  %v14587_v20 = vpop.eup %14586 }
0x1542   :  { %14594 = vrcp.f32 %v7902_v41  ;;  %v6836_v58 = vmul.f32 %v14587_v20, %v17518_v14 }
0x1543   :  { %7662 = vperm.xlu0 %14023, %v7653_v5  }
0x1544   :  { %v14589_v17 = vpop.eup %14588  ;;  %v6839_v27 = vmul.f32 %v17419_v23, %v6836_v58 }
0x1545   :  { %v7905_v6 = vpop.xlane.xlu1 %7904  ;;  %v6846_v57 = vpop.permute.xlu0 %6845  ;;  %v7654_v54 = vmul.f32 %v14589_v17, %v17580_v56 }
0x1546   :  { %14596 = vrcp.f32 %v7905_v6  ;;  %13065 = vmatpush3.msk.msra.mxu1 %vm18879_vm11, %v6846_v57  ;;  %v14591_v13 = vpop.eup %14590 }
0x1547   :  { %7667 = vperm.xlu0 %14023, %v7654_v54   ;;  %13067 = vmatmul.mubr.msk.f32.vlgmr.msra.gmra.mrb[144].mxu1 %vm18884_vm10, %v6838_v52  ;;  %v6837_v33 = vmul.f32 %v14591_v13, %v17530_v7  ;;  %vm18890_vm10 = vmmov %vm18887_vm2 }
0x1548   :  { %v14593_v59 = vpop.eup %14592  ;;  %13069 = vmatprep.mubr.msk.f32.mxu1 %vm14794_vm0, %v14795_v1  ;;  %13755 = vmatprep.subr.bf16.mxu1 %v18809_v47 }
0x1549   :  { %v8156_v31 = vpop.xlane.xlu1 %8155  ;;  %v7909_v49 = vmul.f32 %v14593_v59, %v17571_v32  ;;  %v6840_v53 = vmul.f32 %v17424_v19, %v6837_v33 }
0x154a   :  { %14598 = vrcp.f32 %v8156_v31 }
0x154b   :  { %7914 = vperm.xlu1 %14029, %v7909_v49   ;;  %7677 = vrot.lane.b32.xlu0 %v16956_v10, %s14807_s26  ;;  %14600 = vrcp.f32 %v17558_v37  ;;  %s14840_s26 = smov 33  }
0x154c   :  { %v14595_v42 = vpop.eup %14594  ;;  %13070 = vmatmul.mubr.msk.f32.gmra.mrb[146].mxu1 %vm18881_vm9, %v6839_v27  ;;  %14602 = vrcp.f32 %v17560_v36  ;;  %vm18891_vm9 = vmmov %vm18887_vm2 }
0x154d   :  { %v14157_v40 = vpop.permute.xlu1 %14156  ;;  %13072 = vmatprep.mubr.msk.f32.mxu1 %vm14794_vm0, %v14795_v1  ;;  %v7910_v43 = vmul.f32 %v14595_v42, %v17576_v48  ;;  %14604 = vrcp.f32 %v17562_v0 }
0x154e   :  { %v14159_v9 = vunpack.i.h.bf16 %v14157_v40  ;;  %v14158_v25 = vunpack.i.l.bf16 %v14157_v40 }
0x154f   :  { %14171 = vrot.lane.b32.xlu0 %v16961_v12, %s14809_s27  ;;  %7919 = vperm.xlu1 %14029, %v7910_v43  }
0x1550   :  { %v14597_v23 = vpop.eup %14596  ;;  %v13756_v61 = vpack.c.bf16 %v14159_v9, %v14158_v25  ;;  %13073 = vmatmul.mubr.msk.f32.gmra.mrb[148].mxu1 %vm18885_vm13, %v6840_v53  ;;  %vm18892_vm13 = vmmov %vm18887_vm2 }
0x1551   :  { %v7911_v8 = vmul.f32 %v14597_v23, %v17580_v56  ;;  %13096 = vmatprep.mubr.msk.f32.mxu1 %vm14794_vm0, %v14795_v1 }
0x1552   :  { %13757 = vmatpush3.bf16.msra.mxu1 %v13756_v61 }
0x1553   :  { %7924 = vperm.xlu0 %14023, %v7911_v8   ;;  %7934 = vrot.lane.b32.xlu1 %v16956_v10, %s14809_s27  ;;  %s11399_s27 = sld [smem:[%s18763_s0 + %s14813_s1]]  }
0x1554   :  { %v14599_v18 = vpop.eup %14598  ;;  %13094 = vmatprep.subr.mxu1 %v14795_v1 }
0x1555   :  { %v8166_v19 = vmul.f32 %v14599_v18, %v17571_v32  ;;  %v14601_v24 = vpop.eup %14600 }
0x1556   :  { %v7077_v41 = vmul.f32 %v14601_v24, %v17508_v21  ;;  %v14603_v20 = vpop.eup %14602 }
0x1557   :  { %8171 = vperm.xlu0 %14023, %v8166_v19   ;;  %14176 = vrot.lane.b32.xlu1 %v16961_v12, %s14810_s28  ;;  %v7078_v12 = vmul.f32 %v14603_v20, %v17518_v14  ;;  %v14605_v52 = vpop.eup %14604 }
0x1558   :  { %v7080_v32 = vmul.f32 %v17429_v11, %v7077_v41  ;;  %v7079_v36 = vmul.f32 %v14605_v52, %v17530_v7 }
0x1559   :  { %v7081_v37 = vmul.f32 %v17434_v38, %v7078_v12 }
0x155a   :  { %v7082_v54 = vmul.f32 %v17439_v45, %v7079_v36 }
0x155b   :  { %8191 = vrot.lane.b32.xlu1 %v16956_v10, %s14810_s28  ;;  %s14828_s28 = smov 22  }
0x155c   :  { %s11397_s7 = sld [smem:[%s18763_s0 + %s14828_s28]]  }
0x1576   :  { %v8159_v5 = vpop.xlane.xlu0 %8158 }
0x1577   :  { %14606 = vrcp.f32 %v8159_v5 }
0x157a   :  { %v7088_v17 = vpop.permute.xlu0 %7087 }
0x157b   :  { %13095 = vmatpush3.msk.msra.mxu1 %vm18886_vm14, %v7088_v17  ;;  %vm18893_vm14 = vmmov %vm18879_vm11 }
0x157c   :  { %13097 = vmatmul.mubr.msk.f32.vlgmr.msra.gmra.mrb[150].mxu1 %vm18887_vm2, %v7080_v32  ;;  %13762 = vmatprep.subr.bf16.mxu1 %v18809_v47 }
0x157d   :  { %13099 = vmatprep.mubr.msk.f32.mxu1 %vm14794_vm0, %v14795_v1 }
0x157e   :  { %v8162_v10 = vpop.xlane.xlu1 %8161  ;;  %v14162_v21 = vpop.permute.xlu0 %14161 }
0x157f   :  { %14608 = vrcp.f32 %v8162_v10  ;;  %v14164_v11 = vunpack.i.h.bf16 %v14162_v21  ;;  %v14163_v0 = vunpack.i.l.bf16 %v14162_v21 }
0x1580   :  { %13100 = vmatmul.mubr.msk.f32.gmra.mrb[152].mxu1 %vm18888_vm7, %v7081_v37  ;;  %vm18894_vm7 = vmmov %vm18887_vm2 }
0x1581   :  { %v14607_v14 = vpop.eup %14606  ;;  %v13763_v6 = vpack.c.bf16 %v14164_v11, %v14163_v0  ;;  %13102 = vmatprep.mubr.msk.f32.mxu1 %vm14794_vm0, %v14795_v1 }
0x1582   :  { %v8167_v57 = vmul.f32 %v14607_v14, %v17576_v48  ;;  %v7421_v38 = vpop.permute.xlu0 %7420 }
0x1583   :  { %13764 = vmatpush3.bf16.msra.mxu1 %v13763_v6 }
0x1584   :  { %8176 = vperm.xlu0 %14023, %v8167_v57   ;;  %13103 = vmatmul.mubr.msk.f32.gmra.mrb[154].mxu1 %vm18889_vm8, %v7082_v54  ;;  %vm18895_vm8 = vmmov %vm18887_vm2 }
0x1585   :  { %13124 = vmatprep.subr.mxu1 %v14795_v1  ;;  %13126 = vmatprep.mubr.msk.f32.mxu1 %vm14794_vm0, %v14795_v1 }
0x1587   :  { %13125 = vmatpush3.msk.msra.mxu1 %vm18879_vm11, %v7421_v38 }
0x1588   :  { %13769 = vmatprep.subr.bf16.mxu1 %v18809_v47 }
0x1589   :  { %v14609_v7 = vpop.eup %14608 }
0x158a   :  { %v8168_v58 = vmul.f32 %v14609_v7, %v17580_v56 }
0x158c   :  { %8181 = vperm.xlu0 %14023, %v8168_v58  }
0x15b2   :  { %v7401_v48 = vpop.permute.xlu0 %7400 }
0x15b3   :  { %v7413_v45 = vmul.f32 %v17444_v4, %v7401_v48  ;;  %v14788_v48 = vld [vmem:[%s14851_s6] sm:$0xff] }
0x15b5   :  { %13127 = vmatmul.mubr.msk.f32.vlgmr.msra.gmra.mrb[156].mxu1 %vm18890_vm10, %v7413_v45  ;;  %vm18896_vm10 = vmmov %vm18887_vm2 }
0x15b6   :  { %v7406_v13 = vpop.permute.xlu0 %7405  ;;  %13129 = vmatprep.mubr.msk.f32.mxu1 %vm14794_vm0, %v14795_v1 }
0x15b7   :  { %v7414_v59 = vmul.f32 %v17449_v29, %v7406_v13 }
0x15b9   :  { %13130 = vmatmul.mubr.msk.f32.gmra.mrb[158].mxu1 %vm18891_vm9, %v7414_v59  ;;  %vm18897_vm9 = vmmov %vm18887_vm2 }
0x15ba   :  { %v7411_v31 = vpop.permute.xlu0 %7410  ;;  %13132 = vmatprep.mubr.msk.f32.mxu1 %vm14794_vm0, %v14795_v1 }
0x15bb   :  { %v7415_v56 = vmul.f32 %v17454_v16, %v7411_v31 }
0x15bd   :  { %13133 = vmatmul.mubr.msk.f32.gmra.mrb[160].mxu1 %vm18892_vm13, %v7415_v56  ;;  %vm18898_vm13 = vmmov %vm18879_vm11 }
0x15be   :  { %v14167_v49 = vpop.permute.xlu0 %14166  ;;  %13156 = vmatprep.mubr.msk.f32.mxu1 %vm14794_vm0, %v14795_v1  ;;  %v7658_v29 = vpop.permute.xlu1 %7657 }
0x15bf   :  { %v14169_v4 = vunpack.i.h.bf16 %v14167_v49  ;;  %v14168_v27 = vunpack.i.l.bf16 %v14167_v49  ;;  %v7670_v43 = vmul.f32 %v17459_v63, %v7658_v29 }
0x15c1   :  { %v13770_v33 = vpack.c.bf16 %v14169_v4, %v14168_v27 }
0x15c2   :  { %v7663_v42 = vpop.permute.xlu0 %7662 }
0x15c3   :  { %13771 = vmatpush3.bf16.msra.mxu1 %v13770_v33  ;;  %v7671_v16 = vmul.f32 %v17464_v22, %v7663_v42 }
0x15c4   :  { %13154 = vmatprep.subr.mxu1 %v14795_v1 }
0x15c6   :  { %v7668_v40 = vpop.permute.xlu0 %7667 }
0x15c7   :  { %v7672_v18 = vmul.f32 %v17469_v44, %v7668_v40 }
0x15ca   :  { %v7915_v9 = vpop.permute.xlu1 %7914  ;;  %v7678_v25 = vpop.permute.xlu0 %7677 }
0x15cb   :  { %13155 = vmatpush3.msk.msra.mxu1 %vm18893_vm14, %v7678_v25  ;;  %v7927_v22 = vmul.f32 %v17474_v35, %v7915_v9  ;;  %vm18899_vm14 = vmmov %vm18887_vm2 }
0x15cc   :  { %13157 = vmatmul.mubr.msk.f32.vlgmr.msra.gmra.mrb[162].mxu1 %vm18887_vm2, %v7670_v43  ;;  %13776 = vmatprep.subr.bf16.mxu1 %v18809_v47 }
0x15cd   :  { %13159 = vmatprep.mubr.msk.f32.mxu1 %vm14794_vm0, %v14795_v1 }
0x15ce   :  { %v7920_v53 = vpop.permute.xlu1 %7919  ;;  %v14172_v23 = vpop.permute.xlu0 %14171 }
0x15cf   :  { %v14174_v61 = vunpack.i.h.bf16 %v14172_v23  ;;  %v14173_v8 = vunpack.i.l.bf16 %v14172_v23  ;;  %v7928_v12 = vmul.f32 %v17478_v62, %v7920_v53 }
0x15d0   :  { %13160 = vmatmul.mubr.msk.f32.gmra.mrb[164].mxu1 %vm18894_vm7, %v7671_v16  ;;  %vm18900_vm7 = vmmov %vm18887_vm2 }
0x15d1   :  { %v13777_v63 = vpack.c.bf16 %v14174_v61, %v14173_v8  ;;  %13162 = vmatprep.mubr.msk.f32.mxu1 %vm14794_vm0, %v14795_v1 }
0x15d2   :  { %v7935_v19 = vpop.permute.xlu1 %7934  ;;  %v7925_v44 = vpop.permute.xlu0 %7924 }
0x15d3   :  { %13778 = vmatpush3.bf16.msra.mxu1 %v13777_v63  ;;  %v7929_v10 = vmul.f32 %v17482_v60, %v7925_v44 }
0x15d4   :  { %13163 = vmatmul.mubr.msk.f32.gmra.mrb[166].mxu1 %vm18895_vm8, %v7672_v18  ;;  %13184 = vmatprep.subr.mxu1 %v14795_v1  ;;  %vm18901_vm8 = vmmov %vm18887_vm2 }
0x15d5   :  { %13186 = vmatprep.mubr.msk.f32.mxu1 %vm14794_vm0, %v14795_v1 }
0x15d6   :  { %v14177_v24 = vpop.permute.xlu1 %14176  ;;  %v8172_v37 = vpop.permute.xlu0 %8171 }
0x15d7   :  { %v14179_v41 = vunpack.i.h.bf16 %v14177_v24  ;;  %v14178_v5 = vunpack.i.l.bf16 %v14177_v24  ;;  %13185 = vmatpush3.msk.msra.mxu1 %vm18879_vm11, %v7935_v19  ;;  %v8184_v11 = vmul.f32 %v17486_v46, %v8172_v37 }
0x15d8   :  { %v17675_v20 = vpop.f32.mrb[132].mxu1  ;;  %13187 = vmatmul.mubr.msk.f32.vlgmr.msra.gmra.mrb[168].mxu1 %vm18896_vm10, %v7927_v22  ;;  %13783 = vmatprep.subr.bf16.mxu1 %v18809_v47  ;;  %vm18902_vm10 = vmmov %vm18879_vm11 }
0x15d9   :  { %v13784_v32 = vpack.c.bf16 %v14179_v41, %v14178_v5  ;;  %v13008_v17 = vpop.f32.mrb[133].mxu1  ;;  %13189 = vmatprep.mubr.msk.f32.mxu1 %vm14794_vm0, %v14795_v1 }
0x15da   :  { %v8192_v21 = vpop.permute.xlu1 %8191 }
0x15db   :  { %13785 = vmatpush3.bf16.msra.mxu1 %v13784_v32 }
0x15dc   :  { %v17682_v35 = vpop.f32.mrb[134].mxu1  ;;  %13190 = vmatmul.mubr.msk.f32.gmra.mrb[170].mxu1 %vm18897_vm9, %v7928_v12  ;;  %13214 = vmatprep.subr.mxu1 %v14795_v1  ;;  %vm18903_vm9 = vmmov %vm18902_vm10 }
0x15dd   :  { %v13011_v52 = vpop.f32.mrb[135].mxu1  ;;  %13192 = vmatprep.mubr.msk.f32.mxu1 %vm14794_vm0, %v14795_v1 }
0x15df   :  { %13215 = vmatpush3.msk.msra.mxu1 %vm18898_vm13, %v8192_v21 }
0x15e0   :  { %v17690_v36 = vpop.f32.mrb[136].mxu1  ;;  %13193 = vmatmul.mubr.msk.f32.gmra.mrb[172].mxu1 %vm18899_vm14, %v7929_v10 }
0x15e1   :  { %v13014_v62 = vpop.f32.mrb[137].mxu1  ;;  %13216 = vmatprep.mubr.msk.f32.mxu1 %vm14794_vm0, %v14795_v1 }
0x15e4   :  { %v6684_v0 = vpop.f32.mrb[138].mxu1  ;;  %13217 = vmatmul.mubr.msk.f32.vlgmr.msra.gmra.mrb[174].mxu1 %vm18887_vm2, %v8184_v11 }
0x15e5   :  { %v13038_v14 = vpop.f32.mrb[139].mxu1  ;;  %7185 = vrot.lane.b32.xlu1 %v6684_v0, %s14811_s29  ;;  %13219 = vmatprep.mubr.msk.f32.mxu1 %vm14794_vm0, %v14795_v1 }
0x15e8   :  { %v6689_v60 = vpop.f32.mrb[140].mxu1 }
0x15e9   :  { %v13041_v6 = vpop.f32.mrb[141].mxu1  ;;  %7187 = vrot.lane.b32.xlu0 %v6689_v60, %s14811_s29 }
0x15ec   :  { %v6694_v57 = vpop.f32.mrb[142].mxu1 }
0x15ed   :  { %v13044_v54 = vpop.f32.mrb[143].mxu1  ;;  %7189 = vrot.lane.b32.xlu0 %v6694_v57, %s14811_s29 }
0x1603   :  { %v8177_v38 = vpop.permute.xlu0 %8176 }
0x1604   :  { %v8185_v46 = vmul.f32 %v17496_v26, %v8177_v38 }
0x1606   :  { %13220 = vmatmul.mubr.msk.f32.gmra.mrb[176].mxu1 %vm18900_vm7, %v8185_v46 }
0x1607   :  { %13222 = vmatprep.mubr.msk.f32.mxu1 %vm14794_vm0, %v14795_v1 }
0x160b   :  { %v8182_v7 = vpop.permute.xlu0 %8181 }
0x160c   :  { %v8186_v58 = vmul.f32 %v17500_v15, %v8182_v7 }
0x160e   :  { %13223 = vmatmul.mubr.msk.f32.gmra.mrb[178].mxu1 %vm18901_vm8, %v8186_v58 }
0x160f   :  { %13250 = vmatprep.mubr.msk.f32.mxu1 %vm161_vm1, %v14788_v48 }
0x161a   :  { %v6926_v45 = vpop.f32.mrb[144].mxu1 }
0x161b   :  { %7197 = vrot.lane.b32.xlu1 %v6926_v45, %s14812_s30  ;;  %v13068_v13 = vpop.f32.mrb[145].mxu1 }
0x161f   :  { %v6931_v59 = vpop.f32.mrb[146].mxu1 }
0x1620   :  { %v13071_v31 = vpop.f32.mrb[147].mxu1  ;;  %7199 = vrot.lane.b32.xlu0 %v6931_v59, %s14812_s30 }
0x1623   :  { %v6936_v26 = vpop.f32.mrb[148].mxu1 }
0x1624   :  { %7201 = vrot.lane.b32.xlu1 %v6936_v26, %s14812_s30  ;;  %v13074_v56 = vpop.f32.mrb[149].mxu1 }
0x164f   :  { %v7168_v49 = vpop.f32.mrb[150].mxu1 }
0x1650   :  { %7209 = vrot.lane.b32.xlu1 %v7168_v49, %s14813_s1  ;;  %v13098_v15 = vpop.f32.mrb[151].mxu1 }
0x1653   :  { %v7173_v4 = vpop.f32.mrb[152].mxu1 }
0x1654   :  { %7211 = vrot.lane.b32.xlu0 %v7173_v4, %s14813_s1  ;;  %v13101_v27 = vpop.f32.mrb[153].mxu1 }
0x1657   :  { %v7178_v33 = vpop.f32.mrb[154].mxu1  ;;  %v7186_v12 = vpop.permute.xlu1 %7185 }
0x1658   :  { %v13104_v42 = vpop.f32.mrb[155].mxu1  ;;  %v7218_v37 = vsel %vm708_vm4, %v17675_v20, %v7186_v12 }
0x165b   :  { %v7188_v20 = vpop.permute.xlu0 %7187 }
0x165f   :  { %v7190_v38 = vpop.permute.xlu0 %7189 }
0x1688   :  { %v7501_v29 = vpop.f32.mrb[156].mxu1 }
0x1689   :  { %v13128_v40 = vpop.f32.mrb[157].mxu1 }
0x168c   :  { %v17715_v43 = vpop.f32.mrb[158].mxu1 }
0x168d   :  { %v13131_v9 = vpop.f32.mrb[159].mxu1  ;;  %v7198_v52 = vpop.permute.xlu1 %7197 }
0x168e   :  { %v7221_v62 = vsel %vm1710_vm12, %v7218_v37, %v7198_v52 }
0x1690   :  { %v17717_v25 = vpop.f32.mrb[160].mxu1 }
0x1691   :  { %v13134_v16 = vpop.f32.mrb[161].mxu1 }
0x1692   :  { %v7200_v46 = vpop.permute.xlu0 %7199 }
0x1696   :  { %v7202_v10 = vpop.permute.xlu1 %7201 }
0x169f   :  { %v7758_v53 = vpop.f32.mrb[162].mxu1 }
0x16a0   :  { %8289 = vrot.lane.b32.xlu1 %v7758_v53, %s14811_s29  ;;  %v13158_v23 = vpop.f32.mrb[163].mxu1 }
0x16a3   :  { %v7763_v61 = vpop.f32.mrb[164].mxu1 }
0x16a4   :  { %8291 = vrot.lane.b32.xlu0 %v7763_v61, %s14811_s29  ;;  %v13161_v8 = vpop.f32.mrb[165].mxu1 }
0x16a7   :  { %v7768_v63 = vpop.f32.mrb[166].mxu1 }
0x16a8   :  { %v13164_v18 = vpop.f32.mrb[167].mxu1 }
0x16ab   :  { %v8015_v19 = vpop.f32.mrb[168].mxu1 }
0x16ac   :  { %8301 = vrot.lane.b32.xlu1 %v8015_v19, %s14812_s30  ;;  %v13188_v22 = vpop.f32.mrb[169].mxu1 }
0x16af   :  { %v8020_v24 = vpop.f32.mrb[170].mxu1 }
0x16b0   :  { %8303 = vrot.lane.b32.xlu1 %v8020_v24, %s14812_s30  ;;  %v13191_v41 = vpop.f32.mrb[171].mxu1 }
0x16b3   :  { %v8025_v5 = vpop.f32.mrb[172].mxu1 }
0x16b4   :  { %7213 = vrot.lane.b32.xlu1 %v7178_v33, %s14813_s1  ;;  %v13194_v44 = vpop.f32.mrb[173].mxu1 }
0x16b7   :  { %v8272_v32 = vpop.f32.mrb[174].mxu1 }
0x16b8   :  { %8305 = vrot.lane.b32.xlu1 %v8025_v5, %s14812_s30  ;;  %8313 = vrot.lane.b32.xlu0 %v8272_v32, %s14813_s1  ;;  %v13218_v17 = vpop.f32.mrb[175].mxu1 }
0x16c2   :  { %v7210_v21 = vpop.permute.xlu1 %7209 }
0x16c3   :  { %v7224_v11 = vsel %vm1714_vm15, %v7221_v62, %v7210_v21 }
0x16c4   :  { %v8344_v0 = vadd.f32 %v7224_v11, %v16841_v34  ;;  %v7219_v34 = vsel %vm708_vm4, %v17682_v35, %v7188_v20  ;;  %v7220_v35 = vsel %vm708_vm4, %v17690_v36, %v7190_v38  ;;  %v8635_v20 = vld [vmem:[%s11399_s27 + $0x18] sm:$0xff] }
0x16c5   :  { %v7222_v58 = vsel %vm1710_vm12, %v7219_v34, %v7200_v46  ;;  %v14789_v46 = vld [vmem:[%s14851_s6 + $0x8] sm:$0xff] }
0x16c6   :  { %v8352_v6 = vsel %vm161_vm1, %v8344_v0, 0.0  ;;  %v7212_v7 = vpop.permute.xlu0 %7211  ;;  %v8497_v34 = vld [vmem:[%s11397_s7 + $0x8] sm:$0xff] }
0x16c7   :  { %v7225_v48 = vsel %vm1714_vm15, %v7222_v58, %v7212_v7  ;;  %v8496_v7 = vld [vmem:[%s11397_s7] sm:$0xff]  ;;  %v8498_v58 = vld [vmem:[%s11397_s7 + $0x10] sm:$0xff] }
0x16c8   :  { %v8345_v45 = vadd.f32 %v7225_v48, %v16838_v50  ;;  %v7223_v50 = vsel %vm1710_vm12, %v7220_v35, %v7202_v10  ;;  %v14790_v48 = vld [vmem:[%s14851_s6 + $0x10] sm:$0xff] }
0x16ca   :  { %v8355_v13 = vsel %vm161_vm1, %v8345_v45, 0.0 }
0x16d9   :  { %v8277_v14 = vpop.f32.mrb[176].mxu1 }
0x16da   :  { %8315 = vrot.lane.b32.xlu0 %v8277_v14, %s14813_s1  ;;  %v13221_v60 = vpop.f32.mrb[177].mxu1 }
0x16dc   :  { %8353 = vadd.xlane.f32.xlu1 %v8352_v6  ;;  %v8633_v6 = vld [vmem:[%s11399_s27 + $0x8] sm:$0xff] }
0x16de   :  { %8293 = vrot.lane.b32.xlu0 %v7768_v63, %s14811_s29 }
0x16e1   :  { %v8282_v57 = vpop.f32.mrb[178].mxu1 }
0x16e2   :  { %8317 = vrot.lane.b32.xlu0 %v8282_v57, %s14813_s1  ;;  %v13224_v54 = vpop.f32.mrb[179].mxu1 }
0x16e3   :  { %v8634_v54 = vld [vmem:[%s11399_s27 + $0x10] sm:$0xff] }
0x16e4   :  { %v13798_v38 = vpack.c.bf16 %v8635_v20, %v8634_v54 }
0x1701   :  { %8356 = vadd.xlane.f32.xlu0 %v8355_v13  ;;  %v8499_v13 = vld [vmem:[%s11397_s7 + $0x18] sm:$0xff] }
0x1712   :  { %v8290_v59 = vpop.permute.xlu1 %8289 }
0x1713   :  { %v8322_v49 = vsel %vm708_vm4, %v7501_v29, %v8290_v59 }
0x1716   :  { %v8292_v56 = vpop.permute.xlu0 %8291 }
0x1717   :  { %v8323_v53 = vsel %vm708_vm4, %v17715_v43, %v8292_v56  ;;  %v14791_v56 = vld [vmem:[%s14851_s6 + $0x18] sm:$0xff]  ;;  %s14829_s6 = smov 20  }
0x1718   :  { %s11395_s10 = sld [smem:[%s18763_s0 + %s14829_s6]]  }
0x171e   :  { %v8302_v31 = vpop.permute.xlu1 %8301 }
0x171f   :  { %v8325_v15 = vsel %vm1710_vm12, %v8322_v49, %v8302_v31  ;;  %v13790_v31 = vpack.c.bf16 %v8499_v13, %v8498_v58 }
0x1722   :  { %v8304_v26 = vpop.permute.xlu1 %8303 }
0x1723   :  { %v8326_v36 = vsel %vm1710_vm12, %v8323_v53, %v8304_v26 }
0x1726   :  { %v7214_v4 = vpop.permute.xlu1 %7213 }
0x1727   :  { %v7226_v40 = vsel %vm1714_vm15, %v7223_v50, %v7214_v4 }
0x172a   :  { %v8314_v27 = vpop.permute.xlu0 %8313  ;;  %v8306_v22 = vpop.permute.xlu1 %8305 }
0x172b   :  { %v8328_v33 = vsel %vm1714_vm15, %v8325_v15, %v8314_v27 }
0x172c   :  { %v8334_v42 = vrot.slane %v8328_v33, 1 }
0x172e   :  { %v8343_v9 = vsel %vm18879_vm11, %v7226_v40, %v8334_v42 }
0x172f   :  { %v17750_v16 = vadd.f32 %v8343_v9, %v16853_v39 }
0x1731   :  { %v8358_v29 = vsel %vm161_vm1, %v17750_v16, 0.0 }
0x1732   :  { %8359 = vadd.xlane.f32.xlu0 %v8358_v29 }
0x174c   :  { %v8316_v23 = vpop.permute.xlu0 %8315 }
0x174d   :  { %v8329_v61 = vsel %vm1714_vm15, %v8326_v36, %v8316_v23 }
0x174e   :  { %v8335_v8 = vrot.slane %v8329_v61, 1 }
0x1750   :  { %v8294_v63 = vpop.permute.xlu0 %8293  ;;  %v8336_v18 = vsel %vm18902_vm10, %v8334_v42, %v8335_v8 }
0x1751   :  { %v8324_v39 = vsel %vm708_vm4, %v17717_v25, %v8294_v63  ;;  %v17762_v19 = vadd.f32 %v8336_v18, %v16860_v3 }
0x1752   :  { %v8327_v43 = vsel %vm1710_vm12, %v8324_v39, %v8306_v22 }
0x1753   :  { %v8361_v24 = vsel %vm161_vm1, %v17762_v19, 0.0 }
0x1754   :  { %8362 = vadd.xlane.f32.xlu1 %v8361_v24  ;;  %v8318_v41 = vpop.permute.xlu0 %8317 }
0x1755   :  { %v8330_v5 = vsel %vm1714_vm15, %v8327_v43, %v8318_v41 }
0x1756   :  { %v8337_v44 = vrot.slane %v8330_v5, 1 }
0x1758   :  { %v17769_v32 = vadd.f32 %v8337_v44, %v16885_v55  ;;  %v8338_v17 = vsel %vm18903_vm9, %v8335_v8, %v8337_v44  ;;  %v17836_v44 = vld [vmem:[%s11395_s10] ss:$0 sm:$0xff] }
0x1759   :  { %v17773_v25 = vadd.f32 %v8338_v17, %v16868_v2 }
0x175a   :  { %v8367_v3 = vsel %vm674_vm6, %v17769_v32, 0.0 }
0x175b   :  { %8368 = vadd.xlane.f32.xlu1 %v8367_v3  ;;  %v8364_v12 = vsel %vm161_vm1, %v17773_v25, 0.0 }
0x175c   :  { %8365 = vadd.xlane.f32.xlu0 %v8364_v12 }
0x1769   :  { %v8354_v52 = vpop.xlane.xlu1 %8353 }
0x176a   :  { %v8370_v10 = vmul.f32 0.03125, %v8354_v52 }
0x176c   :  { %v17779_v21 = vsub.f32 %v8344_v0, %v8370_v10  ;;  %v8632_v0 = vld [vmem:[%s11399_s27] sm:$0xff]  ;;  %s11398_s27 = sld [smem:[%s18763_s0 + %s14832_s3]]  }
0x176d   :  { %v13794_v57 = vpack.c.bf16 %v8633_v6, %v8632_v0 }
0x176e   :  { %v8382_v55 = vmul.f32 %v17779_v21, %v17779_v21 }
0x176f   :  { %13795 = vmatprep.subr.bf16.mxu1 %v13794_v57 }
0x1770   :  { %v8388_v37 = vsel %vm161_vm1, %v8382_v55, 0.0  ;;  %13797 = vmatpush3.bf16.msra.mxu1 %v13794_v57 }
0x1771   :  { %8389 = vadd.xlane.f32.xlu0 %v8388_v37  ;;  %13799 = vmatprep.subr.bf16.mxu1 %v13798_v38 }
0x1774   :  { %13801 = vmatpush3.bf16.msra.mxu1 %v13798_v38 }
0x1775   :  { %13806 = vmatprep.subr.bf16.mxu1 %v18809_v47 }
0x1777   :  { %13251 = vmatmul.mubr.msk.f32.vlgmr.msra.gmra.mrb[180].mxu1 %vm161_vm1, %v14789_v46 }
0x1778   :  { %13253 = vmatprep.mubr.msk.f32.mxu1 %vm161_vm1, %v14790_v48 }
0x177b   :  { %13254 = vmatmul.mubr.msk.f32.gmra.mrb[182].mxu1 %vm161_vm1, %v14791_v56 }
0x177c   :  { %13273 = vmatprep.mubr.msk.f32.mxu1 %vm14794_vm0, %v14795_v1 }
0x178e   :  { %v8357_v2 = vpop.xlane.xlu0 %8356 }
0x178f   :  { %v8371_v62 = vmul.f32 0.03125, %v8357_v2 }
0x1791   :  { %v17784_v11 = vsub.f32 %v8345_v45, %v8371_v62  ;;  %v13786_v45 = vpack.c.bf16 %v8497_v34, %v8496_v7 }
0x1793   :  { %v8383_v14 = vmul.f32 %v17784_v11, %v17784_v11  ;;  %13787 = vmatprep.subr.bf16.mxu0 %v13786_v45 }
0x1794   :  { %13789 = vmatpush3.bf16.msra.mxu0 %v13786_v45 }
0x1795   :  { %v8391_v60 = vsel %vm161_vm1, %v8383_v14, 0.0  ;;  %13791 = vmatprep.subr.bf16.mxu0 %v13790_v31 }
0x1796   :  { %8392 = vadd.xlane.f32.xlu1 %v8391_v60  ;;  %v8461_v60 = vmul.f32 %v17836_v44, %v17784_v11 }
0x1798   :  { %13793 = vmatpush3.bf16.msra.mxu0 %v13790_v31 }
0x1799   :  { %13802 = vmatprep.subr.bf16.mxu0 %v18809_v47 }
0x17bf   :  { %v8360_v59 = vpop.xlane.xlu0 %8359 }
0x17c0   :  { %v8372_v26 = vmul.f32 0.03125, %v8360_v59 }
0x17c2   :  { %v17806_v49 = vsub.f32 %v17750_v16, %v8372_v26 }
0x17c4   :  { %v8384_v15 = vmul.f32 %v17806_v49, %v17806_v49  ;;  %v8462_v11 = vmul.f32 %v17836_v44, %v17806_v49 }
0x17c6   :  { %v8394_v4 = vsel %vm161_vm1, %v8384_v15, 0.0 }
0x17c7   :  { %8395 = vadd.xlane.f32.xlu0 %v8394_v4 }
0x17e1   :  { %v8363_v27 = vpop.xlane.xlu1 %8362 }
0x17e2   :  { %v8373_v35 = vmul.f32 0.03125, %v8363_v27 }
0x17e4   :  { %v17813_v33 = vsub.f32 %v17762_v19, %v8373_v35 }
0x17e6   :  { %v8385_v50 = vmul.f32 %v17813_v33, %v17813_v33 }
0x17e8   :  { %v8369_v42 = vpop.xlane.xlu1 %8368  ;;  %v8397_v40 = vsel %vm161_vm1, %v8385_v50, 0.0 }
0x17e9   :  { %v8375_v9 = vmul.f32 0.03125, %v8369_v42  ;;  %8398 = vadd.xlane.f32.xlu1 %v8397_v40  ;;  %v8366_v16 = vpop.xlane.xlu0 %8365 }
0x17ea   :  { %v8374_v29 = vmul.f32 0.03125, %v8366_v16 }
0x17eb   :  { %v17819_v53 = vsub.f32 %v17769_v32, %v8375_v9  ;;  %v8460_v32 = vmul.f32 %v17836_v44, %v17779_v21 }
0x17ec   :  { %v17822_v36 = vsub.f32 %v17773_v25, %v8374_v29  ;;  %v17840_v25 = vld [vmem:[%s11396_s14] ss:$0 sm:$0xff] }
0x17ed   :  { %v8387_v23 = vmul.f32 %v17819_v53, %v17819_v53 }
0x17ee   :  { %v8386_v61 = vmul.f32 %v17822_v36, %v17822_v36 }
0x17ef   :  { %v8403_v8 = vsel %vm674_vm6, %v8387_v23, 0.0 }
0x17f0   :  { %8404 = vadd.xlane.f32.xlu1 %v8403_v8  ;;  %v8400_v63 = vsel %vm161_vm1, %v8386_v61, 0.0 }
0x17f1   :  { %8401 = vadd.xlane.f32.xlu0 %v8400_v63 }
0x17fe   :  { %v8390_v18 = vpop.xlane.xlu0 %8389 }
0x17ff   :  { %v8406_v39 = vmul.f32 0.032258064, %v8390_v18 }
0x1801   :  { %14610 = vrsqrt.f32 %v8406_v39  ;;  %vm8414_vm13 = vcmp.eq.f32.partialorder %v8406_v39, inf  ;;  %v8417_v24 = vand.u32 2147483648, %v8406_v39  ;;  %vm8416_vm14 = vcmp.eq.f32.partialorder %v8406_v39, 0.0 }
0x180b   :  { %v14611_v19 = vpop.eup %14610 }
0x180c   :  { %v8413_v22 = vmul.f32 %v14611_v19, %v8406_v39 }
0x180e   :  { %v8415_v43 = vsel %vm8414_vm13, %v8406_v39, %v8413_v22  ;;  %v11735_v39 = vld [vmem:[%s11400_s2] ss:$0 sm:$0xff] }
0x180f   :  { %v8418_v41 = vsel %vm8416_vm14, %v8417_v24, %v8415_v43 }
0x1810   :  { %v8466_v5 = vadd.f32 1e-08, %v8418_v41 }
0x1812   :  { %14612 = vrcp.f32 %v8466_v5 }
0x181c   :  { %v14613_v17 = vpop.eup %14612 }
0x181d   :  { %v8473_v3 = vmul.f32 %v14613_v17, %v8460_v32 }
0x181f   :  { %v17843_v12 = vadd.f32 %v17840_v25, %v8473_v3 }
0x1821   :  { %13233 = vmatprep.mubr.msk.f32.mxu0 %vm161_vm1, %v17843_v12 }
0x1823   :  { %v8393_v52 = vpop.xlane.xlu1 %8392 }
0x1824   :  { %v8407_v10 = vmul.f32 0.032258064, %v8393_v52 }
0x1826   :  { %14614 = vrsqrt.f32 %v8407_v10  ;;  %vm8421_vm2 = vcmp.eq.f32.partialorder %v8407_v10, inf  ;;  %v8424_v2 = vand.u32 2147483648, %v8407_v10  ;;  %vm8423_vm7 = vcmp.eq.f32.partialorder %v8407_v10, 0.0 }
0x1830   :  { %v14615_v55 = vpop.eup %14614 }
0x1831   :  { %v8420_v37 = vmul.f32 %v14615_v55, %v8407_v10 }
0x1833   :  { %v8422_v62 = vsel %vm8421_vm2, %v8407_v10, %v8420_v37  ;;  %v8463_v10 = vmul.f32 %v17836_v44, %v17813_v33  ;;  %v8465_v33 = vmul.f32 %v17836_v44, %v17819_v53 }
0x1834   :  { %v8425_v21 = vsel %vm8423_vm7, %v8424_v2, %v8422_v62 }
0x1835   :  { %v8467_v14 = vadd.f32 1e-08, %v8425_v21 }
0x1837   :  { %14616 = vrcp.f32 %v8467_v14 }
0x1841   :  { %v14617_v0 = vpop.eup %14616 }
0x1842   :  { %v8475_v6 = vmul.f32 %v14617_v0, %v8461_v60  ;;  %v8464_v0 = vmul.f32 %v17836_v44, %v17822_v36 }
0x1844   :  { %v17850_v57 = vadd.f32 %v17840_v25, %v8475_v6 }
0x1846   :  { %13234 = vmatmul.mubr.msk.f32.vlgmr.msra.gmra.mrb[178].mxu0 %vm161_vm1, %v17850_v57 }
0x184a   :  { %v13252_v41 = vpop.f32.mrb[180].mxu1 }
0x184b   :  { %v8715_v32 = vadd.f32 %v13252_v41, %v11735_v39  ;;  %v8709_v17 = vpop.f32.mrb[181].mxu1 }
0x184c   :  { %v8710_v3 = vadd.f32 %v11735_v39, %v8709_v17 }
0x184d   :  { %v8729_v52 = vmax.f32 %v8715_v32, 0.0 }
0x184e   :  { %v8728_v55 = vmax.f32 %v8710_v3, 0.0  ;;  %v13255_v53 = vpop.f32.mrb[182].mxu1 }
0x184f   :  { %v8725_v36 = vadd.f32 %v13255_v53, %v11735_v39  ;;  %v8719_v44 = vpop.f32.mrb[183].mxu1 }
0x1850   :  { %v17866_v62 = vpack.i.bf16 %v8729_v52, %v8728_v55  ;;  %v13803_v21 = vpack.c.bf16 %v8729_v52, %v8728_v55 }
0x1852   :  { %14181 = vrot.lane.b32.xlu0 %v17866_v62, %s14802_s21  ;;  %13805 = vmatpush3.bf16.xpose.msk.msra.mxu0 %vm15104_vm5, %v13803_v21 }
0x1853   :  { %13809 = vmatprep.subr.bf16.mxu0 %v18809_v47 }
0x1854   :  { %v8396_v54 = vpop.xlane.xlu0 %8395 }
0x1855   :  { %v8408_v20 = vmul.f32 0.032258064, %v8396_v54 }
0x1857   :  { %14618 = vrsqrt.f32 %v8408_v20  ;;  %vm8428_vm8 = vcmp.eq.f32.partialorder %v8408_v20, inf  ;;  %v8431_v7 = vand.u32 2147483648, %v8408_v20  ;;  %vm8430_vm11 = vcmp.eq.f32.partialorder %v8408_v20, 0.0 }
0x1861   :  { %v14619_v38 = vpop.eup %14618 }
0x1862   :  { %v8427_v46 = vmul.f32 %v14619_v38, %v8408_v20 }
0x1864   :  { %v8429_v34 = vsel %vm8428_vm8, %v8408_v20, %v8427_v46  ;;  %vm18904_vm8 = vcmp.eq.f32.partialorder %v14963_v28, 0.0 }
0x1865   :  { %v8432_v58 = vsel %vm8430_vm11, %v8431_v7, %v8429_v34  ;;  %v8720_v7 = vadd.f32 %v11735_v39, %v8719_v44  ;;  %v8731_v34 = vmax.f32 %v8725_v36, 0.0  ;;  %vm18905_vm11 = vcmp.eq.f32.partialorder %v14965_v30, 0.0 }
0x1866   :  { %v8468_v48 = vadd.f32 1e-08, %v8432_v58 }
0x1867   :  { %v8730_v58 = vmax.f32 %v8720_v7, 0.0 }
0x1868   :  { %14620 = vrcp.f32 %v8468_v48 }
0x1869   :  { %v17894_v48 = vpack.i.bf16 %v8731_v34, %v8730_v58 }
0x1872   :  { %v14621_v45 = vpop.eup %14620 }
0x1873   :  { %v8477_v13 = vmul.f32 %v14621_v45, %v8462_v11 }
0x1875   :  { %v17857_v59 = vadd.f32 %v17840_v25, %v8477_v13 }
0x1876   :  { %v8399_v31 = vpop.xlane.xlu1 %8398 }
0x1877   :  { %v8409_v26 = vmul.f32 0.032258064, %v8399_v31  ;;  %13236 = vmatprep.mubr.msk.f32.mxu0 %vm161_vm1, %v17857_v59 }
0x1879   :  { %14622 = vrsqrt.f32 %v8409_v26  ;;  %vm8435_vm10 = vcmp.eq.f32.partialorder %v8409_v26, inf  ;;  %v8438_v49 = vand.u32 2147483648, %v8409_v26  ;;  %vm8437_vm9 = vcmp.eq.f32.partialorder %v8409_v26, 0.0 }
0x187d   :  { %v8405_v56 = vpop.xlane.xlu1 %8404 }
0x187e   :  { %v8411_v15 = vmul.f32 0.032258064, %v8405_v56  ;;  %v8402_v4 = vpop.xlane.xlu0 %8401 }
0x187f   :  { %v8410_v27 = vmul.f32 0.032258064, %v8402_v4 }
0x1880   :  { %14624 = vrsqrt.f32 %v8411_v15  ;;  %vm8449_vm13 = vcmp.eq.f32.partialorder %v8411_v15, inf  ;;  %v8452_v61 = vand.u32 2147483648, %v8411_v15  ;;  %vm8451_vm14 = vcmp.eq.f32.partialorder %v8411_v15, 0.0 }
0x1881   :  { %14626 = vrsqrt.f32 %v8410_v27  ;;  %vm8442_vm2 = vcmp.eq.f32.partialorder %v8410_v27, inf  ;;  %v8445_v18 = vand.u32 2147483648, %v8410_v27  ;;  %vm8444_vm7 = vcmp.eq.f32.partialorder %v8410_v27, 0.0 }
0x1883   :  { %v14623_v35 = vpop.eup %14622 }
0x1884   :  { %v8434_v50 = vmul.f32 %v14623_v35, %v8409_v26 }
0x1886   :  { %v8436_v42 = vsel %vm8435_vm10, %v8409_v26, %v8434_v50  ;;  %vm18908_vm10 = vcmask 129024  }
0x1887   :  { %v8439_v40 = vsel %vm8437_vm9, %v8438_v49, %v8436_v42  ;;  %v17914_v42 = vpack.c.bf16 %v8731_v34, %v8730_v58  ;;  %vm18909_vm9 = vmmov %vm18904_vm8 }
0x1888   :  { %v8469_v9 = vadd.f32 1e-08, %v8439_v40 }
0x188a   :  { %v14625_v16 = vpop.eup %14624  ;;  %14628 = vrcp.f32 %v8469_v9 }
0x188b   :  { %v14627_v29 = vpop.eup %14626  ;;  %v8448_v23 = vmul.f32 %v14625_v16, %v8411_v15 }
0x188c   :  { %v8441_v8 = vmul.f32 %v14627_v29, %v8410_v27 }
0x188d   :  { %v8450_v63 = vsel %vm8449_vm13, %v8411_v15, %v8448_v23  ;;  %vm18910_vm13 = vmmov %vm18905_vm11 }
0x188e   :  { %v8443_v19 = vsel %vm8442_vm2, %v8410_v27, %v8441_v8  ;;  %v8453_v22 = vsel %vm8451_vm14, %v8452_v61, %v8450_v63  ;;  %vm18912_vm2 = vmmov %vm18908_vm10 }
0x188f   :  { %v8446_v24 = vsel %vm8444_vm7, %v8445_v18, %v8443_v19  ;;  %v8471_v43 = vadd.f32 1e-08, %v8453_v22  ;;  %vm18913_vm7 = vmmov %vm18904_vm8 }
0x1890   :  { %v8470_v5 = vadd.f32 1e-08, %v8446_v24 }
0x1891   :  { %14630 = vrcp.f32 %v8471_v43 }
0x1892   :  { %14632 = vrcp.f32 %v8470_v5 }
0x1894   :  { %v14629_v37 = vpop.eup %14628 }
0x1895   :  { %v8479_v2 = vmul.f32 %v14629_v37, %v8463_v10 }
0x1897   :  { %v17869_v14 = vadd.f32 %v17840_v25, %v8479_v2 }
0x1899   :  { %13237 = vmatmul.mubr.msk.f32.gmra.mrb[180].mxu0 %vm161_vm1, %v17869_v14 }
0x189b   :  { %v14631_v60 = vpop.eup %14630 }
0x189c   :  { %v14633_v6 = vpop.eup %14632  ;;  %v8483_v54 = vmul.f32 %v14631_v60, %v8465_v33 }
0x189d   :  { %v8481_v20 = vmul.f32 %v14633_v6, %v8464_v0 }
0x189e   :  { %v17886_v46 = vadd.f32 %v17840_v25, %v8483_v54 }
0x189f   :  { %v17883_v38 = vadd.f32 %v17840_v25, %v8481_v20  ;;  %v11728_v25 = vld [vmem:[%s11398_s27] ss:$0 sm:$0xff] }
0x18a1   :  { %13239 = vmatprep.mubr.msk.f32.mxu0 %vm161_vm1, %v17883_v38 }
0x18a2   :  { %13240 = vmatmul.mubr.msk.f32.gmra.mrb[182].mxu0 %vm161_vm1, %v17886_v46 }
0x18a3   :  { %13260 = vmatprep.mubr.msk.f32.mxu0 %vm14794_vm0, %v14795_v1 }
0x18c4   :  { %v14182_v11 = vpop.permute.xlu0 %14181 }
0x18c5   :  { %v14184_v26 = vunpack.i.h.bf16 %v14182_v11  ;;  %v14183_v56 = vunpack.i.l.bf16 %v14182_v11 }
0x18c7   :  { %v13810_v50 = vpack.c.bf16 %v14184_v26, %v14183_v56 }
0x1919   :  { %v13235_v45 = vpop.f32.mrb[178].mxu0 }
0x191a   :  { %v8597_v13 = vadd.f32 %v13235_v45, %v11728_v25  ;;  %v8591_v31 = vpop.f32.mrb[179].mxu0 }
0x191b   :  { %v8592_v15 = vadd.f32 %v11728_v25, %v8591_v31 }
0x191c   :  { %v8621_v4 = vmax.f32 %v8597_v13, 0.0 }
0x191d   :  { %v8620_v27 = vmax.f32 %v8592_v15, 0.0 }
0x191e   :  { %v8627_v35 = vmul.f32 0.35355338, %v8621_v4 }
0x191f   :  { %v8626_v49 = vmul.f32 0.35355338, %v8620_v27 }
0x1920   :  { %8999 = vrot.lane.b32.xlu0 %v8627_v35, %s14802_s21 }
0x1921   :  { %8997 = vrot.lane.b32.xlu1 %v8626_v49, %s14802_s21  ;;  %13261 = vmatmul.mubr.msk.f32.vlgmr.msra.gmra.mrb[184].mxu0 %vm708_vm4, %v8626_v49 }
0x1922   :  { %13263 = vmatprep.mubr.msk.f32.mxu0 %vm14794_vm0, %v14795_v1  ;;  %13812 = vmatpush3.bf16.xpose.msk.msra.mxu0 %vm15104_vm5, %v13810_v50 }
0x1923   :  { %13816 = vmatprep.subr.bf16.mxu0 %v18809_v47 }
0x1924   :  { %9231 = vrot.lane.b32.xlu0 %v8626_v49, %s14804_s23 }
0x1925   :  { %14186 = vrot.lane.b32.xlu1 %v17866_v62, %s14804_s23  ;;  %13264 = vmatmul.mubr.msk.f32.gmra.mrb[186].mxu0 %vm708_vm4, %v8627_v35 }
0x1926   :  { %13266 = vmatprep.mubr.msk.f32.mxu0 %vm14794_vm0, %v14795_v1 }
0x1928   :  { %9233 = vrot.lane.b32.xlu0 %v8627_v35, %s14804_s23 }
0x192c   :  { %9465 = vrot.lane.b32.xlu0 %v8626_v49, %s14805_s24 }
0x196c   :  { %v13238_v40 = vpop.f32.mrb[180].mxu0 }
0x196d   :  { %v8607_v9 = vadd.f32 %v13238_v40, %v11728_v25  ;;  %v8601_v16 = vpop.f32.mrb[181].mxu0 }
0x196e   :  { %v8602_v29 = vadd.f32 %v11728_v25, %v8601_v16 }
0x196f   :  { %v8623_v23 = vmax.f32 %v8607_v9, 0.0 }
0x1970   :  { %v8622_v61 = vmax.f32 %v8602_v29, 0.0 }
0x1971   :  { %v8629_v8 = vmul.f32 0.35355338, %v8623_v23 }
0x1972   :  { %v8628_v63 = vmul.f32 0.35355338, %v8622_v61 }
0x1973   :  { %v9748_v18 = vrot.slane %v8629_v8, 7 }
0x1974   :  { %9469 = vrot.lane.b32.xlu0 %v8628_v63, %s14805_s24  ;;  %9001 = vrot.lane.b32.xlu1 %v8628_v63, %s14802_s21  ;;  %v9747_v39 = vrot.slane %v8628_v63, 7 }
0x1975   :  { %13267 = vmatmul.mubr.msk.f32.gmra.mrb[188].mxu0 %vm708_vm4, %v8628_v63  ;;  %v13241_v19 = vpop.f32.mrb[182].mxu0 }
0x1976   :  { %v8617_v22 = vadd.f32 %v13241_v19, %v11728_v25  ;;  %v8611_v24 = vpop.f32.mrb[183].mxu0  ;;  %v17921_v43 = vsel %vm438_vm3, %v9747_v39, %v9748_v18  ;;  %13286 = vmatprep.mubr.msk.f32.mxu0 %vm14794_vm0, %v14795_v1 }
0x1977   :  { %v8612_v41 = vadd.f32 %v11728_v25, %v8611_v24 }
0x1978   :  { %v8625_v5 = vmax.f32 %v8617_v22, 0.0  ;;  %10009 = vrot.lane.b32.xlu0 %v17921_v43, %s14802_s21  ;;  %14191 = vrot.lane.b32.xlu1 %v17866_v62, %s14805_s24 }
0x1979   :  { %v8624_v32 = vmax.f32 %v8612_v41, 0.0 }
0x197a   :  { %v8631_v17 = vmul.f32 0.35355338, %v8625_v5 }
0x197b   :  { %v8630_v3 = vmul.f32 0.35355338, %v8624_v32 }
0x197c   :  { %v9752_v52 = vrot.slane %v8631_v17, 7  ;;  %9235 = vrot.lane.b32.xlu1 %v8628_v63, %s14804_s23 }
0x197d   :  { %v9750_v10 = vrot.slane %v8630_v3, 7  ;;  %v18906_v3 = vld [vmem:[#allocation2_spill] sm:$0xff] }
0x197f   :  { %v17931_v55 = vsel %vm438_vm3, %v9748_v18, %v9750_v10  ;;  %v17934_v37 = vsel %vm438_vm3, %v9750_v10, %v9752_v52 }
0x1980   :  { %10011 = vrot.lane.b32.xlu0 %v17931_v55, %s14802_s21  ;;  %9467 = vrot.lane.b32.xlu1 %v8627_v35, %s14805_s24 }
0x1984   :  { %10258 = vrot.lane.b32.xlu0 %v17921_v43, %s14804_s23  ;;  %14196 = vrot.lane.b32.xlu1 %v17894_v48, %s14802_s21 }
0x1988   :  { %10260 = vrot.lane.b32.xlu0 %v17931_v55, %s14804_s23  ;;  %14201 = vrot.lane.b32.xlu1 %v17894_v48, %s14804_s23 }
0x198c   :  { %10507 = vrot.lane.b32.xlu0 %v17921_v43, %s14805_s24  ;;  %10013 = vrot.lane.b32.xlu1 %v17934_v37, %s14802_s21 }
0x1990   :  { %10511 = vrot.lane.b32.xlu0 %v17934_v37, %s14805_s24  ;;  %14206 = vrot.lane.b32.xlu1 %v17894_v48, %s14805_s24 }
0x1992   :  { %v9000_v21 = vpop.permute.xlu0 %8999 }
0x1993   :  { %v8998_v2 = vpop.permute.xlu1 %8997 }
0x1994   :  { %10262 = vrot.lane.b32.xlu1 %v17934_v37, %s14804_s23  ;;  %13287 = vmatmul.mubr.msk.f32.vlgmr.msra.gmra.mrb[190].mxu0 %vm708_vm4, %v8998_v2 }
0x1995   :  { %13289 = vmatprep.mubr.msk.f32.mxu0 %vm14794_vm0, %v14795_v1 }
0x1996   :  { %v9232_v20 = vpop.permute.xlu0 %9231 }
0x1997   :  { %v14187_v33 = vpop.permute.xlu1 %14186 }
0x1998   :  { %v14189_v60 = vunpack.i.h.bf16 %v14187_v33  ;;  %v14188_v0 = vunpack.i.l.bf16 %v14187_v33  ;;  %10509 = vrot.lane.b32.xlu1 %v17931_v55, %s14805_s24  ;;  %13290 = vmatmul.mubr.msk.f32.gmra.mrb[192].mxu0 %vm708_vm4, %v9000_v21 }
0x1999   :  { %13292 = vmatprep.mubr.msk.f32.mxu0 %vm14794_vm0, %v14795_v1 }
0x199a   :  { %v13817_v6 = vpack.c.bf16 %v14189_v60, %v14188_v0  ;;  %v9234_v34 = vpop.permute.xlu0 %9233 }
0x199c   :  { %13819 = vmatpush3.bf16.xpose.msk.msra.mxu0 %vm15104_vm5, %v13817_v6 }
0x199d   :  { %13823 = vmatprep.subr.bf16.mxu0 %v18809_v47 }
0x199e   :  { %v9466_v31 = vpop.permute.xlu0 %9465 }
0x19e6   :  { %v9002_v54 = vpop.permute.xlu1 %9001 }
0x19e7   :  { %13293 = vmatmul.mubr.msk.f32.gmra.mrb[194].mxu0 %vm708_vm4, %v9002_v54 }
0x19e8   :  { %13312 = vmatprep.mubr.msk.f32.mxu0 %vm14794_vm0, %v14795_v1 }
0x19ea   :  { %v14192_v53 = vpop.permute.xlu1 %14191 }
0x19eb   :  { %v14194_v36 = vunpack.i.h.bf16 %v14192_v53  ;;  %v14193_v44 = vunpack.i.l.bf16 %v14192_v53  ;;  %13313 = vmatmul.mubr.msk.f32.vlgmr.msra.gmra.mrb[196].mxu0 %vm708_vm4, %v9232_v20 }
0x19ec   :  { %13315 = vmatprep.mubr.msk.f32.mxu0 %vm14794_vm0, %v14795_v1 }
0x19ed   :  { %v13824_v7 = vpack.c.bf16 %v14194_v36, %v14193_v44 }
0x19ee   :  { %v9236_v58 = vpop.permute.xlu1 %9235 }
0x19ef   :  { %13316 = vmatmul.mubr.msk.f32.gmra.mrb[198].mxu0 %vm708_vm4, %v9234_v34 }
0x19f0   :  { %13826 = vmatpush3.bf16.xpose.msk.msra.mxu0 %vm15104_vm5, %v13824_v7  ;;  %13318 = vmatprep.mubr.msk.f32.mxu0 %vm14794_vm0, %v14795_v1 }
0x19f1   :  { %13830 = vmatprep.subr.bf16.mxu0 %v18809_v47 }
0x19f2   :  { %v9468_v11 = vpop.permute.xlu1 %9467 }
0x19f3   :  { %13319 = vmatmul.mubr.msk.f32.gmra.mrb[200].mxu0 %vm708_vm4, %v9236_v58 }
0x19f4   :  { %v8849_v25 = vpop.f32.mrb[184].mxu0  ;;  %13338 = vmatprep.mubr.msk.f32.mxu0 %vm14794_vm0, %v14795_v1 }
0x19f5   :  { %v17985_v45 = vsel %vm18904_vm8, -4.2949673e+09, %v8849_v25  ;;  %v13262_v13 = vpop.f32.mrb[185].mxu0 }
0x19f6   :  { %v8866_v26 = vsel %vm1710_vm12, %v17985_v45, -inf  ;;  %v14197_v35 = vpop.permute.xlu1 %14196 }
0x19f7   :  { %13339 = vmatmul.mubr.msk.f32.vlgmr.msra.gmra.mrb[202].mxu0 %vm708_vm4, %v9466_v31  ;;  %8867 = vmax.xlane.f32.xlu1 %v8866_v26  ;;  %v14199_v50 = vunpack.i.h.bf16 %v14197_v35  ;;  %v14198_v49 = vunpack.i.l.bf16 %v14197_v35 }
0x19f8   :  { %13833 = vmatpush3.bf16.xpose.msk.msra.mxu0 %vm15104_vm5, %v17914_v42  ;;  %v8854_v56 = vpop.f32.mrb[186].mxu0  ;;  %13341 = vmatprep.mubr.msk.f32.mxu0 %vm14794_vm0, %v14795_v1  ;;  %v9470_v42 = vpop.permute.xlu0 %9469 }
0x19f9   :  { %v17997_v15 = vsel %vm18905_vm11, -4.2949673e+09, %v8854_v56  ;;  %v13265_v4 = vpop.f32.mrb[187].mxu0  ;;  %13837 = vmatprep.subr.bf16.mxu0 %v18809_v47  ;;  %v13838_v40 = vpack.c.bf16 %v14199_v50, %v14198_v49  ;;  %vm18915_vm11 = vmmov %vm18912_vm2 }
0x19fa   :  { %v8869_v27 = vsel %vm1710_vm12, %v17997_v15, -inf  ;;  %v14202_v9 = vpop.permute.xlu1 %14201 }
0x19fb   :  { %13342 = vmatmul.mubr.msk.f32.gmra.mrb[204].mxu0 %vm708_vm4, %v9468_v11  ;;  %8870 = vmax.xlane.f32.xlu1 %v8869_v27  ;;  %v14204_v16 = vunpack.i.h.bf16 %v14202_v9  ;;  %v14203_v29 = vunpack.i.l.bf16 %v14202_v9 }
0x19fc   :  { %13344 = vmatprep.mubr.msk.f32.mxu0 %vm14794_vm0, %v14795_v1  ;;  %v10010_v8 = vpop.permute.xlu0 %10009 }
0x19fd   :  { %v13845_v23 = vpack.c.bf16 %v14204_v16, %v14203_v29 }
0x19fe   :  { %v10014_v61 = vpop.permute.xlu1 %10013 }
0x19ff   :  { %13345 = vmatmul.mubr.msk.f32.gmra.mrb[206].mxu0 %vm708_vm4, %v9470_v42 }
0x1a00   :  { %13364 = vmatprep.mubr.msk.f32.mxu0 %vm14794_vm0, %v14795_v1  ;;  %v10012_v63 = vpop.permute.xlu0 %10011 }
0x1a02   :  { %v14207_v18 = vpop.permute.xlu1 %14206 }
0x1a03   :  { %13365 = vmatmul.mubr.msk.f32.vlgmr.msra.gmra.mrb[208].mxu0 %vm708_vm4, %v17921_v43  ;;  %v14209_v39 = vunpack.i.h.bf16 %v14207_v18  ;;  %v14208_v19 = vunpack.i.l.bf16 %v14207_v18 }
0x1a04   :  { %13367 = vmatprep.mubr.msk.f32.mxu0 %vm14794_vm0, %v14795_v1  ;;  %13840 = vmatpush3.bf16.xpose.msk.msra.mxu0 %vm15104_vm5, %v13838_v40  ;;  %v10259_v22 = vpop.permute.xlu0 %10258 }
0x1a05   :  { %13844 = vmatprep.subr.bf16.mxu0 %v18809_v47  ;;  %v13852_v24 = vpack.c.bf16 %v14209_v39, %v14208_v19  ;;  %v18920_v19 = vld [vmem:[#allocation4_spill] sm:$0xff] }
0x1a06   :  { %v10263_v41 = vpop.permute.xlu1 %10262 }
0x1a07   :  { %13368 = vmatmul.mubr.msk.f32.gmra.mrb[210].mxu0 %vm708_vm4, %v17931_v55 }
0x1a08   :  { %13370 = vmatprep.mubr.msk.f32.mxu0 %vm14794_vm0, %v14795_v1  ;;  %v10261_v43 = vpop.permute.xlu0 %10260 }
0x1a0a   :  { %v10510_v51 = vpop.permute.xlu1 %10509 }
0x1a0b   :  { %13371 = vmatmul.mubr.msk.f32.gmra.mrb[212].mxu0 %vm708_vm4, %v17934_v37 }
0x1a0c   :  { %13390 = vmatprep.mubr.msk.f32.mxu0 %vm14794_vm0, %v14795_v1  ;;  %v10508_v5 = vpop.permute.xlu0 %10507 }
0x1a0f   :  { %13391 = vmatmul.mubr.msk.f32.vlgmr.msra.gmra.mrb[214].mxu0 %vm708_vm4, %v10010_v8 }
0x1a10   :  { %13393 = vmatprep.mubr.msk.f32.mxu0 %vm14794_vm0, %v14795_v1  ;;  %13847 = vmatpush3.bf16.xpose.msk.msra.mxu0 %vm15104_vm5, %v13845_v23  ;;  %v10512_v32 = vpop.permute.xlu0 %10511  ;;  %v18917_v23 = vld [vmem:[#allocation3_spill] sm:$0xff] }
0x1a11   :  { %13851 = vmatprep.subr.bf16.mxu0 %v18809_v47 }
0x1a13   :  { %13394 = vmatmul.mubr.msk.f32.gmra.mrb[216].mxu0 %vm708_vm4, %v10012_v63 }
0x1a14   :  { %13396 = vmatprep.mubr.msk.f32.mxu0 %vm14794_vm0, %v14795_v1 }
0x1a17   :  { %13397 = vmatmul.mubr.msk.f32.gmra.mrb[218].mxu0 %vm708_vm4, %v10014_v61 }
0x1a18   :  { %13416 = vmatprep.mubr.msk.f32.mxu0 %vm14794_vm0, %v14795_v1 }
0x1a1b   :  { %13417 = vmatmul.mubr.msk.f32.vlgmr.msra.gmra.mrb[220].mxu0 %vm708_vm4, %v10259_v22 }
0x1a1c   :  { %13419 = vmatprep.mubr.msk.f32.mxu0 %vm14794_vm0, %v14795_v1  ;;  %13854 = vmatpush3.bf16.xpose.msk.msra.mxu0 %vm15104_vm5, %v13852_v24  ;;  %vm18907_vm5 = vcmp.eq.f32.partialorder %v18906_v3, 0.0 }
0x1a1d   :  { %vm18911_vm14 = vmmov %vm18907_vm5 }
0x1a1e   :  { %vm18914_vm8 = vmmov %vm18907_vm5 }
0x1a1f   :  { %13420 = vmatmul.mubr.msk.f32.gmra.mrb[222].mxu0 %vm708_vm4, %v10261_v43 }
0x1a20   :  { %13422 = vmatprep.mubr.msk.f32.mxu0 %vm14794_vm0, %v14795_v1 }
0x1a23   :  { %13423 = vmatmul.mubr.msk.f32.gmra.mrb[224].mxu0 %vm708_vm4, %v10263_v41 }
0x1a24   :  { %13442 = vmatprep.mubr.msk.f32.mxu0 %vm14794_vm0, %v14795_v1 }
0x1a27   :  { %13443 = vmatmul.mubr.msk.f32.vlgmr.msra.gmra.mrb[226].mxu0 %vm708_vm4, %v10508_v5 }
0x1a28   :  { %13445 = vmatprep.mubr.msk.f32.mxu0 %vm14794_vm0, %v14795_v1 }
0x1a2b   :  { %13446 = vmatmul.mubr.msk.f32.gmra.mrb[228].mxu0 %vm708_vm4, %v10510_v51 }
0x1a2c   :  { %13448 = vmatprep.mubr.msk.f32.mxu0 %vm14794_vm0, %v14795_v1 }
0x1a2f   :  { %13449 = vmatmul.mubr.msk.f32.gmra.mrb[230].mxu0 %vm708_vm4, %v10512_v32  ;;  %v18923_v32 = vld [vmem:[#allocation5_spill] sm:$0xff] }
0x1a48   :  { %v8859_v17 = vpop.f32.mrb[188].mxu0 }
0x1a49   :  { %v18055_v52 = vsel %vm18907_vm5, -4.2949673e+09, %v8859_v17  ;;  %v13268_v10 = vpop.f32.mrb[189].mxu0  ;;  %vm18916_vm5 = vmmov %vm18910_vm13 }
0x1a4a   :  { %v8872_v55 = vsel %vm18908_vm10, %v18055_v52, -inf  ;;  %vm18918_vm10 = vcmp.eq.f32.partialorder %v18917_v23, 0.0 }
0x1a4b   :  { %8873 = vmax.xlane.f32.xlu1 %v8872_v55 }
0x1a67   :  { %v9083_v37 = vpop.f32.mrb[190].mxu0 }
0x1a68   :  { %v18061_v2 = vsel %vm18909_vm9, -4.2949673e+09, %v9083_v37  ;;  %v13288_v21 = vpop.f32.mrb[191].mxu0  ;;  %vm18919_vm9 = vmmov %vm18916_vm5 }
0x1a69   :  { %v9100_v33 = vsel %vm1710_vm12, %v18061_v2, -inf }
0x1a6a   :  { %9101 = vmax.xlane.f32.xlu1 %v9100_v33 }
0x1a6b   :  { %v9088_v60 = vpop.f32.mrb[192].mxu0 }
0x1a6c   :  { %v18067_v0 = vsel %vm18910_vm13, -4.2949673e+09, %v9088_v60  ;;  %v13291_v6 = vpop.f32.mrb[193].mxu0  ;;  %vm18921_vm13 = vcmp.eq.f32.partialorder %v18920_v19, 0.0 }
0x1a6d   :  { %v9103_v54 = vsel %vm1710_vm12, %v18067_v0, -inf }
0x1a6e   :  { %9104 = vmax.xlane.f32.xlu1 %v9103_v54 }
0x1a84   :  { %v8868_v30 = vpop.xlane.xlu1 %8867 }
0x1a85   :  { %v8875_v21 = vsub.f32 %v17985_v45, %v8868_v30 }
0x1a87   :  { %v8878_v45 = vmul.f32 1.442695, %v8875_v21 }
0x1a88   :  { %v8871_v6 = vpop.xlane.xlu1 %8870 }
0x1a89   :  { %14634 = vpow2.f32 %v8878_v45 }
0x1aba   :  { %v9093_v20 = vpop.f32.mrb[194].mxu0 }
0x1abb   :  { %v18073_v53 = vsel %vm18911_vm14, -4.2949673e+09, %v9093_v20  ;;  %v13294_v36 = vpop.f32.mrb[195].mxu0  ;;  %vm18922_vm14 = vmmov %vm18913_vm7  ;;  %v8738_v20 = vsel %vm161_vm1, %v17857_v59, 0.0 }
0x1abc   :  { %v9106_v44 = vsel %vm18912_vm2, %v18073_v53, -inf  ;;  %vm18924_vm2 = vcmp.eq.f32.partialorder %v18923_v32, 0.0 }
0x1abd   :  { %9107 = vmax.xlane.f32.xlu1 %v9106_v44 }
0x1abe   :  { %v9317_v7 = vpop.f32.mrb[196].mxu0 }
0x1abf   :  { %v18079_v34 = vsel %vm18913_vm7, -4.2949673e+09, %v9317_v7  ;;  %v13314_v58 = vpop.f32.mrb[197].mxu0  ;;  %vm18925_vm7 = vmmov %vm18915_vm11  ;;  %v8876_v7 = vsub.f32 %v17997_v15, %v8871_v6 }
0x1ac0   :  { %v9334_v25 = vsel %vm1710_vm12, %v18079_v34, -inf }
0x1ac1   :  { %9335 = vmax.xlane.f32.xlu1 %v9334_v25 }
0x1ac2   :  { %v9322_v11 = vpop.f32.mrb[198].mxu0 }
0x1ac3   :  { %v13317_v13 = vpop.f32.mrb[199].mxu0  ;;  %v18103_v18 = vsel %vm18919_vm9, -4.2949673e+09, %v9322_v11  ;;  %v8732_v11 = vsel %vm161_vm1, %v17843_v12, 0.0 }
0x1ac4   :  { %v9337_v43 = vsel %vm1710_vm12, %v18103_v18, -inf }
0x1ac6   :  { %v9327_v31 = vpop.f32.mrb[200].mxu0 }
0x1ac7   :  { %v18085_v26 = vsel %vm18914_vm8, -4.2949673e+09, %v9327_v31  ;;  %v13320_v56 = vpop.f32.mrb[201].mxu0  ;;  %vm18926_vm8 = vmmov %vm18918_vm10  ;;  %v8880_v31 = vmul.f32 1.442695, %v8876_v7 }
0x1ac8   :  { %v9340_v4 = vsel %vm18915_vm11, %v18085_v26, -inf  ;;  %vm18927_vm11 = vcmp.eq.f32.partialorder %v18906_v3, 0.0 }
0x1ac9   :  { %9341 = vmax.xlane.f32.xlu0 %v9340_v4  ;;  %14636 = vpow2.f32 %v8880_v31 }
0x1aca   :  { %v9551_v27 = vpop.f32.mrb[202].mxu0 }
0x1acb   :  { %v13340_v35 = vpop.f32.mrb[203].mxu0  ;;  %v18115_v5 = vsel %vm18922_vm14, -4.2949673e+09, %v9551_v27  ;;  %v8741_v27 = vsel %vm161_vm1, %v17869_v14, 0.0 }
0x1acc   :  { %v9568_v55 = vsel %vm1710_vm12, %v18115_v5, -inf }
0x1ace   :  { %v9556_v50 = vpop.f32.mrb[204].mxu0 }
0x1acf   :  { %v18091_v49 = vsel %vm18916_vm5, -4.2949673e+09, %v9556_v50  ;;  %v13343_v42 = vpop.f32.mrb[205].mxu0  ;;  %vm18928_vm5 = vmmov %vm18925_vm7 }
0x1ad0   :  { %v9571_v40 = vsel %vm1710_vm12, %v18091_v49, -inf  ;;  %vm18930_vm9 = vmmov %vm18928_vm5 }
0x1ad1   :  { %9572 = vmax.xlane.f32.xlu0 %v9571_v40  ;;  %v8744_v40 = vsel %vm161_vm1, %v17883_v38, 0.0  ;;  %vm18932_vm14 = vmmov %vm18928_vm5 }
0x1ad2   :  { %v9561_v9 = vpop.f32.mrb[206].mxu0 }
0x1ad3   :  { %v13346_v16 = vpop.f32.mrb[207].mxu0  ;;  %v18136_v36 = vsel %vm18927_vm11, -4.2949673e+09, %v9561_v9  ;;  %vm18936_vm11 = vmmov %vm18928_vm5 }
0x1ad4   :  { %v9574_v25 = vsel %vm18928_vm5, %v18136_v36, -inf }
0x1ad6   :  { %v9832_v29 = vpop.f32.mrb[208].mxu0 }
0x1ad7   :  { %v18097_v61 = vsel %vm18918_vm10, -4.2949673e+09, %v9832_v29  ;;  %v13366_v8 = vpop.f32.mrb[209].mxu0  ;;  %vm18929_vm10 = vmmov %vm18921_vm13 }
0x1ad8   :  { %v9849_v63 = vsel %vm1710_vm12, %v18097_v61, -inf  ;;  %v8874_v4 = vpop.xlane.xlu1 %8873  ;;  %v8747_v8 = vsel %vm674_vm6, %v17886_v46, 0.0 }
0x1ad9   :  { %9850 = vmax.xlane.f32.xlu1 %v9849_v63  ;;  %v8877_v50 = vsub.f32 %v18055_v52, %v8874_v4  ;;  %v18156_v63 = vpop.eup %14634 }
0x1ada   :  { %v9837_v39 = vpop.f32.mrb[210].mxu0  ;;  %v18161_v30 = vpop.eup %14636 }
0x1adb   :  { %v18107_v22 = vsel %vm18921_vm13, -4.2949673e+09, %v9837_v39  ;;  %v13369_v24 = vpop.f32.mrb[211].mxu0  ;;  %v8882_v16 = vmul.f32 1.442695, %v8877_v50  ;;  %v8887_v21 = vsel %vm1710_vm12, %v18161_v30, 0.0  ;;  %vm18931_vm13 = vmmov %vm18924_vm2 }
0x1adc   :  { %v9852_v41 = vsel %vm1710_vm12, %v18107_v22, -inf }
0x1add   :  { %9338 = vmax.xlane.f32.xlu1 %v9337_v43  ;;  %9853 = vmax.xlane.f32.xlu0 %v9852_v41  ;;  %14638 = vpow2.f32 %v8882_v16  ;;  %v8884_v41 = vsel %vm1710_vm12, %v18156_v63, 0.0 }
0x1ade   :  { %v9842_v51 = vpop.f32.mrb[212].mxu0 }
0x1adf   :  { %v18119_v17 = vsel %vm18924_vm2, -4.2949673e+09, %v9842_v51  ;;  %v13372_v10 = vpop.f32.mrb[213].mxu0  ;;  %vm18933_vm2 = vmmov %vm18926_vm8 }
0x1ae0   :  { %v9855_v37 = vsel %vm18925_vm7, %v18119_v17, -inf  ;;  %vm18934_vm7 = vmmov %vm18929_vm10 }
0x1ae1   :  { %9569 = vmax.xlane.f32.xlu1 %v9568_v55  ;;  %9856 = vmax.xlane.f32.xlu0 %v9855_v37  ;;  %vm18937_vm5 = vmmov %vm18933_vm2 }
0x1ae2   :  { %v10095_v28 = vpop.f32.mrb[214].mxu0 }
0x1ae3   :  { %v18128_v33 = vsel %vm18926_vm8, -4.2949673e+09, %v10095_v28  ;;  %v13392_v60 = vpop.f32.mrb[215].mxu0  ;;  %vm18935_vm8 = vmmov %vm18931_vm13 }
0x1ae4   :  { %v10112_v54 = vsel %vm1710_vm12, %v18128_v33, -inf }
0x1ae5   :  { %8739 = vadd.xlane.f32.xlu0 %v8738_v20  ;;  %10113 = vmax.xlane.f32.xlu1 %v10112_v54  ;;  %v8735_v54 = vsel %vm161_vm1, %v17850_v57, 0.0 }
0x1ae6   :  { %v10100_v44 = vpop.f32.mrb[216].mxu0 }
0x1ae7   :  { %v13395_v58 = vpop.f32.mrb[217].mxu0  ;;  %v18145_v13 = vsel %vm18929_vm10, -4.2949673e+09, %v10100_v44  ;;  %v18168_v20 = vpop.eup %14638  ;;  %vm18938_vm10 = vmmov %vm18934_vm7 }
0x1ae8   :  { %v10115_v15 = vsel %vm1710_vm12, %v18145_v13, -inf  ;;  %v8890_v7 = vsel %vm18930_vm9, %v18168_v20, 0.0  ;;  %vm18939_vm9 = vmmov %vm18935_vm8 }
0x1ae9   :  { %8733 = vadd.xlane.f32.xlu0 %v8732_v11  ;;  %9575 = vmax.xlane.f32.xlu1 %v9574_v25 }
0x1aea   :  { %v10105_v3 = vpop.f32.mrb[218].mxu0 }
0x1aeb   :  { %v13398_v56 = vpop.f32.mrb[219].mxu0  ;;  %v18178_v25 = vsel %vm18931_vm13, -4.2949673e+09, %v10105_v3  ;;  %vm18940_vm13 = vmmov %vm18936_vm11 }
0x1aec   :  { %v10118_v31 = vsel %vm18932_vm14, %v18178_v25, -inf  ;;  %vm18941_vm14 = vmmov %vm18936_vm11 }
0x1aed   :  { %8742 = vadd.xlane.f32.xlu1 %v8741_v27  ;;  %10116 = vmax.xlane.f32.xlu0 %v10115_v15 }
0x1aee   :  { %v10344_v35 = vpop.f32.mrb[220].mxu0 }
0x1aef   :  { %v13418_v42 = vpop.f32.mrb[221].mxu0  ;;  %v18188_v4 = vsel %vm18933_vm2, -4.2949673e+09, %v10344_v35  ;;  %vm18942_vm2 = vmmov %vm18936_vm11 }
0x1af0   :  { %v10361_v15 = vsel %vm1710_vm12, %v18188_v4, -inf }
0x1af1   :  { %8745 = vadd.xlane.f32.xlu1 %v8744_v40 }
0x1af2   :  { %v10349_v9 = vpop.f32.mrb[222].mxu0 }
0x1af3   :  { %v13421_v29 = vpop.f32.mrb[223].mxu0  ;;  %v18194_v3 = vsel %vm18934_vm7, -4.2949673e+09, %v10349_v9  ;;  %vm18943_vm7 = vmmov %vm18942_vm2 }
0x1af4   :  { %v10364_v27 = vsel %vm1710_vm12, %v18194_v3, -inf }
0x1af5   :  { %8748 = vadd.xlane.f32.xlu1 %v8747_v8 }
0x1af6   :  { %v10354_v39 = vpop.f32.mrb[224].mxu0 }
0x1af7   :  { %v9102_v24 = vpop.xlane.xlu1 %9101  ;;  %v13424_v43 = vpop.f32.mrb[225].mxu0  ;;  %v18200_v50 = vsel %vm18935_vm8, -4.2949673e+09, %v10354_v39  ;;  %vm18944_vm8 = vmmov %vm18942_vm2 }
0x1af8   :  { %v9109_v52 = vsub.f32 %v18061_v2, %v9102_v24  ;;  %v10367_v35 = vsel %vm18936_vm11, %v18200_v50, -inf  ;;  %vm18945_vm11 = vmmov %vm18942_vm2 }
0x1af9   :  { %8885 = vadd.xlane.f32.xlu1 %v8884_v41 }
0x1afa   :  { %v9112_v51 = vmul.f32 1.442695, %v9109_v52  ;;  %v10593_v10 = vpop.f32.mrb[226].mxu0 }
0x1afb   :  { %v9105_v55 = vpop.xlane.xlu1 %9104  ;;  %v13444_v37 = vpop.f32.mrb[227].mxu0  ;;  %v18206_v42 = vsel %vm18937_vm5, -4.2949673e+09, %v10593_v10  ;;  %vm18946_vm5 = vmmov %vm18942_vm2 }
0x1afc   :  { %14640 = vpow2.f32 %v9112_v51  ;;  %v9110_v28 = vsub.f32 %v18067_v0, %v9105_v55  ;;  %v10610_v40 = vsel %vm1710_vm12, %v18206_v42, -inf }
0x1afd   :  { %8888 = vadd.xlane.f32.xlu1 %v8887_v21 }
0x1afe   :  { %v9114_v60 = vmul.f32 1.442695, %v9110_v28  ;;  %v10598_v6 = vpop.f32.mrb[228].mxu0 }
0x1aff   :  { %v13447_v2 = vpop.f32.mrb[229].mxu0  ;;  %v18212_v9 = vsel %vm18938_vm10, -4.2949673e+09, %v10598_v6  ;;  %vm18947_vm10 = vmmov %vm18942_vm2 }
0x1b00   :  { %14642 = vpow2.f32 %v9114_v60  ;;  %v10613_v16 = vsel %vm1710_vm12, %v18212_v9, -inf }
0x1b01   :  { %8736 = vadd.xlane.f32.xlu1 %v8735_v54 }
0x1b02   :  { %v10603_v44 = vpop.f32.mrb[230].mxu0 }
0x1b03   :  { %v13450_v45 = vpop.f32.mrb[231].mxu0  ;;  %v18218_v29 = vsel %vm18939_vm9, -4.2949673e+09, %v10603_v44 }
0x1b04   :  { %v10616_v23 = vsel %vm18940_vm13, %v18218_v29, -inf }
0x1b05   :  { %8891 = vadd.xlane.f32.xlu1 %v8890_v7 }
0x1b06   :  { %v18172_v0 = vpop.eup %14640 }
0x1b07   :  { %v9118_v58 = vsel %vm1710_vm12, %v18172_v0, 0.0 }
0x1b08   :  { %9119 = vadd.xlane.f32.xlu0 %v9118_v58 }
0x1b0a   :  { %v18180_v11 = vpop.eup %14642 }
0x1b0b   :  { %v9121_v56 = vsel %vm1710_vm12, %v18180_v11, 0.0 }
0x1b0c   :  { %9122 = vadd.xlane.f32.xlu1 %v9121_v56  ;;  %10119 = vmax.xlane.f32.xlu0 %v10118_v31 }
0x1b10   :  { %10362 = vmax.xlane.f32.xlu0 %v10361_v15 }
0x1b14   :  { %10365 = vmax.xlane.f32.xlu0 %v10364_v27 }
0x1b18   :  { %10368 = vmax.xlane.f32.xlu0 %v10367_v35 }
0x1b1c   :  { %10611 = vmax.xlane.f32.xlu0 %v10610_v40 }
0x1b20   :  { %10614 = vmax.xlane.f32.xlu0 %v10613_v16 }
0x1b24   :  { %10617 = vmax.xlane.f32.xlu0 %v10616_v23 }
0x1b4a   :  { %v9108_v8 = vpop.xlane.xlu1 %9107 }
0x1b4b   :  { %v9111_v39 = vsub.f32 %v18073_v53, %v9108_v8 }
0x1b4d   :  { %v9116_v24 = vmul.f32 1.442695, %v9111_v39 }
0x1b4e   :  { %v9336_v52 = vpop.xlane.xlu1 %9335 }
0x1b4f   :  { %14644 = vpow2.f32 %v9116_v24  ;;  %v9343_v41 = vsub.f32 %v18079_v34, %v9336_v52 }
0x1b51   :  { %v9346_v37 = vmul.f32 1.442695, %v9343_v41 }
0x1b56   :  { %v9342_v32 = vpop.xlane.xlu0 %9341 }
0x1b57   :  { %v9345_v2 = vsub.f32 %v18085_v26, %v9342_v32 }
0x1b59   :  { %v18223_v19 = vpop.eup %14644  ;;  %v9350_v7 = vmul.f32 1.442695, %v9345_v2 }
0x1b5a   :  { %v9124_v43 = vsel %vm18941_vm14, %v18223_v19, 0.0 }
0x1b5b   :  { %9125 = vadd.xlane.f32.xlu1 %v9124_v43 }
0x1b5e   :  { %v18228_v51 = vpop.xlane.xlu0 %9572 }
0x1b66   :  { %v9851_v10 = vpop.xlane.xlu1 %9850 }
0x1b67   :  { %v9858_v55 = vsub.f32 %v18097_v61, %v9851_v10 }
0x1b69   :  { %v9861_v28 = vmul.f32 1.442695, %v9858_v55 }
0x1b6a   :  { %v9339_v53 = vpop.xlane.xlu1 %9338  ;;  %v9854_v21 = vpop.xlane.xlu0 %9853 }
0x1b6b   :  { %14646 = vpow2.f32 %v9861_v28  ;;  %v9344_v60 = vsub.f32 %v18103_v18, %v9339_v53  ;;  %v9859_v6 = vsub.f32 %v18107_v22, %v9854_v21 }
0x1b6c   :  { %14648 = vpow2.f32 %v9346_v37 }
0x1b6d   :  { %v9348_v54 = vmul.f32 1.442695, %v9344_v60  ;;  %v9863_v44 = vmul.f32 1.442695, %v9859_v6 }
0x1b6e   :  { %v9570_v34 = vpop.xlane.xlu1 %9569  ;;  %v9857_v45 = vpop.xlane.xlu0 %9856 }
0x1b6f   :  { %14650 = vpow2.f32 %v9863_v44  ;;  %v9860_v61 = vsub.f32 %v18119_v17, %v9857_v45  ;;  %v9577_v60 = vsub.f32 %v18115_v5, %v9570_v34 }
0x1b70   :  { %14652 = vpow2.f32 %v9348_v54 }
0x1b71   :  { %14654 = vpow2.f32 %v9350_v7  ;;  %v9865_v18 = vmul.f32 1.442695, %v9860_v61  ;;  %v9580_v44 = vmul.f32 1.442695, %v9577_v60 }
0x1b72   :  { %v18235_v58 = vpop.xlane.xlu0 %8739  ;;  %v10114_v31 = vpop.xlane.xlu1 %10113 }
0x1b73   :  { %v10121_v22 = vsub.f32 %v18128_v33, %v10114_v31  ;;  %14656 = vpow2.f32 %v9865_v18  ;;  %vm8752_vm13 = vcmp.ne.f32.partialorder %v18235_v58, 0.0 }
0x1b75   :  { %v18237_v56 = vpop.eup %14646  ;;  %v10124_v35 = vmul.f32 1.442695, %v10121_v22 }
0x1b76   :  { %v18240_v15 = vpop.xlane.xlu0 %8733  ;;  %v9867_v26 = vsel %vm1710_vm12, %v18237_v56, 0.0  ;;  %v18244_v27 = vpop.eup %14648 }
0x1b77   :  { %9868 = vadd.xlane.f32.xlu0 %v9867_v26  ;;  %v9352_v16 = vsel %vm1710_vm12, %v18244_v27, 0.0  ;;  %14658 = vpow2.f32 %v10124_v35  ;;  %v9576_v45 = vpop.xlane.xlu1 %9575 }
0x1b78   :  { %v9579_v18 = vsub.f32 %v18136_v36, %v9576_v45 }
0x1b79   :  { %v18246_v17 = vpop.eup %14650 }
0x1b7a   :  { %v10117_v40 = vpop.xlane.xlu0 %10116  ;;  %v18250_v23 = vpop.eup %14652  ;;  %v9870_v8 = vsel %vm1710_vm12, %v18246_v17, 0.0  ;;  %v9584_v26 = vmul.f32 1.442695, %v9579_v18 }
0x1b7b   :  { %v10122_v33 = vsub.f32 %v18145_v13, %v10117_v40  ;;  %9353 = vadd.xlane.f32.xlu0 %v9352_v16  ;;  %9871 = vadd.xlane.f32.xlu1 %v9870_v8  ;;  %v9355_v24 = vsel %vm1710_vm12, %v18250_v23, 0.0  ;;  %v18257_v43 = vpop.eup %14654  ;;  %v8743_v60 = vpop.xlane.xlu1 %8742 }
0x1b7c   :  { %v9358_v52 = vsel %vm18942_vm2, %v18257_v43, 0.0  ;;  %vm8753_vm9 = vcmp.ne.f32.partialorder %v8743_v60, 0.0  ;;  %vm8750_vm2 = vcmp.ne.f32.partialorder %v18240_v15, 0.0 }
0x1b7d   :  { %v10126_v39 = vmul.f32 1.442695, %v10122_v33  ;;  %v18261_v32 = vpop.eup %14656 }
0x1b7e   :  { %v9873_v13 = vsel %vm18943_vm7, %v18261_v32, 0.0 }
0x1b7f   :  { %9356 = vadd.xlane.f32.xlu0 %v9355_v24  ;;  %14660 = vpow2.f32 %v10126_v39  ;;  %v8746_v45 = vpop.xlane.xlu1 %8745 }
0x1b80   :  { %vm8754_vm14 = vcmp.ne.f32.partialorder %v8746_v45, 0.0 }
0x1b81   :  { %v18265_v41 = vpop.eup %14658  ;;  %v11744_v60 = vsel %vm8754_vm14, 1.0, %v14795_v1 }
0x1b82   :  { %v10130_v10 = vsel %vm1710_vm12, %v18265_v41, 0.0 }
0x1b83   :  { %9359 = vadd.xlane.f32.xlu0 %v9358_v52 }
0x1b87   :  { %9874 = vadd.xlane.f32.xlu0 %v9873_v13 }
0x1b89   :  { %v18269_v55 = vpop.eup %14660 }
0x1b8a   :  { %v10133_v37 = vsel %vm1710_vm12, %v18269_v55, 0.0 }
0x1b8b   :  { %10131 = vadd.xlane.f32.xlu0 %v10130_v10 }
0x1b8c   :  { %14211 = vrot.lane.b32.xlu1 %v17866_v62, %s14800_s19 }
0x1b8f   :  { %10134 = vadd.xlane.f32.xlu0 %v10133_v37 }
0x1b95   :  { %v18275_v28 = vpop.xlane.xlu0 %9119 }
0x1b99   :  { %v10120_v53 = vpop.xlane.xlu0 %10119 }
0x1b9a   :  { %v10123_v21 = vsub.f32 %v18178_v25, %v10120_v53 }
0x1b9c   :  { %v10128_v6 = vmul.f32 1.442695, %v10123_v21 }
0x1b9d   :  { %v10363_v2 = vpop.xlane.xlu0 %10362 }
0x1b9e   :  { %14662 = vpow2.f32 %v10128_v6  ;;  %v10370_v54 = vsub.f32 %v18188_v4, %v10363_v2 }
0x1ba0   :  { %v10373_v7 = vmul.f32 1.442695, %v10370_v54 }
0x1ba1   :  { %v10366_v61 = vpop.xlane.xlu0 %10365 }
0x1ba2   :  { %14664 = vpow2.f32 %v10373_v7  ;;  %v10371_v31 = vsub.f32 %v18194_v3, %v10366_v61  ;;  %v18320_v61 = vpop.xlane.xlu1 %8748 }
0x1ba3   :  { %14666 = vpow2.f32 %v9580_v44 }
0x1ba4   :  { %v10375_v22 = vmul.f32 1.442695, %v10371_v31 }
0x1ba5   :  { %v10369_v8 = vpop.xlane.xlu0 %10368 }
0x1ba6   :  { %14668 = vpow2.f32 %v10375_v22  ;;  %v10372_v24 = vsub.f32 %v18200_v50, %v10369_v8  ;;  %v9578_v50 = vsub.f32 %v18091_v49, %v18228_v51  ;;  %v8886_v18 = vpop.xlane.xlu1 %8885 }
0x1ba7   :  { %14670 = vpow2.f32 %v9584_v26 }
0x1ba8   :  { %v18282_v25 = vpop.eup %14662  ;;  %v10377_v13 = vmul.f32 1.442695, %v10372_v24  ;;  %v9582_v7 = vmul.f32 1.442695, %v9578_v50  ;;  %v11743_v24 = vsel %vm8753_vm9, 1.0, %v14795_v1 }
0x1ba9   :  { %v10136_v5 = vsel %vm18944_vm8, %v18282_v25, 0.0  ;;  %v10612_v39 = vpop.xlane.xlu0 %10611  ;;  %vm8755_vm8 = vcmp.ne.f32.partialorder %v18320_v61, 0.0 }
0x1baa   :  { %10137 = vadd.xlane.f32.xlu0 %v10136_v5  ;;  %v10619_v10 = vsub.f32 %v18206_v42, %v10612_v39  ;;  %14672 = vpow2.f32 %v10377_v13  ;;  %v8889_v5 = vpop.xlane.xlu1 %8888 }
0x1bac   :  { %v18286_v4 = vpop.eup %14664  ;;  %v10622_v37 = vmul.f32 1.442695, %v10619_v10  ;;  %v18347_v10 = vsel %vm8752_vm13, 1.0, %v14795_v1 }
0x1bad   :  { %v18288_v34 = vpop.eup %14666  ;;  %v10379_v3 = vsel %vm1710_vm12, %v18286_v4, 0.0  ;;  %v10615_v52 = vpop.xlane.xlu0 %10614  ;;  %v9883_v58 = vrot.slane %v18347_v10, 7 }
0x1bae   :  { %10380 = vadd.xlane.f32.xlu0 %v10379_v3  ;;  %v9586_v36 = vsel %vm1710_vm12, %v18288_v34, 0.0  ;;  %v10620_v53 = vsub.f32 %v18212_v9, %v10615_v52  ;;  %14674 = vpow2.f32 %v10622_v37  ;;  %v9884_v37 = vrot.slane %v11743_v24, 7 }
0x1bb0   :  { %v18294_v35 = vpop.eup %14668  ;;  %9587 = vadd.xlane.f32.xlu1 %v9586_v36  ;;  %v10624_v6 = vmul.f32 1.442695, %v10620_v53  ;;  %v8737_v36 = vpop.xlane.xlu1 %8736  ;;  %v18358_v45 = vsel %vm438_vm3, %v9883_v58, %v9884_v37  ;;  %v11745_v58 = vsel %vm8755_vm8, 1.0, %v14795_v1 }
0x1bb1   :  { %v10382_v40 = vsel %vm1710_vm12, %v18294_v35, 0.0  ;;  %v18298_v16 = vpop.eup %14670  ;;  %v10618_v21 = vpop.xlane.xlu0 %10617  ;;  %vm8751_vm7 = vcmp.ne.f32.partialorder %v8737_v36, 0.0  ;;  %v9888_v61 = vrot.slane %v11745_v58, 7 }
0x1bb2   :  { %v9592_v33 = vsel %vm18945_vm11, %v18298_v16, 0.0  ;;  %v10621_v2 = vsub.f32 %v18218_v29, %v10618_v21  ;;  %14676 = vpow2.f32 %v10624_v6 }
0x1bb4   :  { %10383 = vadd.xlane.f32.xlu1 %v10382_v40  ;;  %v10626_v54 = vmul.f32 1.442695, %v10621_v2  ;;  %v18314_v44 = vpop.eup %14672  ;;  %v8892_v40 = vpop.xlane.xlu1 %8891  ;;  %v18355_v2 = vsel %vm8750_vm2, 1.0, %v14795_v1 }
0x1bb5   :  { %v10385_v42 = vsel %vm18946_vm5, %v18314_v44, 0.0 }
0x1bb6   :  { %14678 = vpow2.f32 %v10626_v54 }
0x1bb7   :  { %14680 = vpow2.f32 %v9582_v7 }
0x1bb8   :  { %9593 = vadd.xlane.f32.xlu1 %v9592_v33  ;;  %v18318_v9 = vpop.eup %14674  ;;  %v18336_v33 = vpop.xlane.xlu1 %9122  ;;  %14682 = vrcp.f32 %v8886_v18 }
0x1bb9   :  { %v10628_v29 = vsel %vm1710_vm12, %v18318_v9, 0.0 }
0x1bbc   :  { %v18324_v49 = vpop.eup %14676 }
0x1bbd   :  { %v10631_v51 = vsel %vm1710_vm12, %v18324_v49, 0.0 }
0x1bc0   :  { %v18328_v31 = vpop.eup %14678 }
0x1bc1   :  { %v10634_v22 = vsel %vm18947_vm10, %v18328_v31, 0.0  ;;  %v18332_v26 = vpop.eup %14680 }
0x1bc2   :  { %v9589_v3 = vsel %vm1710_vm12, %v18332_v26, 0.0  ;;  %v14683_v53 = vpop.eup %14682 }
0x1bc3   :  { %v8896_v15 = vmul.f32 %v14683_v53, %v18355_v2 }
0x1bc4   :  { %14216 = vrot.lane.b32.xlu0 %v17866_v62, %s14799_s18 }
0x1bc9   :  { %14221 = vrot.lane.b32.xlu1 %v17866_v62, %s14801_s20 }
0x1bcd   :  { %14231 = vrot.lane.b32.xlu1 %v17894_v48, %s14800_s19  ;;  %s11408_s19 = sld [smem:[%s18763_s0 + %s14840_s26]]  }
0x1be3   :  { %10386 = vadd.xlane.f32.xlu0 %v10385_v42  ;;  %v9886_v42 = vrot.slane %v11744_v60, 7 }
0x1be7   :  { %10629 = vadd.xlane.f32.xlu0 %v10628_v29 }
0x1be8   :  { %v18338_v39 = vpop.xlane.xlu1 %9125 }
0x1beb   :  { %10632 = vadd.xlane.f32.xlu0 %v10631_v51 }
0x1bef   :  { %10635 = vadd.xlane.f32.xlu0 %v10634_v22  ;;  %v18365_v22 = vsel %vm8751_vm7, 1.0, %v14795_v1 }
0x1bf3   :  { %9590 = vadd.xlane.f32.xlu0 %v9589_v3  ;;  %v8899_v3 = vmul.f32 %v18156_v63, %v8896_v15 }
0x1c04   :  { %v9869_v8 = vpop.xlane.xlu0 %9868 }
0x1c05   :  { %14684 = vrcp.f32 %v9869_v8  ;;  %v18371_v8 = vsel %vm438_vm3, %v9884_v37, %v9886_v42 }
0x1c06   :  { %14686 = vrcp.f32 %v8889_v5 }
0x1c07   :  { %14688 = vrcp.f32 %v8892_v40 }
0x1c08   :  { %v18342_v52 = vpop.xlane.xlu0 %9353  ;;  %v9872_v13 = vpop.xlane.xlu1 %9871 }
0x1c09   :  { %14226 = vrot.lane.b32.xlu0 %v17866_v62, %s14803_s22  ;;  %14690 = vrcp.f32 %v9872_v13 }
0x1c0c   :  { %v18350_v21 = vpop.xlane.xlu0 %9356  ;;  %v14212_v6 = vpop.permute.xlu1 %14211 }
0x1c0d   :  { %v14214_v62 = vunpack.i.h.bf16 %v14212_v6  ;;  %v14213_v50 = vunpack.i.l.bf16 %v14212_v6 }
0x1c0f   :  { %v14685_v54 = vpop.eup %14684  ;;  %v13807_v29 = vpack.c.bf16 %v14214_v62, %v14213_v50  ;;  %v18389_v62 = vsel %vm438_vm3, %v9886_v42, %v9888_v61 }
0x1c10   :  { %v14687_v7 = vpop.eup %14686  ;;  %v18361_v51 = vpop.xlane.xlu0 %9359  ;;  %v9893_v18 = vmul.f32 %v14685_v54, %v18358_v45 }
0x1c11   :  { %13808 = vmatpush3.bf16.msra.mxu1 %v13807_v29  ;;  %v14689_v5 = vpop.eup %14688  ;;  %v8897_v40 = vmul.f32 %v14687_v7, %v18365_v22 }
0x1c12   :  { %9898 = vperm.xlu1 %14029, %v9893_v18   ;;  %13813 = vmatprep.subr.bf16.mxu1 %v18809_v47  ;;  %v8898_v53 = vmul.f32 %v14689_v5, %v18347_v10 }
0x1c13   :  { %v14691_v36 = vpop.eup %14690  ;;  %v8900_v63 = vmul.f32 %v18161_v30, %v8897_v40 }
0x1c14   :  { %v9875_v24 = vpop.xlane.xlu0 %9874  ;;  %13274 = vmatmul.mubr.msk.f32.vlgmr.msra.gmra.mrb[184].mxu1 %vm1710_vm12, %v8899_v3  ;;  %v9894_v13 = vmul.f32 %v14691_v36, %v18371_v8  ;;  %v8901_v60 = vmul.f32 %v18168_v20, %v8898_v53 }
0x1c15   :  { %14692 = vrcp.f32 %v9875_v24  ;;  %13276 = vmatprep.mubr.msk.f32.mxu1 %vm14794_vm0, %v14795_v1 }
0x1c16   :  { %9903 = vperm.xlu1 %14029, %v9894_v13  }
0x1c18   :  { %v10132_v37 = vpop.xlane.xlu0 %10131  ;;  %13277 = vmatmul.mubr.msk.f32.gmra.mrb[186].mxu1 %vm1710_vm12, %v8900_v63 }
0x1c19   :  { %14694 = vrcp.f32 %v10132_v37  ;;  %13279 = vmatprep.mubr.msk.f32.mxu1 %vm14794_vm0, %v14795_v1 }
0x1c1c   :  { %v10135_v6 = vpop.xlane.xlu0 %10134  ;;  %13280 = vmatmul.mubr.msk.f32.gmra.mrb[188].mxu1 %vm1710_vm12, %v8901_v60 }
0x1c1d   :  { %14696 = vrcp.f32 %v10135_v6  ;;  %13299 = vmatprep.mubr.msk.f32.mxu1 %vm14794_vm0, %v14795_v1 }
0x1c1e   :  { %14698 = vrcp.f32 %v18275_v28 }
0x1c1f   :  { %v14693_v30 = vpop.eup %14692  ;;  %14700 = vrcp.f32 %v18336_v33 }
0x1c20   :  { %v9895_v50 = vmul.f32 %v14693_v30, %v18389_v62 }
0x1c22   :  { %9908 = vperm.xlu1 %14029, %v9895_v50  }
0x1c23   :  { %v14695_v54 = vpop.eup %14694 }
0x1c24   :  { %v10142_v15 = vmul.f32 %v14695_v54, %v18358_v45 }
0x1c26   :  { %10147 = vperm.xlu1 %14029, %v10142_v15  }
0x1c27   :  { %v14697_v7 = vpop.eup %14696 }
0x1c28   :  { %v10143_v20 = vmul.f32 %v14697_v7, %v18371_v8  ;;  %v14699_v18 = vpop.eup %14698 }
0x1c29   :  { %v14701_v24 = vpop.eup %14700  ;;  %v9130_v13 = vmul.f32 %v14699_v18, %v18355_v2 }
0x1c2a   :  { %14236 = vrot.lane.b32.xlu1 %v17894_v48, %s14799_s18  ;;  %10152 = vperm.xlu0 %14023, %v10143_v20   ;;  %s14833_s18 = smov 28  }
0x1c2b   :  { %v9133_v58 = vmul.f32 %v18172_v0, %v9130_v13  ;;  %s11403_s21 = sld [smem:[%s18763_s0 + %s14833_s18]]  }
0x1c37   :  { %v10138_v42 = vpop.xlane.xlu0 %10137 }
0x1c38   :  { %14702 = vrcp.f32 %v10138_v42 }
0x1c3b   :  { %v10381_v29 = vpop.xlane.xlu0 %10380 }
0x1c3c   :  { %14704 = vrcp.f32 %v10381_v29 }
0x1c3d   :  { %14706 = vrcp.f32 %v18338_v39  ;;  %v9588_v5 = vpop.xlane.xlu1 %9587  ;;  %v9131_v39 = vmul.f32 %v14701_v24, %v18365_v22 }
0x1c3e   :  { %14708 = vrcp.f32 %v18342_v52 }
0x1c3f   :  { %v14217_v3 = vpop.permute.xlu0 %14216  ;;  %v9134_v0 = vmul.f32 %v18180_v11, %v9131_v39 }
0x1c40   :  { %v14219_v40 = vunpack.i.h.bf16 %v14217_v3  ;;  %v14218_v36 = vunpack.i.l.bf16 %v14217_v3 }
0x1c41   :  { %v10384_v53 = vpop.xlane.xlu1 %10383 }
0x1c42   :  { %v14703_v63 = vpop.eup %14702  ;;  %v13814_v28 = vpack.c.bf16 %v14219_v40, %v14218_v36  ;;  %14710 = vrcp.f32 %v10384_v53 }
0x1c43   :  { %v10144_v33 = vmul.f32 %v14703_v63, %v18389_v62  ;;  %14712 = vrcp.f32 %v18350_v21 }
0x1c44   :  { %13815 = vmatpush3.bf16.msra.mxu1 %v13814_v28  ;;  %14714 = vrcp.f32 %v18361_v51 }
0x1c45   :  { %10157 = vperm.xlu0 %14023, %v10144_v33   ;;  %13820 = vmatprep.subr.bf16.mxu1 %v18809_v47  ;;  %v9594_v61 = vpop.xlane.xlu1 %9593 }
0x1c46   :  { %v14705_v37 = vpop.eup %14704 }
0x1c47   :  { %v14707_v60 = vpop.eup %14706  ;;  %13300 = vmatmul.mubr.msk.f32.vlgmr.msra.gmra.mrb[190].mxu1 %vm1710_vm12, %v9133_v58  ;;  %v10391_v52 = vmul.f32 %v14705_v37, %v18358_v45 }
0x1c48   :  { %13302 = vmatprep.mubr.msk.f32.mxu1 %vm14794_vm0, %v14795_v1  ;;  %v9132_v6 = vmul.f32 %v14707_v60, %v18347_v10  ;;  %v14709_v30 = vpop.eup %14708 }
0x1c49   :  { %10396 = vperm.xlu1 %14029, %v10391_v52   ;;  %v14222_v21 = vpop.permute.xlu1 %14221  ;;  %v9364_v51 = vmul.f32 %v14709_v30, %v18355_v2 }
0x1c4a   :  { %v14224_v50 = vunpack.i.h.bf16 %v14222_v21  ;;  %v14223_v54 = vunpack.i.l.bf16 %v14222_v21  ;;  %v9135_v20 = vmul.f32 %v18223_v19, %v9132_v6 }
0x1c4b   :  { %13303 = vmatmul.mubr.msk.f32.gmra.mrb[192].mxu1 %vm1710_vm12, %v9134_v0  ;;  %v9367_v29 = vmul.f32 %v18244_v27, %v9364_v51 }
0x1c4c   :  { %13305 = vmatprep.mubr.msk.f32.mxu1 %vm14794_vm0, %v14795_v1  ;;  %v14711_v15 = vpop.eup %14710  ;;  %v13821_v7 = vpack.c.bf16 %v14224_v50, %v14223_v54 }
0x1c4d   :  { %14241 = vrot.lane.b32.xlu1 %v17894_v48, %s14801_s20  ;;  %v10392_v11 = vmul.f32 %v14711_v15, %v18371_v8  ;;  %v14713_v42 = vpop.eup %14712  ;;  %v14232_v37 = vpop.permute.xlu1 %14231  ;;  %s14841_s20 = smov 34  }
0x1c4e   :  { %13822 = vmatpush3.bf16.msra.mxu1 %v13821_v7  ;;  %v9365_v18 = vmul.f32 %v14713_v42, %v18365_v22  ;;  %v14715_v3 = vpop.eup %14714  ;;  %v14234_v6 = vunpack.i.h.bf16 %v14232_v37  ;;  %v14233_v30 = vunpack.i.l.bf16 %v14232_v37  ;;  %s18729_s23 = sld [smem:[%s18763_s0 + %s14841_s20]]  }
0x1c4f   :  { %10401 = vperm.xlu0 %14023, %v10392_v11   ;;  %13306 = vmatmul.mubr.msk.f32.gmra.mrb[194].mxu1 %vm1710_vm12, %v9135_v20  ;;  %v9366_v40 = vmul.f32 %v14715_v3, %v18347_v10 }
0x1c50   :  { %13325 = vmatprep.mubr.msk.f32.mxu1 %vm14794_vm0, %v14795_v1  ;;  %13827 = vmatprep.subr.bf16.mxu1 %v18809_v47  ;;  %v9368_v19 = vmul.f32 %v18250_v23, %v9365_v18  ;;  %v13835_v7 = vpack.c.bf16 %v14234_v6, %v14233_v30 }
0x1c51   :  { %v9369_v36 = vmul.f32 %v18257_v43, %v9366_v40 }
0x1c53   :  { %13326 = vmatmul.mubr.msk.f32.vlgmr.msra.gmra.mrb[196].mxu1 %vm1710_vm12, %v9367_v29 }
0x1c54   :  { %13328 = vmatprep.mubr.msk.f32.mxu1 %vm14794_vm0, %v14795_v1 }
0x1c57   :  { %13329 = vmatmul.mubr.msk.f32.gmra.mrb[198].mxu1 %vm1710_vm12, %v9368_v19 }
0x1c58   :  { %13331 = vmatprep.mubr.msk.f32.mxu1 %vm14794_vm0, %v14795_v1 }
0x1c5b   :  { %13332 = vmatmul.mubr.msk.f32.gmra.mrb[200].mxu1 %vm1710_vm12, %v9369_v36 }
0x1c5c   :  { %13351 = vmatprep.mubr.msk.f32.mxu1 %vm14794_vm0, %v14795_v1 }
0x1c70   :  { %v10387_v27 = vpop.xlane.xlu0 %10386 }
0x1c71   :  { %14716 = vrcp.f32 %v10387_v27 }
0x1c74   :  { %v10630_v24 = vpop.xlane.xlu0 %10629 }
0x1c75   :  { %14718 = vrcp.f32 %v10630_v24 }
0x1c76   :  { %14720 = vrcp.f32 %v9588_v5 }
0x1c78   :  { %v10633_v23 = vpop.xlane.xlu0 %10632 }
0x1c79   :  { %14722 = vrcp.f32 %v10633_v23 }
0x1c7b   :  { %v14717_v13 = vpop.eup %14716 }
0x1c7c   :  { %v10636_v63 = vpop.xlane.xlu0 %10635  ;;  %v10393_v28 = vmul.f32 %v14717_v13, %v18389_v62 }
0x1c7d   :  { %14724 = vrcp.f32 %v10636_v63 }
0x1c7e   :  { %10406 = vperm.xlu0 %14023, %v10393_v28   ;;  %14726 = vrcp.f32 %v9594_v61 }
0x1c7f   :  { %v14719_v53 = vpop.eup %14718 }
0x1c80   :  { %v9591_v43 = vpop.xlane.xlu0 %9590  ;;  %v10640_v33 = vmul.f32 %v14719_v53, %v18358_v45  ;;  %v14721_v58 = vpop.eup %14720 }
0x1c81   :  { %14728 = vrcp.f32 %v9591_v43  ;;  %v9598_v21 = vmul.f32 %v14721_v58, %v18355_v2 }
0x1c82   :  { %10645 = vperm.xlu1 %14029, %v10640_v33  }
0x1c83   :  { %v14723_v39 = vpop.eup %14722  ;;  %v9601_v15 = vmul.f32 %v18288_v34, %v9598_v21 }
0x1c84   :  { %v14227_v60 = vpop.permute.xlu0 %14226  ;;  %v10641_v5 = vmul.f32 %v14723_v39, %v18371_v8 }
0x1c85   :  { %v14229_v52 = vunpack.i.h.bf16 %v14227_v60  ;;  %v14228_v0 = vunpack.i.l.bf16 %v14227_v60 }
0x1c86   :  { %14246 = vrot.lane.b32.xlu1 %v17894_v48, %s14803_s22  ;;  %10650 = vperm.xlu0 %14023, %v10641_v5   ;;  %s14834_s22 = smov 30  }
0x1c87   :  { %v14725_v61 = vpop.eup %14724  ;;  %v13828_v45 = vpack.c.bf16 %v14229_v52, %v14228_v0 }
0x1c88   :  { %v10642_v50 = vmul.f32 %v14725_v61, %v18389_v62  ;;  %v14727_v54 = vpop.eup %14726 }
0x1c89   :  { %13829 = vmatpush3.bf16.msra.mxu1 %v13828_v45  ;;  %v9600_v62 = vmul.f32 %v14727_v54, %v18347_v10 }
0x1c8a   :  { %10655 = vperm.xlu0 %14023, %v10642_v50   ;;  %13834 = vmatprep.subr.bf16.mxu1 %v18809_v47 }
0x1c8b   :  { %v14729_v8 = vpop.eup %14728  ;;  %v9603_v51 = vmul.f32 %v18298_v16, %v9600_v62 }
0x1c8c   :  { %13352 = vmatmul.mubr.msk.f32.vlgmr.msra.gmra.mrb[202].mxu1 %vm1710_vm12, %v9601_v15  ;;  %v9599_v48 = vmul.f32 %v14729_v8, %v18365_v22 }
0x1c8d   :  { %13836 = vmatpush3.bf16.msra.mxu1 %v13835_v7  ;;  %13354 = vmatprep.mubr.msk.f32.mxu1 %vm14794_vm0, %v14795_v1 }
0x1c8e   :  { %v9602_v2 = vmul.f32 %v18332_v26, %v9599_v48  ;;  %13841 = vmatprep.subr.bf16.mxu1 %v18809_v47 }
0x1c90   :  { %13355 = vmatmul.mubr.msk.f32.gmra.mrb[204].mxu1 %vm1710_vm12, %v9602_v2 }
0x1c91   :  { %v9899_v34 = vpop.permute.xlu1 %9898  ;;  %13357 = vmatprep.mubr.msk.f32.mxu1 %vm14794_vm0, %v14795_v1 }
0x1c92   :  { %v9911_v22 = vmul.f32 %v18237_v56, %v9899_v34 }
0x1c94   :  { %13358 = vmatmul.mubr.msk.f32.gmra.mrb[206].mxu1 %vm1710_vm12, %v9603_v51 }
0x1c95   :  { %13377 = vmatprep.mubr.msk.f32.mxu1 %vm14794_vm0, %v14795_v1  ;;  %v9904_v26 = vpop.permute.xlu1 %9903 }
0x1c96   :  { %v9912_v10 = vmul.f32 %v18246_v17, %v9904_v26 }
0x1c98   :  { %13378 = vmatmul.mubr.msk.f32.vlgmr.msra.gmra.mrb[208].mxu1 %vm1710_vm12, %v9911_v22 }
0x1c99   :  { %13380 = vmatprep.mubr.msk.f32.mxu1 %vm14794_vm0, %v14795_v1 }
0x1c9c   :  { %13381 = vmatmul.mubr.msk.f32.gmra.mrb[210].mxu1 %vm1710_vm12, %v9912_v10 }
0x1c9d   :  { %13383 = vmatprep.mubr.msk.f32.mxu1 %vm14794_vm0, %v14795_v1 }
0x1ca1   :  { %v9909_v16 = vpop.permute.xlu1 %9908 }
0x1ca2   :  { %v9913_v11 = vmul.f32 %v18261_v32, %v9909_v16 }
0x1ca4   :  { %13384 = vmatmul.mubr.msk.f32.gmra.mrb[212].mxu1 %vm1710_vm12, %v9913_v11 }
0x1ca5   :  { %v10148_v20 = vpop.permute.xlu1 %10147  ;;  %13403 = vmatprep.mubr.msk.f32.mxu1 %vm14794_vm0, %v14795_v1 }
0x1ca6   :  { %v10160_v17 = vmul.f32 %v18265_v41, %v10148_v20 }
0x1ca9   :  { %v14237_v56 = vpop.permute.xlu1 %14236  ;;  %v10153_v3 = vpop.permute.xlu0 %10152 }
0x1caa   :  { %v14239_v42 = vunpack.i.h.bf16 %v14237_v56  ;;  %v14238_v29 = vunpack.i.l.bf16 %v14237_v56  ;;  %v10161_v32 = vmul.f32 %v18269_v55, %v10153_v3 }
0x1cac   :  { %v13842_v18 = vpack.c.bf16 %v14239_v42, %v14238_v29 }
0x1cae   :  { %13843 = vmatpush3.bf16.msra.mxu1 %v13842_v18 }
0x1caf   :  { %13848 = vmatprep.subr.bf16.mxu1 %v18809_v47 }
0x1cb1   :  { %13404 = vmatmul.mubr.msk.f32.vlgmr.msra.gmra.mrb[214].mxu1 %vm1710_vm12, %v10160_v17 }
0x1cb2   :  { %13406 = vmatprep.mubr.msk.f32.mxu1 %vm14794_vm0, %v14795_v1 }
0x1cb5   :  { %13407 = vmatmul.mubr.msk.f32.gmra.mrb[216].mxu1 %vm1710_vm12, %v10161_v32 }
0x1cb6   :  { %13409 = vmatprep.mubr.msk.f32.mxu1 %vm14794_vm0, %v14795_v1 }
0x1cc4   :  { %v10158_v19 = vpop.permute.xlu0 %10157 }
0x1cc5   :  { %v10162_v40 = vmul.f32 %v18282_v25, %v10158_v19 }
0x1cc7   :  { %13410 = vmatmul.mubr.msk.f32.gmra.mrb[218].mxu1 %vm1710_vm12, %v10162_v40 }
0x1cc8   :  { %v10397_v41 = vpop.permute.xlu1 %10396  ;;  %13429 = vmatprep.mubr.msk.f32.mxu1 %vm14794_vm0, %v14795_v1 }
0x1cc9   :  { %v10409_v55 = vmul.f32 %v18286_v4, %v10397_v41 }
0x1ccc   :  { %v14242_v36 = vpop.permute.xlu1 %14241 }
0x1ccd   :  { %v14244_v27 = vunpack.i.h.bf16 %v14242_v36  ;;  %v14243_v24 = vunpack.i.l.bf16 %v14242_v36 }
0x1cce   :  { %v10402_v13 = vpop.permute.xlu0 %10401 }
0x1ccf   :  { %v13849_v23 = vpack.c.bf16 %v14244_v27, %v14243_v24  ;;  %v10410_v25 = vmul.f32 %v18294_v35, %v10402_v13 }
0x1cd1   :  { %13850 = vmatpush3.bf16.msra.mxu1 %v13849_v23 }
0x1cd2   :  { %13855 = vmatprep.subr.bf16.mxu1 %v18809_v47 }
0x1cd4   :  { %13430 = vmatmul.mubr.msk.f32.vlgmr.msra.gmra.mrb[220].mxu1 %vm1710_vm12, %v10409_v55 }
0x1cd5   :  { %13432 = vmatprep.mubr.msk.f32.mxu1 %vm14794_vm0, %v14795_v1 }
0x1cd8   :  { %13433 = vmatmul.mubr.msk.f32.gmra.mrb[222].mxu1 %vm1710_vm12, %v10410_v25 }
0x1cd9   :  { %13435 = vmatprep.mubr.msk.f32.mxu1 %vm14794_vm0, %v14795_v1 }
0x1ce7   :  { %v18496_v63 = vpop.f32.mrb[184].mxu1 }
0x1ce8   :  { %v13275_v28 = vpop.f32.mrb[185].mxu1 }
0x1ceb   :  { %v18498_v53 = vpop.f32.mrb[186].mxu1 }
0x1cec   :  { %v13278_v4 = vpop.f32.mrb[187].mxu1 }
0x1cef   :  { %v18500_v47 = vpop.f32.mrb[188].mxu1 }
0x1cf0   :  { %v13281_v43 = vpop.f32.mrb[189].mxu1 }
0x1cfd   :  { %v10407_v33 = vpop.permute.xlu0 %10406 }
0x1cfe   :  { %v10411_v58 = vmul.f32 %v18314_v44, %v10407_v33 }
0x1d00   :  { %13436 = vmatmul.mubr.msk.f32.gmra.mrb[224].mxu1 %vm1710_vm12, %v10411_v58 }
0x1d01   :  { %v10646_v35 = vpop.permute.xlu1 %10645  ;;  %13455 = vmatprep.mubr.msk.f32.mxu1 %vm14794_vm0, %v14795_v1 }
0x1d02   :  { %v10658_v0 = vmul.f32 %v18318_v9, %v10646_v35 }
0x1d05   :  { %v14247_v39 = vpop.permute.xlu1 %14246  ;;  %v10651_v52 = vpop.permute.xlu0 %10650 }
0x1d06   :  { %v14249_v37 = vunpack.i.h.bf16 %v14247_v39  ;;  %v14248_v60 = vunpack.i.l.bf16 %v14247_v39  ;;  %v10659_v44 = vmul.f32 %v18324_v49, %v10651_v52 }
0x1d08   :  { %v13856_v5 = vpack.c.bf16 %v14249_v37, %v14248_v60 }
0x1d09   :  { %v10656_v21 = vpop.permute.xlu0 %10655 }
0x1d0a   :  { %13857 = vmatpush3.bf16.msra.mxu1 %v13856_v5  ;;  %v10660_v61 = vmul.f32 %v18328_v31, %v10656_v21 }
0x1d0d   :  { %13456 = vmatmul.mubr.msk.f32.vlgmr.msra.gmra.mrb[226].mxu1 %vm1710_vm12, %v10658_v0 }
0x1d0e   :  { %13458 = vmatprep.mubr.msk.f32.mxu1 %vm14794_vm0, %v14795_v1 }
0x1d11   :  { %13459 = vmatmul.mubr.msk.f32.gmra.mrb[228].mxu1 %vm1710_vm12, %v10659_v44 }
0x1d12   :  { %13461 = vmatprep.mubr.msk.f32.mxu1 %vm14794_vm0, %v14795_v1  ;;  %vm18948_vm0 = vcmask 1046528  }
0x1d13   :  { %vm18949_vm3 = vmmov %vm18948_vm0 }
0x1d14   :  { %vm18950_vm11 = vmmov %vm18948_vm0 }
0x1d15   :  { %13462 = vmatmul.mubr.msk.f32.gmra.mrb[230].mxu1 %vm1710_vm12, %v10660_v61 }
0x1d1a   :  { %v9217_v6 = vpop.f32.mrb[190].mxu1 }
0x1d1b   :  { %9702 = vrot.lane.b32.xlu1 %v9217_v6, %s14811_s29  ;;  %v13301_v9 = vpop.f32.mrb[191].mxu1 }
0x1d1e   :  { %v9222_v30 = vpop.f32.mrb[192].mxu1 }
0x1d1f   :  { %9704 = vrot.lane.b32.xlu0 %v9222_v30, %s14811_s29  ;;  %v13304_v45 = vpop.f32.mrb[193].mxu1 }
0x1d22   :  { %v9227_v50 = vpop.f32.mrb[194].mxu1 }
0x1d23   :  { %9706 = vrot.lane.b32.xlu1 %v9227_v50, %s14811_s29  ;;  %v13307_v49 = vpop.f32.mrb[195].mxu1 }
0x1d26   :  { %v9451_v54 = vpop.f32.mrb[196].mxu1 }
0x1d27   :  { %9714 = vrot.lane.b32.xlu1 %v9451_v54, %s14812_s30  ;;  %v13327_v1 = vpop.f32.mrb[197].mxu1 }
0x1d2a   :  { %v9456_v15 = vpop.f32.mrb[198].mxu1 }
0x1d2b   :  { %9716 = vrot.lane.b32.xlu1 %v9456_v15, %s14812_s30  ;;  %v13330_v31 = vpop.f32.mrb[199].mxu1 }
0x1d2e   :  { %v9461_v8 = vpop.f32.mrb[200].mxu1 }
0x1d2f   :  { %9718 = vrot.lane.b32.xlu1 %v9461_v8, %s14812_s30  ;;  %v13333_v7 = vpop.f32.mrb[201].mxu1 }
0x1d5f   :  { %v9685_v48 = vpop.f32.mrb[202].mxu1 }
0x1d60   :  { %9726 = vrot.lane.b32.xlu0 %v9685_v48, %s14813_s1  ;;  %v13353_v2 = vpop.f32.mrb[203].mxu1 }
0x1d63   :  { %v9690_v62 = vpop.f32.mrb[204].mxu1 }
0x1d64   :  { %9728 = vrot.lane.b32.xlu0 %v9690_v62, %s14813_s1  ;;  %v13356_v34 = vpop.f32.mrb[205].mxu1 }
0x1d67   :  { %v9695_v51 = vpop.f32.mrb[206].mxu1 }
0x1d68   :  { %9730 = vrot.lane.b32.xlu1 %v9695_v51, %s14813_s1  ;;  %v13359_v22 = vpop.f32.mrb[207].mxu1 }
0x1d6b   :  { %v9995_v26 = vpop.f32.mrb[208].mxu1 }
0x1d6c   :  { %v13379_v10 = vpop.f32.mrb[209].mxu1 }
0x1d6f   :  { %v18525_v16 = vpop.f32.mrb[210].mxu1 }
0x1d70   :  { %v13382_v11 = vpop.f32.mrb[211].mxu1 }
0x1d77   :  { %v18527_v20 = vpop.f32.mrb[212].mxu1 }
0x1d78   :  { %v13385_v56 = vpop.f32.mrb[213].mxu1 }
0x1d84   :  { %v10244_v42 = vpop.f32.mrb[214].mxu1 }
0x1d85   :  { %10759 = vrot.lane.b32.xlu0 %v10244_v42, %s14811_s29  ;;  %v13405_v29 = vpop.f32.mrb[215].mxu1 }
0x1d88   :  { %v10249_v18 = vpop.f32.mrb[216].mxu1 }
0x1d89   :  { %10761 = vrot.lane.b32.xlu1 %v10249_v18, %s14811_s29  ;;  %v13408_v17 = vpop.f32.mrb[217].mxu1 }
0x1d8d   :  { %v9703_v3 = vpop.permute.xlu1 %9702 }
0x1d8e   :  { %v9735_v37 = vsel %vm708_vm4, %v18496_v63, %v9703_v3 }
0x1d91   :  { %v9705_v33 = vpop.permute.xlu0 %9704 }
0x1d92   :  { %v9736_v61 = vsel %vm708_vm4, %v18498_v53, %v9705_v33  ;;  %v10968_v33 = vld [vmem:[%s11403_s21 + $0x10] sm:$0xff] }
0x1d95   :  { %v9707_v32 = vpop.permute.xlu1 %9706 }
0x1d96   :  { %v9737_v19 = vsel %vm708_vm4, %v18500_v47, %v9707_v32 }
0x1d99   :  { %v9715_v35 = vpop.permute.xlu1 %9714 }
0x1d9a   :  { %v10254_v40 = vpop.f32.mrb[218].mxu1  ;;  %v9738_v60 = vsel %vm1710_vm12, %v9735_v37, %v9715_v35  ;;  %v10969_v35 = vld [vmem:[%s11403_s21 + $0x18] sm:$0xff] }
0x1d9b   :  { %10763 = vrot.lane.b32.xlu0 %v10254_v40, %s14811_s29  ;;  %v13411_v41 = vpop.f32.mrb[219].mxu1  ;;  %s18612_s29 = sld [smem:[%s18763_s0 + %s14834_s22]]  }
0x1d9d   :  { %v9717_v44 = vpop.permute.xlu1 %9716 }
0x1d9e   :  { %v9739_v6 = vsel %vm1710_vm12, %v9736_v61, %v9717_v44 }
0x1da1   :  { %v9719_v50 = vpop.permute.xlu1 %9718 }
0x1da2   :  { %v9740_v48 = vsel %vm1710_vm12, %v9737_v19, %v9719_v50 }
0x1da7   :  { %v10493_v36 = vpop.f32.mrb[220].mxu1 }
0x1da8   :  { %10771 = vrot.lane.b32.xlu0 %v10493_v36, %s14812_s30  ;;  %v13431_v27 = vpop.f32.mrb[221].mxu1 }
0x1dab   :  { %v10498_v24 = vpop.f32.mrb[222].mxu1 }
0x1dac   :  { %10773 = vrot.lane.b32.xlu1 %v10498_v24, %s14812_s30  ;;  %v13434_v23 = vpop.f32.mrb[223].mxu1 }
0x1dd2   :  { %v9727_v39 = vpop.permute.xlu0 %9726 }
0x1dd3   :  { %v10503_v55 = vpop.f32.mrb[224].mxu1  ;;  %v9741_v5 = vsel %vm1714_vm15, %v9738_v60, %v9727_v39  ;;  %v13862_v39 = vpack.c.bf16 %v10969_v35, %v10968_v33  ;;  %v11109_v35 = vld [vmem:[%s18612_s29 + $0x68] sm:$0xff] }
0x1dd4   :  { %10775 = vrot.lane.b32.xlu1 %v10503_v55, %s14812_s30  ;;  %v13437_v13 = vpop.f32.mrb[225].mxu1  ;;  %v10814_v52 = vadd.f32 %v9741_v5, %v17843_v12  ;;  %s14835_s30 = smov 26  }
0x1dd5   :  { %s11401_s4 = sld [smem:[%s18763_s0 + %s14835_s30]]  }
0x1dd6   :  { %v10822_v0 = vsel %vm161_vm1, %v10814_v52, 0.0  ;;  %v9729_v21 = vpop.permute.xlu0 %9728 }
0x1dd7   :  { %v9742_v9 = vsel %vm1714_vm15, %v9739_v6, %v9729_v21 }
0x1dd8   :  { %v10815_v63 = vadd.f32 %v9742_v9, %v17850_v57 }
0x1dda   :  { %v10825_v30 = vsel %vm161_vm1, %v10815_v63, 0.0  ;;  %v9731_v49 = vpop.permute.xlu1 %9730 }
0x1ddb   :  { %v9743_v2 = vsel %vm1714_vm15, %v9740_v48, %v9731_v49 }
0x1de0   :  { %v10742_v25 = vpop.f32.mrb[226].mxu1 }
0x1de1   :  { %10783 = vrot.lane.b32.xlu0 %v10742_v25, %s14813_s1  ;;  %v13457_v28 = vpop.f32.mrb[227].mxu1 }
0x1de4   :  { %v10747_v4 = vpop.f32.mrb[228].mxu1 }
0x1de5   :  { %10785 = vrot.lane.b32.xlu0 %v10747_v4, %s14813_s1  ;;  %v13460_v47 = vpop.f32.mrb[229].mxu1 }
0x1de6   :  { %v10966_v47 = vld [vmem:[%s11403_s21] sm:$0xff] }
0x1de8   :  { %v10752_v43 = vpop.f32.mrb[230].mxu1 }
0x1de9   :  { %10787 = vrot.lane.b32.xlu0 %v10752_v43, %s14813_s1  ;;  %v13463_v58 = vpop.f32.mrb[231].mxu1  ;;  %v10967_v43 = vld [vmem:[%s11403_s21 + $0x8] sm:$0xff] }
0x1dea   :  { %v13858_v58 = vpack.c.bf16 %v10967_v43, %v10966_v47  ;;  %v11106_v47 = vld [vmem:[%s18612_s29 + $0x50] sm:$0xff]  ;;  %v11107_v43 = vld [vmem:[%s18612_s29 + $0x58] sm:$0xff] }
0x1deb   :  { %v13886_v33 = vpack.c.bf16 %v11107_v43, %v11106_v47 }
0x1dec   :  { %13859 = vmatprep.subr.bf16.mxu0 %v13858_v58 }
0x1ded   :  { %13861 = vmatpush3.bf16.msra.mxu0 %v13858_v58  ;;  %v11108_v58 = vld [vmem:[%s18612_s29 + $0x60] sm:$0xff] }
0x1dee   :  { %13863 = vmatprep.subr.bf16.mxu0 %v13862_v39 }
0x1df1   :  { %13865 = vmatpush3.bf16.msra.mxu0 %v13862_v39  ;;  %v13890_v39 = vpack.c.bf16 %v11109_v35, %v11108_v58 }
0x1df7   :  { %v10760_v45 = vpop.permute.xlu0 %10759 }
0x1df8   :  { %10823 = vadd.xlane.f32.xlu1 %v10822_v0  ;;  %v10792_v15 = vsel %vm708_vm4, %v9995_v26, %v10760_v45 }
0x1dfb   :  { %v10762_v1 = vpop.permute.xlu1 %10761 }
0x1dfc   :  { %v10793_v62 = vsel %vm708_vm4, %v18525_v16, %v10762_v1 }
0x1e08   :  { %10826 = vadd.xlane.f32.xlu0 %v10825_v30 }
0x1e0d   :  { %v10764_v12 = vpop.permute.xlu0 %10763 }
0x1e0e   :  { %v10794_v42 = vsel %vm708_vm4, %v18527_v20, %v10764_v12 }
0x1e1a   :  { %v10772_v54 = vpop.permute.xlu0 %10771 }
0x1e1b   :  { %v10795_v31 = vsel %vm1710_vm12, %v10792_v15, %v10772_v54 }
0x1e1e   :  { %v10774_v8 = vpop.permute.xlu1 %10773 }
0x1e1f   :  { %v10796_v34 = vsel %vm1710_vm12, %v10793_v62, %v10774_v8 }
0x1e46   :  { %v10776_v26 = vpop.permute.xlu1 %10775 }
0x1e47   :  { %v10797_v18 = vsel %vm1710_vm12, %v10794_v42, %v10776_v26  ;;  %v11096_v26 = vld [vmem:[%s18612_s29] sm:$0xff]  ;;  %v11099_v42 = vld [vmem:[%s18612_s29 + $0x18] sm:$0xff] }
0x1e53   :  { %v10784_v53 = vpop.permute.xlu0 %10783 }
0x1e54   :  { %v10798_v7 = vsel %vm1714_vm15, %v10795_v31, %v10784_v53 }
0x1e55   :  { %v10804_v57 = vrot.slane %v10798_v7, 1 }
0x1e57   :  { %v10786_v51 = vpop.permute.xlu0 %10785  ;;  %v10813_v22 = vsel %vm18948_vm0, %v9743_v2, %v10804_v57 }
0x1e58   :  { %v10799_v10 = vsel %vm1714_vm15, %v10796_v34, %v10786_v51  ;;  %v10816_v11 = vadd.f32 %v10813_v22, %v17857_v59 }
0x1e59   :  { %v10805_v56 = vrot.slane %v10799_v10, 1  ;;  %v11097_v10 = vld [vmem:[%s18612_s29 + $0x8] sm:$0xff] }
0x1e5a   :  { %v10828_v29 = vsel %vm161_vm1, %v10816_v11, 0.0 }
0x1e5b   :  { %10829 = vadd.xlane.f32.xlu0 %v10828_v29  ;;  %v10788_v16 = vpop.permute.xlu0 %10787  ;;  %v10806_v17 = vsel %vm18949_vm3, %v10804_v57, %v10805_v56 }
0x1e5c   :  { %v10800_v3 = vsel %vm1714_vm15, %v10797_v18, %v10788_v16  ;;  %v10817_v32 = vadd.f32 %v10806_v17, %v17869_v14  ;;  %v11100_v18 = vld [vmem:[%s18612_s29 + $0x20] sm:$0xff]  ;;  %v11101_v16 = vld [vmem:[%s18612_s29 + $0x28] sm:$0xff] }
0x1e5d   :  { %v10807_v19 = vrot.slane %v10800_v3, 1  ;;  %v18626_v17 = vld [vmem:[%s11401_s4] ss:$0 sm:$0xff]  ;;  %v13874_v3 = vpack.c.bf16 %v11101_v16, %v11100_v18 }
0x1e5e   :  { %v10831_v40 = vsel %vm161_vm1, %v10817_v32, 0.0 }
0x1e5f   :  { %10832 = vadd.xlane.f32.xlu1 %v10831_v40  ;;  %v10819_v59 = vadd.f32 %v10807_v19, %v17886_v46  ;;  %v10808_v20 = vsel %vm18950_vm11, %v10805_v56, %v10807_v19  ;;  %v13866_v56 = vpack.c.bf16 %v11097_v10, %v11096_v26  ;;  %v11102_v40 = vld [vmem:[%s18612_s29 + $0x30] sm:$0xff] }
0x1e60   :  { %v10818_v41 = vadd.f32 %v10808_v20, %v17883_v38 }
0x1e61   :  { %v10837_v36 = vsel %vm674_vm6, %v10819_v59, 0.0  ;;  %13867 = vmatprep.subr.bf16.mxu1 %v13866_v56 }
0x1e62   :  { %v10834_v27 = vsel %vm161_vm1, %v10818_v41, 0.0  ;;  %13869 = vmatpush3.bf16.msra.mxu1 %v13866_v56 }
0x1e63   :  { %10838 = vadd.xlane.f32.xlu1 %v10837_v36  ;;  %10835 = vadd.xlane.f32.xlu0 %v10834_v27  ;;  %v18632_v36 = vld [vmem:[%s11402_s8] ss:$0 sm:$0xff] }
0x1e85   :  { %v10824_v24 = vpop.xlane.xlu1 %10823 }
0x1e86   :  { %v10840_v23 = vmul.f32 0.03125, %v10824_v24 }
0x1e88   :  { %v18576_v55 = vsub.f32 %v10814_v52, %v10840_v23 }
0x1e8a   :  { %v10852_v14 = vmul.f32 %v18576_v55, %v18576_v55  ;;  %v10930_v19 = vmul.f32 %v18626_v17, %v18576_v55 }
0x1e8c   :  { %v10858_v13 = vsel %vm161_vm1, %v10852_v14, 0.0 }
0x1e8d   :  { %10859 = vadd.xlane.f32.xlu0 %v10858_v13 }
0x1e95   :  { %v10827_v46 = vpop.xlane.xlu0 %10826 }
0x1e96   :  { %v10841_v25 = vmul.f32 0.03125, %v10827_v46  ;;  %v11104_v46 = vld [vmem:[%s18612_s29 + $0x40] sm:$0xff] }
0x1e98   :  { %v18581_v28 = vsub.f32 %v10815_v63, %v10841_v25  ;;  %v11105_v25 = vld [vmem:[%s18612_s29 + $0x48] sm:$0xff] }
0x1e9a   :  { %v10853_v38 = vmul.f32 %v18581_v28, %v18581_v28 }
0x1e9c   :  { %v10861_v4 = vsel %vm161_vm1, %v10853_v38, 0.0 }
0x1e9d   :  { %10862 = vadd.xlane.f32.xlu1 %v10861_v4  ;;  %v13882_v4 = vpack.c.bf16 %v11105_v25, %v11104_v46 }
0x1ee8   :  { %v10830_v37 = vpop.xlane.xlu0 %10829 }
0x1ee9   :  { %v10842_v60 = vmul.f32 0.03125, %v10830_v37  ;;  %v10931_v37 = vmul.f32 %v18626_v17, %v18581_v28 }
0x1eeb   :  { %v18589_v5 = vsub.f32 %v10816_v11, %v10842_v60  ;;  %v11098_v11 = vld [vmem:[%s18612_s29 + $0x10] sm:$0xff] }
0x1eec   :  { %v10833_v52 = vpop.xlane.xlu1 %10832  ;;  %v13870_v29 = vpack.c.bf16 %v11099_v42, %v11098_v11 }
0x1eed   :  { %v10843_v0 = vmul.f32 0.03125, %v10833_v52  ;;  %v10854_v44 = vmul.f32 %v18589_v5, %v18589_v5 }
0x1eee   :  { %13871 = vmatprep.subr.bf16.mxu1 %v13870_v29 }
0x1eef   :  { %v18593_v21 = vsub.f32 %v10817_v32, %v10843_v0  ;;  %v10864_v61 = vsel %vm161_vm1, %v10854_v44, 0.0  ;;  %13873 = vmatpush3.bf16.msra.mxu1 %v13870_v29 }
0x1ef0   :  { %v10839_v6 = vpop.xlane.xlu1 %10838  ;;  %10865 = vadd.xlane.f32.xlu0 %v10864_v61  ;;  %v10836_v9 = vpop.xlane.xlu0 %10835  ;;  %13875 = vmatprep.subr.bf16.mxu1 %v13874_v3 }
0x1ef1   :  { %v10845_v63 = vmul.f32 0.03125, %v10839_v6  ;;  %v10844_v30 = vmul.f32 0.03125, %v10836_v9  ;;  %v10855_v45 = vmul.f32 %v18593_v21, %v18593_v21 }
0x1ef3   :  { %v18598_v50 = vsub.f32 %v10819_v59, %v10845_v63  ;;  %v18600_v12 = vsub.f32 %v10818_v41, %v10844_v30  ;;  %v10867_v49 = vsel %vm161_vm1, %v10855_v45, 0.0  ;;  %v11103_v59 = vld [vmem:[%s18612_s29 + $0x38] sm:$0xff]  ;;  %13877 = vmatpush3.bf16.msra.mxu1 %v13874_v3 }
0x1ef4   :  { %10868 = vadd.xlane.f32.xlu1 %v10867_v49  ;;  %v13878_v14 = vpack.c.bf16 %v11103_v59, %v11102_v40  ;;  %v10933_v59 = vmul.f32 %v18626_v17, %v18593_v21 }
0x1ef5   :  { %v10857_v54 = vmul.f32 %v18598_v50, %v18598_v50  ;;  %v10856_v1 = vmul.f32 %v18600_v12, %v18600_v12  ;;  %v10934_v46 = vmul.f32 %v18626_v17, %v18600_v12  ;;  %v11812_v12 = vld [vmem:[%s11404_s12] ss:$0 sm:$0xff] }
0x1ef6   :  { %13879 = vmatprep.subr.bf16.mxu1 %v13878_v14 }
0x1ef7   :  { %v10873_v15 = vsel %vm674_vm6, %v10857_v54, 0.0  ;;  %v10870_v31 = vsel %vm161_vm1, %v10856_v1, 0.0  ;;  %13881 = vmatpush3.bf16.msra.mxu1 %v13878_v14  ;;  %v11111_v14 = vld [vmem:[%s18612_s29 + $0x78] sm:$0xff] }
0x1ef8   :  { %10874 = vadd.xlane.f32.xlu1 %v10873_v15  ;;  %10871 = vadd.xlane.f32.xlu0 %v10870_v31 }
0x1ef9   :  { %13883 = vmatprep.subr.bf16.mxu1 %v13882_v4 }
0x1efb   :  { %13885 = vmatpush3.bf16.msra.mxu1 %v13882_v4 }
0x1efc   :  { %13887 = vmatprep.subr.bf16.mxu1 %v13886_v33 }
0x1eff   :  { %13889 = vmatpush3.bf16.msra.mxu1 %v13886_v33 }
0x1f00   :  { %13891 = vmatprep.subr.bf16.mxu1 %v13890_v39 }
0x1f03   :  { %13893 = vmatpush3.bf16.msra.mxu1 %v13890_v39 }
0x1f1a   :  { %v10860_v53 = vpop.xlane.xlu0 %10859 }
0x1f1b   :  { %v10876_v8 = vmul.f32 0.032258064, %v10860_v53 }
0x1f1d   :  { %14730 = vrsqrt.f32 %v10876_v8  ;;  %vm10884_vm4 = vcmp.eq.f32.partialorder %v10876_v8, inf  ;;  %v10887_v57 = vand.u32 2147483648, %v10876_v8  ;;  %vm10886_vm12 = vcmp.eq.f32.partialorder %v10876_v8, 0.0 }
0x1f27   :  { %v14731_v7 = vpop.eup %14730 }
0x1f28   :  { %v10883_v48 = vmul.f32 %v14731_v7, %v10876_v8 }
0x1f2a   :  { %v10885_v2 = vsel %vm10884_vm4, %v10876_v8, %v10883_v48  ;;  %v10863_v62 = vpop.xlane.xlu1 %10862 }
0x1f2b   :  { %v10888_v34 = vsel %vm10886_vm12, %v10887_v57, %v10885_v2  ;;  %v10877_v51 = vmul.f32 0.032258064, %v10863_v62 }
0x1f2c   :  { %v10936_v22 = vadd.f32 1e-08, %v10888_v34 }
0x1f2d   :  { %14732 = vrsqrt.f32 %v10877_v51  ;;  %vm10891_vm15 = vcmp.eq.f32.partialorder %v10877_v51, inf  ;;  %v10894_v27 = vand.u32 2147483648, %v10877_v51  ;;  %vm10893_vm5 = vcmp.eq.f32.partialorder %v10877_v51, 0.0 }
0x1f2e   :  { %14734 = vrcp.f32 %v10936_v22 }
0x1f37   :  { %v14733_v32 = vpop.eup %14732 }
0x1f38   :  { %v14735_v20 = vpop.eup %14734  ;;  %v10890_v41 = vmul.f32 %v14733_v32, %v10877_v51  ;;  %v10932_v32 = vmul.f32 %v18626_v17, %v18589_v5  ;;  %v11110_v5 = vld [vmem:[%s18612_s29 + $0x70] sm:$0xff] }
0x1f39   :  { %v10943_v24 = vmul.f32 %v14735_v20, %v10930_v19  ;;  %v13894_v21 = vpack.c.bf16 %v11111_v14, %v11110_v5 }
0x1f3a   :  { %v10892_v23 = vsel %vm10891_vm15, %v10877_v51, %v10890_v41 }
0x1f3b   :  { %v10895_v55 = vsel %vm10893_vm5, %v10894_v27, %v10892_v23  ;;  %v18635_v13 = vadd.f32 %v18632_v36, %v10943_v24  ;;  %v10935_v24 = vmul.f32 %v18626_v17, %v18598_v50  ;;  %13895 = vmatprep.subr.bf16.mxu1 %v13894_v21 }
0x1f3c   :  { %v10937_v38 = vadd.f32 1e-08, %v10895_v55  ;;  %13897 = vmatpush3.bf16.msra.mxu1 %v13894_v21 }
0x1f3d   :  { %13472 = vmatprep.mubr.msk.f32.mxu0 %vm161_vm1, %v18635_v13 }
0x1f3e   :  { %14736 = vrcp.f32 %v10937_v38 }
0x1f48   :  { %v14737_v60 = vpop.eup %14736 }
0x1f49   :  { %v10945_v52 = vmul.f32 %v14737_v60, %v10931_v37 }
0x1f4b   :  { %v18648_v0 = vadd.f32 %v18632_v36, %v10945_v52 }
0x1f4d   :  { %13473 = vmatmul.mubr.msk.f32.vlgmr.msra.gmra.mrb[232].mxu0 %vm161_vm1, %v18648_v0 }
0x1f7d   :  { %v10866_v44 = vpop.xlane.xlu0 %10865 }
0x1f7e   :  { %v10878_v61 = vmul.f32 0.032258064, %v10866_v44 }
0x1f80   :  { %14738 = vrsqrt.f32 %v10878_v61  ;;  %vm10898_vm10 = vcmp.eq.f32.partialorder %v10878_v61, inf  ;;  %v10901_v1 = vand.u32 2147483648, %v10878_v61  ;;  %vm10900_vm9 = vcmp.eq.f32.partialorder %v10878_v61, 0.0 }
0x1f81   :  { %v10869_v6 = vpop.xlane.xlu1 %10868 }
0x1f82   :  { %v10879_v9 = vmul.f32 0.032258064, %v10869_v6 }
0x1f84   :  { %14740 = vrsqrt.f32 %v10879_v9  ;;  %vm10905_vm13 = vcmp.eq.f32.partialorder %v10879_v9, inf  ;;  %v10908_v48 = vand.u32 2147483648, %v10879_v9  ;;  %vm10907_vm14 = vcmp.eq.f32.partialorder %v10879_v9, 0.0 }
0x1f85   :  { %v10875_v63 = vpop.xlane.xlu1 %10874  ;;  %v10872_v30 = vpop.xlane.xlu0 %10871 }
0x1f86   :  { %v10881_v28 = vmul.f32 0.032258064, %v10875_v63  ;;  %v10880_v45 = vmul.f32 0.032258064, %v10872_v30 }
0x1f88   :  { %14742 = vrsqrt.f32 %v10881_v28  ;;  %vm10919_vm2 = vcmp.eq.f32.partialorder %v10881_v28, inf  ;;  %vm10921_vm7 = vcmp.eq.f32.partialorder %v10881_v28, 0.0  ;;  %v10922_v26 = vand.u32 2147483648, %v10881_v28 }
0x1f89   :  { %14744 = vrsqrt.f32 %v10880_v45  ;;  %vm10912_vm8 = vcmp.eq.f32.partialorder %v10880_v45, inf  ;;  %v10915_v56 = vand.u32 2147483648, %v10880_v45  ;;  %vm10914_vm0 = vcmp.eq.f32.partialorder %v10880_v45, 0.0 }
0x1f8a   :  { %v14739_v49 = vpop.eup %14738 }
0x1f8b   :  { %v10897_v54 = vmul.f32 %v14739_v49, %v10878_v61  ;;  %v11819_v49 = vld [vmem:[%s11406_s16] ss:$0 sm:$0xff] }
0x1f8d   :  { %v10899_v15 = vsel %vm10898_vm10, %v10878_v61, %v10897_v54 }
0x1f8e   :  { %v14741_v31 = vpop.eup %14740  ;;  %v10902_v53 = vsel %vm10900_vm9, %v10901_v1, %v10899_v15 }
0x1f8f   :  { %v10904_v8 = vmul.f32 %v14741_v31, %v10879_v9  ;;  %v10938_v7 = vadd.f32 1e-08, %v10902_v53 }
0x1f91   :  { %v10906_v57 = vsel %vm10905_vm13, %v10879_v9, %v10904_v8  ;;  %14746 = vrcp.f32 %v10938_v7 }
0x1f92   :  { %v14743_v2 = vpop.eup %14742  ;;  %v10909_v62 = vsel %vm10907_vm14, %v10908_v48, %v10906_v57 }
0x1f93   :  { %v14745_v34 = vpop.eup %14744  ;;  %v10918_v51 = vmul.f32 %v14743_v2, %v10881_v28  ;;  %v10939_v22 = vadd.f32 1e-08, %v10909_v62 }
0x1f94   :  { %v10911_v10 = vmul.f32 %v14745_v34, %v10880_v45 }
0x1f95   :  { %v10920_v11 = vsel %vm10919_vm2, %v10881_v28, %v10918_v51  ;;  %14748 = vrcp.f32 %v10939_v22 }
0x1f96   :  { %v10923_v42 = vsel %vm10921_vm7, %v10922_v26, %v10920_v11  ;;  %v10913_v29 = vsel %vm10912_vm8, %v10880_v45, %v10911_v10 }
0x1f97   :  { %v10916_v18 = vsel %vm10914_vm0, %v10915_v56, %v10913_v29  ;;  %v10941_v16 = vadd.f32 1e-08, %v10923_v42 }
0x1f98   :  { %v10940_v3 = vadd.f32 1e-08, %v10916_v18 }
0x1f99   :  { %14750 = vrcp.f32 %v10941_v16 }
0x1f9a   :  { %14752 = vrcp.f32 %v10940_v3 }
0x1f9b   :  { %v14747_v19 = vpop.eup %14746 }
0x1f9c   :  { %v10947_v40 = vmul.f32 %v14747_v19, %v10932_v32 }
0x1f9e   :  { %v18657_v20 = vadd.f32 %v18632_v36, %v10947_v40 }
0x1f9f   :  { %v14749_v41 = vpop.eup %14748 }
0x1fa0   :  { %13475 = vmatprep.mubr.msk.f32.mxu0 %vm161_vm1, %v18657_v20  ;;  %v10949_v27 = vmul.f32 %v14749_v41, %v10933_v59 }
0x1fa2   :  { %v10963_v23 = vadd.f32 %v18632_v36, %v10949_v27 }
0x1fa3   :  { %v14751_v55 = vpop.eup %14750 }
0x1fa4   :  { %v14753_v25 = vpop.eup %14752  ;;  %13476 = vmatmul.mubr.msk.f32.gmra.mrb[234].mxu0 %vm161_vm1, %v10963_v23  ;;  %v10953_v38 = vmul.f32 %v14751_v55, %v10935_v24 }
0x1fa5   :  { %v10951_v4 = vmul.f32 %v14753_v25, %v10934_v46 }
0x1fa6   :  { %v10965_v47 = vadd.f32 %v18632_v36, %v10953_v38 }
0x1fa7   :  { %v10964_v50 = vadd.f32 %v18632_v36, %v10951_v4 }
0x1fa9   :  { %13478 = vmatprep.mubr.msk.f32.mxu0 %vm161_vm1, %v10964_v50 }
0x1faa   :  { %13479 = vmatmul.mubr.msk.f32.gmra.mrb[236].mxu0 %vm161_vm1, %v10965_v47 }
0x2020   :  { %v13474_v17 = vpop.f32.mrb[232].mxu0 }
0x2021   :  { %v11067_v43 = vadd.f32 %v13474_v17, %v11812_v12  ;;  %v11061_v33 = vpop.f32.mrb[233].mxu0 }
0x2022   :  { %v11062_v58 = vadd.f32 %v11812_v12, %v11061_v33 }
0x2023   :  { %v11091_v39 = vmax.f32 %v11067_v43, 0.0 }
0x2024   :  { %v11090_v35 = vmax.f32 %v11062_v58, 0.0 }
0x2026   :  { %13513 = vmatprep.mubr.f32.mxu1 %v11090_v35 }
0x2027   :  { %13514 = vmatmul.mubr.f32.vlgmr.msra.gmra.mrb[232].mxu1 %v11091_v39 }
0x2077   :  { %v13477_v37 = vpop.f32.mrb[234].mxu0 }
0x2078   :  { %v11077_v36 = vadd.f32 %v13477_v37, %v11812_v12  ;;  %v11071_v60 = vpop.f32.mrb[235].mxu0 }
0x2079   :  { %v11072_v52 = vadd.f32 %v11812_v12, %v11071_v60 }
0x207a   :  { %v11093_v61 = vmax.f32 %v11077_v36, 0.0 }
0x207b   :  { %v11092_v44 = vmax.f32 %v11072_v52, 0.0 }
0x207d   :  { %v13480_v6 = vpop.f32.mrb[236].mxu0  ;;  %13516 = vmatprep.mubr.f32.mxu1 %v11092_v44 }
0x207e   :  { %v11087_v9 = vadd.f32 %v13480_v6, %v11812_v12  ;;  %v11081_v63 = vpop.f32.mrb[237].mxu0  ;;  %13517 = vmatmul.mubr.f32.gmra.mrb[234].mxu1 %v11093_v61 }
0x207f   :  { %v11082_v30 = vadd.f32 %v11812_v12, %v11081_v63 }
0x2080   :  { %v11095_v45 = vmax.f32 %v11087_v9, 0.0 }
0x2081   :  { %v11094_v28 = vmax.f32 %v11082_v30, 0.0 }
0x2083   :  { %13519 = vmatprep.mubr.f32.mxu1 %v11094_v28 }
0x2084   :  { %13520 = vmatmul.mubr.f32.gmra.mrb[236].mxu1 %v11095_v45 }
0x20fa   :  { %v13515_v54 = vpop.f32.mrb[232].mxu1 }
0x20fb   :  { %v11191_v1 = vadd.f32 %v13515_v54, %v11819_v49  ;;  %v11185_v15 = vpop.f32.mrb[233].mxu1 }
0x20fc   :  { %v11186_v31 = vadd.f32 %v11819_v49, %v11185_v15 }
0x20fd   :  { %v11215_v53 = vadd.f32 %v11191_v1, %v18648_v0 }
0x20fe   :  { %v11214_v8 = vadd.f32 %v11186_v31, %v18635_v13 }
0x20ff   :  { %v11225_v7 = vsel %vm161_vm1, %v11215_v53, 0.0 }
0x2100   :  { %11226 = vadd.xlane.f32.xlu1 %v11225_v7  ;;  %v11222_v48 = vsel %vm161_vm1, %v11214_v8, 0.0  ;;  %v18724_v7 = vld [vmem:[%s11407_s25] ss:$0 sm:$0xff] }
0x2101   :  { %11223 = vadd.xlane.f32.xlu0 %v11222_v48 }
0x2151   :  { %v13518_v57 = vpop.f32.mrb[234].mxu1 }
0x2152   :  { %v11201_v2 = vadd.f32 %v13518_v57, %v11819_v49  ;;  %v11195_v62 = vpop.f32.mrb[235].mxu1 }
0x2153   :  { %v11196_v34 = vadd.f32 %v11819_v49, %v11195_v62  ;;  %v18735_v62 = vld [vmem:[%s11408_s19] ss:$0 sm:$0xff] }
0x2154   :  { %v11217_v51 = vadd.f32 %v11201_v2, %v10963_v23 }
0x2155   :  { %v11216_v22 = vadd.f32 %v11196_v34, %v18657_v20 }
0x2156   :  { %v11231_v26 = vsel %vm161_vm1, %v11217_v51, 0.0 }
0x2157   :  { %v13521_v10 = vpop.f32.mrb[236].mxu1  ;;  %11232 = vadd.xlane.f32.xlu1 %v11231_v26  ;;  %v11228_v0 = vsel %vm161_vm1, %v11216_v22, 0.0 }
0x2158   :  { %v11211_v13 = vadd.f32 %v13521_v10, %v11819_v49  ;;  %v11205_v11 = vpop.f32.mrb[237].mxu1  ;;  %11229 = vadd.xlane.f32.xlu0 %v11228_v0 }
0x2159   :  { %v11206_v56 = vadd.f32 %v11819_v49, %v11205_v11 }
0x215a   :  { %v11219_v42 = vadd.f32 %v11211_v13, %v10965_v47 }
0x215b   :  { %v11218_v29 = vadd.f32 %v11206_v56, %v10964_v50 }
0x215c   :  { %v11237_v18 = vsel %vm674_vm6, %v11219_v42, 0.0 }
0x215d   :  { %11238 = vadd.xlane.f32.xlu1 %v11237_v18  ;;  %v11234_v16 = vsel %vm161_vm1, %v11218_v29, 0.0 }
0x215e   :  { %11235 = vadd.xlane.f32.xlu0 %v11234_v16 }
0x218d   :  { %v11227_v3 = vpop.xlane.xlu1 %11226 }
0x218e   :  { %v11241_v32 = vmul.f32 0.03125, %v11227_v3  ;;  %v11224_v19 = vpop.xlane.xlu0 %11223 }
0x218f   :  { %v11240_v40 = vmul.f32 0.03125, %v11224_v19 }
0x2190   :  { %v18688_v59 = vsub.f32 %v11215_v53, %v11241_v32 }
0x2191   :  { %v18690_v20 = vsub.f32 %v11214_v8, %v11240_v40 }
0x2192   :  { %v11253_v41 = vmul.f32 %v18688_v59, %v18688_v59  ;;  %v11331_v48 = vmul.f32 %v18724_v7, %v18688_v59 }
0x2193   :  { %v11252_v27 = vmul.f32 %v18690_v20, %v18690_v20  ;;  %v11330_v2 = vmul.f32 %v18724_v7, %v18690_v20 }
0x2194   :  { %v11261_v24 = vsel %vm161_vm1, %v11253_v41, 0.0 }
0x2195   :  { %11262 = vadd.xlane.f32.xlu1 %v11261_v24  ;;  %v11258_v23 = vsel %vm161_vm1, %v11252_v27, 0.0 }
0x2196   :  { %11259 = vadd.xlane.f32.xlu0 %v11258_v23 }
0x21e4   :  { %v11233_v5 = vpop.xlane.xlu1 %11232 }
0x21e5   :  { %v11243_v14 = vmul.f32 0.03125, %v11233_v5  ;;  %v11230_v55 = vpop.xlane.xlu0 %11229 }
0x21e6   :  { %v11242_v46 = vmul.f32 0.03125, %v11230_v55 }
0x21e7   :  { %v18698_v21 = vsub.f32 %v11217_v51, %v11243_v14 }
0x21e8   :  { %v18700_v25 = vsub.f32 %v11216_v22, %v11242_v46 }
0x21e9   :  { %v11255_v38 = vmul.f32 %v18698_v21, %v18698_v21 }
0x21ea   :  { %v11239_v4 = vpop.xlane.xlu1 %11238  ;;  %v11254_v47 = vmul.f32 %v18700_v25, %v18700_v25 }
0x21eb   :  { %v11245_v50 = vmul.f32 0.03125, %v11239_v4  ;;  %v11236_v12 = vpop.xlane.xlu0 %11235  ;;  %v11267_v17 = vsel %vm161_vm1, %v11255_v38, 0.0 }
0x21ec   :  { %v11244_v43 = vmul.f32 0.03125, %v11236_v12  ;;  %11268 = vadd.xlane.f32.xlu1 %v11267_v17  ;;  %v11264_v33 = vsel %vm161_vm1, %v11254_v47, 0.0 }
0x21ed   :  { %v18708_v58 = vsub.f32 %v11219_v42, %v11245_v50  ;;  %11265 = vadd.xlane.f32.xlu0 %v11264_v33 }
0x21ee   :  { %v18710_v35 = vsub.f32 %v11218_v29, %v11244_v43 }
0x21ef   :  { %v11257_v39 = vmul.f32 %v18708_v58, %v18708_v58 }
0x21f0   :  { %v11256_v37 = vmul.f32 %v18710_v35, %v18710_v35 }
0x21f1   :  { %v11273_v36 = vsel %vm674_vm6, %v11257_v39, 0.0 }
0x21f2   :  { %11274 = vadd.xlane.f32.xlu1 %v11273_v36  ;;  %v11270_v60 = vsel %vm161_vm1, %v11256_v37, 0.0  ;;  %v11333_v36 = vmul.f32 %v18724_v7, %v18698_v21  ;;  %v11334_v21 = vmul.f32 %v18724_v7, %v18710_v35 }
0x21f3   :  { %11271 = vadd.xlane.f32.xlu0 %v11270_v60 }
0x2222   :  { %v11263_v52 = vpop.xlane.xlu1 %11262 }
0x2223   :  { %v11277_v44 = vmul.f32 0.032258064, %v11263_v52  ;;  %v11260_v61 = vpop.xlane.xlu0 %11259  ;;  %v11332_v52 = vmul.f32 %v18724_v7, %v18700_v25 }
0x2224   :  { %v11276_v6 = vmul.f32 0.032258064, %v11260_v61 }
0x2225   :  { %14754 = vrsqrt.f32 %v11277_v44  ;;  %vm11291_vm3 = vcmp.eq.f32.partialorder %v11277_v44, inf  ;;  %v11294_v28 = vand.u32 2147483648, %v11277_v44  ;;  %vm11293_vm11 = vcmp.eq.f32.partialorder %v11277_v44, 0.0 }
0x2226   :  { %14756 = vrsqrt.f32 %v11276_v6  ;;  %vm11284_vm4 = vcmp.eq.f32.partialorder %v11276_v6, inf  ;;  %v11287_v54 = vand.u32 2147483648, %v11276_v6  ;;  %vm11286_vm12 = vcmp.eq.f32.partialorder %v11276_v6, 0.0 }
0x222f   :  { %v14755_v9 = vpop.eup %14754 }
0x2230   :  { %v14757_v63 = vpop.eup %14756  ;;  %v11290_v30 = vmul.f32 %v14755_v9, %v11277_v44 }
0x2231   :  { %v11283_v45 = vmul.f32 %v14757_v63, %v11276_v6 }
0x2232   :  { %v11292_v49 = vsel %vm11291_vm3, %v11277_v44, %v11290_v30  ;;  %v11335_v30 = vmul.f32 %v18724_v7, %v18708_v58 }
0x2233   :  { %v11295_v1 = vsel %vm11293_vm11, %v11294_v28, %v11292_v49  ;;  %v11285_v15 = vsel %vm11284_vm4, %v11276_v6, %v11283_v45 }
0x2234   :  { %v11337_v31 = vadd.f32 1e-08, %v11295_v1  ;;  %v11288_v53 = vsel %vm11286_vm12, %v11287_v54, %v11285_v15 }
0x2235   :  { %v11336_v8 = vadd.f32 1e-08, %v11288_v53 }
0x2236   :  { %14758 = vrcp.f32 %v11337_v31 }
0x2237   :  { %14760 = vrcp.f32 %v11336_v8 }
0x2240   :  { %v14759_v57 = vpop.eup %14758 }
0x2241   :  { %v14761_v34 = vpop.eup %14760  ;;  %v11345_v51 = vmul.f32 %v14759_v57, %v11331_v48 }
0x2242   :  { %v11343_v22 = vmul.f32 %v14761_v34, %v11330_v2 }
0x2243   :  { %v11361_v26 = vadd.f32 %v18735_v62, %v11345_v51 }
0x2244   :  { %v11360_v10 = vadd.f32 %v18735_v62, %v11343_v22 }
0x2245   :  { %11367 = vst.msk [vmem:[%s18729_s23 + $0x8] sm:$0xff] %vm161_vm1, %v11361_v26 }
0x2246   :  { %11366 = vst.msk [vmem:[%s18729_s23] sm:$0xff] %vm161_vm1, %v11360_v10 }
0x2279   :  { %v11269_v0 = vpop.xlane.xlu1 %11268 }
0x227a   :  { %v11279_v13 = vmul.f32 0.032258064, %v11269_v0  ;;  %v11266_v11 = vpop.xlane.xlu0 %11265 }
0x227b   :  { %v11278_v56 = vmul.f32 0.032258064, %v11266_v11 }
0x227c   :  { %14762 = vrsqrt.f32 %v11279_v13  ;;  %vm11305_vm15 = vcmp.eq.f32.partialorder %v11279_v13, inf  ;;  %v11308_v40 = vand.u32 2147483648, %v11279_v13  ;;  %vm11307_vm5 = vcmp.eq.f32.partialorder %v11279_v13, 0.0 }
0x227d   :  { %14764 = vrsqrt.f32 %v11278_v56  ;;  %vm11298_vm10 = vcmp.eq.f32.partialorder %v11278_v56, inf  ;;  %v11301_v41 = vand.u32 2147483648, %v11278_v56  ;;  %vm11300_vm9 = vcmp.eq.f32.partialorder %v11278_v56, 0.0 }
0x227f   :  { %v11275_v42 = vpop.xlane.xlu1 %11274 }
0x2280   :  { %v11281_v29 = vmul.f32 0.032258064, %v11275_v42  ;;  %v11272_v18 = vpop.xlane.xlu0 %11271 }
0x2281   :  { %v11280_v16 = vmul.f32 0.032258064, %v11272_v18 }
0x2282   :  { %14766 = vrsqrt.f32 %v11281_v29  ;;  %vm11319_vm13 = vcmp.eq.f32.partialorder %v11281_v29, inf  ;;  %v11322_v4 = vand.u32 2147483648, %v11281_v29  ;;  %vm11321_vm14 = vcmp.eq.f32.partialorder %v11281_v29, 0.0 }
0x2283   :  { %14768 = vrsqrt.f32 %v11280_v16  ;;  %vm11312_vm2 = vcmp.eq.f32.partialorder %v11280_v16, inf  ;;  %v11315_v12 = vand.u32 2147483648, %v11280_v16  ;;  %vm11314_vm7 = vcmp.eq.f32.partialorder %v11280_v16, 0.0 }
0x2286   :  { %v14763_v3 = vpop.eup %14762 }
0x2287   :  { %v14765_v32 = vpop.eup %14764  ;;  %v11304_v19 = vmul.f32 %v14763_v3, %v11279_v13 }
0x2288   :  { %v11297_v59 = vmul.f32 %v14765_v32, %v11278_v56 }
0x2289   :  { %v11306_v20 = vsel %vm11305_vm15, %v11279_v13, %v11304_v19 }
0x228a   :  { %v11309_v27 = vsel %vm11307_vm5, %v11308_v40, %v11306_v20  ;;  %v11299_v24 = vsel %vm11298_vm10, %v11278_v56, %v11297_v59 }
0x228b   :  { %v11339_v23 = vadd.f32 1e-08, %v11309_v27  ;;  %v11302_v5 = vsel %vm11300_vm9, %v11301_v41, %v11299_v24 }
0x228c   :  { %v14767_v14 = vpop.eup %14766  ;;  %v11338_v55 = vadd.f32 1e-08, %v11302_v5 }
0x228d   :  { %v14769_v46 = vpop.eup %14768  ;;  %14770 = vrcp.f32 %v11339_v23  ;;  %v11318_v38 = vmul.f32 %v14767_v14, %v11281_v29 }
0x228e   :  { %14772 = vrcp.f32 %v11338_v55  ;;  %v11311_v47 = vmul.f32 %v14769_v46, %v11280_v16 }
0x228f   :  { %v11320_v50 = vsel %vm11319_vm13, %v11281_v29, %v11318_v38 }
0x2290   :  { %v11323_v17 = vsel %vm11321_vm14, %v11322_v4, %v11320_v50  ;;  %v11313_v43 = vsel %vm11312_vm2, %v11280_v16, %v11311_v47 }
0x2291   :  { %v11341_v33 = vadd.f32 1e-08, %v11323_v17  ;;  %v11316_v39 = vsel %vm11314_vm7, %v11315_v12, %v11313_v43 }
0x2292   :  { %v11340_v37 = vadd.f32 1e-08, %v11316_v39 }
0x2293   :  { %14774 = vrcp.f32 %v11341_v33 }
0x2294   :  { %14776 = vrcp.f32 %v11340_v37 }
0x2297   :  { %v14771_v60 = vpop.eup %14770 }
0x2298   :  { %v14773_v44 = vpop.eup %14772  ;;  %v11349_v61 = vmul.f32 %v14771_v60, %v11333_v36 }
0x2299   :  { %v11347_v6 = vmul.f32 %v14773_v44, %v11332_v52 }
0x229a   :  { %v11363_v9 = vadd.f32 %v18735_v62, %v11349_v61 }
0x229b   :  { %v11362_v63 = vadd.f32 %v18735_v62, %v11347_v6 }
0x229c   :  { %11369 = vst.msk [vmem:[%s18729_s23 + $0x18] sm:$0xff] %vm161_vm1, %v11363_v9 }
0x229d   :  { %v14775_v28 = vpop.eup %14774  ;;  %11368 = vst.msk [vmem:[%s18729_s23 + $0x10] sm:$0xff] %vm161_vm1, %v11362_v63 }
0x229e   :  { %v14777_v25 = vpop.eup %14776  ;;  %v11353_v45 = vmul.f32 %v14775_v28, %v11335_v30 }
0x229f   :  { %v11351_v49 = vmul.f32 %v14777_v25, %v11334_v21 }
0x22a0   :  { %v11365_v54 = vadd.f32 %v18735_v62, %v11353_v45 }
0x22a1   :  { %v11364_v1 = vadd.f32 %v18735_v62, %v11351_v49 }
0x22a2   :  { %11371 = vst.msk [vmem:[%s18729_s23 + $0x28] sm:$0x3f] %vm674_vm6, %v11365_v54 }
0x22a3   :  { %11370 = vst.msk [vmem:[%s18729_s23 + $0x20] sm:$0xff] %vm161_vm1, %v11364_v1 }

</bundles_post_ra>
